<compile_context>
chip_gen: v7x
topology: tpu7x:2x2x1
jax: 0.10.0
libtpu: 0.0.40
codegen_flags: <defaults>
</compile_context>

<pallas_src>
import functools

import jax
import jax.numpy as jnp
from jax import lax
from jax.experimental import pallas as pl
from jax.experimental.pallas import tpu as pltpu

FEAT_DIM = 2048       # backbone output channels (ResNet-50-style)
NUM_CLS = 10          # nn.Linear(2048, 10)
CLS_PAD = 128         # classes padded to one full lane-block for a dense head tile
DEFAULT_BLOCK_N = 8   # images per grid step


def _image_classifier_kernel(x_ref, w1t_ref, b1_ref, w2t_ref, b2_ref, out_ref,
                             *, block_n, hw):
    """One grid step = `block_n` images.

    x_ref  : (block_n, C, HW)      f32   channels on sublanes, spatial on lanes
    w1t_ref: (2048, C)             bf16  backbone 1x1-conv weight, transposed
    b1_ref : (2048, 1)             f32   backbone bias (column)
    w2t_ref: (CLS_PAD, 2048)       bf16  head weight, transposed, zero-padded 10->128
    b2_ref : (CLS_PAD, 1)          f32   head bias, zero-padded
    out_ref: (block_n, CLS_PAD, 1) f32   per-image logits column
    """
    w1t = w1t_ref[...]
    b1 = b1_ref[...]
    w2t = w2t_ref[...]
    b2 = b2_ref[...]
    # Global-average-pool as an MXU mat-vec: feat (2048, HW) @ (HW, 1) of 1/HW.
    # 1/HW is a power of two here, exactly representable in bf16.
    inv_hw = jnp.full((hw, 1), 1.0 / hw, dtype=jnp.bfloat16)

    def body(b, carry):
        xb = x_ref[b].astype(jnp.bfloat16)                               # (C, HW)
        # Backbone stand-in: 1x1 conv as (2048, C) @ (C, HW) on the MXU (K=C, untiled).
        conv = jnp.dot(w1t, xb, preferred_element_type=jnp.float32)      # (2048, HW) f32
        feat = jnp.maximum(conv + b1, 0.0)                               # bias + ReLU, f32
        # GAP on the MXU, f32 accumulation.
        pooled = jnp.dot(feat.astype(jnp.bfloat16), inv_hw,
                         preferred_element_type=jnp.float32)             # (2048, 1) f32
        # Predictor Linear(2048 -> 10) with padded output rows.
        logits = jnp.dot(w2t, pooled.astype(jnp.bfloat16),
                         preferred_element_type=jnp.float32) + b2        # (CLS_PAD, 1)
        out_ref[b] = logits.astype(out_ref.dtype)
        return carry

    lax.fori_loop(0, block_n, body, 0)


def image_classifier_forward(x_nchw, w1, b1, w2, b2, *, block_n=DEFAULT_BLOCK_N):
    """x_nchw: (N, C, H, W) float32. Returns logits (N, 10) float32."""
    n, c, h, w = x_nchw.shape
    hw = h * w

    # NCHW -> (N, C, H*W): a pure reshape, NO HBM transpose.
    x3 = x_nchw.reshape(n, c, hw)

    bn = min(block_n, n)
    n_pad = pl.cdiv(n, bn) * bn
    if n_pad != n:
        x3 = jnp.pad(x3, ((0, n_pad - n), (0, 0), (0, 0)))

    # One-time (tiny) weight re-layouts in the wrapper.
    w1t = jnp.transpose(w1).astype(jnp.bfloat16)                       # (2048, C)
    b1c = b1.reshape(FEAT_DIM, 1).astype(jnp.float32)                  # (2048, 1)
    w2t = jnp.zeros((CLS_PAD, FEAT_DIM), jnp.float32).at[:NUM_CLS].set(jnp.transpose(w2))
    w2t = w2t.astype(jnp.bfloat16)                                     # (128, 2048)
    b2c = jnp.zeros((CLS_PAD, 1), jnp.float32).at[:NUM_CLS, 0].set(b2) # (128, 1)

    kernel = functools.partial(_image_classifier_kernel, block_n=bn, hw=hw)

    out = pl.pallas_call(
        kernel,
        out_shape=jax.ShapeDtypeStruct((n_pad, CLS_PAD, 1), jnp.float32),
        grid_spec=pltpu.PrefetchScalarGridSpec(
            num_scalar_prefetch=0,
            grid=(n_pad // bn,),
            in_specs=[
                pl.BlockSpec((bn, c, hw), lambda i: (i, 0, 0)),
                pl.BlockSpec((FEAT_DIM, c), lambda i: (0, 0)),
                pl.BlockSpec((FEAT_DIM, 1), lambda i: (0, 0)),
                pl.BlockSpec((CLS_PAD, FEAT_DIM), lambda i: (0, 0)),
                pl.BlockSpec((CLS_PAD, 1), lambda i: (0, 0)),
            ],
            out_specs=pl.BlockSpec((bn, CLS_PAD, 1), lambda i: (i, 0, 0)),
        ),
        compiler_params=pltpu.CompilerParams(
            dimension_semantics=("parallel",),          # batch axis: 2 TCs on v7x
            vmem_limit_bytes=48 * 1024 * 1024,          # > default scoped 16/32 MiB, < v7x 64 MiB
        ),
    )(x3, w1t, b1c, w2t, b2c)

    # (n_pad, 128, 1) -> (N, 10): drop class padding and batch padding (tiny XLA ops).
    return out.reshape(n_pad, CLS_PAD)[:n, :NUM_CLS]


def reference_forward(x_nchw, w1, b1, w2, b2):
    """Pure-JAX f32 reference with identical semantics."""
    n, c, h, w = x_nchw.shape
    x = x_nchw.reshape(n, c, h * w)                                     # (N, C, HW)
    feat = jnp.maximum(jnp.einsum("ncs,cf->nsf", x, w1) + b1[None, None, :], 0.0)
    pooled = jnp.mean(feat, axis=1)                                     # (N, 2048)
    return pooled @ w2 + b2[None, :]                                    # (N, 10)


if __name__ == "__main__":
    key = jax.random.PRNGKey(0)
    k_x, k_w1, k_b1, k_w2, k_b2 = jax.random.split(key, 5)

    # Small shapes consistent with the forward: batch=2, C_in=4, 16x16 images.
    N, C, H, W = 2, 4, 16, 16
    x = jax.random.normal(k_x, (N, C, H, W), dtype=jnp.float32)

    # Deterministic synthetic parameters (no checkpoint loading).
    w1 = jax.random.normal(k_w1, (C, FEAT_DIM), dtype=jnp.float32) * 0.05
    b1 = jax.random.normal(k_b1, (FEAT_DIM,), dtype=jnp.float32) * 0.05
    # PyTorch Linear(2048, 10) stores weight as (10, 2048); we keep the transposed
    # (2048, 10) layout so semantics are pooled @ W + b.
    w2 = jax.random.normal(k_w2, (FEAT_DIM, NUM_CLS), dtype=jnp.float32) * 0.02
    b2 = jax.random.normal(k_b2, (NUM_CLS,), dtype=jnp.float32) * 0.02

    out = image_classifier_forward(x, w1, b1, w2, b2)
    out = jax.block_until_ready(out)

    ref = reference_forward(x, w1, b1, w2, b2)
    assert out.shape == (N, NUM_CLS)
    max_err = float(jnp.max(jnp.abs(out - ref)))
    # bf16 MXU operands (f32 accumulation) -> loosened tolerance vs. the pure-f32 reference.
    assert jnp.allclose(out, ref, atol=2e-2, rtol=2e-2), f"mismatch vs reference, max abs err {max_err}"

    print("KERNEL_OK")
</pallas_src>

<mosaic_0001>
module attributes {stable_mosaic.version = 11 : i64} {
  func.func @_image_classifier_kernel(%arg0: i32, %arg1: memref<2x4x256xf32, #tpu.memory_space<vmem>>, %arg2: memref<2048x4xbf16, #tpu.memory_space<vmem>>, %arg3: memref<2048x1xf32, #tpu.memory_space<vmem>>, %arg4: memref<128x2048xbf16, #tpu.memory_space<vmem>>, %arg5: memref<128x1xf32, #tpu.memory_space<vmem>>, %arg6: memref<2x128x1xf32, #tpu.memory_space<vmem>>) attributes {dimension_semantics = [#tpu.dimension_semantics<parallel>], iteration_bounds = array<i64: 1>, scalar_prefetch = 0 : i64, scratch_operands = 0 : i64, tpu.core_type = #tpu.core_type<tc>, window_params = [{transform_indices = @transform_0, window_bounds = array<i64: 2, 4, 256>}, {pipeline_mode = #tpu.pipeline_mode<synchronous>, transform_indices = @transform_1, window_bounds = array<i64: 2048, 4>}, {pipeline_mode = #tpu.pipeline_mode<synchronous>, transform_indices = @transform_2, window_bounds = array<i64: 2048, 1>}, {pipeline_mode = #tpu.pipeline_mode<synchronous>, transform_indices = @transform_3, window_bounds = array<i64: 128, 2048>}, {pipeline_mode = #tpu.pipeline_mode<synchronous>, transform_indices = @transform_4, window_bounds = array<i64: 128, 1>}, {transform_indices = @transform_5, window_bounds = array<i64: 2, 128, 1>}]} {
    %c0 = arith.constant 0 : index
    %c0_0 = arith.constant 0 : index
    %0 = vector.load %arg2[%c0, %c0_0] : memref<2048x4xbf16, #tpu.memory_space<vmem>>, vector<2048x4xbf16>
    %c0_1 = arith.constant 0 : index
    %c0_2 = arith.constant 0 : index
    %1 = vector.load %arg3[%c0_1, %c0_2] : memref<2048x1xf32, #tpu.memory_space<vmem>>, vector<2048x1xf32>
    %c0_3 = arith.constant 0 : index
    %c0_4 = arith.constant 0 : index
    %2 = vector.load %arg4[%c0_3, %c0_4] : memref<128x2048xbf16, #tpu.memory_space<vmem>>, vector<128x2048xbf16>
    %c0_5 = arith.constant 0 : index
    %c0_6 = arith.constant 0 : index
    %3 = vector.load %arg5[%c0_5, %c0_6] : memref<128x1xf32, #tpu.memory_space<vmem>>, vector<128x1xf32>
    %cst = arith.constant 3.906250e-03 : bf16
    %4 = vector.broadcast %cst : bf16 to vector<256x1xbf16>
    %c0_i32 = arith.constant 0 : i32
    %c2_i32 = arith.constant 2 : i32
    %5 = arith.addi %c0_i32, %c2_i32 : i32
    %c1_i32 = arith.constant 1 : i32
    scf.for %arg7 = %c0_i32 to %5 step %c1_i32  : i32 {
      %6 = arith.index_cast %arg7 : i32 to index
      %c0_8 = arith.constant 0 : index
      %c0_9 = arith.constant 0 : index
      %7 = vector.load %arg1[%6, %c0_8, %c0_9] : memref<2x4x256xf32, #tpu.memory_space<vmem>>, vector<1x4x256xf32>
      %8 = vector.shape_cast %7 : vector<1x4x256xf32> to vector<4x256xf32>
      %9 = arith.truncf %8 : vector<4x256xf32> to vector<4x256xbf16>
      %cst_10 = arith.constant dense<0.000000e+00> : vector<2048x256xf32>
      %10 = tpu.matmul %0, %9, %cst_10 {dimension_numbers = #tpu.dot_dimension_numbers<[1], [0], [0], [1], [0, 0, 1, 1], [], []>} : vector<2048x4xbf16>, vector<4x256xbf16>, vector<2048x256xf32> -> vector<2048x256xf32>
      %11 = vector.broadcast %1 : vector<2048x1xf32> to vector<2048x256xf32>
      %12 = arith.addf %10, %11 : vector<2048x256xf32>
      %cst_11 = arith.constant 0.000000e+00 : f32
      %13 = vector.broadcast %cst_11 : f32 to vector<2048x256xf32>
      %14 = arith.maximumf %12, %13 : vector<2048x256xf32>
      %15 = arith.truncf %14 : vector<2048x256xf32> to vector<2048x256xbf16>
      %cst_12 = arith.constant dense<0.000000e+00> : vector<2048x1xf32>
      %16 = tpu.matmul %15, %4, %cst_12 {dimension_numbers = #tpu.dot_dimension_numbers<[1], [0], [0], [1], [0, 0, 1, 1], [], []>} : vector<2048x256xbf16>, vector<256x1xbf16>, vector<2048x1xf32> -> vector<2048x1xf32>
      %17 = arith.truncf %16 : vector<2048x1xf32> to vector<2048x1xbf16>
      %cst_13 = arith.constant dense<0.000000e+00> : vector<128x1xf32>
      %18 = tpu.matmul %2, %17, %cst_13 {dimension_numbers = #tpu.dot_dimension_numbers<[1], [0], [0], [1], [0, 0, 1, 1], [], []>} : vector<128x2048xbf16>, vector<2048x1xbf16>, vector<128x1xf32> -> vector<128x1xf32>
      %19 = arith.addf %18, %3 : vector<128x1xf32>
      %20 = arith.index_cast %arg7 : i32 to index
      %c0_14 = arith.constant 0 : index
      %c0_15 = arith.constant 0 : index
      %21 = vector.load %arg6[%20, %c0_14, %c0_15] : memref<2x128x1xf32, #tpu.memory_space<vmem>>, vector<1x128x1xf32>
      %22 = vector.shape_cast %21 : vector<1x128x1xf32> to vector<128x1xf32>
      %23 = vector.shape_cast %19 : vector<128x1xf32> to vector<1x128x1xf32>
      tpu.vector_store %arg6[%20, %c0_14, %c0_15], %23 {strides = array<i32>} : memref<2x128x1xf32, #tpu.memory_space<vmem>>, vector<1x128x1xf32>,
    }
    %c2_i32_7 = arith.constant 2 : i32
    return
  }
  func.func @transform_0(%arg0: i32) -> (i32, i32, i32) {
    %c0_i32 = arith.constant 0 : i32
    %c0_i32_0 = arith.constant 0 : i32
    %c0_i32_1 = arith.constant 0 : i32
    return %arg0, %c0_i32, %c0_i32_0 : i32, i32, i32
  }
  func.func @transform_1(%arg0: i32) -> (i32, i32) {
    %c0_i32 = arith.constant 0 : i32
    %c0_i32_0 = arith.constant 0 : i32
    %c0_i32_1 = arith.constant 0 : i32
    return %c0_i32, %c0_i32_0 : i32, i32
  }
  func.func @transform_2(%arg0: i32) -> (i32, i32) {
    %c0_i32 = arith.constant 0 : i32
    %c0_i32_0 = arith.constant 0 : i32
    %c0_i32_1 = arith.constant 0 : i32
    return %c0_i32, %c0_i32_0 : i32, i32
  }
  func.func @transform_3(%arg0: i32) -> (i32, i32) {
    %c0_i32 = arith.constant 0 : i32
    %c0_i32_0 = arith.constant 0 : i32
    %c0_i32_1 = arith.constant 0 : i32
    return %c0_i32, %c0_i32_0 : i32, i32
  }
  func.func @transform_4(%arg0: i32) -> (i32, i32) {
    %c0_i32 = arith.constant 0 : i32
    %c0_i32_0 = arith.constant 0 : i32
    %c0_i32_1 = arith.constant 0 : i32
    return %c0_i32, %c0_i32_0 : i32, i32
  }
  func.func @transform_5(%arg0: i32) -> (i32, i32, i32) {
    %c0_i32 = arith.constant 0 : i32
    %c0_i32_0 = arith.constant 0 : i32
    %c0_i32_1 = arith.constant 0 : i32
    return %arg0, %c0_i32, %c0_i32_0 : i32, i32, i32
  }
}

</mosaic_0001>

<bundles_post_ra>
// kernel: tpu_custom_call.1
= control target key start
LH: loop header
LB: loop body
LE: loop exit
PB: predicated region body
PF: predicated region fallthrough
CT: control target
= control target key end

     0   :  { %s14925_s0 = inlined_call_operand.vmem [shape: f32[2,4,256], index: 0, kind: input, shape index: {}]   ;;  %s14926_s1 = inlined_call_operand.vmem [shape: bf16[2048,4], index: 1, kind: input, shape index: {}]   ;;  %s14927_s5 = inlined_call_operand.vmem [shape: f32[2,128,1], index: 5, kind: output, shape index: {}]   ;;  %s14928_s2 = inlined_call_operand.vmem [shape: f32[2048,1], index: 2, kind: input, shape index: {}]   ;;  %s14929_s3 = inlined_call_operand.vmem [shape: bf16[128,2048], index: 3, kind: input, shape index: {}]   ;;  %s14930_s4 = inlined_call_operand.vmem [shape: f32[128,1], index: 4, kind: input, shape index: {}]  }
   0x1   :  { %v8692_v0 = vld [vmem:[%s14926_s1] sm:$0xf]  ;;  %v8697_v1 = vld [vmem:[%s14926_s1 + $0x4] sm:$0xf]  ;;  %v8702_v2 = vld [vmem:[%s14926_s1 + $0x8] sm:$0xf] }
   0x2   :  { %15303 = vst [vmem:[#allocation2_spill] sm:$0xff] %v8692_v0  ;;  %15304 = vst [vmem:[#allocation3_spill] sm:$0xff] %v8697_v1  ;;  %v8707_v3 = vld [vmem:[%s14926_s1 + $0xc] sm:$0xf]  ;;  %v8712_v4 = vld [vmem:[%s14926_s1 + $0x10] sm:$0xf] }
   0x3   :  { %15305 = vst [vmem:[#allocation4_spill] sm:$0xff] %v8702_v2  ;;  %15306 = vst [vmem:[#allocation5_spill] sm:$0xff] %v8707_v3  ;;  %v8717_v5 = vld [vmem:[%s14926_s1 + $0x14] sm:$0xf]  ;;  %v8722_v6 = vld [vmem:[%s14926_s1 + $0x18] sm:$0xf] }
   0x4   :  { %15307 = vst [vmem:[#allocation6_spill] sm:$0xff] %v8712_v4  ;;  %15308 = vst [vmem:[#allocation7_spill] sm:$0xff] %v8717_v5  ;;  %v8727_v7 = vld [vmem:[%s14926_s1 + $0x1c] sm:$0xf]  ;;  %v8732_v8 = vld [vmem:[%s14926_s1 + $0x20] sm:$0xf] }
   0x5   :  { %15309 = vst [vmem:[#allocation8_spill] sm:$0xff] %v8722_v6  ;;  %15310 = vst [vmem:[#allocation9_spill] sm:$0xff] %v8727_v7  ;;  %v8737_v9 = vld [vmem:[%s14926_s1 + $0x24] sm:$0xf]  ;;  %v8742_v10 = vld [vmem:[%s14926_s1 + $0x28] sm:$0xf] }
   0x6   :  { %15311 = vst [vmem:[#allocation10_spill] sm:$0xff] %v8732_v8  ;;  %15312 = vst [vmem:[#allocation11_spill] sm:$0xff] %v8737_v9  ;;  %v8747_v11 = vld [vmem:[%s14926_s1 + $0x2c] sm:$0xf]  ;;  %v8752_v12 = vld [vmem:[%s14926_s1 + $0x30] sm:$0xf] }
   0x7   :  { %15313 = vst [vmem:[#allocation12_spill] sm:$0xff] %v8742_v10  ;;  %15314 = vst [vmem:[#allocation13_spill] sm:$0xff] %v8747_v11  ;;  %v8757_v13 = vld [vmem:[%s14926_s1 + $0x34] sm:$0xf]  ;;  %v8762_v14 = vld [vmem:[%s14926_s1 + $0x38] sm:$0xf] }
   0x8   :  { %15315 = vst [vmem:[#allocation14_spill] sm:$0xff] %v8752_v12  ;;  %15316 = vst [vmem:[#allocation15_spill] sm:$0xff] %v8757_v13  ;;  %v8767_v15 = vld [vmem:[%s14926_s1 + $0x3c] sm:$0xf]  ;;  %v8772_v16 = vld [vmem:[%s14926_s1 + $0x40] sm:$0xf] }
   0x9   :  { %15317 = vst [vmem:[#allocation16_spill] sm:$0xff] %v8762_v14  ;;  %15318 = vst [vmem:[#allocation17_spill] sm:$0xff] %v8767_v15  ;;  %v8777_v17 = vld [vmem:[%s14926_s1 + $0x44] sm:$0xf]  ;;  %v8782_v18 = vld [vmem:[%s14926_s1 + $0x48] sm:$0xf] }
   0xa   :  { %15319 = vst [vmem:[#allocation18_spill] sm:$0xff] %v8772_v16  ;;  %15320 = vst [vmem:[#allocation19_spill] sm:$0xff] %v8777_v17  ;;  %v8787_v19 = vld [vmem:[%s14926_s1 + $0x4c] sm:$0xf]  ;;  %v8792_v20 = vld [vmem:[%s14926_s1 + $0x50] sm:$0xf] }
   0xb   :  { %15321 = vst [vmem:[#allocation20_spill] sm:$0xff] %v8782_v18  ;;  %15322 = vst [vmem:[#allocation21_spill] sm:$0xff] %v8787_v19  ;;  %v8797_v21 = vld [vmem:[%s14926_s1 + $0x54] sm:$0xf]  ;;  %v8802_v22 = vld [vmem:[%s14926_s1 + $0x58] sm:$0xf] }
   0xc   :  { %15323 = vst [vmem:[#allocation22_spill] sm:$0xff] %v8792_v20  ;;  %15324 = vst [vmem:[#allocation23_spill] sm:$0xff] %v8797_v21  ;;  %v8807_v23 = vld [vmem:[%s14926_s1 + $0x5c] sm:$0xf]  ;;  %v8812_v24 = vld [vmem:[%s14926_s1 + $0x60] sm:$0xf] }
   0xd   :  { %15325 = vst [vmem:[#allocation24_spill] sm:$0xff] %v8802_v22  ;;  %15326 = vst [vmem:[#allocation25_spill] sm:$0xff] %v8807_v23  ;;  %v8817_v25 = vld [vmem:[%s14926_s1 + $0x64] sm:$0xf]  ;;  %v8822_v26 = vld [vmem:[%s14926_s1 + $0x68] sm:$0xf] }
   0xe   :  { %15327 = vst [vmem:[#allocation26_spill] sm:$0xff] %v8812_v24  ;;  %15328 = vst [vmem:[#allocation27_spill] sm:$0xff] %v8817_v25  ;;  %v8827_v27 = vld [vmem:[%s14926_s1 + $0x6c] sm:$0xf]  ;;  %v8832_v28 = vld [vmem:[%s14926_s1 + $0x70] sm:$0xf] }
   0xf   :  { %15329 = vst [vmem:[#allocation28_spill] sm:$0xff] %v8822_v26  ;;  %15330 = vst [vmem:[#allocation29_spill] sm:$0xff] %v8827_v27  ;;  %v8837_v29 = vld [vmem:[%s14926_s1 + $0x74] sm:$0xf]  ;;  %v8842_v30 = vld [vmem:[%s14926_s1 + $0x78] sm:$0xf] }
  0x10   :  { %15331 = vst [vmem:[#allocation30_spill] sm:$0xff] %v8832_v28  ;;  %15332 = vst [vmem:[#allocation31_spill] sm:$0xff] %v8837_v29  ;;  %v8847_v31 = vld [vmem:[%s14926_s1 + $0x7c] sm:$0xf]  ;;  %v8852_v32 = vld [vmem:[%s14926_s1 + $0x80] sm:$0xf] }
  0x11   :  { %15333 = vst [vmem:[#allocation32_spill] sm:$0xff] %v8842_v30  ;;  %15334 = vst [vmem:[#allocation33_spill] sm:$0xff] %v8847_v31  ;;  %v8857_v33 = vld [vmem:[%s14926_s1 + $0x84] sm:$0xf]  ;;  %v8862_v34 = vld [vmem:[%s14926_s1 + $0x88] sm:$0xf] }
  0x12   :  { %15335 = vst [vmem:[#allocation34_spill] sm:$0xff] %v8852_v32  ;;  %15336 = vst [vmem:[#allocation35_spill] sm:$0xff] %v8857_v33  ;;  %v8867_v35 = vld [vmem:[%s14926_s1 + $0x8c] sm:$0xf]  ;;  %v8872_v36 = vld [vmem:[%s14926_s1 + $0x90] sm:$0xf] }
  0x13   :  { %15337 = vst [vmem:[#allocation36_spill] sm:$0xff] %v8862_v34  ;;  %15338 = vst [vmem:[#allocation37_spill] sm:$0xff] %v8867_v35  ;;  %v8877_v37 = vld [vmem:[%s14926_s1 + $0x94] sm:$0xf]  ;;  %v8882_v38 = vld [vmem:[%s14926_s1 + $0x98] sm:$0xf] }
  0x14   :  { %15339 = vst [vmem:[#allocation38_spill] sm:$0xff] %v8872_v36  ;;  %15340 = vst [vmem:[#allocation39_spill] sm:$0xff] %v8877_v37  ;;  %v8887_v39 = vld [vmem:[%s14926_s1 + $0x9c] sm:$0xf]  ;;  %v8892_v40 = vld [vmem:[%s14926_s1 + $0xa0] sm:$0xf] }
  0x15   :  { %15341 = vst [vmem:[#allocation40_spill] sm:$0xff] %v8882_v38  ;;  %15342 = vst [vmem:[#allocation41_spill] sm:$0xff] %v8887_v39  ;;  %v8897_v41 = vld [vmem:[%s14926_s1 + $0xa4] sm:$0xf]  ;;  %v8902_v42 = vld [vmem:[%s14926_s1 + $0xa8] sm:$0xf] }
  0x16   :  { %15343 = vst [vmem:[#allocation42_spill] sm:$0xff] %v8892_v40  ;;  %15344 = vst [vmem:[#allocation43_spill] sm:$0xff] %v8897_v41  ;;  %v8907_v43 = vld [vmem:[%s14926_s1 + $0xac] sm:$0xf]  ;;  %v8912_v44 = vld [vmem:[%s14926_s1 + $0xb0] sm:$0xf] }
  0x17   :  { %15345 = vst [vmem:[#allocation44_spill] sm:$0xff] %v8902_v42  ;;  %15346 = vst [vmem:[#allocation45_spill] sm:$0xff] %v8907_v43  ;;  %v8917_v45 = vld [vmem:[%s14926_s1 + $0xb4] sm:$0xf]  ;;  %v8922_v46 = vld [vmem:[%s14926_s1 + $0xb8] sm:$0xf] }
  0x18   :  { %15347 = vst [vmem:[#allocation46_spill] sm:$0xff] %v8912_v44  ;;  %15348 = vst [vmem:[#allocation47_spill] sm:$0xff] %v8917_v45  ;;  %v8927_v47 = vld [vmem:[%s14926_s1 + $0xbc] sm:$0xf]  ;;  %v8932_v48 = vld [vmem:[%s14926_s1 + $0xc0] sm:$0xf] }
  0x19   :  { %15349 = vst [vmem:[#allocation48_spill] sm:$0xff] %v8922_v46  ;;  %15350 = vst [vmem:[#allocation49_spill] sm:$0xff] %v8927_v47  ;;  %v8937_v49 = vld [vmem:[%s14926_s1 + $0xc4] sm:$0xf]  ;;  %v8942_v50 = vld [vmem:[%s14926_s1 + $0xc8] sm:$0xf] }
  0x1a   :  { %15351 = vst [vmem:[#allocation50_spill] sm:$0xff] %v8932_v48  ;;  %15352 = vst [vmem:[#allocation51_spill] sm:$0xff] %v8937_v49  ;;  %v8947_v51 = vld [vmem:[%s14926_s1 + $0xcc] sm:$0xf]  ;;  %v8952_v52 = vld [vmem:[%s14926_s1 + $0xd0] sm:$0xf] }
  0x1b   :  { %15353 = vst [vmem:[#allocation52_spill] sm:$0xff] %v8942_v50  ;;  %15354 = vst [vmem:[#allocation53_spill] sm:$0xff] %v8947_v51  ;;  %v8957_v53 = vld [vmem:[%s14926_s1 + $0xd4] sm:$0xf]  ;;  %v8962_v54 = vld [vmem:[%s14926_s1 + $0xd8] sm:$0xf] }
  0x1c   :  { %15355 = vst [vmem:[#allocation54_spill] sm:$0xff] %v8952_v52  ;;  %15356 = vst [vmem:[#allocation55_spill] sm:$0xff] %v8957_v53  ;;  %v8967_v55 = vld [vmem:[%s14926_s1 + $0xdc] sm:$0xf]  ;;  %v8972_v56 = vld [vmem:[%s14926_s1 + $0xe0] sm:$0xf] }
  0x1d   :  { %15357 = vst [vmem:[#allocation56_spill] sm:$0xff] %v8962_v54  ;;  %15358 = vst [vmem:[#allocation57_spill] sm:$0xff] %v8967_v55  ;;  %v8977_v57 = vld [vmem:[%s14926_s1 + $0xe4] sm:$0xf]  ;;  %v8982_v58 = vld [vmem:[%s14926_s1 + $0xe8] sm:$0xf] }
  0x1e   :  { %15359 = vst [vmem:[#allocation58_spill] sm:$0xff] %v8972_v56  ;;  %15360 = vst [vmem:[#allocation59_spill] sm:$0xff] %v8977_v57  ;;  %v8987_v59 = vld [vmem:[%s14926_s1 + $0xec] sm:$0xf]  ;;  %v8992_v60 = vld [vmem:[%s14926_s1 + $0xf0] sm:$0xf] }
  0x1f   :  { %15361 = vst [vmem:[#allocation60_spill] sm:$0xff] %v8982_v58  ;;  %15362 = vst [vmem:[#allocation61_spill] sm:$0xff] %v8987_v59  ;;  %v8997_v61 = vld [vmem:[%s14926_s1 + $0xf4] sm:$0xf]  ;;  %v9002_v62 = vld [vmem:[%s14926_s1 + $0xf8] sm:$0xf] }
  0x20   :  { %15363 = vst [vmem:[#allocation62_spill] sm:$0xff] %v8992_v60  ;;  %15364 = vst [vmem:[#allocation63_spill] sm:$0xff] %v8997_v61  ;;  %v9007_v63 = vld [vmem:[%s14926_s1 + $0xfc] sm:$0xf]  ;;  %v9012_v58 = vld [vmem:[%s14926_s1 + $0x100] sm:$0xf] }
  0x21   :  { %15365 = vst [vmem:[#allocation64_spill] sm:$0xff] %v9002_v62  ;;  %15366 = vst [vmem:[#allocation65_spill] sm:$0xff] %v9007_v63  ;;  %v9017_v60 = vld [vmem:[%s14926_s1 + $0x104] sm:$0xf]  ;;  %v9022_v61 = vld [vmem:[%s14926_s1 + $0x108] sm:$0xf] }
  0x22   :  { %15367 = vst [vmem:[#allocation66_spill] sm:$0xff] %v9012_v58  ;;  %15368 = vst [vmem:[#allocation67_spill] sm:$0xff] %v9017_v60  ;;  %v9027_v62 = vld [vmem:[%s14926_s1 + $0x10c] sm:$0xf]  ;;  %v9032_v63 = vld [vmem:[%s14926_s1 + $0x110] sm:$0xf] }
  0x23   :  { %15369 = vst [vmem:[#allocation68_spill] sm:$0xff] %v9022_v61  ;;  %15370 = vst [vmem:[#allocation69_spill] sm:$0xff] %v9027_v62  ;;  %v9037_v58 = vld [vmem:[%s14926_s1 + $0x114] sm:$0xf]  ;;  %v9042_v60 = vld [vmem:[%s14926_s1 + $0x118] sm:$0xf] }
  0x24   :  { %15371 = vst [vmem:[#allocation70_spill] sm:$0xff] %v9032_v63  ;;  %15372 = vst [vmem:[#allocation71_spill] sm:$0xff] %v9037_v58  ;;  %v9047_v61 = vld [vmem:[%s14926_s1 + $0x11c] sm:$0xf]  ;;  %v9052_v62 = vld [vmem:[%s14926_s1 + $0x120] sm:$0xf] }
  0x25   :  { %15373 = vst [vmem:[#allocation72_spill] sm:$0xff] %v9042_v60  ;;  %15374 = vst [vmem:[#allocation73_spill] sm:$0xff] %v9047_v61  ;;  %v9057_v63 = vld [vmem:[%s14926_s1 + $0x124] sm:$0xf]  ;;  %v9062_v58 = vld [vmem:[%s14926_s1 + $0x128] sm:$0xf] }
  0x26   :  { %15375 = vst [vmem:[#allocation74_spill] sm:$0xff] %v9052_v62  ;;  %15376 = vst [vmem:[#allocation75_spill] sm:$0xff] %v9057_v63  ;;  %v9067_v60 = vld [vmem:[%s14926_s1 + $0x12c] sm:$0xf]  ;;  %v9072_v61 = vld [vmem:[%s14926_s1 + $0x130] sm:$0xf] }
  0x27   :  { %15377 = vst [vmem:[#allocation76_spill] sm:$0xff] %v9062_v58  ;;  %15378 = vst [vmem:[#allocation77_spill] sm:$0xff] %v9067_v60  ;;  %v9077_v62 = vld [vmem:[%s14926_s1 + $0x134] sm:$0xf]  ;;  %v9082_v63 = vld [vmem:[%s14926_s1 + $0x138] sm:$0xf] }
  0x28   :  { %15379 = vst [vmem:[#allocation78_spill] sm:$0xff] %v9072_v61  ;;  %15380 = vst [vmem:[#allocation79_spill] sm:$0xff] %v9077_v62  ;;  %v9087_v58 = vld [vmem:[%s14926_s1 + $0x13c] sm:$0xf]  ;;  %v9092_v60 = vld [vmem:[%s14926_s1 + $0x140] sm:$0xf] }
  0x29   :  { %15381 = vst [vmem:[#allocation80_spill] sm:$0xff] %v9082_v63  ;;  %15382 = vst [vmem:[#allocation81_spill] sm:$0xff] %v9087_v58  ;;  %v9097_v61 = vld [vmem:[%s14926_s1 + $0x144] sm:$0xf]  ;;  %v9102_v62 = vld [vmem:[%s14926_s1 + $0x148] sm:$0xf] }
  0x2a   :  { %15383 = vst [vmem:[#allocation82_spill] sm:$0xff] %v9092_v60  ;;  %15384 = vst [vmem:[#allocation83_spill] sm:$0xff] %v9097_v61  ;;  %v9107_v63 = vld [vmem:[%s14926_s1 + $0x14c] sm:$0xf]  ;;  %v9112_v58 = vld [vmem:[%s14926_s1 + $0x150] sm:$0xf] }
  0x2b   :  { %15385 = vst [vmem:[#allocation84_spill] sm:$0xff] %v9102_v62  ;;  %15386 = vst [vmem:[#allocation85_spill] sm:$0xff] %v9107_v63  ;;  %v9117_v60 = vld [vmem:[%s14926_s1 + $0x154] sm:$0xf]  ;;  %v9122_v61 = vld [vmem:[%s14926_s1 + $0x158] sm:$0xf] }
  0x2c   :  { %15387 = vst [vmem:[#allocation86_spill] sm:$0xff] %v9112_v58  ;;  %15388 = vst [vmem:[#allocation87_spill] sm:$0xff] %v9117_v60  ;;  %v9127_v62 = vld [vmem:[%s14926_s1 + $0x15c] sm:$0xf]  ;;  %v9132_v63 = vld [vmem:[%s14926_s1 + $0x160] sm:$0xf] }
  0x2d   :  { %15389 = vst [vmem:[#allocation88_spill] sm:$0xff] %v9122_v61  ;;  %15390 = vst [vmem:[#allocation89_spill] sm:$0xff] %v9127_v62  ;;  %v9137_v58 = vld [vmem:[%s14926_s1 + $0x164] sm:$0xf]  ;;  %v9142_v60 = vld [vmem:[%s14926_s1 + $0x168] sm:$0xf] }
  0x2e   :  { %15391 = vst [vmem:[#allocation90_spill] sm:$0xff] %v9132_v63  ;;  %15392 = vst [vmem:[#allocation91_spill] sm:$0xff] %v9137_v58  ;;  %v9147_v61 = vld [vmem:[%s14926_s1 + $0x16c] sm:$0xf]  ;;  %v9152_v62 = vld [vmem:[%s14926_s1 + $0x170] sm:$0xf] }
  0x2f   :  { %15393 = vst [vmem:[#allocation92_spill] sm:$0xff] %v9142_v60  ;;  %15394 = vst [vmem:[#allocation93_spill] sm:$0xff] %v9147_v61  ;;  %v9157_v63 = vld [vmem:[%s14926_s1 + $0x174] sm:$0xf]  ;;  %v9162_v58 = vld [vmem:[%s14926_s1 + $0x178] sm:$0xf] }
  0x30   :  { %15395 = vst [vmem:[#allocation94_spill] sm:$0xff] %v9152_v62  ;;  %15396 = vst [vmem:[#allocation95_spill] sm:$0xff] %v9157_v63  ;;  %v9167_v60 = vld [vmem:[%s14926_s1 + $0x17c] sm:$0xf]  ;;  %v9172_v61 = vld [vmem:[%s14926_s1 + $0x180] sm:$0xf] }
  0x31   :  { %15397 = vst [vmem:[#allocation96_spill] sm:$0xff] %v9162_v58  ;;  %15398 = vst [vmem:[#allocation97_spill] sm:$0xff] %v9167_v60  ;;  %v9177_v62 = vld [vmem:[%s14926_s1 + $0x184] sm:$0xf]  ;;  %v9182_v63 = vld [vmem:[%s14926_s1 + $0x188] sm:$0xf] }
  0x32   :  { %15399 = vst [vmem:[#allocation98_spill] sm:$0xff] %v9172_v61  ;;  %15400 = vst [vmem:[#allocation99_spill] sm:$0xff] %v9177_v62  ;;  %v9187_v58 = vld [vmem:[%s14926_s1 + $0x18c] sm:$0xf]  ;;  %v9192_v60 = vld [vmem:[%s14926_s1 + $0x190] sm:$0xf] }
  0x33   :  { %15401 = vst [vmem:[#allocation100_spill] sm:$0xff] %v9182_v63  ;;  %15402 = vst [vmem:[#allocation101_spill] sm:$0xff] %v9187_v58  ;;  %v9197_v61 = vld [vmem:[%s14926_s1 + $0x194] sm:$0xf]  ;;  %v9202_v62 = vld [vmem:[%s14926_s1 + $0x198] sm:$0xf] }
  0x34   :  { %15403 = vst [vmem:[#allocation102_spill] sm:$0xff] %v9192_v60  ;;  %15404 = vst [vmem:[#allocation103_spill] sm:$0xff] %v9197_v61  ;;  %v9207_v63 = vld [vmem:[%s14926_s1 + $0x19c] sm:$0xf]  ;;  %v9212_v58 = vld [vmem:[%s14926_s1 + $0x1a0] sm:$0xf] }
  0x35   :  { %15405 = vst [vmem:[#allocation104_spill] sm:$0xff] %v9202_v62  ;;  %15406 = vst [vmem:[#allocation105_spill] sm:$0xff] %v9207_v63  ;;  %v9217_v60 = vld [vmem:[%s14926_s1 + $0x1a4] sm:$0xf]  ;;  %v9222_v61 = vld [vmem:[%s14926_s1 + $0x1a8] sm:$0xf] }
  0x36   :  { %15407 = vst [vmem:[#allocation106_spill] sm:$0xff] %v9212_v58  ;;  %15408 = vst [vmem:[#allocation107_spill] sm:$0xff] %v9217_v60  ;;  %v9227_v62 = vld [vmem:[%s14926_s1 + $0x1ac] sm:$0xf]  ;;  %v9232_v63 = vld [vmem:[%s14926_s1 + $0x1b0] sm:$0xf] }
  0x37   :  { %15409 = vst [vmem:[#allocation108_spill] sm:$0xff] %v9222_v61  ;;  %15410 = vst [vmem:[#allocation109_spill] sm:$0xff] %v9227_v62  ;;  %v9237_v58 = vld [vmem:[%s14926_s1 + $0x1b4] sm:$0xf]  ;;  %v9242_v60 = vld [vmem:[%s14926_s1 + $0x1b8] sm:$0xf] }
  0x38   :  { %15411 = vst [vmem:[#allocation110_spill] sm:$0xff] %v9232_v63  ;;  %15412 = vst [vmem:[#allocation111_spill] sm:$0xff] %v9237_v58  ;;  %v9247_v61 = vld [vmem:[%s14926_s1 + $0x1bc] sm:$0xf]  ;;  %v9252_v62 = vld [vmem:[%s14926_s1 + $0x1c0] sm:$0xf] }
  0x39   :  { %15413 = vst [vmem:[#allocation112_spill] sm:$0xff] %v9242_v60  ;;  %15414 = vst [vmem:[#allocation113_spill] sm:$0xff] %v9247_v61  ;;  %v9257_v63 = vld [vmem:[%s14926_s1 + $0x1c4] sm:$0xf]  ;;  %v9262_v58 = vld [vmem:[%s14926_s1 + $0x1c8] sm:$0xf] }
  0x3a   :  { %15415 = vst [vmem:[#allocation114_spill] sm:$0xff] %v9252_v62  ;;  %15416 = vst [vmem:[#allocation115_spill] sm:$0xff] %v9257_v63  ;;  %v9267_v60 = vld [vmem:[%s14926_s1 + $0x1cc] sm:$0xf]  ;;  %v9272_v61 = vld [vmem:[%s14926_s1 + $0x1d0] sm:$0xf] }
  0x3b   :  { %15417 = vst [vmem:[#allocation116_spill] sm:$0xff] %v9262_v58  ;;  %15418 = vst [vmem:[#allocation117_spill] sm:$0xff] %v9267_v60  ;;  %v9277_v62 = vld [vmem:[%s14926_s1 + $0x1d4] sm:$0xf]  ;;  %v9282_v63 = vld [vmem:[%s14926_s1 + $0x1d8] sm:$0xf] }
  0x3c   :  { %15419 = vst [vmem:[#allocation118_spill] sm:$0xff] %v9272_v61  ;;  %15420 = vst [vmem:[#allocation119_spill] sm:$0xff] %v9277_v62  ;;  %v9287_v58 = vld [vmem:[%s14926_s1 + $0x1dc] sm:$0xf]  ;;  %v9292_v60 = vld [vmem:[%s14926_s1 + $0x1e0] sm:$0xf] }
  0x3d   :  { %15421 = vst [vmem:[#allocation120_spill] sm:$0xff] %v9282_v63  ;;  %15422 = vst [vmem:[#allocation121_spill] sm:$0xff] %v9287_v58  ;;  %v9297_v61 = vld [vmem:[%s14926_s1 + $0x1e4] sm:$0xf]  ;;  %v9302_v62 = vld [vmem:[%s14926_s1 + $0x1e8] sm:$0xf] }
  0x3e   :  { %15423 = vst [vmem:[#allocation122_spill] sm:$0xff] %v9292_v60  ;;  %15424 = vst [vmem:[#allocation123_spill] sm:$0xff] %v9297_v61  ;;  %v9307_v63 = vld [vmem:[%s14926_s1 + $0x1ec] sm:$0xf]  ;;  %v9312_v58 = vld [vmem:[%s14926_s1 + $0x1f0] sm:$0xf] }
  0x3f   :  { %15425 = vst [vmem:[#allocation124_spill] sm:$0xff] %v9302_v62  ;;  %15426 = vst [vmem:[#allocation125_spill] sm:$0xff] %v9307_v63  ;;  %v9317_v60 = vld [vmem:[%s14926_s1 + $0x1f4] sm:$0xf]  ;;  %v9322_v61 = vld [vmem:[%s14926_s1 + $0x1f8] sm:$0xf] }
  0x40   :  { %15427 = vst [vmem:[#allocation126_spill] sm:$0xff] %v9312_v58  ;;  %15428 = vst [vmem:[#allocation127_spill] sm:$0xff] %v9317_v60  ;;  %v9327_v62 = vld [vmem:[%s14926_s1 + $0x1fc] sm:$0xf]  ;;  %v9332_v63 = vld [vmem:[%s14926_s1 + $0x200] sm:$0xf] }
  0x41   :  { %15429 = vst [vmem:[#allocation128_spill] sm:$0xff] %v9322_v61  ;;  %15430 = vst [vmem:[#allocation129_spill] sm:$0xff] %v9327_v62  ;;  %v9337_v58 = vld [vmem:[%s14926_s1 + $0x204] sm:$0xf]  ;;  %v9342_v60 = vld [vmem:[%s14926_s1 + $0x208] sm:$0xf] }
  0x42   :  { %15431 = vst [vmem:[#allocation130_spill] sm:$0xff] %v9332_v63  ;;  %15432 = vst [vmem:[#allocation131_spill] sm:$0xff] %v9337_v58  ;;  %v9347_v61 = vld [vmem:[%s14926_s1 + $0x20c] sm:$0xf]  ;;  %v9352_v62 = vld [vmem:[%s14926_s1 + $0x210] sm:$0xf] }
  0x43   :  { %15433 = vst [vmem:[#allocation132_spill] sm:$0xff] %v9342_v60  ;;  %15434 = vst [vmem:[#allocation133_spill] sm:$0xff] %v9347_v61  ;;  %v9357_v63 = vld [vmem:[%s14926_s1 + $0x214] sm:$0xf]  ;;  %v9362_v58 = vld [vmem:[%s14926_s1 + $0x218] sm:$0xf] }
  0x44   :  { %15435 = vst [vmem:[#allocation134_spill] sm:$0xff] %v9352_v62  ;;  %15436 = vst [vmem:[#allocation135_spill] sm:$0xff] %v9357_v63  ;;  %v9367_v60 = vld [vmem:[%s14926_s1 + $0x21c] sm:$0xf]  ;;  %v9372_v61 = vld [vmem:[%s14926_s1 + $0x220] sm:$0xf] }
  0x45   :  { %15437 = vst [vmem:[#allocation136_spill] sm:$0xff] %v9362_v58  ;;  %15438 = vst [vmem:[#allocation137_spill] sm:$0xff] %v9367_v60  ;;  %v9377_v62 = vld [vmem:[%s14926_s1 + $0x224] sm:$0xf]  ;;  %v9382_v63 = vld [vmem:[%s14926_s1 + $0x228] sm:$0xf] }
  0x46   :  { %15439 = vst [vmem:[#allocation138_spill] sm:$0xff] %v9372_v61  ;;  %15440 = vst [vmem:[#allocation139_spill] sm:$0xff] %v9377_v62  ;;  %v9387_v58 = vld [vmem:[%s14926_s1 + $0x22c] sm:$0xf]  ;;  %v9392_v60 = vld [vmem:[%s14926_s1 + $0x230] sm:$0xf] }
  0x47   :  { %15441 = vst [vmem:[#allocation140_spill] sm:$0xff] %v9382_v63  ;;  %15442 = vst [vmem:[#allocation141_spill] sm:$0xff] %v9387_v58  ;;  %v9397_v61 = vld [vmem:[%s14926_s1 + $0x234] sm:$0xf]  ;;  %v9402_v62 = vld [vmem:[%s14926_s1 + $0x238] sm:$0xf] }
  0x48   :  { %15443 = vst [vmem:[#allocation142_spill] sm:$0xff] %v9392_v60  ;;  %15444 = vst [vmem:[#allocation143_spill] sm:$0xff] %v9397_v61  ;;  %v9407_v63 = vld [vmem:[%s14926_s1 + $0x23c] sm:$0xf]  ;;  %v9412_v58 = vld [vmem:[%s14926_s1 + $0x240] sm:$0xf] }
  0x49   :  { %15445 = vst [vmem:[#allocation144_spill] sm:$0xff] %v9402_v62  ;;  %15446 = vst [vmem:[#allocation145_spill] sm:$0xff] %v9407_v63  ;;  %v9417_v60 = vld [vmem:[%s14926_s1 + $0x244] sm:$0xf]  ;;  %v9422_v61 = vld [vmem:[%s14926_s1 + $0x248] sm:$0xf] }
  0x4a   :  { %15447 = vst [vmem:[#allocation146_spill] sm:$0xff] %v9412_v58  ;;  %15448 = vst [vmem:[#allocation147_spill] sm:$0xff] %v9417_v60  ;;  %v9427_v62 = vld [vmem:[%s14926_s1 + $0x24c] sm:$0xf]  ;;  %v9432_v63 = vld [vmem:[%s14926_s1 + $0x250] sm:$0xf] }
  0x4b   :  { %15449 = vst [vmem:[#allocation148_spill] sm:$0xff] %v9422_v61  ;;  %15450 = vst [vmem:[#allocation149_spill] sm:$0xff] %v9427_v62  ;;  %v9437_v58 = vld [vmem:[%s14926_s1 + $0x254] sm:$0xf]  ;;  %v9442_v60 = vld [vmem:[%s14926_s1 + $0x258] sm:$0xf] }
  0x4c   :  { %15451 = vst [vmem:[#allocation150_spill] sm:$0xff] %v9432_v63  ;;  %15452 = vst [vmem:[#allocation151_spill] sm:$0xff] %v9437_v58  ;;  %v9447_v61 = vld [vmem:[%s14926_s1 + $0x25c] sm:$0xf]  ;;  %v9452_v62 = vld [vmem:[%s14926_s1 + $0x260] sm:$0xf] }
  0x4d   :  { %15453 = vst [vmem:[#allocation152_spill] sm:$0xff] %v9442_v60  ;;  %15454 = vst [vmem:[#allocation153_spill] sm:$0xff] %v9447_v61  ;;  %v9457_v63 = vld [vmem:[%s14926_s1 + $0x264] sm:$0xf]  ;;  %v9462_v58 = vld [vmem:[%s14926_s1 + $0x268] sm:$0xf] }
  0x4e   :  { %15455 = vst [vmem:[#allocation154_spill] sm:$0xff] %v9452_v62  ;;  %15456 = vst [vmem:[#allocation155_spill] sm:$0xff] %v9457_v63  ;;  %v9467_v60 = vld [vmem:[%s14926_s1 + $0x26c] sm:$0xf]  ;;  %v9472_v61 = vld [vmem:[%s14926_s1 + $0x270] sm:$0xf] }
  0x4f   :  { %15457 = vst [vmem:[#allocation156_spill] sm:$0xff] %v9462_v58  ;;  %15458 = vst [vmem:[#allocation157_spill] sm:$0xff] %v9467_v60  ;;  %v9477_v62 = vld [vmem:[%s14926_s1 + $0x274] sm:$0xf]  ;;  %v9482_v63 = vld [vmem:[%s14926_s1 + $0x278] sm:$0xf] }
  0x50   :  { %15459 = vst [vmem:[#allocation158_spill] sm:$0xff] %v9472_v61  ;;  %15460 = vst [vmem:[#allocation159_spill] sm:$0xff] %v9477_v62  ;;  %v9487_v58 = vld [vmem:[%s14926_s1 + $0x27c] sm:$0xf]  ;;  %v9492_v60 = vld [vmem:[%s14926_s1 + $0x280] sm:$0xf] }
  0x51   :  { %15461 = vst [vmem:[#allocation160_spill] sm:$0xff] %v9482_v63  ;;  %15462 = vst [vmem:[#allocation161_spill] sm:$0xff] %v9487_v58  ;;  %v9497_v61 = vld [vmem:[%s14926_s1 + $0x284] sm:$0xf]  ;;  %v9502_v62 = vld [vmem:[%s14926_s1 + $0x288] sm:$0xf] }
  0x52   :  { %15463 = vst [vmem:[#allocation162_spill] sm:$0xff] %v9492_v60  ;;  %15464 = vst [vmem:[#allocation163_spill] sm:$0xff] %v9497_v61  ;;  %v9507_v63 = vld [vmem:[%s14926_s1 + $0x28c] sm:$0xf]  ;;  %v9512_v58 = vld [vmem:[%s14926_s1 + $0x290] sm:$0xf] }
  0x53   :  { %15465 = vst [vmem:[#allocation164_spill] sm:$0xff] %v9502_v62  ;;  %15466 = vst [vmem:[#allocation165_spill] sm:$0xff] %v9507_v63  ;;  %v9517_v60 = vld [vmem:[%s14926_s1 + $0x294] sm:$0xf]  ;;  %v9522_v61 = vld [vmem:[%s14926_s1 + $0x298] sm:$0xf] }
  0x54   :  { %15467 = vst [vmem:[#allocation166_spill] sm:$0xff] %v9512_v58  ;;  %15468 = vst [vmem:[#allocation167_spill] sm:$0xff] %v9517_v60  ;;  %v9527_v62 = vld [vmem:[%s14926_s1 + $0x29c] sm:$0xf]  ;;  %v9532_v63 = vld [vmem:[%s14926_s1 + $0x2a0] sm:$0xf] }
  0x55   :  { %15469 = vst [vmem:[#allocation168_spill] sm:$0xff] %v9522_v61  ;;  %15470 = vst [vmem:[#allocation169_spill] sm:$0xff] %v9527_v62  ;;  %v9537_v58 = vld [vmem:[%s14926_s1 + $0x2a4] sm:$0xf]  ;;  %v9542_v60 = vld [vmem:[%s14926_s1 + $0x2a8] sm:$0xf] }
  0x56   :  { %15471 = vst [vmem:[#allocation170_spill] sm:$0xff] %v9532_v63  ;;  %15472 = vst [vmem:[#allocation171_spill] sm:$0xff] %v9537_v58  ;;  %v9547_v61 = vld [vmem:[%s14926_s1 + $0x2ac] sm:$0xf]  ;;  %v9552_v62 = vld [vmem:[%s14926_s1 + $0x2b0] sm:$0xf] }
  0x57   :  { %15473 = vst [vmem:[#allocation172_spill] sm:$0xff] %v9542_v60  ;;  %15474 = vst [vmem:[#allocation173_spill] sm:$0xff] %v9547_v61  ;;  %v9557_v63 = vld [vmem:[%s14926_s1 + $0x2b4] sm:$0xf]  ;;  %v9562_v58 = vld [vmem:[%s14926_s1 + $0x2b8] sm:$0xf] }
  0x58   :  { %15475 = vst [vmem:[#allocation174_spill] sm:$0xff] %v9552_v62  ;;  %15476 = vst [vmem:[#allocation175_spill] sm:$0xff] %v9557_v63  ;;  %v9567_v60 = vld [vmem:[%s14926_s1 + $0x2bc] sm:$0xf]  ;;  %v9572_v61 = vld [vmem:[%s14926_s1 + $0x2c0] sm:$0xf] }
  0x59   :  { %15477 = vst [vmem:[#allocation176_spill] sm:$0xff] %v9562_v58  ;;  %15478 = vst [vmem:[#allocation177_spill] sm:$0xff] %v9567_v60  ;;  %v9577_v62 = vld [vmem:[%s14926_s1 + $0x2c4] sm:$0xf]  ;;  %v9582_v63 = vld [vmem:[%s14926_s1 + $0x2c8] sm:$0xf] }
  0x5a   :  { %15479 = vst [vmem:[#allocation178_spill] sm:$0xff] %v9572_v61  ;;  %15480 = vst [vmem:[#allocation179_spill] sm:$0xff] %v9577_v62  ;;  %v9587_v58 = vld [vmem:[%s14926_s1 + $0x2cc] sm:$0xf]  ;;  %v9592_v60 = vld [vmem:[%s14926_s1 + $0x2d0] sm:$0xf] }
  0x5b   :  { %15481 = vst [vmem:[#allocation180_spill] sm:$0xff] %v9582_v63  ;;  %15482 = vst [vmem:[#allocation181_spill] sm:$0xff] %v9587_v58  ;;  %v9597_v61 = vld [vmem:[%s14926_s1 + $0x2d4] sm:$0xf]  ;;  %v9602_v62 = vld [vmem:[%s14926_s1 + $0x2d8] sm:$0xf] }
  0x5c   :  { %15483 = vst [vmem:[#allocation182_spill] sm:$0xff] %v9592_v60  ;;  %15484 = vst [vmem:[#allocation183_spill] sm:$0xff] %v9597_v61  ;;  %v9607_v63 = vld [vmem:[%s14926_s1 + $0x2dc] sm:$0xf]  ;;  %v9612_v58 = vld [vmem:[%s14926_s1 + $0x2e0] sm:$0xf] }
  0x5d   :  { %15485 = vst [vmem:[#allocation184_spill] sm:$0xff] %v9602_v62  ;;  %15486 = vst [vmem:[#allocation185_spill] sm:$0xff] %v9607_v63  ;;  %v9617_v60 = vld [vmem:[%s14926_s1 + $0x2e4] sm:$0xf]  ;;  %v9622_v61 = vld [vmem:[%s14926_s1 + $0x2e8] sm:$0xf] }
  0x5e   :  { %15487 = vst [vmem:[#allocation186_spill] sm:$0xff] %v9612_v58  ;;  %15488 = vst [vmem:[#allocation187_spill] sm:$0xff] %v9617_v60  ;;  %v9627_v62 = vld [vmem:[%s14926_s1 + $0x2ec] sm:$0xf]  ;;  %v9632_v63 = vld [vmem:[%s14926_s1 + $0x2f0] sm:$0xf] }
  0x5f   :  { %15489 = vst [vmem:[#allocation188_spill] sm:$0xff] %v9622_v61  ;;  %15490 = vst [vmem:[#allocation189_spill] sm:$0xff] %v9627_v62  ;;  %v9637_v58 = vld [vmem:[%s14926_s1 + $0x2f4] sm:$0xf]  ;;  %v9642_v60 = vld [vmem:[%s14926_s1 + $0x2f8] sm:$0xf] }
  0x60   :  { %15491 = vst [vmem:[#allocation190_spill] sm:$0xff] %v9632_v63  ;;  %15492 = vst [vmem:[#allocation191_spill] sm:$0xff] %v9637_v58  ;;  %v9647_v61 = vld [vmem:[%s14926_s1 + $0x2fc] sm:$0xf]  ;;  %v9652_v62 = vld [vmem:[%s14926_s1 + $0x300] sm:$0xf] }
  0x61   :  { %15493 = vst [vmem:[#allocation192_spill] sm:$0xff] %v9642_v60  ;;  %15494 = vst [vmem:[#allocation193_spill] sm:$0xff] %v9647_v61  ;;  %v9657_v63 = vld [vmem:[%s14926_s1 + $0x304] sm:$0xf]  ;;  %v9662_v58 = vld [vmem:[%s14926_s1 + $0x308] sm:$0xf] }
  0x62   :  { %15495 = vst [vmem:[#allocation194_spill] sm:$0xff] %v9652_v62  ;;  %15496 = vst [vmem:[#allocation195_spill] sm:$0xff] %v9657_v63  ;;  %v9667_v60 = vld [vmem:[%s14926_s1 + $0x30c] sm:$0xf]  ;;  %v9672_v61 = vld [vmem:[%s14926_s1 + $0x310] sm:$0xf] }
  0x63   :  { %15497 = vst [vmem:[#allocation196_spill] sm:$0xff] %v9662_v58  ;;  %15498 = vst [vmem:[#allocation197_spill] sm:$0xff] %v9667_v60  ;;  %v9677_v62 = vld [vmem:[%s14926_s1 + $0x314] sm:$0xf]  ;;  %v9682_v63 = vld [vmem:[%s14926_s1 + $0x318] sm:$0xf] }
  0x64   :  { %15499 = vst [vmem:[#allocation198_spill] sm:$0xff] %v9672_v61  ;;  %15500 = vst [vmem:[#allocation199_spill] sm:$0xff] %v9677_v62  ;;  %v9687_v58 = vld [vmem:[%s14926_s1 + $0x31c] sm:$0xf]  ;;  %v9692_v60 = vld [vmem:[%s14926_s1 + $0x320] sm:$0xf] }
  0x65   :  { %15501 = vst [vmem:[#allocation200_spill] sm:$0xff] %v9682_v63  ;;  %15502 = vst [vmem:[#allocation201_spill] sm:$0xff] %v9687_v58  ;;  %v9697_v61 = vld [vmem:[%s14926_s1 + $0x324] sm:$0xf]  ;;  %v9702_v62 = vld [vmem:[%s14926_s1 + $0x328] sm:$0xf] }
  0x66   :  { %15503 = vst [vmem:[#allocation202_spill] sm:$0xff] %v9692_v60  ;;  %15504 = vst [vmem:[#allocation203_spill] sm:$0xff] %v9697_v61  ;;  %v9707_v63 = vld [vmem:[%s14926_s1 + $0x32c] sm:$0xf]  ;;  %v9712_v58 = vld [vmem:[%s14926_s1 + $0x330] sm:$0xf] }
  0x67   :  { %15505 = vst [vmem:[#allocation204_spill] sm:$0xff] %v9702_v62  ;;  %15506 = vst [vmem:[#allocation205_spill] sm:$0xff] %v9707_v63  ;;  %v9717_v60 = vld [vmem:[%s14926_s1 + $0x334] sm:$0xf]  ;;  %v9722_v61 = vld [vmem:[%s14926_s1 + $0x338] sm:$0xf] }
  0x68   :  { %15507 = vst [vmem:[#allocation206_spill] sm:$0xff] %v9712_v58  ;;  %15508 = vst [vmem:[#allocation207_spill] sm:$0xff] %v9717_v60  ;;  %v9727_v62 = vld [vmem:[%s14926_s1 + $0x33c] sm:$0xf]  ;;  %v9732_v63 = vld [vmem:[%s14926_s1 + $0x340] sm:$0xf] }
  0x69   :  { %15509 = vst [vmem:[#allocation208_spill] sm:$0xff] %v9722_v61  ;;  %15510 = vst [vmem:[#allocation209_spill] sm:$0xff] %v9727_v62  ;;  %v9737_v58 = vld [vmem:[%s14926_s1 + $0x344] sm:$0xf]  ;;  %v9742_v60 = vld [vmem:[%s14926_s1 + $0x348] sm:$0xf] }
  0x6a   :  { %15511 = vst [vmem:[#allocation210_spill] sm:$0xff] %v9732_v63  ;;  %15512 = vst [vmem:[#allocation211_spill] sm:$0xff] %v9737_v58  ;;  %v9747_v61 = vld [vmem:[%s14926_s1 + $0x34c] sm:$0xf]  ;;  %v9752_v62 = vld [vmem:[%s14926_s1 + $0x350] sm:$0xf] }
  0x6b   :  { %15513 = vst [vmem:[#allocation212_spill] sm:$0xff] %v9742_v60  ;;  %15514 = vst [vmem:[#allocation213_spill] sm:$0xff] %v9747_v61  ;;  %v9757_v63 = vld [vmem:[%s14926_s1 + $0x354] sm:$0xf]  ;;  %v9762_v58 = vld [vmem:[%s14926_s1 + $0x358] sm:$0xf] }
  0x6c   :  { %15515 = vst [vmem:[#allocation214_spill] sm:$0xff] %v9752_v62  ;;  %15516 = vst [vmem:[#allocation215_spill] sm:$0xff] %v9757_v63  ;;  %v9767_v60 = vld [vmem:[%s14926_s1 + $0x35c] sm:$0xf]  ;;  %v9772_v61 = vld [vmem:[%s14926_s1 + $0x360] sm:$0xf] }
  0x6d   :  { %15517 = vst [vmem:[#allocation216_spill] sm:$0xff] %v9762_v58  ;;  %15518 = vst [vmem:[#allocation217_spill] sm:$0xff] %v9767_v60  ;;  %v9777_v62 = vld [vmem:[%s14926_s1 + $0x364] sm:$0xf]  ;;  %v9782_v63 = vld [vmem:[%s14926_s1 + $0x368] sm:$0xf] }
  0x6e   :  { %15519 = vst [vmem:[#allocation218_spill] sm:$0xff] %v9772_v61  ;;  %15520 = vst [vmem:[#allocation219_spill] sm:$0xff] %v9777_v62  ;;  %v9787_v58 = vld [vmem:[%s14926_s1 + $0x36c] sm:$0xf]  ;;  %v9792_v60 = vld [vmem:[%s14926_s1 + $0x370] sm:$0xf] }
  0x6f   :  { %15521 = vst [vmem:[#allocation220_spill] sm:$0xff] %v9782_v63  ;;  %15522 = vst [vmem:[#allocation221_spill] sm:$0xff] %v9787_v58  ;;  %v9797_v61 = vld [vmem:[%s14926_s1 + $0x374] sm:$0xf]  ;;  %v9802_v62 = vld [vmem:[%s14926_s1 + $0x378] sm:$0xf] }
  0x70   :  { %15523 = vst [vmem:[#allocation222_spill] sm:$0xff] %v9792_v60  ;;  %15524 = vst [vmem:[#allocation223_spill] sm:$0xff] %v9797_v61  ;;  %v9807_v63 = vld [vmem:[%s14926_s1 + $0x37c] sm:$0xf]  ;;  %v9812_v58 = vld [vmem:[%s14926_s1 + $0x380] sm:$0xf] }
  0x71   :  { %15525 = vst [vmem:[#allocation224_spill] sm:$0xff] %v9802_v62  ;;  %15526 = vst [vmem:[#allocation225_spill] sm:$0xff] %v9807_v63  ;;  %v9817_v60 = vld [vmem:[%s14926_s1 + $0x384] sm:$0xf]  ;;  %v9822_v61 = vld [vmem:[%s14926_s1 + $0x388] sm:$0xf] }
  0x72   :  { %15527 = vst [vmem:[#allocation226_spill] sm:$0xff] %v9812_v58  ;;  %15528 = vst [vmem:[#allocation227_spill] sm:$0xff] %v9817_v60  ;;  %v9827_v62 = vld [vmem:[%s14926_s1 + $0x38c] sm:$0xf]  ;;  %v9832_v63 = vld [vmem:[%s14926_s1 + $0x390] sm:$0xf] }
  0x73   :  { %15529 = vst [vmem:[#allocation228_spill] sm:$0xff] %v9822_v61  ;;  %15530 = vst [vmem:[#allocation229_spill] sm:$0xff] %v9827_v62  ;;  %v9837_v58 = vld [vmem:[%s14926_s1 + $0x394] sm:$0xf]  ;;  %v9842_v60 = vld [vmem:[%s14926_s1 + $0x398] sm:$0xf] }
  0x74   :  { %15531 = vst [vmem:[#allocation230_spill] sm:$0xff] %v9832_v63  ;;  %15532 = vst [vmem:[#allocation231_spill] sm:$0xff] %v9837_v58  ;;  %v9847_v61 = vld [vmem:[%s14926_s1 + $0x39c] sm:$0xf]  ;;  %v9852_v62 = vld [vmem:[%s14926_s1 + $0x3a0] sm:$0xf] }
  0x75   :  { %15533 = vst [vmem:[#allocation232_spill] sm:$0xff] %v9842_v60  ;;  %15534 = vst [vmem:[#allocation233_spill] sm:$0xff] %v9847_v61  ;;  %v9857_v63 = vld [vmem:[%s14926_s1 + $0x3a4] sm:$0xf]  ;;  %v9862_v58 = vld [vmem:[%s14926_s1 + $0x3a8] sm:$0xf] }
  0x76   :  { %15535 = vst [vmem:[#allocation234_spill] sm:$0xff] %v9852_v62  ;;  %15536 = vst [vmem:[#allocation235_spill] sm:$0xff] %v9857_v63  ;;  %v9867_v60 = vld [vmem:[%s14926_s1 + $0x3ac] sm:$0xf]  ;;  %v9872_v61 = vld [vmem:[%s14926_s1 + $0x3b0] sm:$0xf] }
  0x77   :  { %15537 = vst [vmem:[#allocation236_spill] sm:$0xff] %v9862_v58  ;;  %15538 = vst [vmem:[#allocation237_spill] sm:$0xff] %v9867_v60  ;;  %v9877_v62 = vld [vmem:[%s14926_s1 + $0x3b4] sm:$0xf]  ;;  %v9882_v63 = vld [vmem:[%s14926_s1 + $0x3b8] sm:$0xf] }
  0x78   :  { %15539 = vst [vmem:[#allocation238_spill] sm:$0xff] %v9872_v61  ;;  %15540 = vst [vmem:[#allocation239_spill] sm:$0xff] %v9877_v62  ;;  %v9887_v58 = vld [vmem:[%s14926_s1 + $0x3bc] sm:$0xf]  ;;  %v9892_v60 = vld [vmem:[%s14926_s1 + $0x3c0] sm:$0xf] }
  0x79   :  { %15541 = vst [vmem:[#allocation240_spill] sm:$0xff] %v9882_v63  ;;  %15542 = vst [vmem:[#allocation241_spill] sm:$0xff] %v9887_v58  ;;  %v9897_v61 = vld [vmem:[%s14926_s1 + $0x3c4] sm:$0xf]  ;;  %v9902_v62 = vld [vmem:[%s14926_s1 + $0x3c8] sm:$0xf] }
  0x7a   :  { %15543 = vst [vmem:[#allocation242_spill] sm:$0xff] %v9892_v60  ;;  %15544 = vst [vmem:[#allocation243_spill] sm:$0xff] %v9897_v61  ;;  %v9907_v63 = vld [vmem:[%s14926_s1 + $0x3cc] sm:$0xf]  ;;  %v9912_v58 = vld [vmem:[%s14926_s1 + $0x3d0] sm:$0xf] }
  0x7b   :  { %15545 = vst [vmem:[#allocation244_spill] sm:$0xff] %v9902_v62  ;;  %15546 = vst [vmem:[#allocation245_spill] sm:$0xff] %v9907_v63  ;;  %v9917_v60 = vld [vmem:[%s14926_s1 + $0x3d4] sm:$0xf]  ;;  %v9922_v61 = vld [vmem:[%s14926_s1 + $0x3d8] sm:$0xf] }
  0x7c   :  { %15547 = vst [vmem:[#allocation246_spill] sm:$0xff] %v9912_v58  ;;  %15548 = vst [vmem:[#allocation247_spill] sm:$0xff] %v9917_v60  ;;  %v9927_v62 = vld [vmem:[%s14926_s1 + $0x3dc] sm:$0xf]  ;;  %v9932_v63 = vld [vmem:[%s14926_s1 + $0x3e0] sm:$0xf] }
  0x7d   :  { %15549 = vst [vmem:[#allocation248_spill] sm:$0xff] %v9922_v61  ;;  %15550 = vst [vmem:[#allocation249_spill] sm:$0xff] %v9927_v62  ;;  %v9937_v58 = vld [vmem:[%s14926_s1 + $0x3e4] sm:$0xf]  ;;  %v9942_v60 = vld [vmem:[%s14926_s1 + $0x3e8] sm:$0xf] }
  0x7e   :  { %15551 = vst [vmem:[#allocation250_spill] sm:$0xff] %v9932_v63  ;;  %15552 = vst [vmem:[#allocation251_spill] sm:$0xff] %v9937_v58  ;;  %v9947_v61 = vld [vmem:[%s14926_s1 + $0x3ec] sm:$0xf]  ;;  %v9952_v62 = vld [vmem:[%s14926_s1 + $0x3f0] sm:$0xf] }
  0x7f   :  { %15553 = vst [vmem:[#allocation252_spill] sm:$0xff] %v9942_v60  ;;  %15554 = vst [vmem:[#allocation253_spill] sm:$0xff] %v9947_v61  ;;  %v9957_v63 = vld [vmem:[%s14926_s1 + $0x3f4] sm:$0xf]  ;;  %v9962_v58 = vld [vmem:[%s14926_s1 + $0x3f8] sm:$0xf] }
  0x80   :  { %15555 = vst [vmem:[#allocation254_spill] sm:$0xff] %v9952_v62  ;;  %15556 = vst [vmem:[#allocation255_spill] sm:$0xff] %v9957_v63  ;;  %v9967_v60 = vld [vmem:[%s14926_s1 + $0x3fc] sm:$0xf]  ;;  %v9972_v61 = vld [vmem:[%s14928_s2] sm:$0xff]  ;;  %s11969_s1 = smov 0  }
  0x81   :  { %15557 = vst [vmem:[#allocation256_spill] sm:$0xff] %v9962_v58  ;;  %15558 = vst [vmem:[#allocation257_spill] sm:$0xff] %v9967_v60  ;;  %v9977_v62 = vld [vmem:[%s14928_s2 + $0x8] sm:$0xff]  ;;  %v9982_v63 = vld [vmem:[%s14928_s2 + $0x10] sm:$0xff] }
  0x82   :  { %15559 = vst [vmem:[#allocation258_spill] sm:$0xff] %v9972_v61  ;;  %15560 = vst [vmem:[#allocation259_spill] sm:$0xff] %v9977_v62  ;;  %v9987_v58 = vld [vmem:[%s14928_s2 + $0x18] sm:$0xff]  ;;  %v9992_v60 = vld [vmem:[%s14928_s2 + $0x20] sm:$0xff] }
  0x83   :  { %15561 = vst [vmem:[#allocation260_spill] sm:$0xff] %v9982_v63  ;;  %15562 = vst [vmem:[#allocation261_spill] sm:$0xff] %v9987_v58  ;;  %v9997_v59 = vld [vmem:[%s14928_s2 + $0x28] sm:$0xff]  ;;  %v10002_v56 = vld [vmem:[%s14928_s2 + $0x30] sm:$0xff] }
  0x84   :  { %15563 = vst [vmem:[#allocation262_spill] sm:$0xff] %v9992_v60  ;;  %15564 = vst [vmem:[#allocation263_spill] sm:$0xff] %v9997_v59  ;;  %v10007_v57 = vld [vmem:[%s14928_s2 + $0x38] sm:$0xff]  ;;  %v10012_v54 = vld [vmem:[%s14928_s2 + $0x40] sm:$0xff] }
  0x85   :  { %15565 = vst [vmem:[#allocation264_spill] sm:$0xff] %v10002_v56  ;;  %15566 = vst [vmem:[#allocation265_spill] sm:$0xff] %v10007_v57  ;;  %v10017_v55 = vld [vmem:[%s14928_s2 + $0x48] sm:$0xff]  ;;  %v10022_v52 = vld [vmem:[%s14928_s2 + $0x50] sm:$0xff] }
  0x86   :  { %15567 = vst [vmem:[#allocation266_spill] sm:$0xff] %v10012_v54  ;;  %15568 = vst [vmem:[#allocation267_spill] sm:$0xff] %v10017_v55  ;;  %v10027_v53 = vld [vmem:[%s14928_s2 + $0x58] sm:$0xff]  ;;  %v10032_v50 = vld [vmem:[%s14928_s2 + $0x60] sm:$0xff] }
  0x87   :  { %15569 = vst [vmem:[#allocation268_spill] sm:$0xff] %v10022_v52  ;;  %15570 = vst [vmem:[#allocation269_spill] sm:$0xff] %v10027_v53  ;;  %v10037_v51 = vld [vmem:[%s14928_s2 + $0x68] sm:$0xff]  ;;  %v10042_v48 = vld [vmem:[%s14928_s2 + $0x70] sm:$0xff] }
  0x88   :  { %15571 = vst [vmem:[#allocation270_spill] sm:$0xff] %v10032_v50  ;;  %15572 = vst [vmem:[#allocation271_spill] sm:$0xff] %v10037_v51  ;;  %v10047_v49 = vld [vmem:[%s14928_s2 + $0x78] sm:$0xff]  ;;  %v10052_v46 = vld [vmem:[%s14928_s2 + $0x80] sm:$0xff] }
  0x89   :  { %15573 = vst [vmem:[#allocation272_spill] sm:$0xff] %v10042_v48  ;;  %15574 = vst [vmem:[#allocation273_spill] sm:$0xff] %v10047_v49  ;;  %v10057_v47 = vld [vmem:[%s14928_s2 + $0x88] sm:$0xff]  ;;  %v10062_v44 = vld [vmem:[%s14928_s2 + $0x90] sm:$0xff] }
  0x8a   :  { %15575 = vst [vmem:[#allocation274_spill] sm:$0xff] %v10052_v46  ;;  %15576 = vst [vmem:[#allocation275_spill] sm:$0xff] %v10057_v47  ;;  %v10067_v45 = vld [vmem:[%s14928_s2 + $0x98] sm:$0xff]  ;;  %v10072_v42 = vld [vmem:[%s14928_s2 + $0xa0] sm:$0xff] }
  0x8b   :  { %15577 = vst [vmem:[#allocation276_spill] sm:$0xff] %v10062_v44  ;;  %15578 = vst [vmem:[#allocation277_spill] sm:$0xff] %v10067_v45  ;;  %v10077_v43 = vld [vmem:[%s14928_s2 + $0xa8] sm:$0xff]  ;;  %v10082_v40 = vld [vmem:[%s14928_s2 + $0xb0] sm:$0xff] }
  0x8c   :  { %15579 = vst [vmem:[#allocation278_spill] sm:$0xff] %v10072_v42  ;;  %15580 = vst [vmem:[#allocation279_spill] sm:$0xff] %v10077_v43  ;;  %v10087_v41 = vld [vmem:[%s14928_s2 + $0xb8] sm:$0xff]  ;;  %v10092_v38 = vld [vmem:[%s14928_s2 + $0xc0] sm:$0xff] }
  0x8d   :  { %15581 = vst [vmem:[#allocation280_spill] sm:$0xff] %v10082_v40  ;;  %15582 = vst [vmem:[#allocation281_spill] sm:$0xff] %v10087_v41  ;;  %v10097_v39 = vld [vmem:[%s14928_s2 + $0xc8] sm:$0xff]  ;;  %v10102_v36 = vld [vmem:[%s14928_s2 + $0xd0] sm:$0xff] }
  0x8e   :  { %15583 = vst [vmem:[#allocation282_spill] sm:$0xff] %v10092_v38  ;;  %15584 = vst [vmem:[#allocation283_spill] sm:$0xff] %v10097_v39  ;;  %v10107_v37 = vld [vmem:[%s14928_s2 + $0xd8] sm:$0xff]  ;;  %v10112_v34 = vld [vmem:[%s14928_s2 + $0xe0] sm:$0xff] }
  0x8f   :  { %15585 = vst [vmem:[#allocation284_spill] sm:$0xff] %v10102_v36  ;;  %15586 = vst [vmem:[#allocation285_spill] sm:$0xff] %v10107_v37  ;;  %v10117_v35 = vld [vmem:[%s14928_s2 + $0xe8] sm:$0xff]  ;;  %v10122_v32 = vld [vmem:[%s14928_s2 + $0xf0] sm:$0xff] }
  0x90   :  { %15587 = vst [vmem:[#allocation286_spill] sm:$0xff] %v10112_v34  ;;  %15588 = vst [vmem:[#allocation287_spill] sm:$0xff] %v10117_v35  ;;  %v10127_v33 = vld [vmem:[%s14928_s2 + $0xf8] sm:$0xff]  ;;  %v10132_v30 = vld [vmem:[%s14928_s2 + $0x100] sm:$0xff] }
  0x91   :  { %15589 = vst [vmem:[#allocation288_spill] sm:$0xff] %v10122_v32  ;;  %15590 = vst [vmem:[#allocation289_spill] sm:$0xff] %v10127_v33  ;;  %v10137_v31 = vld [vmem:[%s14928_s2 + $0x108] sm:$0xff]  ;;  %v10142_v28 = vld [vmem:[%s14928_s2 + $0x110] sm:$0xff] }
  0x92   :  { %15591 = vst [vmem:[#allocation290_spill] sm:$0xff] %v10132_v30  ;;  %15592 = vst [vmem:[#allocation291_spill] sm:$0xff] %v10137_v31  ;;  %v10147_v29 = vld [vmem:[%s14928_s2 + $0x118] sm:$0xff]  ;;  %v10152_v26 = vld [vmem:[%s14928_s2 + $0x120] sm:$0xff] }
  0x93   :  { %15593 = vst [vmem:[#allocation292_spill] sm:$0xff] %v10142_v28  ;;  %15594 = vst [vmem:[#allocation293_spill] sm:$0xff] %v10147_v29  ;;  %v10157_v27 = vld [vmem:[%s14928_s2 + $0x128] sm:$0xff]  ;;  %v10162_v24 = vld [vmem:[%s14928_s2 + $0x130] sm:$0xff] }
  0x94   :  { %15595 = vst [vmem:[#allocation294_spill] sm:$0xff] %v10152_v26  ;;  %15596 = vst [vmem:[#allocation295_spill] sm:$0xff] %v10157_v27  ;;  %v10167_v25 = vld [vmem:[%s14928_s2 + $0x138] sm:$0xff]  ;;  %v10172_v22 = vld [vmem:[%s14928_s2 + $0x140] sm:$0xff] }
  0x95   :  { %15597 = vst [vmem:[#allocation296_spill] sm:$0xff] %v10162_v24  ;;  %15598 = vst [vmem:[#allocation297_spill] sm:$0xff] %v10167_v25  ;;  %v10177_v23 = vld [vmem:[%s14928_s2 + $0x148] sm:$0xff]  ;;  %v10182_v20 = vld [vmem:[%s14928_s2 + $0x150] sm:$0xff] }
  0x96   :  { %15599 = vst [vmem:[#allocation298_spill] sm:$0xff] %v10172_v22  ;;  %15600 = vst [vmem:[#allocation299_spill] sm:$0xff] %v10177_v23  ;;  %v10187_v21 = vld [vmem:[%s14928_s2 + $0x158] sm:$0xff]  ;;  %v10192_v18 = vld [vmem:[%s14928_s2 + $0x160] sm:$0xff] }
  0x97   :  { %15601 = vst [vmem:[#allocation300_spill] sm:$0xff] %v10182_v20  ;;  %15602 = vst [vmem:[#allocation301_spill] sm:$0xff] %v10187_v21  ;;  %v10197_v22 = vld [vmem:[%s14928_s2 + $0x168] sm:$0xff]  ;;  %v10202_v19 = vld [vmem:[%s14928_s2 + $0x170] sm:$0xff] }
  0x98   :  { %15603 = vst [vmem:[#allocation302_spill] sm:$0xff] %v10192_v18  ;;  %15604 = vst [vmem:[#allocation303_spill] sm:$0xff] %v10197_v22  ;;  %v10207_v20 = vld [vmem:[%s14928_s2 + $0x178] sm:$0xff]  ;;  %v10212_v21 = vld [vmem:[%s14928_s2 + $0x180] sm:$0xff] }
  0x99   :  { %15605 = vst [vmem:[#allocation304_spill] sm:$0xff] %v10202_v19  ;;  %15606 = vst [vmem:[#allocation305_spill] sm:$0xff] %v10207_v20  ;;  %v10217_v18 = vld [vmem:[%s14928_s2 + $0x188] sm:$0xff]  ;;  %v10222_v22 = vld [vmem:[%s14928_s2 + $0x190] sm:$0xff] }
  0x9a   :  { %15607 = vst [vmem:[#allocation306_spill] sm:$0xff] %v10212_v21  ;;  %15608 = vst [vmem:[#allocation307_spill] sm:$0xff] %v10217_v18  ;;  %v10227_v19 = vld [vmem:[%s14928_s2 + $0x198] sm:$0xff]  ;;  %v10232_v20 = vld [vmem:[%s14928_s2 + $0x1a0] sm:$0xff] }
  0x9b   :  { %15609 = vst [vmem:[#allocation308_spill] sm:$0xff] %v10222_v22  ;;  %15610 = vst [vmem:[#allocation309_spill] sm:$0xff] %v10227_v19  ;;  %v10237_v21 = vld [vmem:[%s14928_s2 + $0x1a8] sm:$0xff]  ;;  %v10242_v18 = vld [vmem:[%s14928_s2 + $0x1b0] sm:$0xff] }
  0x9c   :  { %15611 = vst [vmem:[#allocation310_spill] sm:$0xff] %v10232_v20  ;;  %15612 = vst [vmem:[#allocation311_spill] sm:$0xff] %v10237_v21  ;;  %v10247_v22 = vld [vmem:[%s14928_s2 + $0x1b8] sm:$0xff]  ;;  %v10252_v19 = vld [vmem:[%s14928_s2 + $0x1c0] sm:$0xff] }
  0x9d   :  { %15613 = vst [vmem:[#allocation312_spill] sm:$0xff] %v10242_v18  ;;  %15614 = vst [vmem:[#allocation313_spill] sm:$0xff] %v10247_v22  ;;  %v10257_v20 = vld [vmem:[%s14928_s2 + $0x1c8] sm:$0xff]  ;;  %v10262_v21 = vld [vmem:[%s14928_s2 + $0x1d0] sm:$0xff] }
  0x9e   :  { %15615 = vst [vmem:[#allocation314_spill] sm:$0xff] %v10252_v19  ;;  %15616 = vst [vmem:[#allocation315_spill] sm:$0xff] %v10257_v20  ;;  %v10267_v18 = vld [vmem:[%s14928_s2 + $0x1d8] sm:$0xff]  ;;  %v10272_v22 = vld [vmem:[%s14928_s2 + $0x1e0] sm:$0xff] }
  0x9f   :  { %15617 = vst [vmem:[#allocation316_spill] sm:$0xff] %v10262_v21  ;;  %15618 = vst [vmem:[#allocation317_spill] sm:$0xff] %v10267_v18  ;;  %v10277_v19 = vld [vmem:[%s14928_s2 + $0x1e8] sm:$0xff]  ;;  %v10282_v20 = vld [vmem:[%s14928_s2 + $0x1f0] sm:$0xff] }
  0xa0   :  { %15619 = vst [vmem:[#allocation318_spill] sm:$0xff] %v10272_v22  ;;  %15620 = vst [vmem:[#allocation319_spill] sm:$0xff] %v10277_v19  ;;  %v10287_v21 = vld [vmem:[%s14928_s2 + $0x1f8] sm:$0xff]  ;;  %v10292_v18 = vld [vmem:[%s14928_s2 + $0x200] sm:$0xff] }
  0xa1   :  { %15621 = vst [vmem:[#allocation320_spill] sm:$0xff] %v10282_v20  ;;  %15622 = vst [vmem:[#allocation321_spill] sm:$0xff] %v10287_v21  ;;  %v10297_v22 = vld [vmem:[%s14928_s2 + $0x208] sm:$0xff]  ;;  %v10302_v19 = vld [vmem:[%s14928_s2 + $0x210] sm:$0xff] }
  0xa2   :  { %15623 = vst [vmem:[#allocation322_spill] sm:$0xff] %v10292_v18  ;;  %15624 = vst [vmem:[#allocation323_spill] sm:$0xff] %v10297_v22  ;;  %v10307_v20 = vld [vmem:[%s14928_s2 + $0x218] sm:$0xff]  ;;  %v10312_v21 = vld [vmem:[%s14928_s2 + $0x220] sm:$0xff] }
  0xa3   :  { %15625 = vst [vmem:[#allocation324_spill] sm:$0xff] %v10302_v19  ;;  %15626 = vst [vmem:[#allocation325_spill] sm:$0xff] %v10307_v20  ;;  %v10317_v18 = vld [vmem:[%s14928_s2 + $0x228] sm:$0xff]  ;;  %v10322_v22 = vld [vmem:[%s14928_s2 + $0x230] sm:$0xff] }
  0xa4   :  { %15627 = vst [vmem:[#allocation326_spill] sm:$0xff] %v10312_v21  ;;  %15628 = vst [vmem:[#allocation327_spill] sm:$0xff] %v10317_v18  ;;  %v10327_v19 = vld [vmem:[%s14928_s2 + $0x238] sm:$0xff]  ;;  %v10332_v20 = vld [vmem:[%s14928_s2 + $0x240] sm:$0xff] }
  0xa5   :  { %15629 = vst [vmem:[#allocation328_spill] sm:$0xff] %v10322_v22  ;;  %15630 = vst [vmem:[#allocation329_spill] sm:$0xff] %v10327_v19  ;;  %v10337_v21 = vld [vmem:[%s14928_s2 + $0x248] sm:$0xff]  ;;  %v10342_v18 = vld [vmem:[%s14928_s2 + $0x250] sm:$0xff] }
  0xa6   :  { %15631 = vst [vmem:[#allocation330_spill] sm:$0xff] %v10332_v20  ;;  %15632 = vst [vmem:[#allocation331_spill] sm:$0xff] %v10337_v21  ;;  %v10347_v22 = vld [vmem:[%s14928_s2 + $0x258] sm:$0xff]  ;;  %v10352_v19 = vld [vmem:[%s14928_s2 + $0x260] sm:$0xff] }
  0xa7   :  { %15633 = vst [vmem:[#allocation332_spill] sm:$0xff] %v10342_v18  ;;  %15634 = vst [vmem:[#allocation333_spill] sm:$0xff] %v10347_v22  ;;  %v10357_v20 = vld [vmem:[%s14928_s2 + $0x268] sm:$0xff]  ;;  %v10362_v21 = vld [vmem:[%s14928_s2 + $0x270] sm:$0xff] }
  0xa8   :  { %15635 = vst [vmem:[#allocation334_spill] sm:$0xff] %v10352_v19  ;;  %15636 = vst [vmem:[#allocation335_spill] sm:$0xff] %v10357_v20  ;;  %v10367_v18 = vld [vmem:[%s14928_s2 + $0x278] sm:$0xff]  ;;  %v10372_v22 = vld [vmem:[%s14928_s2 + $0x280] sm:$0xff] }
  0xa9   :  { %15637 = vst [vmem:[#allocation336_spill] sm:$0xff] %v10362_v21  ;;  %15638 = vst [vmem:[#allocation337_spill] sm:$0xff] %v10367_v18  ;;  %v10377_v19 = vld [vmem:[%s14928_s2 + $0x288] sm:$0xff]  ;;  %v10382_v20 = vld [vmem:[%s14928_s2 + $0x290] sm:$0xff] }
  0xaa   :  { %15639 = vst [vmem:[#allocation338_spill] sm:$0xff] %v10372_v22  ;;  %15640 = vst [vmem:[#allocation339_spill] sm:$0xff] %v10377_v19  ;;  %v10387_v21 = vld [vmem:[%s14928_s2 + $0x298] sm:$0xff]  ;;  %v10392_v18 = vld [vmem:[%s14928_s2 + $0x2a0] sm:$0xff] }
  0xab   :  { %15641 = vst [vmem:[#allocation340_spill] sm:$0xff] %v10382_v20  ;;  %15642 = vst [vmem:[#allocation341_spill] sm:$0xff] %v10387_v21  ;;  %v10397_v22 = vld [vmem:[%s14928_s2 + $0x2a8] sm:$0xff]  ;;  %v10402_v19 = vld [vmem:[%s14928_s2 + $0x2b0] sm:$0xff] }
  0xac   :  { %15643 = vst [vmem:[#allocation342_spill] sm:$0xff] %v10392_v18  ;;  %15644 = vst [vmem:[#allocation343_spill] sm:$0xff] %v10397_v22  ;;  %v10407_v20 = vld [vmem:[%s14928_s2 + $0x2b8] sm:$0xff]  ;;  %v10412_v21 = vld [vmem:[%s14928_s2 + $0x2c0] sm:$0xff] }
  0xad   :  { %15645 = vst [vmem:[#allocation344_spill] sm:$0xff] %v10402_v19  ;;  %15646 = vst [vmem:[#allocation345_spill] sm:$0xff] %v10407_v20  ;;  %v10417_v18 = vld [vmem:[%s14928_s2 + $0x2c8] sm:$0xff]  ;;  %v10422_v22 = vld [vmem:[%s14928_s2 + $0x2d0] sm:$0xff] }
  0xae   :  { %15647 = vst [vmem:[#allocation346_spill] sm:$0xff] %v10412_v21  ;;  %15648 = vst [vmem:[#allocation347_spill] sm:$0xff] %v10417_v18  ;;  %v10427_v19 = vld [vmem:[%s14928_s2 + $0x2d8] sm:$0xff]  ;;  %v10432_v20 = vld [vmem:[%s14928_s2 + $0x2e0] sm:$0xff] }
  0xaf   :  { %15649 = vst [vmem:[#allocation348_spill] sm:$0xff] %v10422_v22  ;;  %15650 = vst [vmem:[#allocation349_spill] sm:$0xff] %v10427_v19  ;;  %v10437_v21 = vld [vmem:[%s14928_s2 + $0x2e8] sm:$0xff]  ;;  %v10442_v18 = vld [vmem:[%s14928_s2 + $0x2f0] sm:$0xff] }
  0xb0   :  { %15651 = vst [vmem:[#allocation350_spill] sm:$0xff] %v10432_v20  ;;  %15652 = vst [vmem:[#allocation351_spill] sm:$0xff] %v10437_v21  ;;  %v10447_v22 = vld [vmem:[%s14928_s2 + $0x2f8] sm:$0xff]  ;;  %v10452_v19 = vld [vmem:[%s14928_s2 + $0x300] sm:$0xff] }
  0xb1   :  { %15653 = vst [vmem:[#allocation352_spill] sm:$0xff] %v10442_v18  ;;  %15654 = vst [vmem:[#allocation353_spill] sm:$0xff] %v10447_v22  ;;  %v10457_v20 = vld [vmem:[%s14928_s2 + $0x308] sm:$0xff]  ;;  %v10462_v21 = vld [vmem:[%s14928_s2 + $0x310] sm:$0xff] }
  0xb2   :  { %15655 = vst [vmem:[#allocation354_spill] sm:$0xff] %v10452_v19  ;;  %15656 = vst [vmem:[#allocation355_spill] sm:$0xff] %v10457_v20  ;;  %v10467_v18 = vld [vmem:[%s14928_s2 + $0x318] sm:$0xff]  ;;  %v10472_v22 = vld [vmem:[%s14928_s2 + $0x320] sm:$0xff] }
  0xb3   :  { %15657 = vst [vmem:[#allocation356_spill] sm:$0xff] %v10462_v21  ;;  %15658 = vst [vmem:[#allocation357_spill] sm:$0xff] %v10467_v18  ;;  %v10477_v19 = vld [vmem:[%s14928_s2 + $0x328] sm:$0xff]  ;;  %v10482_v20 = vld [vmem:[%s14928_s2 + $0x330] sm:$0xff] }
  0xb4   :  { %15659 = vst [vmem:[#allocation358_spill] sm:$0xff] %v10472_v22  ;;  %15660 = vst [vmem:[#allocation359_spill] sm:$0xff] %v10477_v19  ;;  %v10487_v21 = vld [vmem:[%s14928_s2 + $0x338] sm:$0xff]  ;;  %v10492_v18 = vld [vmem:[%s14928_s2 + $0x340] sm:$0xff] }
  0xb5   :  { %15661 = vst [vmem:[#allocation360_spill] sm:$0xff] %v10482_v20  ;;  %15662 = vst [vmem:[#allocation361_spill] sm:$0xff] %v10487_v21  ;;  %v10497_v22 = vld [vmem:[%s14928_s2 + $0x348] sm:$0xff]  ;;  %v10502_v19 = vld [vmem:[%s14928_s2 + $0x350] sm:$0xff] }
  0xb6   :  { %15663 = vst [vmem:[#allocation362_spill] sm:$0xff] %v10492_v18  ;;  %15664 = vst [vmem:[#allocation363_spill] sm:$0xff] %v10497_v22  ;;  %v10507_v20 = vld [vmem:[%s14928_s2 + $0x358] sm:$0xff]  ;;  %v10512_v21 = vld [vmem:[%s14928_s2 + $0x360] sm:$0xff] }
  0xb7   :  { %15665 = vst [vmem:[#allocation364_spill] sm:$0xff] %v10502_v19  ;;  %15666 = vst [vmem:[#allocation365_spill] sm:$0xff] %v10507_v20  ;;  %v10517_v18 = vld [vmem:[%s14928_s2 + $0x368] sm:$0xff]  ;;  %v10522_v22 = vld [vmem:[%s14928_s2 + $0x370] sm:$0xff] }
  0xb8   :  { %15667 = vst [vmem:[#allocation366_spill] sm:$0xff] %v10512_v21  ;;  %15668 = vst [vmem:[#allocation367_spill] sm:$0xff] %v10517_v18  ;;  %v10527_v19 = vld [vmem:[%s14928_s2 + $0x378] sm:$0xff]  ;;  %v10532_v20 = vld [vmem:[%s14928_s2 + $0x380] sm:$0xff] }
  0xb9   :  { %15669 = vst [vmem:[#allocation368_spill] sm:$0xff] %v10522_v22  ;;  %15670 = vst [vmem:[#allocation369_spill] sm:$0xff] %v10527_v19  ;;  %v10537_v21 = vld [vmem:[%s14928_s2 + $0x388] sm:$0xff]  ;;  %v10542_v18 = vld [vmem:[%s14928_s2 + $0x390] sm:$0xff] }
  0xba   :  { %15671 = vst [vmem:[#allocation370_spill] sm:$0xff] %v10532_v20  ;;  %15672 = vst [vmem:[#allocation371_spill] sm:$0xff] %v10537_v21  ;;  %v10547_v22 = vld [vmem:[%s14928_s2 + $0x398] sm:$0xff]  ;;  %v10552_v19 = vld [vmem:[%s14928_s2 + $0x3a0] sm:$0xff] }
  0xbb   :  { %15673 = vst [vmem:[#allocation372_spill] sm:$0xff] %v10542_v18  ;;  %15674 = vst [vmem:[#allocation373_spill] sm:$0xff] %v10547_v22  ;;  %v10557_v20 = vld [vmem:[%s14928_s2 + $0x3a8] sm:$0xff]  ;;  %v10562_v21 = vld [vmem:[%s14928_s2 + $0x3b0] sm:$0xff] }
  0xbc   :  { %15675 = vst [vmem:[#allocation374_spill] sm:$0xff] %v10552_v19  ;;  %15676 = vst [vmem:[#allocation375_spill] sm:$0xff] %v10557_v20  ;;  %v10567_v18 = vld [vmem:[%s14928_s2 + $0x3b8] sm:$0xff]  ;;  %v10572_v22 = vld [vmem:[%s14928_s2 + $0x3c0] sm:$0xff] }
  0xbd   :  { %15677 = vst [vmem:[#allocation376_spill] sm:$0xff] %v10562_v21  ;;  %15678 = vst [vmem:[#allocation377_spill] sm:$0xff] %v10567_v18  ;;  %v10577_v19 = vld [vmem:[%s14928_s2 + $0x3c8] sm:$0xff]  ;;  %v10582_v20 = vld [vmem:[%s14928_s2 + $0x3d0] sm:$0xff] }
  0xbe   :  { %15679 = vst [vmem:[#allocation378_spill] sm:$0xff] %v10572_v22  ;;  %15680 = vst [vmem:[#allocation379_spill] sm:$0xff] %v10577_v19  ;;  %v10587_v21 = vld [vmem:[%s14928_s2 + $0x3d8] sm:$0xff]  ;;  %v10592_v18 = vld [vmem:[%s14928_s2 + $0x3e0] sm:$0xff] }
  0xbf   :  { %15681 = vst [vmem:[#allocation380_spill] sm:$0xff] %v10582_v20  ;;  %15682 = vst [vmem:[#allocation381_spill] sm:$0xff] %v10587_v21  ;;  %v10597_v22 = vld [vmem:[%s14928_s2 + $0x3e8] sm:$0xff]  ;;  %v10602_v19 = vld [vmem:[%s14928_s2 + $0x3f0] sm:$0xff] }
  0xc0   :  { %15683 = vst [vmem:[#allocation382_spill] sm:$0xff] %v10592_v18  ;;  %15684 = vst [vmem:[#allocation383_spill] sm:$0xff] %v10597_v22  ;;  %v10607_v20 = vld [vmem:[%s14928_s2 + $0x3f8] sm:$0xff]  ;;  %v10612_v21 = vld [vmem:[%s14928_s2 + $0x400] sm:$0xff] }
  0xc1   :  { %15685 = vst [vmem:[#allocation384_spill] sm:$0xff] %v10602_v19  ;;  %15686 = vst [vmem:[#allocation385_spill] sm:$0xff] %v10607_v20  ;;  %v10617_v18 = vld [vmem:[%s14928_s2 + $0x408] sm:$0xff]  ;;  %v10622_v22 = vld [vmem:[%s14928_s2 + $0x410] sm:$0xff] }
  0xc2   :  { %15687 = vst [vmem:[#allocation386_spill] sm:$0xff] %v10612_v21  ;;  %15688 = vst [vmem:[#allocation387_spill] sm:$0xff] %v10617_v18  ;;  %v10627_v19 = vld [vmem:[%s14928_s2 + $0x418] sm:$0xff]  ;;  %v10632_v20 = vld [vmem:[%s14928_s2 + $0x420] sm:$0xff] }
  0xc3   :  { %15689 = vst [vmem:[#allocation388_spill] sm:$0xff] %v10622_v22  ;;  %15690 = vst [vmem:[#allocation389_spill] sm:$0xff] %v10627_v19  ;;  %v10637_v21 = vld [vmem:[%s14928_s2 + $0x428] sm:$0xff]  ;;  %v10642_v18 = vld [vmem:[%s14928_s2 + $0x430] sm:$0xff] }
  0xc4   :  { %15691 = vst [vmem:[#allocation390_spill] sm:$0xff] %v10632_v20  ;;  %15692 = vst [vmem:[#allocation391_spill] sm:$0xff] %v10637_v21  ;;  %v10647_v22 = vld [vmem:[%s14928_s2 + $0x438] sm:$0xff]  ;;  %v10652_v19 = vld [vmem:[%s14928_s2 + $0x440] sm:$0xff] }
  0xc5   :  { %15693 = vst [vmem:[#allocation392_spill] sm:$0xff] %v10642_v18  ;;  %15694 = vst [vmem:[#allocation393_spill] sm:$0xff] %v10647_v22  ;;  %v10657_v20 = vld [vmem:[%s14928_s2 + $0x448] sm:$0xff]  ;;  %v10662_v21 = vld [vmem:[%s14928_s2 + $0x450] sm:$0xff] }
  0xc6   :  { %15695 = vst [vmem:[#allocation394_spill] sm:$0xff] %v10652_v19  ;;  %15696 = vst [vmem:[#allocation395_spill] sm:$0xff] %v10657_v20  ;;  %v10667_v18 = vld [vmem:[%s14928_s2 + $0x458] sm:$0xff]  ;;  %v10672_v22 = vld [vmem:[%s14928_s2 + $0x460] sm:$0xff] }
  0xc7   :  { %15697 = vst [vmem:[#allocation396_spill] sm:$0xff] %v10662_v21  ;;  %15698 = vst [vmem:[#allocation397_spill] sm:$0xff] %v10667_v18  ;;  %v10677_v19 = vld [vmem:[%s14928_s2 + $0x468] sm:$0xff]  ;;  %v10682_v20 = vld [vmem:[%s14928_s2 + $0x470] sm:$0xff] }
  0xc8   :  { %15699 = vst [vmem:[#allocation398_spill] sm:$0xff] %v10672_v22  ;;  %15700 = vst [vmem:[#allocation399_spill] sm:$0xff] %v10677_v19  ;;  %v10687_v21 = vld [vmem:[%s14928_s2 + $0x478] sm:$0xff]  ;;  %v10692_v18 = vld [vmem:[%s14928_s2 + $0x480] sm:$0xff] }
  0xc9   :  { %15701 = vst [vmem:[#allocation400_spill] sm:$0xff] %v10682_v20  ;;  %15702 = vst [vmem:[#allocation401_spill] sm:$0xff] %v10687_v21  ;;  %v10697_v22 = vld [vmem:[%s14928_s2 + $0x488] sm:$0xff]  ;;  %v10702_v19 = vld [vmem:[%s14928_s2 + $0x490] sm:$0xff] }
  0xca   :  { %15703 = vst [vmem:[#allocation402_spill] sm:$0xff] %v10692_v18  ;;  %15704 = vst [vmem:[#allocation403_spill] sm:$0xff] %v10697_v22  ;;  %v10707_v20 = vld [vmem:[%s14928_s2 + $0x498] sm:$0xff]  ;;  %v10712_v21 = vld [vmem:[%s14928_s2 + $0x4a0] sm:$0xff] }
  0xcb   :  { %15705 = vst [vmem:[#allocation404_spill] sm:$0xff] %v10702_v19  ;;  %15706 = vst [vmem:[#allocation405_spill] sm:$0xff] %v10707_v20  ;;  %v10717_v18 = vld [vmem:[%s14928_s2 + $0x4a8] sm:$0xff]  ;;  %v10722_v22 = vld [vmem:[%s14928_s2 + $0x4b0] sm:$0xff] }
  0xcc   :  { %15707 = vst [vmem:[#allocation406_spill] sm:$0xff] %v10712_v21  ;;  %15708 = vst [vmem:[#allocation407_spill] sm:$0xff] %v10717_v18  ;;  %v10727_v19 = vld [vmem:[%s14928_s2 + $0x4b8] sm:$0xff]  ;;  %v10732_v20 = vld [vmem:[%s14928_s2 + $0x4c0] sm:$0xff] }
  0xcd   :  { %15709 = vst [vmem:[#allocation408_spill] sm:$0xff] %v10722_v22  ;;  %15710 = vst [vmem:[#allocation409_spill] sm:$0xff] %v10727_v19  ;;  %v10737_v21 = vld [vmem:[%s14928_s2 + $0x4c8] sm:$0xff]  ;;  %v10742_v18 = vld [vmem:[%s14928_s2 + $0x4d0] sm:$0xff] }
  0xce   :  { %15711 = vst [vmem:[#allocation410_spill] sm:$0xff] %v10732_v20  ;;  %15712 = vst [vmem:[#allocation411_spill] sm:$0xff] %v10737_v21  ;;  %v10747_v22 = vld [vmem:[%s14928_s2 + $0x4d8] sm:$0xff]  ;;  %v10752_v19 = vld [vmem:[%s14928_s2 + $0x4e0] sm:$0xff] }
  0xcf   :  { %15713 = vst [vmem:[#allocation412_spill] sm:$0xff] %v10742_v18  ;;  %15714 = vst [vmem:[#allocation413_spill] sm:$0xff] %v10747_v22  ;;  %v10757_v20 = vld [vmem:[%s14928_s2 + $0x4e8] sm:$0xff]  ;;  %v10762_v21 = vld [vmem:[%s14928_s2 + $0x4f0] sm:$0xff] }
  0xd0   :  { %15715 = vst [vmem:[#allocation414_spill] sm:$0xff] %v10752_v19  ;;  %15716 = vst [vmem:[#allocation415_spill] sm:$0xff] %v10757_v20  ;;  %v10767_v18 = vld [vmem:[%s14928_s2 + $0x4f8] sm:$0xff]  ;;  %v10772_v22 = vld [vmem:[%s14928_s2 + $0x500] sm:$0xff] }
  0xd1   :  { %15717 = vst [vmem:[#allocation416_spill] sm:$0xff] %v10762_v21  ;;  %15718 = vst [vmem:[#allocation417_spill] sm:$0xff] %v10767_v18  ;;  %v10777_v19 = vld [vmem:[%s14928_s2 + $0x508] sm:$0xff]  ;;  %v10782_v20 = vld [vmem:[%s14928_s2 + $0x510] sm:$0xff] }
  0xd2   :  { %15719 = vst [vmem:[#allocation418_spill] sm:$0xff] %v10772_v22  ;;  %15720 = vst [vmem:[#allocation419_spill] sm:$0xff] %v10777_v19  ;;  %v10787_v21 = vld [vmem:[%s14928_s2 + $0x518] sm:$0xff]  ;;  %v10792_v18 = vld [vmem:[%s14928_s2 + $0x520] sm:$0xff] }
  0xd3   :  { %15721 = vst [vmem:[#allocation420_spill] sm:$0xff] %v10782_v20  ;;  %15722 = vst [vmem:[#allocation421_spill] sm:$0xff] %v10787_v21  ;;  %v10797_v22 = vld [vmem:[%s14928_s2 + $0x528] sm:$0xff]  ;;  %v10802_v19 = vld [vmem:[%s14928_s2 + $0x530] sm:$0xff] }
  0xd4   :  { %15723 = vst [vmem:[#allocation422_spill] sm:$0xff] %v10792_v18  ;;  %15724 = vst [vmem:[#allocation423_spill] sm:$0xff] %v10797_v22  ;;  %v10807_v20 = vld [vmem:[%s14928_s2 + $0x538] sm:$0xff]  ;;  %v10812_v21 = vld [vmem:[%s14928_s2 + $0x540] sm:$0xff] }
  0xd5   :  { %15725 = vst [vmem:[#allocation424_spill] sm:$0xff] %v10802_v19  ;;  %15726 = vst [vmem:[#allocation425_spill] sm:$0xff] %v10807_v20  ;;  %v10817_v18 = vld [vmem:[%s14928_s2 + $0x548] sm:$0xff]  ;;  %v10822_v22 = vld [vmem:[%s14928_s2 + $0x550] sm:$0xff] }
  0xd6   :  { %15727 = vst [vmem:[#allocation426_spill] sm:$0xff] %v10812_v21  ;;  %15728 = vst [vmem:[#allocation427_spill] sm:$0xff] %v10817_v18  ;;  %v10827_v19 = vld [vmem:[%s14928_s2 + $0x558] sm:$0xff]  ;;  %v10832_v20 = vld [vmem:[%s14928_s2 + $0x560] sm:$0xff] }
  0xd7   :  { %15729 = vst [vmem:[#allocation428_spill] sm:$0xff] %v10822_v22  ;;  %15730 = vst [vmem:[#allocation429_spill] sm:$0xff] %v10827_v19  ;;  %v10837_v21 = vld [vmem:[%s14928_s2 + $0x568] sm:$0xff]  ;;  %v10842_v18 = vld [vmem:[%s14928_s2 + $0x570] sm:$0xff] }
  0xd8   :  { %15731 = vst [vmem:[#allocation430_spill] sm:$0xff] %v10832_v20  ;;  %15732 = vst [vmem:[#allocation431_spill] sm:$0xff] %v10837_v21  ;;  %v10847_v22 = vld [vmem:[%s14928_s2 + $0x578] sm:$0xff]  ;;  %v10852_v19 = vld [vmem:[%s14928_s2 + $0x580] sm:$0xff] }
  0xd9   :  { %15733 = vst [vmem:[#allocation432_spill] sm:$0xff] %v10842_v18  ;;  %15734 = vst [vmem:[#allocation433_spill] sm:$0xff] %v10847_v22  ;;  %v10857_v20 = vld [vmem:[%s14928_s2 + $0x588] sm:$0xff]  ;;  %v10862_v21 = vld [vmem:[%s14928_s2 + $0x590] sm:$0xff] }
  0xda   :  { %15735 = vst [vmem:[#allocation434_spill] sm:$0xff] %v10852_v19  ;;  %15736 = vst [vmem:[#allocation435_spill] sm:$0xff] %v10857_v20  ;;  %v10867_v18 = vld [vmem:[%s14928_s2 + $0x598] sm:$0xff]  ;;  %v10872_v22 = vld [vmem:[%s14928_s2 + $0x5a0] sm:$0xff] }
  0xdb   :  { %15737 = vst [vmem:[#allocation436_spill] sm:$0xff] %v10862_v21  ;;  %15738 = vst [vmem:[#allocation437_spill] sm:$0xff] %v10867_v18  ;;  %v10877_v19 = vld [vmem:[%s14928_s2 + $0x5a8] sm:$0xff]  ;;  %v10882_v20 = vld [vmem:[%s14928_s2 + $0x5b0] sm:$0xff] }
  0xdc   :  { %15739 = vst [vmem:[#allocation438_spill] sm:$0xff] %v10872_v22  ;;  %15740 = vst [vmem:[#allocation439_spill] sm:$0xff] %v10877_v19  ;;  %v10887_v21 = vld [vmem:[%s14928_s2 + $0x5b8] sm:$0xff]  ;;  %v10892_v18 = vld [vmem:[%s14928_s2 + $0x5c0] sm:$0xff] }
  0xdd   :  { %15741 = vst [vmem:[#allocation440_spill] sm:$0xff] %v10882_v20  ;;  %15742 = vst [vmem:[#allocation441_spill] sm:$0xff] %v10887_v21  ;;  %v10897_v22 = vld [vmem:[%s14928_s2 + $0x5c8] sm:$0xff]  ;;  %v10902_v19 = vld [vmem:[%s14928_s2 + $0x5d0] sm:$0xff] }
  0xde   :  { %15743 = vst [vmem:[#allocation442_spill] sm:$0xff] %v10892_v18  ;;  %15744 = vst [vmem:[#allocation443_spill] sm:$0xff] %v10897_v22  ;;  %v10907_v20 = vld [vmem:[%s14928_s2 + $0x5d8] sm:$0xff]  ;;  %v10912_v21 = vld [vmem:[%s14928_s2 + $0x5e0] sm:$0xff] }
  0xdf   :  { %15745 = vst [vmem:[#allocation444_spill] sm:$0xff] %v10902_v19  ;;  %15746 = vst [vmem:[#allocation445_spill] sm:$0xff] %v10907_v20  ;;  %v10917_v18 = vld [vmem:[%s14928_s2 + $0x5e8] sm:$0xff]  ;;  %v10922_v22 = vld [vmem:[%s14928_s2 + $0x5f0] sm:$0xff] }
  0xe0   :  { %15747 = vst [vmem:[#allocation446_spill] sm:$0xff] %v10912_v21  ;;  %15748 = vst [vmem:[#allocation447_spill] sm:$0xff] %v10917_v18  ;;  %v10927_v19 = vld [vmem:[%s14928_s2 + $0x5f8] sm:$0xff]  ;;  %v10932_v20 = vld [vmem:[%s14928_s2 + $0x600] sm:$0xff] }
  0xe1   :  { %15749 = vst [vmem:[#allocation448_spill] sm:$0xff] %v10922_v22  ;;  %15750 = vst [vmem:[#allocation449_spill] sm:$0xff] %v10927_v19  ;;  %v10937_v21 = vld [vmem:[%s14928_s2 + $0x608] sm:$0xff]  ;;  %v10942_v18 = vld [vmem:[%s14928_s2 + $0x610] sm:$0xff] }
  0xe2   :  { %15751 = vst [vmem:[#allocation450_spill] sm:$0xff] %v10932_v20  ;;  %15752 = vst [vmem:[#allocation451_spill] sm:$0xff] %v10937_v21  ;;  %v10947_v22 = vld [vmem:[%s14928_s2 + $0x618] sm:$0xff]  ;;  %v10952_v19 = vld [vmem:[%s14928_s2 + $0x620] sm:$0xff] }
  0xe3   :  { %15753 = vst [vmem:[#allocation452_spill] sm:$0xff] %v10942_v18  ;;  %15754 = vst [vmem:[#allocation453_spill] sm:$0xff] %v10947_v22  ;;  %v10957_v20 = vld [vmem:[%s14928_s2 + $0x628] sm:$0xff]  ;;  %v10962_v21 = vld [vmem:[%s14928_s2 + $0x630] sm:$0xff] }
  0xe4   :  { %15755 = vst [vmem:[#allocation454_spill] sm:$0xff] %v10952_v19  ;;  %15756 = vst [vmem:[#allocation455_spill] sm:$0xff] %v10957_v20  ;;  %v10967_v18 = vld [vmem:[%s14928_s2 + $0x638] sm:$0xff]  ;;  %v10972_v22 = vld [vmem:[%s14928_s2 + $0x640] sm:$0xff] }
  0xe5   :  { %15757 = vst [vmem:[#allocation456_spill] sm:$0xff] %v10962_v21  ;;  %15758 = vst [vmem:[#allocation457_spill] sm:$0xff] %v10967_v18  ;;  %v10977_v19 = vld [vmem:[%s14928_s2 + $0x648] sm:$0xff]  ;;  %v10982_v20 = vld [vmem:[%s14928_s2 + $0x650] sm:$0xff] }
  0xe6   :  { %15759 = vst [vmem:[#allocation458_spill] sm:$0xff] %v10972_v22  ;;  %15760 = vst [vmem:[#allocation459_spill] sm:$0xff] %v10977_v19  ;;  %v10987_v21 = vld [vmem:[%s14928_s2 + $0x658] sm:$0xff]  ;;  %v10992_v18 = vld [vmem:[%s14928_s2 + $0x660] sm:$0xff] }
  0xe7   :  { %15761 = vst [vmem:[#allocation460_spill] sm:$0xff] %v10982_v20  ;;  %15762 = vst [vmem:[#allocation461_spill] sm:$0xff] %v10987_v21  ;;  %v10997_v22 = vld [vmem:[%s14928_s2 + $0x668] sm:$0xff]  ;;  %v11002_v19 = vld [vmem:[%s14928_s2 + $0x670] sm:$0xff] }
  0xe8   :  { %15763 = vst [vmem:[#allocation462_spill] sm:$0xff] %v10992_v18  ;;  %15764 = vst [vmem:[#allocation463_spill] sm:$0xff] %v10997_v22  ;;  %v11007_v20 = vld [vmem:[%s14928_s2 + $0x678] sm:$0xff]  ;;  %v11012_v21 = vld [vmem:[%s14928_s2 + $0x680] sm:$0xff] }
  0xe9   :  { %15765 = vst [vmem:[#allocation464_spill] sm:$0xff] %v11002_v19  ;;  %15766 = vst [vmem:[#allocation465_spill] sm:$0xff] %v11007_v20  ;;  %v11017_v18 = vld [vmem:[%s14928_s2 + $0x688] sm:$0xff]  ;;  %v11022_v22 = vld [vmem:[%s14928_s2 + $0x690] sm:$0xff] }
  0xea   :  { %15767 = vst [vmem:[#allocation466_spill] sm:$0xff] %v11012_v21  ;;  %15768 = vst [vmem:[#allocation467_spill] sm:$0xff] %v11017_v18  ;;  %v11027_v19 = vld [vmem:[%s14928_s2 + $0x698] sm:$0xff]  ;;  %v11032_v20 = vld [vmem:[%s14928_s2 + $0x6a0] sm:$0xff] }
  0xeb   :  { %15769 = vst [vmem:[#allocation468_spill] sm:$0xff] %v11022_v22  ;;  %15770 = vst [vmem:[#allocation469_spill] sm:$0xff] %v11027_v19  ;;  %v11037_v21 = vld [vmem:[%s14928_s2 + $0x6a8] sm:$0xff]  ;;  %v11042_v18 = vld [vmem:[%s14928_s2 + $0x6b0] sm:$0xff] }
  0xec   :  { %15771 = vst [vmem:[#allocation470_spill] sm:$0xff] %v11032_v20  ;;  %15772 = vst [vmem:[#allocation471_spill] sm:$0xff] %v11037_v21  ;;  %v11047_v22 = vld [vmem:[%s14928_s2 + $0x6b8] sm:$0xff]  ;;  %v11052_v19 = vld [vmem:[%s14928_s2 + $0x6c0] sm:$0xff] }
  0xed   :  { %15773 = vst [vmem:[#allocation472_spill] sm:$0xff] %v11042_v18  ;;  %15774 = vst [vmem:[#allocation473_spill] sm:$0xff] %v11047_v22  ;;  %v11057_v20 = vld [vmem:[%s14928_s2 + $0x6c8] sm:$0xff]  ;;  %v11062_v21 = vld [vmem:[%s14928_s2 + $0x6d0] sm:$0xff] }
  0xee   :  { %15775 = vst [vmem:[#allocation474_spill] sm:$0xff] %v11052_v19  ;;  %15776 = vst [vmem:[#allocation475_spill] sm:$0xff] %v11057_v20  ;;  %v11067_v18 = vld [vmem:[%s14928_s2 + $0x6d8] sm:$0xff]  ;;  %v11072_v22 = vld [vmem:[%s14928_s2 + $0x6e0] sm:$0xff] }
  0xef   :  { %15777 = vst [vmem:[#allocation476_spill] sm:$0xff] %v11062_v21  ;;  %15778 = vst [vmem:[#allocation477_spill] sm:$0xff] %v11067_v18  ;;  %v11077_v19 = vld [vmem:[%s14928_s2 + $0x6e8] sm:$0xff]  ;;  %v11082_v20 = vld [vmem:[%s14928_s2 + $0x6f0] sm:$0xff] }
  0xf0   :  { %15779 = vst [vmem:[#allocation478_spill] sm:$0xff] %v11072_v22  ;;  %15780 = vst [vmem:[#allocation479_spill] sm:$0xff] %v11077_v19  ;;  %v11087_v21 = vld [vmem:[%s14928_s2 + $0x6f8] sm:$0xff]  ;;  %v11092_v18 = vld [vmem:[%s14928_s2 + $0x700] sm:$0xff] }
  0xf1   :  { %15781 = vst [vmem:[#allocation480_spill] sm:$0xff] %v11082_v20  ;;  %15782 = vst [vmem:[#allocation481_spill] sm:$0xff] %v11087_v21  ;;  %v11097_v22 = vld [vmem:[%s14928_s2 + $0x708] sm:$0xff]  ;;  %v11102_v19 = vld [vmem:[%s14928_s2 + $0x710] sm:$0xff] }
  0xf2   :  { %15783 = vst [vmem:[#allocation482_spill] sm:$0xff] %v11092_v18  ;;  %15784 = vst [vmem:[#allocation483_spill] sm:$0xff] %v11097_v22  ;;  %v11107_v20 = vld [vmem:[%s14928_s2 + $0x718] sm:$0xff]  ;;  %v11112_v21 = vld [vmem:[%s14928_s2 + $0x720] sm:$0xff] }
  0xf3   :  { %15785 = vst [vmem:[#allocation484_spill] sm:$0xff] %v11102_v19  ;;  %15786 = vst [vmem:[#allocation485_spill] sm:$0xff] %v11107_v20  ;;  %v11117_v18 = vld [vmem:[%s14928_s2 + $0x728] sm:$0xff]  ;;  %v11122_v22 = vld [vmem:[%s14928_s2 + $0x730] sm:$0xff] }
  0xf4   :  { %15787 = vst [vmem:[#allocation486_spill] sm:$0xff] %v11112_v21  ;;  %15788 = vst [vmem:[#allocation487_spill] sm:$0xff] %v11117_v18  ;;  %v11127_v19 = vld [vmem:[%s14928_s2 + $0x738] sm:$0xff]  ;;  %v11132_v20 = vld [vmem:[%s14928_s2 + $0x740] sm:$0xff] }
  0xf5   :  { %15789 = vst [vmem:[#allocation488_spill] sm:$0xff] %v11122_v22  ;;  %15790 = vst [vmem:[#allocation489_spill] sm:$0xff] %v11127_v19  ;;  %v11137_v21 = vld [vmem:[%s14928_s2 + $0x748] sm:$0xff]  ;;  %v11142_v18 = vld [vmem:[%s14928_s2 + $0x750] sm:$0xff] }
  0xf6   :  { %15791 = vst [vmem:[#allocation490_spill] sm:$0xff] %v11132_v20  ;;  %15792 = vst [vmem:[#allocation491_spill] sm:$0xff] %v11137_v21  ;;  %v11147_v22 = vld [vmem:[%s14928_s2 + $0x758] sm:$0xff]  ;;  %v11152_v19 = vld [vmem:[%s14928_s2 + $0x760] sm:$0xff] }
  0xf7   :  { %15793 = vst [vmem:[#allocation492_spill] sm:$0xff] %v11142_v18  ;;  %15794 = vst [vmem:[#allocation493_spill] sm:$0xff] %v11147_v22  ;;  %v11157_v20 = vld [vmem:[%s14928_s2 + $0x768] sm:$0xff]  ;;  %v11162_v21 = vld [vmem:[%s14928_s2 + $0x770] sm:$0xff] }
  0xf8   :  { %15795 = vst [vmem:[#allocation494_spill] sm:$0xff] %v11152_v19  ;;  %15796 = vst [vmem:[#allocation495_spill] sm:$0xff] %v11157_v20  ;;  %v11167_v18 = vld [vmem:[%s14928_s2 + $0x778] sm:$0xff]  ;;  %v11172_v22 = vld [vmem:[%s14928_s2 + $0x780] sm:$0xff] }
  0xf9   :  { %15797 = vst [vmem:[#allocation496_spill] sm:$0xff] %v11162_v21  ;;  %15798 = vst [vmem:[#allocation497_spill] sm:$0xff] %v11167_v18  ;;  %v11177_v19 = vld [vmem:[%s14928_s2 + $0x788] sm:$0xff]  ;;  %v11182_v20 = vld [vmem:[%s14928_s2 + $0x790] sm:$0xff] }
  0xfa   :  { %15799 = vst [vmem:[#allocation498_spill] sm:$0xff] %v11172_v22  ;;  %15800 = vst [vmem:[#allocation499_spill] sm:$0xff] %v11177_v19  ;;  %v11187_v21 = vld [vmem:[%s14928_s2 + $0x798] sm:$0xff]  ;;  %v11192_v18 = vld [vmem:[%s14928_s2 + $0x7a0] sm:$0xff] }
  0xfb   :  { %15801 = vst [vmem:[#allocation500_spill] sm:$0xff] %v11182_v20  ;;  %15802 = vst [vmem:[#allocation501_spill] sm:$0xff] %v11187_v21  ;;  %v11197_v22 = vld [vmem:[%s14928_s2 + $0x7a8] sm:$0xff]  ;;  %v11202_v19 = vld [vmem:[%s14928_s2 + $0x7b0] sm:$0xff] }
  0xfc   :  { %15803 = vst [vmem:[#allocation502_spill] sm:$0xff] %v11192_v18  ;;  %15804 = vst [vmem:[#allocation503_spill] sm:$0xff] %v11197_v22  ;;  %v11207_v20 = vld [vmem:[%s14928_s2 + $0x7b8] sm:$0xff]  ;;  %v11212_v21 = vld [vmem:[%s14928_s2 + $0x7c0] sm:$0xff] }
  0xfd   :  { %15805 = vst [vmem:[#allocation504_spill] sm:$0xff] %v11202_v19  ;;  %15806 = vst [vmem:[#allocation505_spill] sm:$0xff] %v11207_v20  ;;  %v11217_v18 = vld [vmem:[%s14928_s2 + $0x7c8] sm:$0xff]  ;;  %v11222_v22 = vld [vmem:[%s14928_s2 + $0x7d0] sm:$0xff] }
  0xfe   :  { %15807 = vst [vmem:[#allocation506_spill] sm:$0xff] %v11212_v21  ;;  %15808 = vst [vmem:[#allocation507_spill] sm:$0xff] %v11217_v18  ;;  %v11227_v19 = vld [vmem:[%s14928_s2 + $0x7d8] sm:$0xff]  ;;  %v11232_v20 = vld [vmem:[%s14928_s2 + $0x7e0] sm:$0xff] }
  0xff   :  { %15809 = vst [vmem:[#allocation508_spill] sm:$0xff] %v11222_v22  ;;  %15810 = vst [vmem:[#allocation509_spill] sm:$0xff] %v11227_v19  ;;  %v11237_v21 = vld [vmem:[%s14928_s2 + $0x7e8] sm:$0xff]  ;;  %v11242_v18 = vld [vmem:[%s14928_s2 + $0x7f0] sm:$0xff] }
 0x100   :  { %15811 = vst [vmem:[#allocation510_spill] sm:$0xff] %v11232_v20  ;;  %15812 = vst [vmem:[#allocation511_spill] sm:$0xff] %v11237_v21  ;;  %v11247_v22 = vld [vmem:[%s14928_s2 + $0x7f8] sm:$0xff]  ;;  %v11252_v19 = vld [vmem:[%s14929_s3] sm:$0xff] }
 0x101   :  { %15813 = vst [vmem:[#allocation512_spill] sm:$0xff] %v11242_v18  ;;  %15814 = vst [vmem:[#allocation513_spill] sm:$0xff] %v11247_v22  ;;  %v11257_v20 = vld [vmem:[%s14929_s3 + $0x8] sm:$0xff]  ;;  %v11262_v21 = vld [vmem:[%s14929_s3 + $0x10] sm:$0xff] }
 0x102   :  { %15815 = vst [vmem:[#allocation514_spill] sm:$0xff] %v11252_v19  ;;  %15816 = vst [vmem:[#allocation515_spill] sm:$0xff] %v11257_v20  ;;  %v11267_v18 = vld [vmem:[%s14929_s3 + $0x18] sm:$0xff]  ;;  %v11272_v22 = vld [vmem:[%s14929_s3 + $0x20] sm:$0xff] }
 0x103   :  { %15817 = vst [vmem:[#allocation516_spill] sm:$0xff] %v11262_v21  ;;  %15818 = vst [vmem:[#allocation517_spill] sm:$0xff] %v11267_v18  ;;  %v11277_v19 = vld [vmem:[%s14929_s3 + $0x28] sm:$0xff]  ;;  %v11282_v20 = vld [vmem:[%s14929_s3 + $0x30] sm:$0xff] }
 0x104   :  { %15819 = vst [vmem:[#allocation518_spill] sm:$0xff] %v11272_v22  ;;  %15820 = vst [vmem:[#allocation519_spill] sm:$0xff] %v11277_v19  ;;  %v11287_v21 = vld [vmem:[%s14929_s3 + $0x38] sm:$0xff]  ;;  %v11292_v18 = vld [vmem:[%s14929_s3 + $0x40] sm:$0xff] }
 0x105   :  { %15821 = vst [vmem:[#allocation520_spill] sm:$0xff] %v11282_v20  ;;  %15822 = vst [vmem:[#allocation521_spill] sm:$0xff] %v11287_v21  ;;  %v11297_v22 = vld [vmem:[%s14929_s3 + $0x48] sm:$0xff]  ;;  %v11302_v19 = vld [vmem:[%s14929_s3 + $0x50] sm:$0xff] }
 0x106   :  { %15823 = vst [vmem:[#allocation522_spill] sm:$0xff] %v11292_v18  ;;  %15824 = vst [vmem:[#allocation523_spill] sm:$0xff] %v11297_v22  ;;  %v11307_v20 = vld [vmem:[%s14929_s3 + $0x58] sm:$0xff]  ;;  %v11312_v21 = vld [vmem:[%s14929_s3 + $0x60] sm:$0xff] }
 0x107   :  { %15825 = vst [vmem:[#allocation524_spill] sm:$0xff] %v11302_v19  ;;  %15826 = vst [vmem:[#allocation525_spill] sm:$0xff] %v11307_v20  ;;  %v11317_v18 = vld [vmem:[%s14929_s3 + $0x68] sm:$0xff]  ;;  %v11322_v22 = vld [vmem:[%s14929_s3 + $0x70] sm:$0xff] }
 0x108   :  { %15827 = vst [vmem:[#allocation526_spill] sm:$0xff] %v11312_v21  ;;  %15828 = vst [vmem:[#allocation527_spill] sm:$0xff] %v11317_v18  ;;  %v11327_v19 = vld [vmem:[%s14929_s3 + $0x78] sm:$0xff]  ;;  %v11332_v20 = vld [vmem:[%s14929_s3 + $0x80] sm:$0xff] }
 0x109   :  { %15829 = vst [vmem:[#allocation528_spill] sm:$0xff] %v11322_v22  ;;  %15830 = vst [vmem:[#allocation529_spill] sm:$0xff] %v11327_v19  ;;  %v11337_v21 = vld [vmem:[%s14929_s3 + $0x88] sm:$0xff]  ;;  %v11342_v18 = vld [vmem:[%s14929_s3 + $0x90] sm:$0xff] }
 0x10a   :  { %15831 = vst [vmem:[#allocation530_spill] sm:$0xff] %v11332_v20  ;;  %15832 = vst [vmem:[#allocation531_spill] sm:$0xff] %v11337_v21  ;;  %v11347_v22 = vld [vmem:[%s14929_s3 + $0x98] sm:$0xff]  ;;  %v11352_v19 = vld [vmem:[%s14929_s3 + $0xa0] sm:$0xff] }
 0x10b   :  { %15833 = vst [vmem:[#allocation532_spill] sm:$0xff] %v11342_v18  ;;  %15834 = vst [vmem:[#allocation533_spill] sm:$0xff] %v11347_v22  ;;  %v11357_v20 = vld [vmem:[%s14929_s3 + $0xa8] sm:$0xff]  ;;  %v11362_v21 = vld [vmem:[%s14929_s3 + $0xb0] sm:$0xff] }
 0x10c   :  { %15835 = vst [vmem:[#allocation534_spill] sm:$0xff] %v11352_v19  ;;  %15836 = vst [vmem:[#allocation535_spill] sm:$0xff] %v11357_v20  ;;  %v11367_v18 = vld [vmem:[%s14929_s3 + $0xb8] sm:$0xff]  ;;  %v11372_v22 = vld [vmem:[%s14929_s3 + $0xc0] sm:$0xff] }
 0x10d   :  { %15837 = vst [vmem:[#allocation536_spill] sm:$0xff] %v11362_v21  ;;  %15838 = vst [vmem:[#allocation537_spill] sm:$0xff] %v11367_v18  ;;  %v11377_v19 = vld [vmem:[%s14929_s3 + $0xc8] sm:$0xff]  ;;  %v11382_v20 = vld [vmem:[%s14929_s3 + $0xd0] sm:$0xff] }
 0x10e   :  { %15839 = vst [vmem:[#allocation538_spill] sm:$0xff] %v11372_v22  ;;  %15840 = vst [vmem:[#allocation539_spill] sm:$0xff] %v11377_v19  ;;  %v11387_v21 = vld [vmem:[%s14929_s3 + $0xd8] sm:$0xff]  ;;  %v11392_v18 = vld [vmem:[%s14929_s3 + $0xe0] sm:$0xff] }
 0x10f   :  { %15841 = vst [vmem:[#allocation540_spill] sm:$0xff] %v11382_v20  ;;  %15842 = vst [vmem:[#allocation541_spill] sm:$0xff] %v11387_v21  ;;  %v11397_v22 = vld [vmem:[%s14929_s3 + $0xe8] sm:$0xff]  ;;  %v11402_v19 = vld [vmem:[%s14929_s3 + $0xf0] sm:$0xff] }
 0x110   :  { %15843 = vst [vmem:[#allocation542_spill] sm:$0xff] %v11392_v18  ;;  %15844 = vst [vmem:[#allocation543_spill] sm:$0xff] %v11397_v22  ;;  %v11407_v20 = vld [vmem:[%s14929_s3 + $0xf8] sm:$0xff]  ;;  %v11412_v21 = vld [vmem:[%s14929_s3 + $0x100] sm:$0xff] }
 0x111   :  { %15845 = vst [vmem:[#allocation544_spill] sm:$0xff] %v11402_v19  ;;  %15846 = vst [vmem:[#allocation545_spill] sm:$0xff] %v11407_v20  ;;  %v11417_v18 = vld [vmem:[%s14929_s3 + $0x108] sm:$0xff]  ;;  %v11422_v22 = vld [vmem:[%s14929_s3 + $0x110] sm:$0xff] }
 0x112   :  { %15847 = vst [vmem:[#allocation546_spill] sm:$0xff] %v11412_v21  ;;  %15848 = vst [vmem:[#allocation547_spill] sm:$0xff] %v11417_v18  ;;  %v11427_v19 = vld [vmem:[%s14929_s3 + $0x118] sm:$0xff]  ;;  %v11432_v20 = vld [vmem:[%s14929_s3 + $0x120] sm:$0xff] }
 0x113   :  { %15849 = vst [vmem:[#allocation548_spill] sm:$0xff] %v11422_v22  ;;  %15850 = vst [vmem:[#allocation549_spill] sm:$0xff] %v11427_v19  ;;  %v11437_v21 = vld [vmem:[%s14929_s3 + $0x128] sm:$0xff]  ;;  %v11442_v18 = vld [vmem:[%s14929_s3 + $0x130] sm:$0xff] }
 0x114   :  { %15851 = vst [vmem:[#allocation550_spill] sm:$0xff] %v11432_v20  ;;  %15852 = vst [vmem:[#allocation551_spill] sm:$0xff] %v11437_v21  ;;  %v11447_v22 = vld [vmem:[%s14929_s3 + $0x138] sm:$0xff]  ;;  %v11452_v19 = vld [vmem:[%s14929_s3 + $0x140] sm:$0xff] }
 0x115   :  { %15853 = vst [vmem:[#allocation552_spill] sm:$0xff] %v11442_v18  ;;  %15854 = vst [vmem:[#allocation553_spill] sm:$0xff] %v11447_v22  ;;  %v11457_v20 = vld [vmem:[%s14929_s3 + $0x148] sm:$0xff]  ;;  %v11462_v21 = vld [vmem:[%s14929_s3 + $0x150] sm:$0xff] }
 0x116   :  { %15855 = vst [vmem:[#allocation554_spill] sm:$0xff] %v11452_v19  ;;  %15856 = vst [vmem:[#allocation555_spill] sm:$0xff] %v11457_v20  ;;  %v11467_v18 = vld [vmem:[%s14929_s3 + $0x158] sm:$0xff]  ;;  %v11472_v22 = vld [vmem:[%s14929_s3 + $0x160] sm:$0xff] }
 0x117   :  { %15857 = vst [vmem:[#allocation556_spill] sm:$0xff] %v11462_v21  ;;  %15858 = vst [vmem:[#allocation557_spill] sm:$0xff] %v11467_v18  ;;  %v11477_v19 = vld [vmem:[%s14929_s3 + $0x168] sm:$0xff]  ;;  %v11482_v20 = vld [vmem:[%s14929_s3 + $0x170] sm:$0xff] }
 0x118   :  { %15859 = vst [vmem:[#allocation558_spill] sm:$0xff] %v11472_v22  ;;  %15860 = vst [vmem:[#allocation559_spill] sm:$0xff] %v11477_v19  ;;  %v11487_v21 = vld [vmem:[%s14929_s3 + $0x178] sm:$0xff]  ;;  %v11492_v18 = vld [vmem:[%s14929_s3 + $0x180] sm:$0xff] }
 0x119   :  { %15861 = vst [vmem:[#allocation560_spill] sm:$0xff] %v11482_v20  ;;  %15862 = vst [vmem:[#allocation561_spill] sm:$0xff] %v11487_v21  ;;  %v11497_v22 = vld [vmem:[%s14929_s3 + $0x188] sm:$0xff]  ;;  %v11502_v19 = vld [vmem:[%s14929_s3 + $0x190] sm:$0xff] }
 0x11a   :  { %15863 = vst [vmem:[#allocation562_spill] sm:$0xff] %v11492_v18  ;;  %15864 = vst [vmem:[#allocation563_spill] sm:$0xff] %v11497_v22  ;;  %v11507_v20 = vld [vmem:[%s14929_s3 + $0x198] sm:$0xff]  ;;  %v11512_v21 = vld [vmem:[%s14929_s3 + $0x1a0] sm:$0xff] }
 0x11b   :  { %15865 = vst [vmem:[#allocation564_spill] sm:$0xff] %v11502_v19  ;;  %15866 = vst [vmem:[#allocation565_spill] sm:$0xff] %v11507_v20  ;;  %v11517_v18 = vld [vmem:[%s14929_s3 + $0x1a8] sm:$0xff]  ;;  %v11522_v22 = vld [vmem:[%s14929_s3 + $0x1b0] sm:$0xff] }
 0x11c   :  { %15867 = vst [vmem:[#allocation566_spill] sm:$0xff] %v11512_v21  ;;  %15868 = vst [vmem:[#allocation567_spill] sm:$0xff] %v11517_v18  ;;  %v11527_v19 = vld [vmem:[%s14929_s3 + $0x1b8] sm:$0xff]  ;;  %v11532_v20 = vld [vmem:[%s14929_s3 + $0x1c0] sm:$0xff] }
 0x11d   :  { %15869 = vst [vmem:[#allocation568_spill] sm:$0xff] %v11522_v22  ;;  %15870 = vst [vmem:[#allocation569_spill] sm:$0xff] %v11527_v19  ;;  %v11537_v21 = vld [vmem:[%s14929_s3 + $0x1c8] sm:$0xff]  ;;  %v11542_v18 = vld [vmem:[%s14929_s3 + $0x1d0] sm:$0xff] }
 0x11e   :  { %15871 = vst [vmem:[#allocation570_spill] sm:$0xff] %v11532_v20  ;;  %15872 = vst [vmem:[#allocation571_spill] sm:$0xff] %v11537_v21  ;;  %v11547_v22 = vld [vmem:[%s14929_s3 + $0x1d8] sm:$0xff]  ;;  %v11552_v19 = vld [vmem:[%s14929_s3 + $0x1e0] sm:$0xff] }
 0x11f   :  { %15873 = vst [vmem:[#allocation572_spill] sm:$0xff] %v11542_v18  ;;  %15874 = vst [vmem:[#allocation573_spill] sm:$0xff] %v11547_v22  ;;  %v11557_v20 = vld [vmem:[%s14929_s3 + $0x1e8] sm:$0xff]  ;;  %v11562_v21 = vld [vmem:[%s14929_s3 + $0x1f0] sm:$0xff] }
 0x120   :  { %15875 = vst [vmem:[#allocation574_spill] sm:$0xff] %v11552_v19  ;;  %15876 = vst [vmem:[#allocation575_spill] sm:$0xff] %v11557_v20  ;;  %v11567_v18 = vld [vmem:[%s14929_s3 + $0x1f8] sm:$0xff]  ;;  %v11572_v22 = vld [vmem:[%s14929_s3 + $0x200] sm:$0xff] }
 0x121   :  { %15877 = vst [vmem:[#allocation576_spill] sm:$0xff] %v11562_v21  ;;  %15878 = vst [vmem:[#allocation577_spill] sm:$0xff] %v11567_v18  ;;  %v11577_v19 = vld [vmem:[%s14929_s3 + $0x208] sm:$0xff]  ;;  %v11582_v20 = vld [vmem:[%s14929_s3 + $0x210] sm:$0xff] }
 0x122   :  { %15879 = vst [vmem:[#allocation578_spill] sm:$0xff] %v11572_v22  ;;  %15880 = vst [vmem:[#allocation579_spill] sm:$0xff] %v11577_v19  ;;  %v11587_v21 = vld [vmem:[%s14929_s3 + $0x218] sm:$0xff]  ;;  %v11592_v18 = vld [vmem:[%s14929_s3 + $0x220] sm:$0xff] }
 0x123   :  { %15881 = vst [vmem:[#allocation580_spill] sm:$0xff] %v11582_v20  ;;  %15882 = vst [vmem:[#allocation581_spill] sm:$0xff] %v11587_v21  ;;  %v11597_v22 = vld [vmem:[%s14929_s3 + $0x228] sm:$0xff]  ;;  %v11602_v19 = vld [vmem:[%s14929_s3 + $0x230] sm:$0xff] }
 0x124   :  { %15883 = vst [vmem:[#allocation582_spill] sm:$0xff] %v11592_v18  ;;  %15884 = vst [vmem:[#allocation583_spill] sm:$0xff] %v11597_v22  ;;  %v11607_v20 = vld [vmem:[%s14929_s3 + $0x238] sm:$0xff]  ;;  %v11612_v21 = vld [vmem:[%s14929_s3 + $0x240] sm:$0xff] }
 0x125   :  { %15885 = vst [vmem:[#allocation584_spill] sm:$0xff] %v11602_v19  ;;  %15886 = vst [vmem:[#allocation585_spill] sm:$0xff] %v11607_v20  ;;  %v11617_v18 = vld [vmem:[%s14929_s3 + $0x248] sm:$0xff]  ;;  %v11622_v22 = vld [vmem:[%s14929_s3 + $0x250] sm:$0xff] }
 0x126   :  { %15887 = vst [vmem:[#allocation586_spill] sm:$0xff] %v11612_v21  ;;  %15888 = vst [vmem:[#allocation587_spill] sm:$0xff] %v11617_v18  ;;  %v11627_v19 = vld [vmem:[%s14929_s3 + $0x258] sm:$0xff]  ;;  %v11632_v20 = vld [vmem:[%s14929_s3 + $0x260] sm:$0xff] }
 0x127   :  { %15889 = vst [vmem:[#allocation588_spill] sm:$0xff] %v11622_v22  ;;  %15890 = vst [vmem:[#allocation589_spill] sm:$0xff] %v11627_v19  ;;  %v11637_v21 = vld [vmem:[%s14929_s3 + $0x268] sm:$0xff]  ;;  %v11642_v18 = vld [vmem:[%s14929_s3 + $0x270] sm:$0xff] }
 0x128   :  { %15891 = vst [vmem:[#allocation590_spill] sm:$0xff] %v11632_v20  ;;  %15892 = vst [vmem:[#allocation591_spill] sm:$0xff] %v11637_v21  ;;  %v11647_v22 = vld [vmem:[%s14929_s3 + $0x278] sm:$0xff]  ;;  %v11652_v19 = vld [vmem:[%s14929_s3 + $0x280] sm:$0xff] }
 0x129   :  { %15893 = vst [vmem:[#allocation592_spill] sm:$0xff] %v11642_v18  ;;  %15894 = vst [vmem:[#allocation593_spill] sm:$0xff] %v11647_v22  ;;  %v11657_v20 = vld [vmem:[%s14929_s3 + $0x288] sm:$0xff]  ;;  %v11662_v21 = vld [vmem:[%s14929_s3 + $0x290] sm:$0xff] }
 0x12a   :  { %15895 = vst [vmem:[#allocation594_spill] sm:$0xff] %v11652_v19  ;;  %15896 = vst [vmem:[#allocation595_spill] sm:$0xff] %v11657_v20  ;;  %v11667_v18 = vld [vmem:[%s14929_s3 + $0x298] sm:$0xff]  ;;  %v11672_v22 = vld [vmem:[%s14929_s3 + $0x2a0] sm:$0xff] }
 0x12b   :  { %15897 = vst [vmem:[#allocation596_spill] sm:$0xff] %v11662_v21  ;;  %15898 = vst [vmem:[#allocation597_spill] sm:$0xff] %v11667_v18  ;;  %v11677_v19 = vld [vmem:[%s14929_s3 + $0x2a8] sm:$0xff]  ;;  %v11682_v20 = vld [vmem:[%s14929_s3 + $0x2b0] sm:$0xff] }
 0x12c   :  { %15899 = vst [vmem:[#allocation598_spill] sm:$0xff] %v11672_v22  ;;  %15900 = vst [vmem:[#allocation599_spill] sm:$0xff] %v11677_v19  ;;  %v11687_v21 = vld [vmem:[%s14929_s3 + $0x2b8] sm:$0xff]  ;;  %v11692_v18 = vld [vmem:[%s14929_s3 + $0x2c0] sm:$0xff] }
 0x12d   :  { %15901 = vst [vmem:[#allocation600_spill] sm:$0xff] %v11682_v20  ;;  %15902 = vst [vmem:[#allocation601_spill] sm:$0xff] %v11687_v21  ;;  %v11697_v22 = vld [vmem:[%s14929_s3 + $0x2c8] sm:$0xff]  ;;  %v11702_v19 = vld [vmem:[%s14929_s3 + $0x2d0] sm:$0xff] }
 0x12e   :  { %15903 = vst [vmem:[#allocation602_spill] sm:$0xff] %v11692_v18  ;;  %15904 = vst [vmem:[#allocation603_spill] sm:$0xff] %v11697_v22  ;;  %v11707_v20 = vld [vmem:[%s14929_s3 + $0x2d8] sm:$0xff]  ;;  %v11712_v21 = vld [vmem:[%s14929_s3 + $0x2e0] sm:$0xff] }
 0x12f   :  { %15905 = vst [vmem:[#allocation604_spill] sm:$0xff] %v11702_v19  ;;  %15906 = vst [vmem:[#allocation605_spill] sm:$0xff] %v11707_v20  ;;  %v11717_v18 = vld [vmem:[%s14929_s3 + $0x2e8] sm:$0xff]  ;;  %v11722_v22 = vld [vmem:[%s14929_s3 + $0x2f0] sm:$0xff] }
 0x130   :  { %15907 = vst [vmem:[#allocation606_spill] sm:$0xff] %v11712_v21  ;;  %15908 = vst [vmem:[#allocation607_spill] sm:$0xff] %v11717_v18  ;;  %v11727_v19 = vld [vmem:[%s14929_s3 + $0x2f8] sm:$0xff]  ;;  %v11732_v20 = vld [vmem:[%s14929_s3 + $0x300] sm:$0xff] }
 0x131   :  { %15909 = vst [vmem:[#allocation608_spill] sm:$0xff] %v11722_v22  ;;  %15910 = vst [vmem:[#allocation609_spill] sm:$0xff] %v11727_v19  ;;  %v11737_v21 = vld [vmem:[%s14929_s3 + $0x308] sm:$0xff]  ;;  %v11742_v18 = vld [vmem:[%s14929_s3 + $0x310] sm:$0xff] }
 0x132   :  { %15911 = vst [vmem:[#allocation610_spill] sm:$0xff] %v11732_v20  ;;  %15912 = vst [vmem:[#allocation611_spill] sm:$0xff] %v11737_v21  ;;  %v11747_v22 = vld [vmem:[%s14929_s3 + $0x318] sm:$0xff]  ;;  %v11752_v19 = vld [vmem:[%s14929_s3 + $0x320] sm:$0xff] }
 0x133   :  { %15913 = vst [vmem:[#allocation612_spill] sm:$0xff] %v11742_v18  ;;  %15914 = vst [vmem:[#allocation613_spill] sm:$0xff] %v11747_v22  ;;  %v11757_v20 = vld [vmem:[%s14929_s3 + $0x328] sm:$0xff]  ;;  %v11762_v21 = vld [vmem:[%s14929_s3 + $0x330] sm:$0xff] }
 0x134   :  { %15915 = vst [vmem:[#allocation614_spill] sm:$0xff] %v11752_v19  ;;  %15916 = vst [vmem:[#allocation615_spill] sm:$0xff] %v11757_v20  ;;  %v11767_v18 = vld [vmem:[%s14929_s3 + $0x338] sm:$0xff]  ;;  %v11772_v22 = vld [vmem:[%s14929_s3 + $0x340] sm:$0xff] }
 0x135   :  { %15917 = vst [vmem:[#allocation616_spill] sm:$0xff] %v11762_v21  ;;  %15918 = vst [vmem:[#allocation617_spill] sm:$0xff] %v11767_v18  ;;  %v11777_v19 = vld [vmem:[%s14929_s3 + $0x348] sm:$0xff]  ;;  %v11782_v20 = vld [vmem:[%s14929_s3 + $0x350] sm:$0xff] }
 0x136   :  { %15919 = vst [vmem:[#allocation618_spill] sm:$0xff] %v11772_v22  ;;  %15920 = vst [vmem:[#allocation619_spill] sm:$0xff] %v11777_v19  ;;  %v11787_v21 = vld [vmem:[%s14929_s3 + $0x358] sm:$0xff]  ;;  %v11792_v18 = vld [vmem:[%s14929_s3 + $0x360] sm:$0xff] }
 0x137   :  { %15921 = vst [vmem:[#allocation620_spill] sm:$0xff] %v11782_v20  ;;  %15922 = vst [vmem:[#allocation621_spill] sm:$0xff] %v11787_v21  ;;  %v11797_v22 = vld [vmem:[%s14929_s3 + $0x368] sm:$0xff]  ;;  %v11802_v19 = vld [vmem:[%s14929_s3 + $0x370] sm:$0xff] }
 0x138   :  { %15923 = vst [vmem:[#allocation622_spill] sm:$0xff] %v11792_v18  ;;  %15924 = vst [vmem:[#allocation623_spill] sm:$0xff] %v11797_v22  ;;  %v11807_v20 = vld [vmem:[%s14929_s3 + $0x378] sm:$0xff]  ;;  %v11812_v21 = vld [vmem:[%s14929_s3 + $0x380] sm:$0xff] }
 0x139   :  { %15925 = vst [vmem:[#allocation624_spill] sm:$0xff] %v11802_v19  ;;  %15926 = vst [vmem:[#allocation625_spill] sm:$0xff] %v11807_v20  ;;  %v11817_v18 = vld [vmem:[%s14929_s3 + $0x388] sm:$0xff]  ;;  %v11822_v22 = vld [vmem:[%s14929_s3 + $0x390] sm:$0xff] }
 0x13a   :  { %15927 = vst [vmem:[#allocation626_spill] sm:$0xff] %v11812_v21  ;;  %15928 = vst [vmem:[#allocation627_spill] sm:$0xff] %v11817_v18  ;;  %v11827_v19 = vld [vmem:[%s14929_s3 + $0x398] sm:$0xff]  ;;  %v11832_v20 = vld [vmem:[%s14929_s3 + $0x3a0] sm:$0xff] }
 0x13b   :  { %15929 = vst [vmem:[#allocation628_spill] sm:$0xff] %v11822_v22  ;;  %15930 = vst [vmem:[#allocation629_spill] sm:$0xff] %v11827_v19  ;;  %v11837_v21 = vld [vmem:[%s14929_s3 + $0x3a8] sm:$0xff]  ;;  %v11842_v18 = vld [vmem:[%s14929_s3 + $0x3b0] sm:$0xff] }
 0x13c   :  { %15931 = vst [vmem:[#allocation630_spill] sm:$0xff] %v11832_v20  ;;  %15932 = vst [vmem:[#allocation631_spill] sm:$0xff] %v11837_v21  ;;  %v11847_v22 = vld [vmem:[%s14929_s3 + $0x3b8] sm:$0xff]  ;;  %v11852_v19 = vld [vmem:[%s14929_s3 + $0x3c0] sm:$0xff] }
 0x13d   :  { %15933 = vst [vmem:[#allocation632_spill] sm:$0xff] %v11842_v18  ;;  %15934 = vst [vmem:[#allocation633_spill] sm:$0xff] %v11847_v22  ;;  %v11857_v20 = vld [vmem:[%s14929_s3 + $0x3c8] sm:$0xff]  ;;  %v11862_v21 = vld [vmem:[%s14929_s3 + $0x3d0] sm:$0xff] }
 0x13e   :  { %15935 = vst [vmem:[#allocation634_spill] sm:$0xff] %v11852_v19  ;;  %15936 = vst [vmem:[#allocation635_spill] sm:$0xff] %v11857_v20  ;;  %v11867_v18 = vld [vmem:[%s14929_s3 + $0x3d8] sm:$0xff]  ;;  %v11872_v22 = vld [vmem:[%s14929_s3 + $0x3e0] sm:$0xff] }
 0x13f   :  { %15937 = vst [vmem:[#allocation636_spill] sm:$0xff] %v11862_v21  ;;  %15938 = vst [vmem:[#allocation637_spill] sm:$0xff] %v11867_v18  ;;  %v11877_v19 = vld [vmem:[%s14929_s3 + $0x3e8] sm:$0xff]  ;;  %v11882_v20 = vld [vmem:[%s14929_s3 + $0x3f0] sm:$0xff] }
 0x140   :  { %15939 = vst [vmem:[#allocation638_spill] sm:$0xff] %v11872_v22  ;;  %15940 = vst [vmem:[#allocation639_spill] sm:$0xff] %v11877_v19  ;;  %v11887_v21 = vld [vmem:[%s14929_s3 + $0x3f8] sm:$0xff]  ;;  %v11892_v18 = vld [vmem:[%s14930_s4] sm:$0xff] }
 0x141   :  { %15941 = vst [vmem:[#allocation640_spill] sm:$0xff] %v11882_v20  ;;  %15942 = vst [vmem:[#allocation641_spill] sm:$0xff] %v11887_v21  ;;  %v11897_v22 = vld [vmem:[%s14930_s4 + $0x8] sm:$0xff]  ;;  %v11902_v19 = vld [vmem:[%s14930_s4 + $0x10] sm:$0xff] }
 0x142   :  { %15943 = vst [vmem:[#allocation642_spill] sm:$0xff] %v11892_v18  ;;  %15944 = vst [vmem:[#allocation643_spill] sm:$0xff] %v11897_v22  ;;  %v11907_v20 = vld [vmem:[%s14930_s4 + $0x18] sm:$0xff]  ;;  %v11912_v21 = vld [vmem:[%s14930_s4 + $0x20] sm:$0xff] }
 0x143   :  { %15945 = vst [vmem:[#allocation644_spill] sm:$0xff] %v11902_v19  ;;  %15946 = vst [vmem:[#allocation645_spill] sm:$0xff] %v11907_v20  ;;  %v11917_v18 = vld [vmem:[%s14930_s4 + $0x28] sm:$0xff]  ;;  %v11922_v22 = vld [vmem:[%s14930_s4 + $0x30] sm:$0xff] }
 0x144   :  { %15947 = vst [vmem:[#allocation646_spill] sm:$0xff] %v11912_v21  ;;  %15948 = vst [vmem:[#allocation647_spill] sm:$0xff] %v11917_v18  ;;  %v11927_v19 = vld [vmem:[%s14930_s4 + $0x38] sm:$0xff]  ;;  %v11932_v20 = vld [vmem:[%s14930_s4 + $0x40] sm:$0xff] }
 0x145   :  { %15949 = vst [vmem:[#allocation648_spill] sm:$0xff] %v11922_v22  ;;  %15950 = vst [vmem:[#allocation649_spill] sm:$0xff] %v11927_v19  ;;  %v11937_v21 = vld [vmem:[%s14930_s4 + $0x48] sm:$0xff]  ;;  %v11942_v18 = vld [vmem:[%s14930_s4 + $0x50] sm:$0xff] }
 0x146   :  { %15951 = vst [vmem:[#allocation650_spill] sm:$0xff] %v11932_v20  ;;  %15952 = vst [vmem:[#allocation651_spill] sm:$0xff] %v11937_v21  ;;  %v11947_v22 = vld [vmem:[%s14930_s4 + $0x58] sm:$0xff]  ;;  %v11952_v19 = vld [vmem:[%s14930_s4 + $0x60] sm:$0xff] }
 0x147   :  { %15953 = vst [vmem:[#allocation652_spill] sm:$0xff] %v11942_v18  ;;  %15954 = vst [vmem:[#allocation653_spill] sm:$0xff] %v11947_v22  ;;  %v11957_v20 = vld [vmem:[%s14930_s4 + $0x68] sm:$0xff]  ;;  %v11962_v21 = vld [vmem:[%s14930_s4 + $0x70] sm:$0xff] }
 0x148   :  { %15955 = vst [vmem:[#allocation654_spill] sm:$0xff] %v11952_v19  ;;  %15956 = vst [vmem:[#allocation655_spill] sm:$0xff] %v11957_v20  ;;  %v11967_v18 = vld [vmem:[%s14930_s4 + $0x78] sm:$0xff] }
 0x149   :  { %15957 = vst [vmem:[#allocation656_spill] sm:$0xff] %v11962_v21  ;;  %15958 = vst [vmem:[#allocation657_spill] sm:$0xff] %v11967_v18 }
 0x14a LB: > { %v15059_v19 = vmov 0   ;;  %v15959_v63 = vld [vmem:[#allocation260_spill] sm:$0xff]  ;;  %v15960_v61 = vld [vmem:[#allocation258_spill] sm:$0xff]  ;;  %s8107_s13 = sshll.u32 %s8655_s1, 3  ;;  %vm2998_vm0 = vcmask 1041408   ;;  %v15961_v58 = vld [vmem:[#allocation261_spill] sm:$0xff]  ;;  %s8655_s1 = sphi %s11969_s1, %s683_s1  }
 0x14b   : > { %8647 = vset.pattern.permute.xlu1 %v15059_v19  ;;  %8646 = vset.pattern.permute.xlu0 %v15059_v19  ;;  %s686_s15 = scalar_lea.vmem %s14925_s0, %s8107_s13  ;;  %v15962_v62 = vld [vmem:[#allocation259_spill] sm:$0xff]  ;;  %v15964_v60 = vld [vmem:[#allocation262_spill] sm:$0xff]  ;;  %vm2613_vm1 = vcmask 31744   ;;  %v15967_v57 = vld [vmem:[#allocation265_spill] sm:$0xff]  ;;  %s8106_s3 = sshll.u32 %s8655_s1, 7  ;;  %vm7689_vm2 = vcmask 7168  }
 0x14c   : > { %705 = vperm.xlu1 %8647, %v15959_v63   ;;  %695 = vperm.xlu0 %8646, %v15960_v61   ;;  %v687_v18 = vld [vmem:[%s686_s15] sm:$0xff]  ;;  %v15963_v59 = vld [vmem:[#allocation263_spill] sm:$0xff]  ;;  %v15968_v56 = vld [vmem:[#allocation264_spill] sm:$0xff]  ;;  %s14872_s18 = scalar_lea.vmem %s14927_s5, %s8106_s3  ;;  %s683_s1 = sadd.s32 1, %s8655_s1  }
 0x14d   : > { %3037 = vmatprep.mubr.bf16.mxu0 %v15059_v19  ;;  %5086 = vmatprep.subr.bf16.mxu1 %v15059_v19  ;;  %v689_v21 = vcombine.high %v687_v18, %v687_v18  ;;  %v691_v20 = vpack.c.bf16 %v687_v18, %v687_v18  ;;  %v15965_v1 = vld [vmem:[#allocation3_spill] sm:$0xff]  ;;  %v15966_v0 = vld [vmem:[#allocation2_spill] sm:$0xff]  ;;  %v15970_v3 = vld [vmem:[#allocation5_spill] sm:$0xff]  ;;  %p680_p0 = scmp.ge.s32.totalorder %s683_s1, 2  }
 0x14e   : > { %v7721_v61 = vcombine.low %v15966_v0, %v15965_v1  ;;  %v15969_v55 = vld [vmem:[#allocation267_spill] sm:$0xff]  ;;  %v15971_v2 = vld [vmem:[#allocation4_spill] sm:$0xff]  ;;  %v15972_v54 = vld [vmem:[#allocation266_spill] sm:$0xff] }
 0x14f   : > { %v692_v63 = vpack.c.bf16 %v689_v21, %v689_v21  ;;  %v3000_v22 = vsel %vm2998_vm0, %v691_v20, 0  ;;  %v7722_v18 = vcombine.low %v15971_v2, %v15970_v3  ;;  %v15973_v53 = vld [vmem:[#allocation269_spill] sm:$0xff]  ;;  %v15974_v52 = vld [vmem:[#allocation268_spill] sm:$0xff]  ;;  %v15975_v51 = vld [vmem:[#allocation271_spill] sm:$0xff] }
 0x150   : > { %710 = vperm.xlu1 %8647, %v15961_v58   ;;  %700 = vperm.xlu0 %8646, %v15962_v62   ;;  %v15976_v5 = vld [vmem:[#allocation7_spill] sm:$0xff]  ;;  %v15977_v4 = vld [vmem:[#allocation6_spill] sm:$0xff]  ;;  %v15979_v49 = vld [vmem:[#allocation273_spill] sm:$0xff] }
 0x151   : > { %7849 = vmatprep.subr.msk.bf16.mxu0 %vm2998_vm0, %v692_v63  ;;  %v7723_v20 = vcombine.low %v15977_v4, %v15976_v5  ;;  %v15978_v50 = vld [vmem:[#allocation270_spill] sm:$0xff]  ;;  %v15980_v48 = vld [vmem:[#allocation272_spill] sm:$0xff]  ;;  %v15981_v47 = vld [vmem:[#allocation275_spill] sm:$0xff] }
 0x152   : > { %3006 = vmatpush1.bf16.msra.mxu0 %v3000_v22  ;;  %v15982_v7 = vld [vmem:[#allocation9_spill] sm:$0xff]  ;;  %v15983_v6 = vld [vmem:[#allocation8_spill] sm:$0xff]  ;;  %v15984_v46 = vld [vmem:[#allocation274_spill] sm:$0xff] }
 0x153   : > { %v7724_v21 = vcombine.low %v15983_v6, %v15982_v7  ;;  %v15985_v45 = vld [vmem:[#allocation277_spill] sm:$0xff]  ;;  %v15986_v44 = vld [vmem:[#allocation276_spill] sm:$0xff]  ;;  %v15987_v43 = vld [vmem:[#allocation279_spill] sm:$0xff] }
 0x154   : > { %720 = vperm.xlu1 %8647, %v15963_v59   ;;  %715 = vperm.xlu0 %8646, %v15964_v60   ;;  %v15988_v9 = vld [vmem:[#allocation11_spill] sm:$0xff]  ;;  %v15989_v8 = vld [vmem:[#allocation10_spill] sm:$0xff]  ;;  %v15991_v41 = vld [vmem:[#allocation281_spill] sm:$0xff] }
 0x155   : > { %7850 = vmatmul.mubr.msk.bf16.vlgmr.msra.gmra.mrb[0].mxu0 %vm2613_vm1, %v7721_v61  ;;  %v7725_v22 = vcombine.low %v15989_v8, %v15988_v9  ;;  %v15990_v42 = vld [vmem:[#allocation278_spill] sm:$0xff]  ;;  %v8658_v61 = vmov 998259584   ;;  %v15992_v40 = vld [vmem:[#allocation280_spill] sm:$0xff]  ;;  %v15993_v39 = vld [vmem:[#allocation283_spill] sm:$0xff] }
 0x156   : > { %3047 = vmatprep.mubr.bf16.mxu0 %v15059_v19  ;;  %5087 = vmatpush1.bf16.msra.mxu1 %v8658_v61  ;;  %v15994_v11 = vld [vmem:[#allocation13_spill] sm:$0xff]  ;;  %v15995_v10 = vld [vmem:[#allocation12_spill] sm:$0xff]  ;;  %v15996_v38 = vld [vmem:[#allocation282_spill] sm:$0xff] }
 0x157   : > { %5088 = vmatprep.subr.bf16.mxu1 %v15059_v19  ;;  %v7726_v63 = vcombine.low %v15995_v10, %v15994_v11  ;;  %v15997_v37 = vld [vmem:[#allocation285_spill] sm:$0xff]  ;;  %v15998_v36 = vld [vmem:[#allocation284_spill] sm:$0xff]  ;;  %v15999_v35 = vld [vmem:[#allocation287_spill] sm:$0xff] }
 0x158   : > { %730 = vperm.xlu1 %8647, %v15967_v57   ;;  %725 = vperm.xlu0 %8646, %v15968_v56   ;;  %v16000_v13 = vld [vmem:[#allocation15_spill] sm:$0xff]  ;;  %v16001_v12 = vld [vmem:[#allocation14_spill] sm:$0xff]  ;;  %v16003_v33 = vld [vmem:[#allocation289_spill] sm:$0xff] }
 0x159   : > { %v16002_v34 = vld [vmem:[#allocation286_spill] sm:$0xff]  ;;  %v16004_v32 = vld [vmem:[#allocation288_spill] sm:$0xff]  ;;  %v16005_v31 = vld [vmem:[#allocation291_spill] sm:$0xff] }
 0x15a   : > { %5089 = vmatpush1.bf16.msra.mxu1 %v8658_v61  ;;  %v16006_v15 = vld [vmem:[#allocation17_spill] sm:$0xff]  ;;  %v16007_v14 = vld [vmem:[#allocation16_spill] sm:$0xff]  ;;  %v16008_v30 = vld [vmem:[#allocation290_spill] sm:$0xff] }
 0x15b   : > { %5090 = vmatprep.subr.bf16.mxu1 %v15059_v19  ;;  %v16009_v29 = vld [vmem:[#allocation293_spill] sm:$0xff]  ;;  %v16010_v28 = vld [vmem:[#allocation292_spill] sm:$0xff]  ;;  %v16011_v27 = vld [vmem:[#allocation295_spill] sm:$0xff] }
 0x15c   : > { %740 = vperm.xlu1 %8647, %v15969_v55   ;;  %735 = vperm.xlu0 %8646, %v15972_v54   ;;  %v16012_v17 = vld [vmem:[#allocation19_spill] sm:$0xff]  ;;  %v16013_v16 = vld [vmem:[#allocation18_spill] sm:$0xff]  ;;  %v16015_v25 = vld [vmem:[#allocation297_spill] sm:$0xff] }
 0x15d   : > { %7851 = vmatmul.mubr.msk.bf16.gmra.mrb[4].mxu0 %vm2613_vm1, %v7722_v18  ;;  %v7727_v18 = vcombine.low %v16001_v12, %v16000_v13  ;;  %v16014_v26 = vld [vmem:[#allocation294_spill] sm:$0xff]  ;;  %v16016_v24 = vld [vmem:[#allocation296_spill] sm:$0xff]  ;;  %v16017_v23 = vld [vmem:[#allocation299_spill] sm:$0xff] }
 0x15e   : > { %3057 = vmatprep.mubr.bf16.mxu0 %v15059_v19  ;;  %5091 = vmatpush1.bf16.msra.mxu1 %v8658_v61  ;;  %v16022_v0 = vld [vmem:[#allocation300_spill] sm:$0xff]  ;;  %v16023_v1 = vld [vmem:[#allocation303_spill] sm:$0xff]  ;;  %v16026_v2 = vld [vmem:[#allocation302_spill] sm:$0xff] }
 0x15f   : > { %5092 = vmatprep.subr.bf16.mxu1 %v15059_v19  ;;  %v16039_v3 = vld [vmem:[#allocation313_spill] sm:$0xff]  ;;  %v16043_v4 = vld [vmem:[#allocation28_spill] sm:$0xff]  ;;  %v16044_v5 = vld [vmem:[#allocation314_spill] sm:$0xff] }
 0x160   : > { %750 = vperm.xlu1 %8647, %v15973_v53   ;;  %745 = vperm.xlu0 %8646, %v15974_v52   ;;  %v16059_v6 = vld [vmem:[#allocation327_spill] sm:$0xff]  ;;  %v16062_v7 = vld [vmem:[#allocation326_spill] sm:$0xff]  ;;  %v16129_v56 = vld [vmem:[#allocation57_spill] sm:$0xff] }
 0x161   : > { %v16065_v10 = vld [vmem:[#allocation331_spill] sm:$0xff]  ;;  %v16068_v11 = vld [vmem:[#allocation330_spill] sm:$0xff]  ;;  %v16130_v57 = vld [vmem:[#allocation56_spill] sm:$0xff] }
 0x162   : > { %5093 = vmatpush1.bf16.msra.mxu1 %v8658_v61  ;;  %v16122_v52 = vld [vmem:[#allocation366_spill] sm:$0xff]  ;;  %v7748_v58 = vcombine.low %v16130_v57, %v16129_v56  ;;  %v16135_v56 = vld [vmem:[#allocation372_spill] sm:$0xff] }
 0x163   : > { %5094 = vmatprep.subr.bf16.mxu1 %v15059_v19 }
 0x164   : > { %760 = vperm.xlu1 %8647, %v15975_v51   ;;  %755 = vperm.xlu0 %8646, %v15978_v50   ;;  %v16119_v51 = vld [vmem:[#allocation367_spill] sm:$0xff] }
 0x165   : > { %7852 = vmatmul.mubr.msk.bf16.gmra.mrb[8].mxu0 %vm2613_vm1, %v7723_v20  ;;  %v7728_v20 = vcombine.low %v16007_v14, %v16006_v15  ;;  %v16071_v14 = vld [vmem:[#allocation335_spill] sm:$0xff]  ;;  %v16074_v15 = vld [vmem:[#allocation334_spill] sm:$0xff] }
 0x166   : > { %3067 = vmatprep.mubr.bf16.mxu0 %v15059_v19  ;;  %5095 = vmatpush1.bf16.msra.mxu1 %v8658_v61 }
 0x167   : > { %5096 = vmatprep.subr.bf16.mxu1 %v15059_v19 }
 0x168   : > { %770 = vperm.xlu1 %8647, %v15979_v49   ;;  %765 = vperm.xlu0 %8646, %v15980_v48   ;;  %v16116_v48 = vld [vmem:[#allocation362_spill] sm:$0xff] }
 0x16a   : > { %5097 = vmatpush1.bf16.msra.mxu1 %v8658_v61 }
 0x16b   : > { %5098 = vmatprep.subr.bf16.mxu1 %v15059_v19 }
 0x16c   : > { %780 = vperm.xlu1 %8647, %v15981_v47   ;;  %775 = vperm.xlu0 %8646, %v15984_v46   ;;  %v16113_v47 = vld [vmem:[#allocation363_spill] sm:$0xff] }
 0x16d   : > { %7853 = vmatmul.mubr.msk.bf16.gmra.mrb[12].mxu0 %vm2613_vm1, %v7724_v21  ;;  %v7729_v21 = vcombine.low %v16013_v16, %v16012_v17 }
 0x16e   : > { %3077 = vmatprep.mubr.bf16.mxu0 %v15059_v19  ;;  %5099 = vmatpush1.bf16.msra.mxu1 %v8658_v61 }
 0x16f   : > { %5100 = vmatprep.subr.bf16.mxu1 %v15059_v19 }
 0x170   : > { %790 = vperm.xlu1 %8647, %v15985_v45   ;;  %785 = vperm.xlu0 %8646, %v15986_v44   ;;  %v16110_v44 = vld [vmem:[#allocation358_spill] sm:$0xff] }
 0x172   : > { %5101 = vmatpush1.bf16.msra.mxu1 %v8658_v61 }
 0x173   : > { %5102 = vmatprep.subr.bf16.mxu1 %v15059_v19 }
 0x174   : > { %800 = vperm.xlu1 %8647, %v15987_v43   ;;  %795 = vperm.xlu0 %8646, %v15990_v42   ;;  %v16107_v43 = vld [vmem:[#allocation359_spill] sm:$0xff] }
 0x175   : > { %7854 = vmatmul.mubr.msk.bf16.gmra.mrb[16].mxu0 %vm2613_vm1, %v7725_v22  ;;  %v16018_v22 = vld [vmem:[#allocation21_spill] sm:$0xff] }
 0x176   : > { %3087 = vmatprep.mubr.bf16.mxu0 %v15059_v19  ;;  %5103 = vmatpush1.bf16.msra.mxu1 %v8658_v61 }
 0x177   : > { %5104 = vmatprep.subr.bf16.mxu1 %v15059_v19 }
 0x178   : > { %810 = vperm.xlu1 %8647, %v15991_v41   ;;  %805 = vperm.xlu0 %8646, %v15992_v40   ;;  %v16104_v40 = vld [vmem:[#allocation354_spill] sm:$0xff] }
 0x17a   : > { %5105 = vmatpush1.bf16.msra.mxu1 %v8658_v61 }
 0x17b   : > { %5106 = vmatprep.subr.bf16.mxu1 %v15059_v19 }
 0x17c   : > { %820 = vperm.xlu1 %8647, %v15993_v39   ;;  %815 = vperm.xlu0 %8646, %v15996_v38   ;;  %v16101_v39 = vld [vmem:[#allocation355_spill] sm:$0xff] }
 0x17d   : > { %7855 = vmatmul.mubr.msk.bf16.gmra.mrb[20].mxu0 %vm2613_vm1, %v7726_v63  ;;  %v16019_v63 = vld [vmem:[#allocation20_spill] sm:$0xff] }
 0x17e   : > { %3097 = vmatprep.mubr.bf16.mxu0 %v15059_v19  ;;  %5107 = vmatpush1.bf16.msra.mxu1 %v8658_v61 }
 0x17f   : > { %5108 = vmatprep.subr.bf16.mxu1 %v15059_v19 }
 0x180   : > { %830 = vperm.xlu1 %8647, %v15997_v37   ;;  %825 = vperm.xlu0 %8646, %v15998_v36   ;;  %v16098_v36 = vld [vmem:[#allocation350_spill] sm:$0xff] }
 0x182   : > { %5109 = vmatpush1.bf16.msra.mxu1 %v8658_v61 }
 0x183   : > { %5110 = vmatprep.subr.bf16.mxu1 %v15059_v19 }
 0x184   : > { %840 = vperm.xlu1 %8647, %v15999_v35   ;;  %835 = vperm.xlu0 %8646, %v16002_v34   ;;  %v16095_v35 = vld [vmem:[#allocation351_spill] sm:$0xff] }
 0x185   : > { %7856 = vmatmul.mubr.msk.bf16.gmra.mrb[24].mxu0 %vm2613_vm1, %v7727_v18  ;;  %v7730_v18 = vcombine.low %v16019_v63, %v16018_v22  ;;  %v16024_v22 = vld [vmem:[#allocation23_spill] sm:$0xff]  ;;  %v16025_v63 = vld [vmem:[#allocation22_spill] sm:$0xff] }
 0x186   : > { %3107 = vmatprep.mubr.bf16.mxu0 %v15059_v19  ;;  %5111 = vmatpush1.bf16.msra.mxu1 %v8658_v61 }
 0x187   : > { %5112 = vmatprep.subr.bf16.mxu1 %v15059_v19 }
 0x188   : > { %850 = vperm.xlu1 %8647, %v16003_v33   ;;  %845 = vperm.xlu0 %8646, %v16004_v32   ;;  %v16092_v32 = vld [vmem:[#allocation346_spill] sm:$0xff] }
 0x18a   : > { %5113 = vmatpush1.bf16.msra.mxu1 %v8658_v61 }
 0x18b   : > { %5114 = vmatprep.subr.bf16.mxu1 %v15059_v19 }
 0x18c   : > { %860 = vperm.xlu1 %8647, %v16005_v31   ;;  %855 = vperm.xlu0 %8646, %v16008_v30   ;;  %v16089_v31 = vld [vmem:[#allocation347_spill] sm:$0xff] }
 0x18d   : > { %7857 = vmatmul.mubr.msk.bf16.gmra.mrb[28].mxu0 %vm2613_vm1, %v7728_v20  ;;  %v16020_v20 = vld [vmem:[#allocation298_spill] sm:$0xff] }
 0x18e   : > { %3117 = vmatprep.mubr.bf16.mxu0 %v15059_v19  ;;  %5115 = vmatpush1.bf16.msra.mxu1 %v8658_v61 }
 0x18f   : > { %5116 = vmatprep.subr.bf16.mxu1 %v15059_v19 }
 0x190   : > { %870 = vperm.xlu1 %8647, %v16009_v29   ;;  %865 = vperm.xlu0 %8646, %v16010_v28   ;;  %v16086_v28 = vld [vmem:[#allocation342_spill] sm:$0xff] }
 0x192   : > { %5117 = vmatpush1.bf16.msra.mxu1 %v8658_v61 }
 0x194   : > { %880 = vperm.xlu1 %8647, %v16011_v27   ;;  %875 = vperm.xlu0 %8646, %v16014_v26   ;;  %v16083_v27 = vld [vmem:[#allocation343_spill] sm:$0xff] }
 0x195   : > { %7858 = vmatmul.mubr.msk.bf16.gmra.mrb[32].mxu0 %vm2613_vm1, %v7729_v21  ;;  %v16021_v21 = vld [vmem:[#allocation301_spill] sm:$0xff] }
 0x196   : > { %3127 = vmatprep.mubr.bf16.mxu0 %v15059_v19 }
 0x198   : > { %890 = vperm.xlu1 %8647, %v16015_v25   ;;  %885 = vperm.xlu0 %8646, %v16016_v24   ;;  %v16080_v24 = vld [vmem:[#allocation338_spill] sm:$0xff] }
 0x19c   : > { %900 = vperm.xlu1 %8647, %v16017_v23   ;;  %895 = vperm.xlu0 %8646, %v16020_v20   ;;  %v7731_v20 = vcombine.low %v16025_v63, %v16024_v22  ;;  %v16032_v63 = vld [vmem:[#allocation306_spill] sm:$0xff]  ;;  %v16077_v23 = vld [vmem:[#allocation339_spill] sm:$0xff] }
 0x19d   : > { %7859 = vmatmul.mubr.msk.bf16.gmra.mrb[36].mxu0 %vm2613_vm1, %v7730_v18  ;;  %v16028_v18 = vld [vmem:[#allocation304_spill] sm:$0xff] }
 0x19e   : > { %3137 = vmatprep.mubr.bf16.mxu0 %v15059_v19 }
 0x1a0   : > { %910 = vperm.xlu1 %8647, %v16021_v21   ;;  %905 = vperm.xlu0 %8646, %v16022_v0   ;;  %v16027_v0 = vld [vmem:[#allocation305_spill] sm:$0xff] }
 0x1a1   : > { %v16030_v21 = vld [vmem:[#allocation25_spill] sm:$0xff] }
 0x1a4   : > { %920 = vperm.xlu1 %8647, %v16023_v1   ;;  %915 = vperm.xlu0 %8646, %v16026_v2   ;;  %v16029_v1 = vld [vmem:[#allocation307_spill] sm:$0xff]  ;;  %v16031_v2 = vld [vmem:[#allocation24_spill] sm:$0xff] }
 0x1a5   : > { %7860 = vmatmul.mubr.msk.bf16.gmra.mrb[40].mxu0 %vm2613_vm1, %v7731_v20  ;;  %v7732_v22 = vcombine.low %v16031_v2, %v16030_v21  ;;  %v16033_v20 = vld [vmem:[#allocation309_spill] sm:$0xff]  ;;  %v16037_v21 = vld [vmem:[#allocation26_spill] sm:$0xff] }
 0x1a6   : > { %3147 = vmatprep.mubr.bf16.mxu0 %v15059_v19 }
 0x1a8   : > { %930 = vperm.xlu1 %8647, %v16027_v0   ;;  %925 = vperm.xlu0 %8646, %v16028_v18   ;;  %v16034_v0 = vld [vmem:[#allocation308_spill] sm:$0xff]  ;;  %v16035_v18 = vld [vmem:[#allocation311_spill] sm:$0xff] }
 0x1ac   : > { %940 = vperm.xlu1 %8647, %v16029_v1   ;;  %935 = vperm.xlu0 %8646, %v16032_v63   ;;  %v16036_v1 = vld [vmem:[#allocation27_spill] sm:$0xff]  ;;  %v16038_v63 = vld [vmem:[#allocation310_spill] sm:$0xff] }
 0x1ad   : > { %7861 = vmatmul.mubr.msk.bf16.gmra.mrb[44].mxu0 %vm2613_vm1, %v7732_v22  ;;  %v7733_v2 = vcombine.low %v16037_v21, %v16036_v1  ;;  %v16040_v22 = vld [vmem:[#allocation312_spill] sm:$0xff]  ;;  %v16048_v21 = vld [vmem:[#allocation31_spill] sm:$0xff] }
 0x1ae   : > { %3157 = vmatprep.mubr.bf16.mxu0 %v15059_v19  ;;  %v16046_v1 = vld [vmem:[#allocation316_spill] sm:$0xff] }
 0x1b0   : > { %950 = vperm.xlu1 %8647, %v16033_v20   ;;  %945 = vperm.xlu0 %8646, %v16034_v0   ;;  %v16041_v20 = vld [vmem:[#allocation315_spill] sm:$0xff]  ;;  %v16042_v0 = vld [vmem:[#allocation29_spill] sm:$0xff] }
 0x1b1   : > { %v7734_v61 = vcombine.low %v16043_v4, %v16042_v0  ;;  %v16051_v4 = vld [vmem:[#allocation321_spill] sm:$0xff] }
 0x1b4   : > { %960 = vperm.xlu1 %8647, %v16035_v18   ;;  %955 = vperm.xlu0 %8646, %v16038_v63   ;;  %v16045_v18 = vld [vmem:[#allocation317_spill] sm:$0xff] }
 0x1b5   : > { %7862 = vmatmul.mubr.msk.bf16.gmra.mrb[48].mxu0 %vm2613_vm1, %v7733_v2  ;;  %v16049_v2 = vld [vmem:[#allocation30_spill] sm:$0xff] }
 0x1b6   : > { %3167 = vmatprep.mubr.bf16.mxu0 %v15059_v19  ;;  %v7735_v63 = vcombine.low %v16049_v2, %v16048_v21  ;;  %v16056_v21 = vld [vmem:[#allocation322_spill] sm:$0xff] }
 0x1b8   : > { %970 = vperm.xlu1 %8647, %v16039_v3   ;;  %965 = vperm.xlu0 %8646, %v16040_v22   ;;  %v16047_v3 = vld [vmem:[#allocation319_spill] sm:$0xff]  ;;  %v16050_v22 = vld [vmem:[#allocation318_spill] sm:$0xff] }
 0x1bc   : > { %980 = vperm.xlu1 %8647, %v16041_v20   ;;  %975 = vperm.xlu0 %8646, %v16044_v5   ;;  %v16052_v5 = vld [vmem:[#allocation320_spill] sm:$0xff] }
 0x1bd   : > { %7863 = vmatmul.mubr.msk.bf16.gmra.mrb[52].mxu0 %vm2613_vm1, %v7734_v61  ;;  %v16053_v61 = vld [vmem:[#allocation323_spill] sm:$0xff] }
 0x1be   : > { %3177 = vmatprep.mubr.bf16.mxu0 %v15059_v19 }
 0x1c0   : > { %990 = vperm.xlu1 %8647, %v16045_v18   ;;  %985 = vperm.xlu0 %8646, %v16046_v1   ;;  %v16054_v18 = vld [vmem:[#allocation33_spill] sm:$0xff]  ;;  %v16055_v1 = vld [vmem:[#allocation32_spill] sm:$0xff] }
 0x1c4   : > { %1000 = vperm.xlu1 %8647, %v16047_v3   ;;  %995 = vperm.xlu0 %8646, %v16050_v22   ;;  %v7736_v3 = vcombine.low %v16055_v1, %v16054_v18  ;;  %v16057_v22 = vld [vmem:[#allocation325_spill] sm:$0xff]  ;;  %v16060_v18 = vld [vmem:[#allocation35_spill] sm:$0xff]  ;;  %v16061_v1 = vld [vmem:[#allocation34_spill] sm:$0xff] }
 0x1c5   : > { %7864 = vmatmul.mubr.msk.bf16.gmra.mrb[56].mxu0 %vm2613_vm1, %v7735_v63 }
 0x1c6   : > { %3187 = vmatprep.mubr.bf16.mxu0 %v15059_v19 }
 0x1c8   : > { %1010 = vperm.xlu1 %8647, %v16051_v4   ;;  %1005 = vperm.xlu0 %8646, %v16052_v5   ;;  %v16058_v4 = vld [vmem:[#allocation324_spill] sm:$0xff] }
 0x1cb   : > { %v12137_v20 = vpop.permute.xlu1 %705  ;;  %v12139_v0 = vpop.permute.xlu0 %695 }
 0x1cc   : > { %1020 = vperm.xlu1 %8647, %v16053_v61   ;;  %1015 = vperm.xlu0 %8646, %v16056_v21   ;;  %v7737_v21 = vcombine.low %v16061_v1, %v16060_v18  ;;  %v16066_v18 = vld [vmem:[#allocation37_spill] sm:$0xff] }
 0x1cd   : > { %7865 = vmatmul.mubr.msk.bf16.gmra.mrb[60].mxu0 %vm2613_vm1, %v7736_v3 }
 0x1ce   : > { %3197 = vmatprep.mubr.bf16.mxu0 %v15059_v19 }
 0x1cf   : > { %v12145_v2 = vpop.permute.xlu1 %710  ;;  %v12147_v63 = vpop.permute.xlu0 %700 }
 0x1d0   : > { %1030 = vperm.xlu1 %8647, %v16057_v22   ;;  %1025 = vperm.xlu0 %8646, %v16058_v4   ;;  %v16063_v22 = vld [vmem:[#allocation329_spill] sm:$0xff]  ;;  %v16064_v4 = vld [vmem:[#allocation328_spill] sm:$0xff] }
 0x1d3   : > { %v12153_v5 = vpop.permute.xlu1 %720  ;;  %v12155_v61 = vpop.permute.xlu0 %715 }
 0x1d4   : > { %1040 = vperm.xlu1 %8647, %v16059_v6   ;;  %1035 = vperm.xlu0 %8646, %v16062_v7   ;;  %v16067_v7 = vld [vmem:[#allocation36_spill] sm:$0xff] }
 0x1d5   : > { %7866 = vmatmul.mubr.msk.bf16.gmra.mrb[64].mxu0 %vm2613_vm1, %v7737_v21  ;;  %v7738_v1 = vcombine.low %v16067_v7, %v16066_v18  ;;  %v16072_v18 = vld [vmem:[#allocation39_spill] sm:$0xff] }
 0x1d6   : > { %3207 = vmatprep.mubr.bf16.mxu0 %v15059_v19 }
 0x1d7   : > { %v12161_v8 = vpop.permute.xlu1 %730  ;;  %v12163_v3 = vpop.permute.xlu0 %725 }
 0x1d8   : > { %1050 = vperm.xlu1 %8647, %v16063_v22   ;;  %1045 = vperm.xlu0 %8646, %v16064_v4   ;;  %v16069_v22 = vld [vmem:[#allocation333_spill] sm:$0xff]  ;;  %v16070_v4 = vld [vmem:[#allocation332_spill] sm:$0xff] }
 0x1db   : > { %v12169_v9 = vpop.permute.xlu1 %740  ;;  %v12171_v6 = vpop.permute.xlu0 %735 }
 0x1dc   : > { %1060 = vperm.xlu1 %8647, %v16065_v10   ;;  %1055 = vperm.xlu0 %8646, %v16068_v11   ;;  %v16073_v11 = vld [vmem:[#allocation38_spill] sm:$0xff] }
 0x1dd   : > { %7867 = vmatmul.mubr.msk.bf16.gmra.mrb[68].mxu0 %vm2613_vm1, %v7738_v1  ;;  %v7739_v7 = vcombine.low %v16073_v11, %v16072_v18  ;;  %v16078_v18 = vld [vmem:[#allocation41_spill] sm:$0xff] }
 0x1de   : > { %3217 = vmatprep.mubr.bf16.mxu0 %v15059_v19 }
 0x1df   : > { %v12177_v12 = vpop.permute.xlu1 %750  ;;  %v12179_v21 = vpop.permute.xlu0 %745 }
 0x1e0   : > { %1070 = vperm.xlu1 %8647, %v16069_v22   ;;  %1065 = vperm.xlu0 %8646, %v16070_v4   ;;  %v16075_v22 = vld [vmem:[#allocation337_spill] sm:$0xff]  ;;  %v16076_v4 = vld [vmem:[#allocation336_spill] sm:$0xff] }
 0x1e3   : > { %v12185_v13 = vpop.permute.xlu1 %760  ;;  %v12187_v10 = vpop.permute.xlu0 %755 }
 0x1e4   : > { %1080 = vperm.xlu1 %8647, %v16071_v14   ;;  %1075 = vperm.xlu0 %8646, %v16074_v15   ;;  %v16079_v15 = vld [vmem:[#allocation40_spill] sm:$0xff] }
 0x1e5   : > { %7868 = vmatmul.mubr.msk.bf16.gmra.mrb[72].mxu0 %vm2613_vm1, %v7739_v7  ;;  %v7740_v11 = vcombine.low %v16079_v15, %v16078_v18  ;;  %v16084_v18 = vld [vmem:[#allocation43_spill] sm:$0xff] }
 0x1e6   : > { %3227 = vmatprep.mubr.bf16.mxu0 %v15059_v19 }
 0x1e7   : > { %v12193_v16 = vpop.permute.xlu1 %770  ;;  %v12195_v1 = vpop.permute.xlu0 %765 }
 0x1e8   : > { %1090 = vperm.xlu1 %8647, %v16075_v22   ;;  %1085 = vperm.xlu0 %8646, %v16076_v4   ;;  %v16081_v22 = vld [vmem:[#allocation341_spill] sm:$0xff]  ;;  %v16082_v4 = vld [vmem:[#allocation340_spill] sm:$0xff] }
 0x1eb   : > { %v12201_v17 = vpop.permute.xlu1 %780  ;;  %v12203_v14 = vpop.permute.xlu0 %775 }
 0x1ec   : > { %1100 = vperm.xlu1 %8647, %v16077_v23   ;;  %1095 = vperm.xlu0 %8646, %v16080_v24   ;;  %v16085_v24 = vld [vmem:[#allocation42_spill] sm:$0xff] }
 0x1ed   : > { %7869 = vmatmul.mubr.msk.bf16.gmra.mrb[76].mxu0 %vm2613_vm1, %v7740_v11  ;;  %v7741_v15 = vcombine.low %v16085_v24, %v16084_v18  ;;  %v16090_v18 = vld [vmem:[#allocation45_spill] sm:$0xff] }
 0x1ee   : > { %3237 = vmatprep.mubr.bf16.mxu0 %v15059_v19 }
 0x1ef   : > { %v12209_v25 = vpop.permute.xlu1 %790  ;;  %v12211_v7 = vpop.permute.xlu0 %785 }
 0x1f0   : > { %1110 = vperm.xlu1 %8647, %v16081_v22   ;;  %1105 = vperm.xlu0 %8646, %v16082_v4   ;;  %v16087_v22 = vld [vmem:[#allocation345_spill] sm:$0xff]  ;;  %v16088_v4 = vld [vmem:[#allocation344_spill] sm:$0xff] }
 0x1f3   : > { %v12217_v26 = vpop.permute.xlu1 %800  ;;  %v12219_v23 = vpop.permute.xlu0 %795 }
 0x1f4   : > { %1120 = vperm.xlu1 %8647, %v16083_v27   ;;  %1115 = vperm.xlu0 %8646, %v16086_v28   ;;  %v16091_v28 = vld [vmem:[#allocation44_spill] sm:$0xff] }
 0x1f5   : > { %7870 = vmatmul.mubr.msk.bf16.gmra.mrb[80].mxu0 %vm2613_vm1, %v7741_v15  ;;  %v7742_v24 = vcombine.low %v16091_v28, %v16090_v18  ;;  %v16096_v18 = vld [vmem:[#allocation47_spill] sm:$0xff] }
 0x1f6   : > { %3247 = vmatprep.mubr.bf16.mxu0 %v15059_v19 }
 0x1f7   : > { %v12225_v29 = vpop.permute.xlu1 %810  ;;  %v12227_v11 = vpop.permute.xlu0 %805 }
 0x1f8   : > { %1130 = vperm.xlu1 %8647, %v16087_v22   ;;  %1125 = vperm.xlu0 %8646, %v16088_v4   ;;  %v16093_v22 = vld [vmem:[#allocation349_spill] sm:$0xff]  ;;  %v16094_v4 = vld [vmem:[#allocation348_spill] sm:$0xff] }
 0x1fb   : > { %v12233_v30 = vpop.permute.xlu1 %820  ;;  %v12235_v27 = vpop.permute.xlu0 %815 }
 0x1fc   : > { %1140 = vperm.xlu1 %8647, %v16089_v31   ;;  %1135 = vperm.xlu0 %8646, %v16092_v32   ;;  %v16097_v32 = vld [vmem:[#allocation46_spill] sm:$0xff] }
 0x1fd   : > { %7871 = vmatmul.mubr.msk.bf16.gmra.mrb[84].mxu0 %vm2613_vm1, %v7742_v24  ;;  %v7743_v28 = vcombine.low %v16097_v32, %v16096_v18  ;;  %v16102_v18 = vld [vmem:[#allocation49_spill] sm:$0xff] }
 0x1fe   : > { %3257 = vmatprep.mubr.bf16.mxu0 %v15059_v19 }
 0x1ff   : > { %v12241_v33 = vpop.permute.xlu1 %830  ;;  %v12243_v15 = vpop.permute.xlu0 %825 }
 0x200   : > { %1150 = vperm.xlu1 %8647, %v16093_v22   ;;  %1145 = vperm.xlu0 %8646, %v16094_v4   ;;  %v16099_v22 = vld [vmem:[#allocation353_spill] sm:$0xff]  ;;  %v16100_v4 = vld [vmem:[#allocation352_spill] sm:$0xff] }
 0x203   : > { %v12249_v34 = vpop.permute.xlu1 %840  ;;  %v12251_v31 = vpop.permute.xlu0 %835 }
 0x204   : > { %1160 = vperm.xlu1 %8647, %v16095_v35   ;;  %1155 = vperm.xlu0 %8646, %v16098_v36   ;;  %v16103_v36 = vld [vmem:[#allocation48_spill] sm:$0xff] }
 0x205   : > { %7872 = vmatmul.mubr.msk.bf16.gmra.mrb[88].mxu0 %vm2613_vm1, %v7743_v28  ;;  %v7744_v32 = vcombine.low %v16103_v36, %v16102_v18  ;;  %v16108_v18 = vld [vmem:[#allocation51_spill] sm:$0xff] }
 0x206   : > { %3267 = vmatprep.mubr.bf16.mxu0 %v15059_v19 }
 0x207   : > { %v12257_v37 = vpop.permute.xlu1 %850  ;;  %v12259_v24 = vpop.permute.xlu0 %845 }
 0x208   : > { %1170 = vperm.xlu1 %8647, %v16099_v22   ;;  %1165 = vperm.xlu0 %8646, %v16100_v4   ;;  %v16105_v22 = vld [vmem:[#allocation357_spill] sm:$0xff]  ;;  %v16106_v4 = vld [vmem:[#allocation356_spill] sm:$0xff] }
 0x20b   : > { %v12265_v38 = vpop.permute.xlu1 %860  ;;  %v12267_v35 = vpop.permute.xlu0 %855 }
 0x20c   : > { %1180 = vperm.xlu1 %8647, %v16101_v39   ;;  %1175 = vperm.xlu0 %8646, %v16104_v40   ;;  %v16109_v40 = vld [vmem:[#allocation50_spill] sm:$0xff] }
 0x20d   : > { %7873 = vmatmul.mubr.msk.bf16.gmra.mrb[92].mxu0 %vm2613_vm1, %v7744_v32  ;;  %v7745_v36 = vcombine.low %v16109_v40, %v16108_v18  ;;  %v16114_v18 = vld [vmem:[#allocation53_spill] sm:$0xff] }
 0x20e   : > { %3277 = vmatprep.mubr.bf16.mxu0 %v15059_v19 }
 0x20f   : > { %v12273_v41 = vpop.permute.xlu1 %870  ;;  %v12275_v28 = vpop.permute.xlu0 %865 }
 0x210   : > { %1190 = vperm.xlu1 %8647, %v16105_v22   ;;  %1185 = vperm.xlu0 %8646, %v16106_v4   ;;  %v16111_v22 = vld [vmem:[#allocation361_spill] sm:$0xff]  ;;  %v16112_v4 = vld [vmem:[#allocation360_spill] sm:$0xff] }
 0x213   : > { %v12281_v42 = vpop.permute.xlu1 %880  ;;  %v12283_v39 = vpop.permute.xlu0 %875 }
 0x214   : > { %1200 = vperm.xlu1 %8647, %v16107_v43   ;;  %1195 = vperm.xlu0 %8646, %v16110_v44   ;;  %v16115_v44 = vld [vmem:[#allocation52_spill] sm:$0xff] }
 0x215   : > { %7874 = vmatmul.mubr.msk.bf16.gmra.mrb[96].mxu0 %vm2613_vm1, %v7745_v36  ;;  %v7746_v40 = vcombine.low %v16115_v44, %v16114_v18  ;;  %v16120_v18 = vld [vmem:[#allocation55_spill] sm:$0xff] }
 0x216   : > { %3287 = vmatprep.mubr.bf16.mxu0 %v15059_v19 }
 0x217   : > { %v12289_v45 = vpop.permute.xlu1 %890  ;;  %v12291_v32 = vpop.permute.xlu0 %885 }
 0x218   : > { %1210 = vperm.xlu1 %8647, %v16111_v22   ;;  %1205 = vperm.xlu0 %8646, %v16112_v4   ;;  %v16117_v22 = vld [vmem:[#allocation365_spill] sm:$0xff]  ;;  %v16118_v4 = vld [vmem:[#allocation364_spill] sm:$0xff] }
 0x21b   : > { %v12297_v46 = vpop.permute.xlu1 %900  ;;  %v12299_v43 = vpop.permute.xlu0 %895 }
 0x21c   : > { %1220 = vperm.xlu1 %8647, %v16113_v47   ;;  %1215 = vperm.xlu0 %8646, %v16116_v48   ;;  %v16121_v48 = vld [vmem:[#allocation54_spill] sm:$0xff] }
 0x21d   : > { %7875 = vmatmul.mubr.msk.bf16.gmra.mrb[100].mxu0 %vm2613_vm1, %v7746_v40  ;;  %v7747_v44 = vcombine.low %v16121_v48, %v16120_v18  ;;  %v16128_v48 = vld [vmem:[#allocation371_spill] sm:$0xff] }
 0x21e   : > { %3297 = vmatprep.mubr.bf16.mxu0 %v15059_v19 }
 0x21f   : > { %v12305_v49 = vpop.permute.xlu1 %910  ;;  %v12307_v36 = vpop.permute.xlu0 %905 }
 0x220   : > { %1230 = vperm.xlu1 %8647, %v16117_v22   ;;  %1225 = vperm.xlu0 %8646, %v16118_v4   ;;  %v16124_v22 = vld [vmem:[#allocation369_spill] sm:$0xff]  ;;  %v16125_v4 = vld [vmem:[#allocation368_spill] sm:$0xff] }
 0x223   : > { %v12313_v50 = vpop.permute.xlu1 %920  ;;  %v12315_v47 = vpop.permute.xlu0 %915 }
 0x224   : > { %1240 = vperm.xlu1 %8647, %v16119_v51   ;;  %1235 = vperm.xlu0 %8646, %v16122_v52  }
 0x225   : > { %7876 = vmatmul.mubr.msk.bf16.gmra.mrb[104].mxu0 %vm2613_vm1, %v7747_v44  ;;  %v16131_v44 = vld [vmem:[#allocation370_spill] sm:$0xff] }
 0x226   : > { %3307 = vmatprep.mubr.bf16.mxu0 %v15059_v19 }
 0x227   : > { %v12321_v53 = vpop.permute.xlu1 %930  ;;  %v12323_v40 = vpop.permute.xlu0 %925 }
 0x228   : > { %16123 = vst [vmem:[#allocation658_spill] sm:$0xff] %v12321_v53  ;;  %1250 = vperm.xlu1 %8647, %v16124_v22   ;;  %1245 = vperm.xlu0 %8646, %v16125_v4   ;;  %v3039_v54 = vpop.f32.mrb[0].mxu0 }
 0x229   : > { %v3040_v51 = vadd.f32 %v3039_v54, %v12139_v0  ;;  %v3041_v52 = vpop.f32.mrb[1].mxu0 }
 0x22a   : > { %v3043_v22 = vpop.f32.mrb[2].mxu0  ;;  %v3042_v4 = vadd.f32 %v3041_v52, %v12139_v0  ;;  %v16136_v0 = vmov 0  }
 0x22b   : > { %v12329_v55 = vpop.permute.xlu1 %940  ;;  %v12332_v18 = vpop.permute.xlu0 %935  ;;  %v3044_v19 = vadd.f32 %v3043_v22, %v12147_v63  ;;  %v4318_v62 = vmax.f32 %v3040_v51, 0.0  ;;  %v16138_v51 = vld [vmem:[#allocation375_spill] sm:$0xff] }
 0x22c   : > { %16126 = vst [vmem:[#allocation659_spill] sm:$0xff] %v12329_v55  ;;  %16127 = vst [vmem:[#allocation660_spill] sm:$0xff] %v12332_v18  ;;  %1260 = vperm.xlu1 %8647, %v16128_v48   ;;  %1255 = vperm.xlu0 %8646, %v16131_v44   ;;  %v3045_v59 = vpop.f32.mrb[3].mxu0  ;;  %v16134_v48 = vld [vmem:[#allocation373_spill] sm:$0xff]  ;;  %v4319_v57 = vmax.f32 %v3042_v4, 0.0 }
 0x22d   : > { %v3046_v54 = vadd.f32 %v3045_v59, %v12147_v63  ;;  %v4320_v55 = vmax.f32 %v3044_v19, 0.0  ;;  %7877 = vmatmul.mubr.msk.bf16.gmra.mrb[108].mxu0 %vm2613_vm1, %v7748_v58  ;;  %v16139_v58 = vld [vmem:[#allocation59_spill] sm:$0xff] }
 0x22e   : > { %3317 = vmatprep.mubr.bf16.mxu0 %v16136_v0 }
 0x22f   : > { %v12340_v60 = vpop.permute.xlu1 %950  ;;  %v12343_v18 = vpop.permute.xlu0 %945  ;;  %v4321_v44 = vmax.f32 %v3046_v54, 0.0  ;;  %v4830_v52 = vpack.c.bf16 %v4320_v55, %v4318_v62  ;;  %v16141_v54 = vld [vmem:[#allocation374_spill] sm:$0xff] }
 0x230   : > { %16132 = vst [vmem:[#allocation661_spill] sm:$0xff] %v12340_v60  ;;  %16133 = vst [vmem:[#allocation662_spill] sm:$0xff] %v12343_v18  ;;  %1270 = vperm.xlu1 %8647, %v16134_v48   ;;  %1265 = vperm.xlu0 %8646, %v16135_v56   ;;  %v3049_v22 = vpop.f32.mrb[4].mxu0  ;;  %v16140_v48 = vld [vmem:[#allocation58_spill] sm:$0xff] }
 0x231   : > { %v4831_v60 = vpack.c.bf16 %v4321_v44, %v4319_v57  ;;  %v3050_v59 = vadd.f32 %v3049_v22, %v12137_v20  ;;  %v3051_v63 = vpop.f32.mrb[5].mxu0  ;;  %v7749_v18 = vcombine.low %v16140_v48, %v16139_v58  ;;  %v16143_v58 = vld [vmem:[#allocation377_spill] sm:$0xff]  ;;  %v16144_v48 = vld [vmem:[#allocation376_spill] sm:$0xff] }
 0x232   : > { %v3052_v4 = vadd.f32 %v3051_v63, %v12137_v20  ;;  %v3053_v56 = vpop.f32.mrb[6].mxu0 }
 0x233   : > { %v12349_v53 = vpop.permute.xlu1 %960  ;;  %v12352_v19 = vpop.permute.xlu0 %955  ;;  %5118 = vmatprep.mubr.bf16.mxu1 %v4831_v60  ;;  %v3054_v55 = vadd.f32 %v3053_v56, %v12145_v2  ;;  %v4322_v22 = vmax.f32 %v3050_v59, 0.0 }
 0x234   : > { %16137 = vst [vmem:[#allocation663_spill] sm:$0xff] %v12349_v53  ;;  %1280 = vperm.xlu1 %8647, %v16138_v51   ;;  %1275 = vperm.xlu0 %8646, %v16141_v54   ;;  %v3055_v62 = vpop.f32.mrb[7].mxu0  ;;  %v4323_v20 = vmax.f32 %v3052_v4, 0.0 }
 0x235   : > { %5119 = vmatmul.mubr.bf16.vlgmr.msra.gmra.mrb[0].mxu1 %v4830_v52  ;;  %v3056_v57 = vadd.f32 %v3055_v62, %v12145_v2  ;;  %v4324_v53 = vmax.f32 %v3054_v55, 0.0  ;;  %7878 = vmatmul.mubr.msk.bf16.gmra.mrb[112].mxu0 %vm2613_vm1, %v7749_v18  ;;  %v16146_v62 = vld [vmem:[#allocation379_spill] sm:$0xff]  ;;  %v16147_v18 = vld [vmem:[#allocation61_spill] sm:$0xff] }
 0x236   : > { %3327 = vmatprep.mubr.bf16.mxu0 %v16136_v0 }
 0x237   : > { %v12361_v44 = vpop.permute.xlu1 %970  ;;  %v12363_v51 = vpop.permute.xlu0 %965  ;;  %v4325_v63 = vmax.f32 %v3056_v57, 0.0  ;;  %v4832_v60 = vpack.c.bf16 %v4324_v53, %v4322_v22 }
 0x238   : > { %16142 = vst [vmem:[#allocation664_spill] sm:$0xff] %v12361_v44  ;;  %1290 = vperm.xlu1 %8647, %v16143_v58   ;;  %1285 = vperm.xlu0 %8646, %v16144_v48   ;;  %v3059_v52 = vpop.f32.mrb[8].mxu0  ;;  %v16148_v58 = vld [vmem:[#allocation60_spill] sm:$0xff]  ;;  %v16149_v48 = vld [vmem:[#allocation378_spill] sm:$0xff] }
 0x239   : > { %v4833_v2 = vpack.c.bf16 %v4325_v63, %v4323_v20  ;;  %v3060_v59 = vadd.f32 %v3059_v52, %v12155_v61  ;;  %v3061_v55 = vpop.f32.mrb[9].mxu0  ;;  %v7750_v4 = vcombine.low %v16148_v58, %v16147_v18  ;;  %v16151_v18 = vld [vmem:[#allocation381_spill] sm:$0xff]  ;;  %v16152_v58 = vld [vmem:[#allocation380_spill] sm:$0xff] }
 0x23a   : > { %v3062_v57 = vadd.f32 %v3061_v55, %v12155_v61  ;;  %v3063_v44 = vpop.f32.mrb[10].mxu0 }
 0x23b   : > { %v12369_v54 = vpop.permute.xlu1 %980  ;;  %v12372_v56 = vpop.permute.xlu0 %975  ;;  %5126 = vmatprep.mubr.bf16.mxu1 %v4833_v2  ;;  %v3064_v53 = vadd.f32 %v3063_v44, %v12153_v5  ;;  %v4326_v52 = vmax.f32 %v3060_v59, 0.0 }
 0x23c   : > { %16145 = vst [vmem:[#allocation665_spill] sm:$0xff] %v12369_v54  ;;  %1300 = vperm.xlu1 %8647, %v16146_v62   ;;  %1295 = vperm.xlu0 %8646, %v16149_v48   ;;  %v3065_v22 = vpop.f32.mrb[11].mxu0  ;;  %v4327_v61 = vmax.f32 %v3062_v57, 0.0 }
 0x23d   : > { %5127 = vmatmul.mubr.bf16.gmra.mrb[4].mxu1 %v4832_v60  ;;  %v3066_v20 = vadd.f32 %v3065_v22, %v12153_v5  ;;  %v4328_v54 = vmax.f32 %v3064_v53, 0.0  ;;  %7879 = vmatmul.mubr.msk.bf16.gmra.mrb[116].mxu0 %vm2613_vm1, %v7750_v4  ;;  %v16154_v22 = vld [vmem:[#allocation383_spill] sm:$0xff] }
 0x23e   : > { %3337 = vmatprep.mubr.bf16.mxu0 %v16136_v0  ;;  %v16155_v4 = vld [vmem:[#allocation63_spill] sm:$0xff] }
 0x23f   : > { %v12381_v63 = vpop.permute.xlu1 %990  ;;  %v12383_v62 = vpop.permute.xlu0 %985  ;;  %v4329_v55 = vmax.f32 %v3066_v20, 0.0  ;;  %v4834_v44 = vpack.c.bf16 %v4328_v54, %v4326_v52 }
 0x240   : > { %16150 = vst [vmem:[#allocation666_spill] sm:$0xff] %v12381_v63  ;;  %1310 = vperm.xlu1 %8647, %v16151_v18   ;;  %1305 = vperm.xlu0 %8646, %v16152_v58   ;;  %v3069_v60 = vpop.f32.mrb[12].mxu0  ;;  %v16156_v18 = vld [vmem:[#allocation62_spill] sm:$0xff] }
 0x241   : > { %v4835_v5 = vpack.c.bf16 %v4329_v55, %v4327_v61  ;;  %v3070_v59 = vadd.f32 %v3069_v60, %v12163_v3  ;;  %v3071_v53 = vpop.f32.mrb[13].mxu0  ;;  %v7751_v57 = vcombine.low %v16156_v18, %v16155_v4  ;;  %v16157_v58 = vld [vmem:[#allocation382_spill] sm:$0xff]  ;;  %v16159_v4 = vld [vmem:[#allocation385_spill] sm:$0xff]  ;;  %v16160_v18 = vld [vmem:[#allocation384_spill] sm:$0xff] }
 0x242   : > { %v3072_v20 = vadd.f32 %v3071_v53, %v12163_v3  ;;  %v3073_v63 = vpop.f32.mrb[14].mxu0 }
 0x243   : > { %v12389_v2 = vpop.permute.xlu1 %1000  ;;  %v12392_v48 = vpop.permute.xlu0 %995  ;;  %5134 = vmatprep.mubr.bf16.mxu1 %v4835_v5  ;;  %v3074_v54 = vadd.f32 %v3073_v63, %v12161_v8  ;;  %v4330_v60 = vmax.f32 %v3070_v59, 0.0 }
 0x244   : > { %16153 = vst [vmem:[#allocation667_spill] sm:$0xff] %v12389_v2  ;;  %1320 = vperm.xlu1 %8647, %v16154_v22   ;;  %1315 = vperm.xlu0 %8646, %v16157_v58   ;;  %v3075_v52 = vpop.f32.mrb[15].mxu0  ;;  %v4331_v3 = vmax.f32 %v3072_v20, 0.0 }
 0x245   : > { %5135 = vmatmul.mubr.bf16.gmra.mrb[8].mxu1 %v4834_v44  ;;  %v3076_v61 = vadd.f32 %v3075_v52, %v12161_v8  ;;  %v4332_v2 = vmax.f32 %v3074_v54, 0.0  ;;  %7880 = vmatmul.mubr.msk.bf16.gmra.mrb[120].mxu0 %vm2613_vm1, %v7751_v57  ;;  %v16162_v52 = vld [vmem:[#allocation387_spill] sm:$0xff]  ;;  %v16163_v57 = vld [vmem:[#allocation65_spill] sm:$0xff] }
 0x246   : > { %3347 = vmatprep.mubr.bf16.mxu0 %v16136_v0 }
 0x247   : > { %v12401_v55 = vpop.permute.xlu1 %1010  ;;  %v12403_v22 = vpop.permute.xlu0 %1005  ;;  %v4333_v53 = vmax.f32 %v3076_v61, 0.0  ;;  %v4836_v63 = vpack.c.bf16 %v4332_v2, %v4330_v60 }
 0x248   : > { %16158 = vst [vmem:[#allocation668_spill] sm:$0xff] %v12401_v55  ;;  %1330 = vperm.xlu1 %8647, %v16159_v4   ;;  %1325 = vperm.xlu0 %8646, %v16160_v18   ;;  %v3079_v44 = vpop.f32.mrb[16].mxu0  ;;  %v16164_v4 = vld [vmem:[#allocation64_spill] sm:$0xff]  ;;  %v16165_v18 = vld [vmem:[#allocation386_spill] sm:$0xff] }
 0x249   : > { %v4837_v8 = vpack.c.bf16 %v4333_v53, %v4331_v3  ;;  %v3080_v59 = vadd.f32 %v3079_v44, %v12171_v6  ;;  %v3081_v54 = vpop.f32.mrb[17].mxu0  ;;  %v7752_v20 = vcombine.low %v16164_v4, %v16163_v57  ;;  %v16167_v57 = vld [vmem:[#allocation389_spill] sm:$0xff]  ;;  %v16168_v4 = vld [vmem:[#allocation388_spill] sm:$0xff] }
 0x24a   : > { %v3082_v61 = vadd.f32 %v3081_v54, %v12171_v6  ;;  %v3083_v55 = vpop.f32.mrb[18].mxu0 }
 0x24b   : > { %v12409_v5 = vpop.permute.xlu1 %1020  ;;  %v12412_v58 = vpop.permute.xlu0 %1015  ;;  %5142 = vmatprep.mubr.bf16.mxu1 %v4837_v8  ;;  %v3084_v2 = vadd.f32 %v3083_v55, %v12169_v9  ;;  %v4334_v44 = vmax.f32 %v3080_v59, 0.0 }
 0x24c   : > { %16161 = vst [vmem:[#allocation669_spill] sm:$0xff] %v12409_v5  ;;  %1340 = vperm.xlu1 %8647, %v16162_v52   ;;  %1335 = vperm.xlu0 %8646, %v16165_v18   ;;  %v3085_v60 = vpop.f32.mrb[19].mxu0  ;;  %v4335_v6 = vmax.f32 %v3082_v61, 0.0 }
 0x24d   : > { %5143 = vmatmul.mubr.bf16.gmra.mrb[12].mxu1 %v4836_v63  ;;  %v3086_v3 = vadd.f32 %v3085_v60, %v12169_v9  ;;  %v4336_v5 = vmax.f32 %v3084_v2, 0.0  ;;  %7881 = vmatmul.mubr.msk.bf16.gmra.mrb[124].mxu0 %vm2613_vm1, %v7752_v20  ;;  %v16170_v60 = vld [vmem:[#allocation391_spill] sm:$0xff] }
 0x24e   : > { %3357 = vmatprep.mubr.bf16.mxu0 %v16136_v0  ;;  %v16171_v20 = vld [vmem:[#allocation67_spill] sm:$0xff] }
 0x24f   : > { %v12421_v53 = vpop.permute.xlu1 %1030  ;;  %v12423_v52 = vpop.permute.xlu0 %1025  ;;  %v4337_v54 = vmax.f32 %v3086_v3, 0.0  ;;  %v4838_v55 = vpack.c.bf16 %v4336_v5, %v4334_v44 }
 0x250   : > { %16166 = vst [vmem:[#allocation670_spill] sm:$0xff] %v12421_v53  ;;  %1350 = vperm.xlu1 %8647, %v16167_v57   ;;  %1345 = vperm.xlu0 %8646, %v16168_v4   ;;  %v3089_v63 = vpop.f32.mrb[20].mxu0  ;;  %v16172_v57 = vld [vmem:[#allocation66_spill] sm:$0xff] }
 0x251   : > { %v4839_v9 = vpack.c.bf16 %v4337_v54, %v4335_v6  ;;  %v3090_v59 = vadd.f32 %v3089_v63, %v12179_v21  ;;  %v3091_v2 = vpop.f32.mrb[21].mxu0  ;;  %v7753_v61 = vcombine.low %v16172_v57, %v16171_v20  ;;  %v16173_v4 = vld [vmem:[#allocation390_spill] sm:$0xff]  ;;  %v16175_v20 = vld [vmem:[#allocation393_spill] sm:$0xff]  ;;  %v16176_v57 = vld [vmem:[#allocation392_spill] sm:$0xff] }
 0x252   : > { %v3092_v3 = vadd.f32 %v3091_v2, %v12179_v21  ;;  %v3093_v53 = vpop.f32.mrb[22].mxu0 }
 0x253   : > { %v12429_v8 = vpop.permute.xlu1 %1040  ;;  %v12432_v18 = vpop.permute.xlu0 %1035  ;;  %5150 = vmatprep.mubr.bf16.mxu1 %v4839_v9  ;;  %v3094_v5 = vadd.f32 %v3093_v53, %v12177_v12  ;;  %v4338_v63 = vmax.f32 %v3090_v59, 0.0 }
 0x254   : > { %16169 = vst [vmem:[#allocation671_spill] sm:$0xff] %v12429_v8  ;;  %1360 = vperm.xlu1 %8647, %v16170_v60   ;;  %1355 = vperm.xlu0 %8646, %v16173_v4   ;;  %v3095_v44 = vpop.f32.mrb[23].mxu0  ;;  %v4339_v21 = vmax.f32 %v3092_v3, 0.0 }
 0x255   : > { %5151 = vmatmul.mubr.bf16.gmra.mrb[16].mxu1 %v4838_v55  ;;  %v3096_v6 = vadd.f32 %v3095_v44, %v12177_v12  ;;  %v4340_v8 = vmax.f32 %v3094_v5, 0.0  ;;  %7882 = vmatmul.mubr.msk.bf16.gmra.mrb[128].mxu0 %vm2613_vm1, %v7753_v61  ;;  %v16178_v44 = vld [vmem:[#allocation395_spill] sm:$0xff]  ;;  %v16179_v61 = vld [vmem:[#allocation69_spill] sm:$0xff] }
 0x256   : > { %3367 = vmatprep.mubr.bf16.mxu0 %v16136_v0 }
 0x257   : > { %v12441_v54 = vpop.permute.xlu1 %1050  ;;  %v12443_v60 = vpop.permute.xlu0 %1045  ;;  %v4341_v2 = vmax.f32 %v3096_v6, 0.0  ;;  %v4840_v53 = vpack.c.bf16 %v4340_v8, %v4338_v63 }
 0x258   : > { %16174 = vst [vmem:[#allocation672_spill] sm:$0xff] %v12441_v54  ;;  %1370 = vperm.xlu1 %8647, %v16175_v20   ;;  %1365 = vperm.xlu0 %8646, %v16176_v57   ;;  %v3099_v55 = vpop.f32.mrb[24].mxu0  ;;  %v16180_v20 = vld [vmem:[#allocation68_spill] sm:$0xff]  ;;  %v16181_v57 = vld [vmem:[#allocation394_spill] sm:$0xff] }
 0x259   : > { %v4841_v12 = vpack.c.bf16 %v4341_v2, %v4339_v21  ;;  %v3100_v59 = vadd.f32 %v3099_v55, %v12187_v10  ;;  %v3101_v5 = vpop.f32.mrb[25].mxu0  ;;  %v7754_v3 = vcombine.low %v16180_v20, %v16179_v61  ;;  %v16183_v61 = vld [vmem:[#allocation397_spill] sm:$0xff]  ;;  %v16184_v20 = vld [vmem:[#allocation396_spill] sm:$0xff] }
 0x25a   : > { %v3102_v6 = vadd.f32 %v3101_v5, %v12187_v10  ;;  %v3103_v54 = vpop.f32.mrb[26].mxu0 }
 0x25b   : > { %v12449_v9 = vpop.permute.xlu1 %1060  ;;  %v12452_v4 = vpop.permute.xlu0 %1055  ;;  %5158 = vmatprep.mubr.bf16.mxu1 %v4841_v12  ;;  %v3104_v8 = vadd.f32 %v3103_v54, %v12185_v13  ;;  %v4342_v55 = vmax.f32 %v3100_v59, 0.0 }
 0x25c   : > { %16177 = vst [vmem:[#allocation673_spill] sm:$0xff] %v12449_v9  ;;  %1380 = vperm.xlu1 %8647, %v16178_v44   ;;  %1375 = vperm.xlu0 %8646, %v16181_v57   ;;  %v3105_v63 = vpop.f32.mrb[27].mxu0  ;;  %v4343_v10 = vmax.f32 %v3102_v6, 0.0 }
 0x25d   : > { %5159 = vmatmul.mubr.bf16.gmra.mrb[20].mxu1 %v4840_v53  ;;  %v3106_v21 = vadd.f32 %v3105_v63, %v12185_v13  ;;  %v4344_v9 = vmax.f32 %v3104_v8, 0.0  ;;  %7883 = vmatmul.mubr.msk.bf16.gmra.mrb[132].mxu0 %vm2613_vm1, %v7754_v3  ;;  %v16186_v63 = vld [vmem:[#allocation399_spill] sm:$0xff] }
 0x25e   : > { %3377 = vmatprep.mubr.bf16.mxu0 %v16136_v0  ;;  %v16187_v3 = vld [vmem:[#allocation71_spill] sm:$0xff] }
 0x25f   : > { %v12461_v2 = vpop.permute.xlu1 %1070  ;;  %v12463_v44 = vpop.permute.xlu0 %1065  ;;  %v4345_v5 = vmax.f32 %v3106_v21, 0.0  ;;  %v4842_v54 = vpack.c.bf16 %v4344_v9, %v4342_v55 }
 0x260   : > { %16182 = vst [vmem:[#allocation674_spill] sm:$0xff] %v12461_v2  ;;  %1390 = vperm.xlu1 %8647, %v16183_v61   ;;  %1385 = vperm.xlu0 %8646, %v16184_v20   ;;  %v3109_v53 = vpop.f32.mrb[28].mxu0  ;;  %v16188_v61 = vld [vmem:[#allocation70_spill] sm:$0xff] }
 0x261   : > { %v4843_v13 = vpack.c.bf16 %v4345_v5, %v4343_v10  ;;  %v3110_v59 = vadd.f32 %v3109_v53, %v12195_v1  ;;  %v3111_v8 = vpop.f32.mrb[29].mxu0  ;;  %v7755_v6 = vcombine.low %v16188_v61, %v16187_v3  ;;  %v16189_v20 = vld [vmem:[#allocation398_spill] sm:$0xff]  ;;  %v16191_v3 = vld [vmem:[#allocation401_spill] sm:$0xff]  ;;  %v16192_v61 = vld [vmem:[#allocation400_spill] sm:$0xff] }
 0x262   : > { %v3112_v21 = vadd.f32 %v3111_v8, %v12195_v1  ;;  %v3113_v2 = vpop.f32.mrb[30].mxu0 }
 0x263   : > { %v12469_v12 = vpop.permute.xlu1 %1080  ;;  %v12472_v57 = vpop.permute.xlu0 %1075  ;;  %5166 = vmatprep.mubr.bf16.mxu1 %v4843_v13  ;;  %v3114_v9 = vadd.f32 %v3113_v2, %v12193_v16  ;;  %v4346_v53 = vmax.f32 %v3110_v59, 0.0 }
 0x264   : > { %16185 = vst [vmem:[#allocation675_spill] sm:$0xff] %v12469_v12  ;;  %1400 = vperm.xlu1 %8647, %v16186_v63   ;;  %1395 = vperm.xlu0 %8646, %v16189_v20   ;;  %v3115_v55 = vpop.f32.mrb[31].mxu0  ;;  %v4347_v1 = vmax.f32 %v3112_v21, 0.0 }
 0x265   : > { %5167 = vmatmul.mubr.bf16.gmra.mrb[24].mxu1 %v4842_v54  ;;  %v3116_v10 = vadd.f32 %v3115_v55, %v12193_v16  ;;  %v4348_v12 = vmax.f32 %v3114_v9, 0.0  ;;  %7884 = vmatmul.mubr.msk.bf16.gmra.mrb[136].mxu0 %vm2613_vm1, %v7755_v6  ;;  %v16194_v55 = vld [vmem:[#allocation403_spill] sm:$0xff]  ;;  %v16195_v6 = vld [vmem:[#allocation73_spill] sm:$0xff] }
 0x266   : > { %3387 = vmatprep.mubr.bf16.mxu0 %v16136_v0 }
 0x267   : > { %v12481_v5 = vpop.permute.xlu1 %1090  ;;  %v12483_v63 = vpop.permute.xlu0 %1085  ;;  %v4349_v8 = vmax.f32 %v3116_v10, 0.0  ;;  %v4844_v2 = vpack.c.bf16 %v4348_v12, %v4346_v53 }
 0x268   : > { %16190 = vst [vmem:[#allocation676_spill] sm:$0xff] %v12481_v5  ;;  %1410 = vperm.xlu1 %8647, %v16191_v3   ;;  %1405 = vperm.xlu0 %8646, %v16192_v61   ;;  %v3119_v54 = vpop.f32.mrb[32].mxu0  ;;  %v16196_v3 = vld [vmem:[#allocation72_spill] sm:$0xff]  ;;  %v16197_v61 = vld [vmem:[#allocation402_spill] sm:$0xff] }
 0x269   : > { %v4845_v16 = vpack.c.bf16 %v4349_v8, %v4347_v1  ;;  %v3120_v59 = vadd.f32 %v3119_v54, %v12203_v14  ;;  %v3121_v9 = vpop.f32.mrb[33].mxu0  ;;  %v7756_v21 = vcombine.low %v16196_v3, %v16195_v6  ;;  %v16199_v6 = vld [vmem:[#allocation405_spill] sm:$0xff]  ;;  %v16200_v3 = vld [vmem:[#allocation404_spill] sm:$0xff] }
 0x26a   : > { %v3122_v10 = vadd.f32 %v3121_v9, %v12203_v14  ;;  %v3123_v5 = vpop.f32.mrb[34].mxu0 }
 0x26b   : > { %v12489_v13 = vpop.permute.xlu1 %1100  ;;  %v12492_v20 = vpop.permute.xlu0 %1095  ;;  %5174 = vmatprep.mubr.bf16.mxu1 %v4845_v16  ;;  %v3124_v12 = vadd.f32 %v3123_v5, %v12201_v17  ;;  %v4350_v54 = vmax.f32 %v3120_v59, 0.0 }
 0x26c   : > { %16193 = vst [vmem:[#allocation677_spill] sm:$0xff] %v12489_v13  ;;  %1420 = vperm.xlu1 %8647, %v16194_v55   ;;  %1415 = vperm.xlu0 %8646, %v16197_v61   ;;  %v3125_v53 = vpop.f32.mrb[35].mxu0  ;;  %v4351_v14 = vmax.f32 %v3122_v10, 0.0 }
 0x26d   : > { %5175 = vmatmul.mubr.bf16.gmra.mrb[28].mxu1 %v4844_v2  ;;  %v3126_v1 = vadd.f32 %v3125_v53, %v12201_v17  ;;  %v4352_v13 = vmax.f32 %v3124_v12, 0.0  ;;  %7885 = vmatmul.mubr.msk.bf16.gmra.mrb[140].mxu0 %vm2613_vm1, %v7756_v21  ;;  %v16202_v53 = vld [vmem:[#allocation407_spill] sm:$0xff] }
 0x26e   : > { %3397 = vmatprep.mubr.bf16.mxu0 %v16136_v0  ;;  %v16203_v21 = vld [vmem:[#allocation75_spill] sm:$0xff] }
 0x26f   : > { %v12501_v8 = vpop.permute.xlu1 %1110  ;;  %v12503_v55 = vpop.permute.xlu0 %1105  ;;  %v4353_v9 = vmax.f32 %v3126_v1, 0.0  ;;  %v4846_v5 = vpack.c.bf16 %v4352_v13, %v4350_v54 }
 0x270   : > { %16198 = vst [vmem:[#allocation678_spill] sm:$0xff] %v12501_v8  ;;  %1430 = vperm.xlu1 %8647, %v16199_v6   ;;  %1425 = vperm.xlu0 %8646, %v16200_v3   ;;  %v3129_v2 = vpop.f32.mrb[36].mxu0  ;;  %v16204_v6 = vld [vmem:[#allocation74_spill] sm:$0xff] }
 0x271   : > { %v4847_v17 = vpack.c.bf16 %v4353_v9, %v4351_v14  ;;  %v3130_v59 = vadd.f32 %v3129_v2, %v12211_v7  ;;  %v3131_v12 = vpop.f32.mrb[37].mxu0  ;;  %v7757_v10 = vcombine.low %v16204_v6, %v16203_v21  ;;  %v16205_v3 = vld [vmem:[#allocation406_spill] sm:$0xff]  ;;  %v16207_v21 = vld [vmem:[#allocation409_spill] sm:$0xff]  ;;  %v16208_v6 = vld [vmem:[#allocation408_spill] sm:$0xff] }
 0x272   : > { %v3132_v1 = vadd.f32 %v3131_v12, %v12211_v7  ;;  %v3133_v8 = vpop.f32.mrb[38].mxu0 }
 0x273   : > { %v12509_v16 = vpop.permute.xlu1 %1120  ;;  %v12512_v61 = vpop.permute.xlu0 %1115  ;;  %5182 = vmatprep.mubr.bf16.mxu1 %v4847_v17  ;;  %v3134_v13 = vadd.f32 %v3133_v8, %v12209_v25  ;;  %v4354_v2 = vmax.f32 %v3130_v59, 0.0 }
 0x274   : > { %16201 = vst [vmem:[#allocation679_spill] sm:$0xff] %v12509_v16  ;;  %1440 = vperm.xlu1 %8647, %v16202_v53   ;;  %1435 = vperm.xlu0 %8646, %v16205_v3   ;;  %v3135_v54 = vpop.f32.mrb[39].mxu0  ;;  %v4355_v7 = vmax.f32 %v3132_v1, 0.0 }
 0x275   : > { %5183 = vmatmul.mubr.bf16.gmra.mrb[32].mxu1 %v4846_v5  ;;  %v3136_v14 = vadd.f32 %v3135_v54, %v12209_v25  ;;  %v4356_v16 = vmax.f32 %v3134_v13, 0.0  ;;  %7886 = vmatmul.mubr.msk.bf16.gmra.mrb[144].mxu0 %vm2613_vm1, %v7757_v10  ;;  %v16210_v54 = vld [vmem:[#allocation411_spill] sm:$0xff]  ;;  %v16211_v10 = vld [vmem:[#allocation77_spill] sm:$0xff] }
 0x276   : > { %3407 = vmatprep.mubr.bf16.mxu0 %v16136_v0 }
 0x277   : > { %v12521_v9 = vpop.permute.xlu1 %1130  ;;  %v12523_v53 = vpop.permute.xlu0 %1125  ;;  %v4357_v12 = vmax.f32 %v3136_v14, 0.0  ;;  %v4848_v8 = vpack.c.bf16 %v4356_v16, %v4354_v2 }
 0x278   : > { %16206 = vst [vmem:[#allocation680_spill] sm:$0xff] %v12521_v9  ;;  %1450 = vperm.xlu1 %8647, %v16207_v21   ;;  %1445 = vperm.xlu0 %8646, %v16208_v6   ;;  %v3139_v5 = vpop.f32.mrb[40].mxu0  ;;  %v16212_v21 = vld [vmem:[#allocation76_spill] sm:$0xff]  ;;  %v16213_v6 = vld [vmem:[#allocation410_spill] sm:$0xff] }
 0x279   : > { %v4849_v25 = vpack.c.bf16 %v4357_v12, %v4355_v7  ;;  %v3140_v59 = vadd.f32 %v3139_v5, %v12219_v23  ;;  %v3141_v13 = vpop.f32.mrb[41].mxu0  ;;  %v7758_v1 = vcombine.low %v16212_v21, %v16211_v10 }
 0x27a   : > { %v3142_v14 = vadd.f32 %v3141_v13, %v12219_v23  ;;  %v3143_v9 = vpop.f32.mrb[42].mxu0  ;;  %v16215_v13 = vld [vmem:[#allocation412_spill] sm:$0xff] }
 0x27b   : > { %v12529_v17 = vpop.permute.xlu1 %1140  ;;  %v12532_v3 = vpop.permute.xlu0 %1135  ;;  %5190 = vmatprep.mubr.bf16.mxu1 %v4849_v25  ;;  %v3144_v16 = vadd.f32 %v3143_v9, %v12217_v26  ;;  %v4358_v12 = vmax.f32 %v3140_v59, 0.0 }
 0x27c   : > { %16209 = vst [vmem:[#allocation681_spill] sm:$0xff] %v12529_v17  ;;  %1460 = vperm.xlu1 %8647, %v16210_v54   ;;  %1455 = vperm.xlu0 %8646, %v16213_v6   ;;  %v3145_v2 = vpop.f32.mrb[43].mxu0  ;;  %v16214_v54 = vld [vmem:[#allocation413_spill] sm:$0xff]  ;;  %v4359_v10 = vmax.f32 %v3142_v14, 0.0  ;;  %v16216_v6 = vld [vmem:[#allocation415_spill] sm:$0xff] }
 0x27d   : > { %5191 = vmatmul.mubr.bf16.gmra.mrb[36].mxu1 %v4848_v8  ;;  %v3146_v7 = vadd.f32 %v3145_v2, %v12217_v26  ;;  %v4360_v5 = vmax.f32 %v3144_v16, 0.0  ;;  %7887 = vmatmul.mubr.msk.bf16.gmra.mrb[148].mxu0 %vm2613_vm1, %v7758_v1  ;;  %v16217_v16 = vld [vmem:[#allocation79_spill] sm:$0xff]  ;;  %v16218_v1 = vld [vmem:[#allocation78_spill] sm:$0xff] }
 0x27e   : > { %3417 = vmatprep.mubr.bf16.mxu0 %v16136_v0  ;;  %v7759_v2 = vcombine.low %v16218_v1, %v16217_v16  ;;  %v16221_v16 = vld [vmem:[#allocation417_spill] sm:$0xff]  ;;  %v16222_v1 = vld [vmem:[#allocation416_spill] sm:$0xff] }
 0x27f   : > { %v12541_v17 = vpop.permute.xlu1 %1150  ;;  %v4361_v23 = vmax.f32 %v3146_v7, 0.0  ;;  %v12547_v25 = vpop.permute.xlu0 %1145  ;;  %v4850_v9 = vpack.c.bf16 %v4360_v5, %v4358_v12  ;;  %v16219_v7 = vld [vmem:[#allocation414_spill] sm:$0xff] }
 0x280   : > { %1470 = vperm.xlu1 %8647, %v16214_v54   ;;  %1465 = vperm.xlu0 %8646, %v16215_v13   ;;  %v3149_v8 = vpop.f32.mrb[44].mxu0 }
 0x281   : > { %v4851_v21 = vpack.c.bf16 %v4361_v23, %v4359_v10  ;;  %v3150_v26 = vadd.f32 %v3149_v8, %v12227_v11  ;;  %v3151_v59 = vpop.f32.mrb[45].mxu0 }
 0x282   : > { %v3152_v14 = vadd.f32 %v3151_v59, %v12227_v11  ;;  %v3153_v54 = vpop.f32.mrb[46].mxu0 }
 0x283   : > { %5198 = vmatprep.mubr.bf16.mxu1 %v4851_v21  ;;  %v12555_v13 = vpop.permute.xlu1 %1160  ;;  %v3154_v12 = vadd.f32 %v3153_v54, %v12225_v29  ;;  %v3155_v5 = vpop.f32.mrb[47].mxu0  ;;  %v4362_v23 = vmax.f32 %v3150_v26, 0.0 }
 0x284   : > { %1480 = vperm.xlu1 %8647, %v16216_v6   ;;  %1475 = vperm.xlu0 %8646, %v16219_v7   ;;  %16220 = vst [vmem:[#allocation682_spill] sm:$0xff] %v12555_v13  ;;  %v3156_v10 = vadd.f32 %v3155_v5, %v12225_v29  ;;  %v12559_v8 = vpop.permute.xlu0 %1155  ;;  %v4363_v11 = vmax.f32 %v3152_v14, 0.0  ;;  %v16223_v5 = vld [vmem:[#allocation419_spill] sm:$0xff] }
 0x285   : > { %5199 = vmatmul.mubr.bf16.gmra.mrb[40].mxu1 %v4850_v9  ;;  %v4364_v6 = vmax.f32 %v3154_v12, 0.0  ;;  %7888 = vmatmul.mubr.msk.bf16.gmra.mrb[152].mxu0 %vm2613_vm1, %v7759_v2  ;;  %v16224_v12 = vld [vmem:[#allocation81_spill] sm:$0xff]  ;;  %v16225_v2 = vld [vmem:[#allocation80_spill] sm:$0xff] }
 0x286   : > { %v4365_v59 = vmax.f32 %v3156_v10, 0.0  ;;  %3427 = vmatprep.mubr.bf16.mxu0 %v16136_v0  ;;  %v7760_v13 = vcombine.low %v16225_v2, %v16224_v12  ;;  %v16226_v10 = vld [vmem:[#allocation418_spill] sm:$0xff] }
 0x287   : > { %v4852_v21 = vpack.c.bf16 %v4364_v6, %v4362_v23  ;;  %v12565_v9 = vpop.permute.xlu1 %1170 }
 0x288   : > { %1490 = vperm.xlu1 %8647, %v16221_v16   ;;  %1485 = vperm.xlu0 %8646, %v16222_v1   ;;  %v3159_v7 = vpop.f32.mrb[48].mxu0  ;;  %v4853_v54 = vpack.c.bf16 %v4365_v59, %v4363_v11  ;;  %v12573_v1 = vpop.permute.xlu0 %1165 }
 0x289   : > { %v3160_v29 = vadd.f32 %v3159_v7, %v12235_v27  ;;  %v3161_v26 = vpop.f32.mrb[49].mxu0 }
 0x28a   : > { %v3162_v14 = vadd.f32 %v3161_v26, %v12235_v27  ;;  %v3163_v16 = vpop.f32.mrb[50].mxu0  ;;  %5206 = vmatprep.mubr.bf16.mxu1 %v4853_v54  ;;  %v16228_v26 = vld [vmem:[#allocation420_spill] sm:$0xff] }
 0x28b   : > { %v3164_v23 = vadd.f32 %v3163_v16, %v12233_v30  ;;  %v3165_v6 = vpop.f32.mrb[51].mxu0  ;;  %v4366_v59 = vmax.f32 %v3160_v29, 0.0  ;;  %v12581_v54 = vpop.permute.xlu1 %1180 }
 0x28c   : > { %1500 = vperm.xlu1 %8647, %v16223_v5   ;;  %1495 = vperm.xlu0 %8646, %v16226_v10   ;;  %v3166_v11 = vadd.f32 %v3165_v6, %v12233_v30  ;;  %v16227_v5 = vld [vmem:[#allocation421_spill] sm:$0xff]  ;;  %v4367_v12 = vmax.f32 %v3162_v14, 0.0  ;;  %16229 = vst [vmem:[#allocation683_spill] sm:$0xff] %v12581_v54  ;;  %v16232_v6 = vld [vmem:[#allocation82_spill] sm:$0xff] }
 0x28d   : > { %5207 = vmatmul.mubr.bf16.gmra.mrb[44].mxu1 %v4852_v21  ;;  %v4368_v7 = vmax.f32 %v3164_v23, 0.0  ;;  %7889 = vmatmul.mubr.msk.bf16.gmra.mrb[156].mxu0 %vm2613_vm1, %v7760_v13  ;;  %v12583_v21 = vpop.permute.xlu0 %1175  ;;  %v16230_v23 = vld [vmem:[#allocation423_spill] sm:$0xff] }
 0x28e   : > { %v4369_v27 = vmax.f32 %v3166_v11, 0.0  ;;  %3437 = vmatprep.mubr.bf16.mxu0 %v16136_v0  ;;  %v16231_v13 = vld [vmem:[#allocation83_spill] sm:$0xff] }
 0x28f   : > { %v4854_v2 = vpack.c.bf16 %v4368_v7, %v4366_v59  ;;  %v7761_v14 = vcombine.low %v16232_v6, %v16231_v13 }
 0x290   : > { %1510 = vperm.xlu1 %8647, %v16227_v5   ;;  %1505 = vperm.xlu0 %8646, %v16228_v26   ;;  %v3169_v10 = vpop.f32.mrb[52].mxu0  ;;  %v4855_v16 = vpack.c.bf16 %v4369_v27, %v4367_v12  ;;  %v16233_v5 = vld [vmem:[#allocation422_spill] sm:$0xff]  ;;  %v12593_v27 = vpop.permute.xlu1 %1190 }
 0x291   : > { %v3170_v30 = vadd.f32 %v3169_v10, %v12243_v15  ;;  %v3171_v29 = vpop.f32.mrb[53].mxu0 }
 0x292   : > { %v3172_v11 = vadd.f32 %v3171_v29, %v12243_v15  ;;  %v3173_v26 = vpop.f32.mrb[54].mxu0  ;;  %5214 = vmatprep.mubr.bf16.mxu1 %v4855_v16  ;;  %v16235_v29 = vld [vmem:[#allocation424_spill] sm:$0xff]  ;;  %v12599_v16 = vpop.permute.xlu0 %1185 }
 0x293   : > { %v3174_v59 = vadd.f32 %v3173_v26, %v12241_v33  ;;  %v3175_v7 = vpop.f32.mrb[55].mxu0  ;;  %v4370_v10 = vmax.f32 %v3170_v30, 0.0  ;;  %v16236_v30 = vld [vmem:[#allocation427_spill] sm:$0xff] }
 0x294   : > { %1520 = vperm.xlu1 %8647, %v16230_v23   ;;  %1515 = vperm.xlu0 %8646, %v16233_v5   ;;  %v3176_v12 = vadd.f32 %v3175_v7, %v12241_v33  ;;  %v16234_v23 = vld [vmem:[#allocation425_spill] sm:$0xff]  ;;  %v4371_v13 = vmax.f32 %v3172_v11, 0.0 }
 0x295   : > { %5215 = vmatmul.mubr.bf16.gmra.mrb[48].mxu1 %v4854_v2  ;;  %v4372_v54 = vmax.f32 %v3174_v59, 0.0  ;;  %7890 = vmatmul.mubr.msk.bf16.gmra.mrb[160].mxu0 %vm2613_vm1, %v7761_v14  ;;  %v16237_v59 = vld [vmem:[#allocation85_spill] sm:$0xff]  ;;  %v16238_v14 = vld [vmem:[#allocation84_spill] sm:$0xff] }
 0x296   : > { %v4373_v15 = vmax.f32 %v3176_v12, 0.0  ;;  %3447 = vmatprep.mubr.bf16.mxu0 %v16136_v0  ;;  %v7762_v7 = vcombine.low %v16238_v14, %v16237_v59  ;;  %v16239_v12 = vld [vmem:[#allocation426_spill] sm:$0xff]  ;;  %v16241_v59 = vld [vmem:[#allocation429_spill] sm:$0xff]  ;;  %v16242_v14 = vld [vmem:[#allocation428_spill] sm:$0xff] }
 0x297   : > { %v4856_v6 = vpack.c.bf16 %v4372_v54, %v4370_v10 }
 0x298   : > { %1530 = vperm.xlu1 %8647, %v16234_v23   ;;  %1525 = vperm.xlu0 %8646, %v16235_v29   ;;  %v3179_v2 = vpop.f32.mrb[56].mxu0  ;;  %v4857_v5 = vpack.c.bf16 %v4373_v15, %v4371_v13  ;;  %v12607_v29 = vpop.permute.xlu1 %1200 }
 0x299   : > { %v3180_v33 = vadd.f32 %v3179_v2, %v12251_v31  ;;  %v3181_v26 = vpop.f32.mrb[57].mxu0  ;;  %16240 = vst [vmem:[#allocation684_spill] sm:$0xff] %v12607_v29  ;;  %v12611_v15 = vpop.permute.xlu0 %1195 }
 0x29a   : > { %v3182_v11 = vadd.f32 %v3181_v26, %v12251_v31  ;;  %v3183_v23 = vpop.f32.mrb[58].mxu0  ;;  %5222 = vmatprep.mubr.bf16.mxu1 %v4857_v5 }
 0x29b   : > { %v3184_v54 = vadd.f32 %v3183_v23, %v12249_v34  ;;  %v3185_v10 = vpop.f32.mrb[59].mxu0  ;;  %v4374_v2 = vmax.f32 %v3180_v33, 0.0  ;;  %v16243_v33 = vld [vmem:[#allocation431_spill] sm:$0xff] }
 0x29c   : > { %1540 = vperm.xlu1 %8647, %v16236_v30   ;;  %1535 = vperm.xlu0 %8646, %v16239_v12   ;;  %v3186_v13 = vadd.f32 %v3185_v10, %v12249_v34  ;;  %v4375_v31 = vmax.f32 %v3182_v11, 0.0 }
 0x29d   : > { %5223 = vmatmul.mubr.bf16.gmra.mrb[52].mxu1 %v4856_v6  ;;  %v4376_v30 = vmax.f32 %v3184_v54, 0.0  ;;  %7891 = vmatmul.mubr.msk.bf16.gmra.mrb[164].mxu0 %vm2613_vm1, %v7762_v7  ;;  %v12617_v6 = vpop.permute.xlu1 %1210  ;;  %v16244_v54 = vld [vmem:[#allocation87_spill] sm:$0xff]  ;;  %v16245_v7 = vld [vmem:[#allocation86_spill] sm:$0xff] }
 0x29e   : > { %v4377_v26 = vmax.f32 %v3186_v13, 0.0  ;;  %3457 = vmatprep.mubr.bf16.mxu0 %v16136_v0  ;;  %v7763_v29 = vcombine.low %v16245_v7, %v16244_v54  ;;  %v16246_v13 = vld [vmem:[#allocation430_spill] sm:$0xff] }
 0x29f   : > { %v4858_v5 = vpack.c.bf16 %v4376_v30, %v4374_v2 }
 0x2a0   : > { %1550 = vperm.xlu1 %8647, %v16241_v59   ;;  %1545 = vperm.xlu0 %8646, %v16242_v14   ;;  %v3189_v12 = vpop.f32.mrb[60].mxu0  ;;  %v4859_v23 = vpack.c.bf16 %v4377_v26, %v4375_v31  ;;  %v12625_v14 = vpop.permute.xlu0 %1205 }
 0x2a1   : > { %v3190_v34 = vadd.f32 %v3189_v12, %v12259_v24  ;;  %v3191_v10 = vpop.f32.mrb[61].mxu0 }
 0x2a2   : > { %v3192_v11 = vadd.f32 %v3191_v10, %v12259_v24  ;;  %v3193_v59 = vpop.f32.mrb[62].mxu0  ;;  %5230 = vmatprep.mubr.bf16.mxu1 %v4859_v23  ;;  %v16248_v10 = vld [vmem:[#allocation432_spill] sm:$0xff]  ;;  %v12633_v23 = vpop.permute.xlu1 %1220 }
 0x2a3   : > { %v3194_v2 = vadd.f32 %v3193_v59, %v12257_v37  ;;  %v3195_v30 = vpop.f32.mrb[63].mxu0  ;;  %v4378_v26 = vmax.f32 %v3190_v34, 0.0  ;;  %16249 = vst [vmem:[#allocation685_spill] sm:$0xff] %v12633_v23 }
 0x2a4   : > { %1560 = vperm.xlu1 %8647, %v16243_v33   ;;  %1555 = vperm.xlu0 %8646, %v16246_v13   ;;  %v3196_v31 = vadd.f32 %v3195_v30, %v12257_v37  ;;  %v16247_v33 = vld [vmem:[#allocation433_spill] sm:$0xff]  ;;  %v4379_v54 = vmax.f32 %v3192_v11, 0.0  ;;  %v16252_v30 = vld [vmem:[#allocation88_spill] sm:$0xff] }
 0x2a5   : > { %5231 = vmatmul.mubr.bf16.gmra.mrb[56].mxu1 %v4858_v5  ;;  %v4380_v12 = vmax.f32 %v3194_v2, 0.0  ;;  %7892 = vmatmul.mubr.msk.bf16.gmra.mrb[168].mxu0 %vm2613_vm1, %v7763_v29  ;;  %v12635_v5 = vpop.permute.xlu0 %1215  ;;  %v16250_v2 = vld [vmem:[#allocation435_spill] sm:$0xff]  ;;  %v16251_v29 = vld [vmem:[#allocation89_spill] sm:$0xff] }
 0x2a6   : > { %v4381_v24 = vmax.f32 %v3196_v31, 0.0  ;;  %3467 = vmatprep.mubr.bf16.mxu0 %v16136_v0  ;;  %v7764_v11 = vcombine.low %v16252_v30, %v16251_v29 }
 0x2a7   : > { %v4860_v7 = vpack.c.bf16 %v4380_v12, %v4378_v26 }
 0x2a8   : > { %1570 = vperm.xlu1 %8647, %v16247_v33   ;;  %1565 = vperm.xlu0 %8646, %v16248_v10   ;;  %v3199_v13 = vpop.f32.mrb[64].mxu0  ;;  %v4861_v59 = vpack.c.bf16 %v4381_v24, %v4379_v54  ;;  %v16253_v33 = vld [vmem:[#allocation434_spill] sm:$0xff]  ;;  %v12645_v24 = vpop.permute.xlu1 %1230 }
 0x2a9   : > { %v3200_v37 = vadd.f32 %v3199_v13, %v12267_v35  ;;  %v3201_v34 = vpop.f32.mrb[65].mxu0 }
 0x2aa   : > { %v3202_v31 = vadd.f32 %v3201_v34, %v12267_v35  ;;  %v3203_v10 = vpop.f32.mrb[66].mxu0  ;;  %5238 = vmatprep.mubr.bf16.mxu1 %v4861_v59  ;;  %v16255_v34 = vld [vmem:[#allocation436_spill] sm:$0xff]  ;;  %v12651_v59 = vpop.permute.xlu0 %1225 }
 0x2ab   : > { %v3204_v26 = vadd.f32 %v3203_v10, %v12265_v38  ;;  %v3205_v12 = vpop.f32.mrb[67].mxu0  ;;  %v4382_v13 = vmax.f32 %v3200_v37, 0.0  ;;  %v16256_v37 = vld [vmem:[#allocation439_spill] sm:$0xff] }
 0x2ac   : > { %1580 = vperm.xlu1 %8647, %v16250_v2   ;;  %1575 = vperm.xlu0 %8646, %v16253_v33   ;;  %v3206_v54 = vadd.f32 %v3205_v12, %v12265_v38  ;;  %v16254_v2 = vld [vmem:[#allocation437_spill] sm:$0xff]  ;;  %v4383_v29 = vmax.f32 %v3202_v31, 0.0 }
 0x2ad   : > { %5239 = vmatmul.mubr.bf16.gmra.mrb[60].mxu1 %v4860_v7  ;;  %v4384_v23 = vmax.f32 %v3204_v26, 0.0  ;;  %7893 = vmatmul.mubr.msk.bf16.gmra.mrb[172].mxu0 %vm2613_vm1, %v7764_v11  ;;  %v16257_v26 = vld [vmem:[#allocation91_spill] sm:$0xff]  ;;  %v16258_v11 = vld [vmem:[#allocation90_spill] sm:$0xff] }
 0x2ae   : > { %v4385_v35 = vmax.f32 %v3206_v54, 0.0  ;;  %3477 = vmatprep.mubr.bf16.mxu0 %v16136_v0  ;;  %v7765_v12 = vcombine.low %v16258_v11, %v16257_v26  ;;  %v16259_v54 = vld [vmem:[#allocation438_spill] sm:$0xff]  ;;  %v16261_v26 = vld [vmem:[#allocation441_spill] sm:$0xff]  ;;  %v16262_v11 = vld [vmem:[#allocation440_spill] sm:$0xff] }
 0x2af   : > { %v4862_v30 = vpack.c.bf16 %v4384_v23, %v4382_v13 }
 0x2b0   : > { %1590 = vperm.xlu1 %8647, %v16254_v2   ;;  %1585 = vperm.xlu0 %8646, %v16255_v34   ;;  %v3209_v7 = vpop.f32.mrb[68].mxu0  ;;  %v4863_v33 = vpack.c.bf16 %v4385_v35, %v4383_v29  ;;  %v12659_v34 = vpop.permute.xlu1 %1240 }
 0x2b1   : > { %v3210_v38 = vadd.f32 %v3209_v7, %v12275_v28  ;;  %v3211_v10 = vpop.f32.mrb[69].mxu0  ;;  %16260 = vst [vmem:[#allocation686_spill] sm:$0xff] %v12659_v34  ;;  %v12663_v35 = vpop.permute.xlu0 %1235 }
 0x2b2   : > { %v3212_v31 = vadd.f32 %v3211_v10, %v12275_v28  ;;  %v3213_v2 = vpop.f32.mrb[70].mxu0  ;;  %5246 = vmatprep.mubr.bf16.mxu1 %v4863_v33 }
 0x2b3   : > { %v3214_v23 = vadd.f32 %v3213_v2, %v12273_v41  ;;  %v3215_v13 = vpop.f32.mrb[71].mxu0  ;;  %v4386_v7 = vmax.f32 %v3210_v38, 0.0  ;;  %v16263_v38 = vld [vmem:[#allocation443_spill] sm:$0xff] }
 0x2b4   : > { %1600 = vperm.xlu1 %8647, %v16256_v37   ;;  %1595 = vperm.xlu0 %8646, %v16259_v54   ;;  %v3216_v29 = vadd.f32 %v3215_v13, %v12273_v41  ;;  %v4387_v28 = vmax.f32 %v3212_v31, 0.0 }
 0x2b5   : > { %5247 = vmatmul.mubr.bf16.gmra.mrb[64].mxu1 %v4862_v30  ;;  %v4388_v37 = vmax.f32 %v3214_v23, 0.0  ;;  %7894 = vmatmul.mubr.msk.bf16.gmra.mrb[176].mxu0 %vm2613_vm1, %v7765_v12  ;;  %v12669_v30 = vpop.permute.xlu1 %1250  ;;  %v16264_v23 = vld [vmem:[#allocation93_spill] sm:$0xff]  ;;  %v16265_v12 = vld [vmem:[#allocation92_spill] sm:$0xff] }
 0x2b6   : > { %v4389_v10 = vmax.f32 %v3216_v29, 0.0  ;;  %3487 = vmatprep.mubr.bf16.mxu0 %v16136_v0  ;;  %v7766_v34 = vcombine.low %v16265_v12, %v16264_v23  ;;  %v16266_v29 = vld [vmem:[#allocation442_spill] sm:$0xff] }
 0x2b7   : > { %v4864_v33 = vpack.c.bf16 %v4388_v37, %v4386_v7 }
 0x2b8   : > { %1610 = vperm.xlu1 %8647, %v16261_v26   ;;  %1605 = vperm.xlu0 %8646, %v16262_v11   ;;  %v3219_v54 = vpop.f32.mrb[72].mxu0  ;;  %v4865_v2 = vpack.c.bf16 %v4389_v10, %v4387_v28  ;;  %v12677_v11 = vpop.permute.xlu0 %1245 }
 0x2b9   : > { %v3220_v41 = vadd.f32 %v3219_v54, %v12283_v39  ;;  %v3221_v13 = vpop.f32.mrb[73].mxu0 }
 0x2ba   : > { %v3222_v31 = vadd.f32 %v3221_v13, %v12283_v39  ;;  %v3223_v26 = vpop.f32.mrb[74].mxu0  ;;  %5254 = vmatprep.mubr.bf16.mxu1 %v4865_v2  ;;  %v16268_v13 = vld [vmem:[#allocation444_spill] sm:$0xff]  ;;  %v12685_v2 = vpop.permute.xlu1 %1260 }
 0x2bb   : > { %v3224_v7 = vadd.f32 %v3223_v26, %v12281_v42  ;;  %v3225_v37 = vpop.f32.mrb[75].mxu0  ;;  %v4390_v10 = vmax.f32 %v3220_v41, 0.0  ;;  %16269 = vst [vmem:[#allocation687_spill] sm:$0xff] %v12685_v2 }
 0x2bc   : > { %1620 = vperm.xlu1 %8647, %v16263_v38   ;;  %1615 = vperm.xlu0 %8646, %v16266_v29   ;;  %v3226_v28 = vadd.f32 %v3225_v37, %v12281_v42  ;;  %v16267_v38 = vld [vmem:[#allocation445_spill] sm:$0xff]  ;;  %v4391_v23 = vmax.f32 %v3222_v31, 0.0  ;;  %v16273_v37 = vld [vmem:[#allocation94_spill] sm:$0xff] }
 0x2bd   : > { %5255 = vmatmul.mubr.bf16.gmra.mrb[68].mxu1 %v4864_v33  ;;  %v4392_v54 = vmax.f32 %v3224_v7, 0.0  ;;  %7895 = vmatmul.mubr.msk.bf16.gmra.mrb[180].mxu0 %vm2613_vm1, %v7766_v34  ;;  %v12687_v33 = vpop.permute.xlu0 %1255  ;;  %v16271_v7 = vld [vmem:[#allocation447_spill] sm:$0xff] }
 0x2be   : > { %v4393_v39 = vmax.f32 %v3226_v28, 0.0  ;;  %3497 = vmatprep.mubr.bf16.mxu0 %v16136_v0  ;;  %16270 = vst [vmem:[#allocation688_spill] sm:$0xff] %v12687_v33  ;;  %v16272_v34 = vld [vmem:[#allocation95_spill] sm:$0xff] }
 0x2bf   : > { %v4866_v12 = vpack.c.bf16 %v4392_v54, %v4390_v10  ;;  %v7767_v31 = vcombine.low %v16273_v37, %v16272_v34 }
 0x2c0   : > { %1630 = vperm.xlu1 %8647, %v16267_v38   ;;  %1625 = vperm.xlu0 %8646, %v16268_v13   ;;  %v3229_v29 = vpop.f32.mrb[76].mxu0  ;;  %v4867_v26 = vpack.c.bf16 %v4393_v39, %v4391_v23  ;;  %v16274_v38 = vld [vmem:[#allocation446_spill] sm:$0xff]  ;;  %v12697_v39 = vpop.permute.xlu1 %1270 }
 0x2c1   : > { %v3230_v42 = vadd.f32 %v3229_v29, %v12291_v32  ;;  %v3231_v41 = vpop.f32.mrb[77].mxu0  ;;  %16275 = vst [vmem:[#allocation689_spill] sm:$0xff] %v12697_v39 }
 0x2c2   : > { %v3232_v28 = vadd.f32 %v3231_v41, %v12291_v32  ;;  %v3233_v13 = vpop.f32.mrb[78].mxu0  ;;  %5262 = vmatprep.mubr.bf16.mxu1 %v4867_v26  ;;  %v16277_v41 = vld [vmem:[#allocation448_spill] sm:$0xff]  ;;  %v12703_v26 = vpop.permute.xlu0 %1265 }
 0x2c3   : > { %v3234_v10 = vadd.f32 %v3233_v13, %v12289_v45  ;;  %v3235_v54 = vpop.f32.mrb[79].mxu0  ;;  %v4394_v29 = vmax.f32 %v3230_v42, 0.0  ;;  %16278 = vst [vmem:[#allocation690_spill] sm:$0xff] %v12703_v26  ;;  %v16279_v42 = vld [vmem:[#allocation451_spill] sm:$0xff] }
 0x2c4   : > { %1640 = vperm.xlu1 %8647, %v16271_v7   ;;  %1635 = vperm.xlu0 %8646, %v16274_v38   ;;  %v3236_v23 = vadd.f32 %v3235_v54, %v12289_v45  ;;  %v16276_v7 = vld [vmem:[#allocation449_spill] sm:$0xff]  ;;  %v4395_v34 = vmax.f32 %v3232_v28, 0.0 }
 0x2c5   : > { %5263 = vmatmul.mubr.bf16.gmra.mrb[72].mxu1 %v4866_v12  ;;  %v4396_v2 = vmax.f32 %v3234_v10, 0.0  ;;  %7896 = vmatmul.mubr.msk.bf16.gmra.mrb[184].mxu0 %vm2613_vm1, %v7767_v31  ;;  %v16280_v10 = vld [vmem:[#allocation97_spill] sm:$0xff]  ;;  %v16281_v31 = vld [vmem:[#allocation96_spill] sm:$0xff] }
 0x2c6   : > { %v4397_v32 = vmax.f32 %v3236_v23, 0.0  ;;  %3507 = vmatprep.mubr.bf16.mxu0 %v16136_v0  ;;  %v7768_v54 = vcombine.low %v16281_v31, %v16280_v10  ;;  %v16282_v23 = vld [vmem:[#allocation450_spill] sm:$0xff]  ;;  %v16285_v10 = vld [vmem:[#allocation453_spill] sm:$0xff]  ;;  %v16286_v31 = vld [vmem:[#allocation452_spill] sm:$0xff] }
 0x2c7   : > { %v4868_v37 = vpack.c.bf16 %v4396_v2, %v4394_v29 }
 0x2c8   : > { %1650 = vperm.xlu1 %8647, %v16276_v7   ;;  %1645 = vperm.xlu0 %8646, %v16277_v41   ;;  %v3239_v12 = vpop.f32.mrb[80].mxu0  ;;  %v4869_v38 = vpack.c.bf16 %v4397_v32, %v4395_v34  ;;  %v12711_v41 = vpop.permute.xlu1 %1280 }
 0x2c9   : > { %v3240_v45 = vadd.f32 %v3239_v12, %v12299_v43  ;;  %v3241_v13 = vpop.f32.mrb[81].mxu0  ;;  %16283 = vst [vmem:[#allocation691_spill] sm:$0xff] %v12711_v41  ;;  %v12715_v32 = vpop.permute.xlu0 %1275 }
 0x2ca   : > { %v3242_v28 = vadd.f32 %v3241_v13, %v12299_v43  ;;  %v3243_v7 = vpop.f32.mrb[82].mxu0  ;;  %5270 = vmatprep.mubr.bf16.mxu1 %v4869_v38  ;;  %16284 = vst [vmem:[#allocation692_spill] sm:$0xff] %v12715_v32 }
 0x2cb   : > { %v3244_v2 = vadd.f32 %v3243_v7, %v12297_v46  ;;  %v3245_v29 = vpop.f32.mrb[83].mxu0  ;;  %v4398_v12 = vmax.f32 %v3240_v45, 0.0  ;;  %v16288_v45 = vld [vmem:[#allocation455_spill] sm:$0xff] }
 0x2cc   : > { %1660 = vperm.xlu1 %8647, %v16279_v42   ;;  %1655 = vperm.xlu0 %8646, %v16282_v23   ;;  %v3246_v34 = vadd.f32 %v3245_v29, %v12297_v46  ;;  %v4399_v43 = vmax.f32 %v3242_v28, 0.0 }
 0x2cd   : > { %5271 = vmatmul.mubr.bf16.gmra.mrb[76].mxu1 %v4868_v37  ;;  %v4400_v42 = vmax.f32 %v3244_v2, 0.0  ;;  %7897 = vmatmul.mubr.msk.bf16.gmra.mrb[188].mxu0 %vm2613_vm1, %v7768_v54  ;;  %v12721_v37 = vpop.permute.xlu1 %1290  ;;  %v16289_v2 = vld [vmem:[#allocation99_spill] sm:$0xff]  ;;  %v16290_v54 = vld [vmem:[#allocation98_spill] sm:$0xff] }
 0x2ce   : > { %v4401_v13 = vmax.f32 %v3246_v34, 0.0  ;;  %3517 = vmatprep.mubr.bf16.mxu0 %v16136_v0  ;;  %16287 = vst [vmem:[#allocation693_spill] sm:$0xff] %v12721_v37  ;;  %v7769_v41 = vcombine.low %v16290_v54, %v16289_v2  ;;  %v16291_v34 = vld [vmem:[#allocation454_spill] sm:$0xff] }
 0x2cf   : > { %v4870_v38 = vpack.c.bf16 %v4400_v42, %v4398_v12 }
 0x2d0   : > { %1670 = vperm.xlu1 %8647, %v16285_v10   ;;  %1665 = vperm.xlu0 %8646, %v16286_v31   ;;  %v3249_v23 = vpop.f32.mrb[84].mxu0  ;;  %v4871_v7 = vpack.c.bf16 %v4401_v13, %v4399_v43  ;;  %v12729_v31 = vpop.permute.xlu0 %1285 }
 0x2d1   : > { %v3250_v46 = vadd.f32 %v3249_v23, %v12307_v36  ;;  %v3251_v29 = vpop.f32.mrb[85].mxu0  ;;  %16292 = vst [vmem:[#allocation694_spill] sm:$0xff] %v12729_v31 }
 0x2d2   : > { %v3252_v28 = vadd.f32 %v3251_v29, %v12307_v36  ;;  %v3253_v10 = vpop.f32.mrb[86].mxu0  ;;  %5278 = vmatprep.mubr.bf16.mxu1 %v4871_v7  ;;  %v16294_v29 = vld [vmem:[#allocation456_spill] sm:$0xff]  ;;  %v12737_v7 = vpop.permute.xlu1 %1300 }
 0x2d3   : > { %v3254_v12 = vadd.f32 %v3253_v10, %v12305_v49  ;;  %v3255_v42 = vpop.f32.mrb[87].mxu0  ;;  %v4402_v13 = vmax.f32 %v3250_v46, 0.0  ;;  %16295 = vst [vmem:[#allocation695_spill] sm:$0xff] %v12737_v7 }
 0x2d4   : > { %1680 = vperm.xlu1 %8647, %v16288_v45   ;;  %1675 = vperm.xlu0 %8646, %v16291_v34   ;;  %v3256_v43 = vadd.f32 %v3255_v42, %v12305_v49  ;;  %v16293_v45 = vld [vmem:[#allocation457_spill] sm:$0xff]  ;;  %v4403_v2 = vmax.f32 %v3252_v28, 0.0  ;;  %v16299_v42 = vld [vmem:[#allocation100_spill] sm:$0xff] }
 0x2d5   : > { %5279 = vmatmul.mubr.bf16.gmra.mrb[80].mxu1 %v4870_v38  ;;  %v4404_v23 = vmax.f32 %v3254_v12, 0.0  ;;  %7898 = vmatmul.mubr.msk.bf16.gmra.mrb[192].mxu0 %vm2613_vm1, %v7769_v41  ;;  %v12739_v38 = vpop.permute.xlu0 %1295  ;;  %v16297_v12 = vld [vmem:[#allocation459_spill] sm:$0xff]  ;;  %v16298_v41 = vld [vmem:[#allocation101_spill] sm:$0xff] }
 0x2d6   : > { %v4405_v36 = vmax.f32 %v3256_v43, 0.0  ;;  %3527 = vmatprep.mubr.bf16.mxu0 %v16136_v0  ;;  %16296 = vst [vmem:[#allocation696_spill] sm:$0xff] %v12739_v38  ;;  %v7770_v28 = vcombine.low %v16299_v42, %v16298_v41 }
 0x2d7   : > { %v4872_v54 = vpack.c.bf16 %v4404_v23, %v4402_v13 }
 0x2d8   : > { %1690 = vperm.xlu1 %8647, %v16293_v45   ;;  %1685 = vperm.xlu0 %8646, %v16294_v29   ;;  %v3259_v34 = vpop.f32.mrb[88].mxu0  ;;  %v4873_v10 = vpack.c.bf16 %v4405_v36, %v4403_v2  ;;  %v16300_v45 = vld [vmem:[#allocation458_spill] sm:$0xff]  ;;  %v12749_v36 = vpop.permute.xlu1 %1310 }
 0x2d9   : > { %v3260_v49 = vadd.f32 %v3259_v34, %v12315_v47  ;;  %v3261_v46 = vpop.f32.mrb[89].mxu0  ;;  %16301 = vst [vmem:[#allocation697_spill] sm:$0xff] %v12749_v36  ;;  %v16310_v36 = vld [vmem:[#allocation658_spill] sm:$0xff] }
 0x2da   : > { %v3262_v43 = vadd.f32 %v3261_v46, %v12315_v47  ;;  %v3263_v29 = vpop.f32.mrb[90].mxu0  ;;  %5286 = vmatprep.mubr.bf16.mxu1 %v4873_v10  ;;  %v16303_v46 = vld [vmem:[#allocation460_spill] sm:$0xff]  ;;  %v12755_v10 = vpop.permute.xlu0 %1305 }
 0x2db   : > { %v3264_v13 = vadd.f32 %v3263_v29, %v12313_v50  ;;  %v3265_v23 = vpop.f32.mrb[91].mxu0  ;;  %v4406_v34 = vmax.f32 %v3260_v49, 0.0  ;;  %16304 = vst [vmem:[#allocation698_spill] sm:$0xff] %v12755_v10  ;;  %v16305_v49 = vld [vmem:[#allocation463_spill] sm:$0xff] }
 0x2dc   : > { %1700 = vperm.xlu1 %8647, %v16297_v12   ;;  %1695 = vperm.xlu0 %8646, %v16300_v45   ;;  %v3266_v2 = vadd.f32 %v3265_v23, %v12313_v50  ;;  %v16302_v12 = vld [vmem:[#allocation461_spill] sm:$0xff]  ;;  %v4407_v41 = vmax.f32 %v3262_v43, 0.0 }
 0x2dd   : > { %5287 = vmatmul.mubr.bf16.gmra.mrb[84].mxu1 %v4872_v54  ;;  %v4408_v7 = vmax.f32 %v3264_v13, 0.0  ;;  %7899 = vmatmul.mubr.msk.bf16.gmra.mrb[196].mxu0 %vm2613_vm1, %v7770_v28  ;;  %v16306_v13 = vld [vmem:[#allocation103_spill] sm:$0xff]  ;;  %v16307_v28 = vld [vmem:[#allocation102_spill] sm:$0xff] }
 0x2de   : > { %v4409_v47 = vmax.f32 %v3266_v2, 0.0  ;;  %3537 = vmatprep.mubr.bf16.mxu0 %v16136_v0  ;;  %v7771_v23 = vcombine.low %v16307_v28, %v16306_v13  ;;  %v16308_v2 = vld [vmem:[#allocation462_spill] sm:$0xff]  ;;  %v16312_v13 = vld [vmem:[#allocation465_spill] sm:$0xff]  ;;  %v16313_v28 = vld [vmem:[#allocation464_spill] sm:$0xff] }
 0x2df   : > { %v4874_v42 = vpack.c.bf16 %v4408_v7, %v4406_v34 }
 0x2e0   : > { %1710 = vperm.xlu1 %8647, %v16302_v12   ;;  %1705 = vperm.xlu0 %8646, %v16303_v46   ;;  %v3269_v54 = vpop.f32.mrb[92].mxu0  ;;  %v4875_v45 = vpack.c.bf16 %v4409_v47, %v4407_v41  ;;  %v12763_v46 = vpop.permute.xlu1 %1320 }
 0x2e1   : > { %v3270_v50 = vadd.f32 %v3269_v54, %v12323_v40  ;;  %v3271_v29 = vpop.f32.mrb[93].mxu0  ;;  %16309 = vst [vmem:[#allocation699_spill] sm:$0xff] %v12763_v46  ;;  %v12767_v47 = vpop.permute.xlu0 %1315 }
 0x2e2   : > { %v3272_v43 = vadd.f32 %v3271_v29, %v12323_v40  ;;  %v3273_v12 = vpop.f32.mrb[94].mxu0  ;;  %5294 = vmatprep.mubr.bf16.mxu1 %v4875_v45  ;;  %16311 = vst [vmem:[#allocation658_spill] sm:$0xff] %v12767_v47 }
 0x2e3   : > { %v3274_v7 = vadd.f32 %v3273_v12, %v16310_v36  ;;  %v3275_v34 = vpop.f32.mrb[95].mxu0  ;;  %v4410_v54 = vmax.f32 %v3270_v50, 0.0  ;;  %v16316_v50 = vld [vmem:[#allocation467_spill] sm:$0xff] }
 0x2e4   : > { %1720 = vperm.xlu1 %8647, %v16305_v49   ;;  %1715 = vperm.xlu0 %8646, %v16308_v2   ;;  %v3276_v41 = vadd.f32 %v3275_v34, %v16310_v36  ;;  %v4411_v40 = vmax.f32 %v3272_v43, 0.0  ;;  %v16315_v36 = vld [vmem:[#allocation660_spill] sm:$0xff] }
 0x2e5   : > { %5295 = vmatmul.mubr.bf16.gmra.mrb[88].mxu1 %v4874_v42  ;;  %v4412_v49 = vmax.f32 %v3274_v7, 0.0  ;;  %7900 = vmatmul.mubr.msk.bf16.gmra.mrb[200].mxu0 %vm2613_vm1, %v7771_v23  ;;  %v12773_v42 = vpop.permute.xlu1 %1330  ;;  %v16317_v7 = vld [vmem:[#allocation105_spill] sm:$0xff]  ;;  %v16318_v23 = vld [vmem:[#allocation104_spill] sm:$0xff] }
 0x2e6   : > { %v4413_v29 = vmax.f32 %v3276_v41, 0.0  ;;  %3547 = vmatprep.mubr.bf16.mxu0 %v16136_v0  ;;  %16314 = vst [vmem:[#allocation700_spill] sm:$0xff] %v12773_v42  ;;  %v7772_v47 = vcombine.low %v16318_v23, %v16317_v7  ;;  %v16319_v41 = vld [vmem:[#allocation466_spill] sm:$0xff] }
 0x2e7   : > { %v4876_v45 = vpack.c.bf16 %v4412_v49, %v4410_v54  ;;  %v16321_v54 = vld [vmem:[#allocation659_spill] sm:$0xff] }
 0x2e8   : > { %1730 = vperm.xlu1 %8647, %v16312_v13   ;;  %1725 = vperm.xlu0 %8646, %v16313_v28   ;;  %v3279_v2 = vpop.f32.mrb[96].mxu0  ;;  %v4877_v12 = vpack.c.bf16 %v4413_v29, %v4411_v40  ;;  %v12781_v28 = vpop.permute.xlu0 %1325 }
 0x2e9   : > { %v3280_v34 = vadd.f32 %v3279_v2, %v16315_v36  ;;  %v3281_v46 = vpop.f32.mrb[97].mxu0  ;;  %16320 = vst [vmem:[#allocation660_spill] sm:$0xff] %v12781_v28 }
 0x2ea   : > { %v3282_v43 = vadd.f32 %v3281_v46, %v16315_v36  ;;  %v3283_v13 = vpop.f32.mrb[98].mxu0  ;;  %5302 = vmatprep.mubr.bf16.mxu1 %v4877_v12  ;;  %v16323_v36 = vld [vmem:[#allocation468_spill] sm:$0xff]  ;;  %v12789_v12 = vpop.permute.xlu1 %1340 }
 0x2eb   : > { %v3284_v49 = vadd.f32 %v3283_v13, %v16321_v54  ;;  %v3285_v40 = vpop.f32.mrb[99].mxu0  ;;  %v4414_v2 = vmax.f32 %v3280_v34, 0.0  ;;  %16324 = vst [vmem:[#allocation659_spill] sm:$0xff] %v12789_v12  ;;  %v16331_v12 = vld [vmem:[#allocation661_spill] sm:$0xff] }
 0x2ec   : > { %1740 = vperm.xlu1 %8647, %v16316_v50   ;;  %1735 = vperm.xlu0 %8646, %v16319_v41   ;;  %v3286_v29 = vadd.f32 %v3285_v40, %v16321_v54  ;;  %v16322_v50 = vld [vmem:[#allocation469_spill] sm:$0xff]  ;;  %v4415_v7 = vmax.f32 %v3282_v43, 0.0  ;;  %v16326_v54 = vld [vmem:[#allocation662_spill] sm:$0xff]  ;;  %v16327_v40 = vld [vmem:[#allocation471_spill] sm:$0xff] }
 0x2ed   : > { %5303 = vmatmul.mubr.bf16.gmra.mrb[92].mxu1 %v4876_v45  ;;  %v4416_v42 = vmax.f32 %v3284_v49, 0.0  ;;  %7901 = vmatmul.mubr.msk.bf16.gmra.mrb[204].mxu0 %vm2613_vm1, %v7772_v47  ;;  %v12791_v45 = vpop.permute.xlu0 %1335  ;;  %v16328_v47 = vld [vmem:[#allocation107_spill] sm:$0xff] }
 0x2ee   : > { %v4417_v46 = vmax.f32 %v3286_v29, 0.0  ;;  %3557 = vmatprep.mubr.bf16.mxu0 %v16136_v0  ;;  %16325 = vst [vmem:[#allocation701_spill] sm:$0xff] %v12791_v45 }
 0x2ef   : > { %v4878_v23 = vpack.c.bf16 %v4416_v42, %v4414_v2 }
 0x2f0   : > { %1750 = vperm.xlu1 %8647, %v16322_v50   ;;  %1745 = vperm.xlu0 %8646, %v16323_v36   ;;  %v3289_v41 = vpop.f32.mrb[100].mxu0  ;;  %v4879_v13 = vpack.c.bf16 %v4417_v46, %v4415_v7  ;;  %v16329_v50 = vld [vmem:[#allocation106_spill] sm:$0xff]  ;;  %v12801_v46 = vpop.permute.xlu1 %1350 }
 0x2f1   : > { %v3290_v34 = vadd.f32 %v3289_v41, %v16326_v54  ;;  %v3291_v49 = vpop.f32.mrb[101].mxu0  ;;  %v7773_v43 = vcombine.low %v16329_v50, %v16328_v47  ;;  %v16330_v36 = vld [vmem:[#allocation470_spill] sm:$0xff]  ;;  %16332 = vst [vmem:[#allocation662_spill] sm:$0xff] %v12801_v46  ;;  %v16341_v46 = vld [vmem:[#allocation663_spill] sm:$0xff] }
 0x2f2   : > { %v3292_v29 = vadd.f32 %v3291_v49, %v16326_v54  ;;  %v3293_v28 = vpop.f32.mrb[102].mxu0  ;;  %5310 = vmatprep.mubr.bf16.mxu1 %v4879_v13  ;;  %v16334_v49 = vld [vmem:[#allocation472_spill] sm:$0xff]  ;;  %v12807_v13 = vpop.permute.xlu0 %1345 }
 0x2f3   : > { %v3294_v42 = vadd.f32 %v3293_v28, %v16331_v12  ;;  %v3295_v2 = vpop.f32.mrb[103].mxu0  ;;  %v4418_v41 = vmax.f32 %v3290_v34, 0.0  ;;  %16335 = vst [vmem:[#allocation661_spill] sm:$0xff] %v12807_v13  ;;  %v16336_v34 = vld [vmem:[#allocation475_spill] sm:$0xff] }
 0x2f4   : > { %1760 = vperm.xlu1 %8647, %v16327_v40   ;;  %1755 = vperm.xlu0 %8646, %v16330_v36   ;;  %v3296_v7 = vadd.f32 %v3295_v2, %v16331_v12  ;;  %v16333_v40 = vld [vmem:[#allocation473_spill] sm:$0xff]  ;;  %v4419_v47 = vmax.f32 %v3292_v29, 0.0 }
 0x2f5   : > { %5311 = vmatmul.mubr.bf16.gmra.mrb[96].mxu1 %v4878_v23  ;;  %v4420_v45 = vmax.f32 %v3294_v42, 0.0  ;;  %7902 = vmatmul.mubr.msk.bf16.gmra.mrb[208].mxu0 %vm2613_vm1, %v7773_v43  ;;  %v16337_v42 = vld [vmem:[#allocation109_spill] sm:$0xff]  ;;  %v16338_v43 = vld [vmem:[#allocation108_spill] sm:$0xff] }
 0x2f6   : > { %v4421_v54 = vmax.f32 %v3296_v7, 0.0  ;;  %3567 = vmatprep.mubr.bf16.mxu0 %v16136_v0  ;;  %v7774_v2 = vcombine.low %v16338_v43, %v16337_v42  ;;  %v16339_v7 = vld [vmem:[#allocation474_spill] sm:$0xff]  ;;  %v16343_v42 = vld [vmem:[#allocation477_spill] sm:$0xff]  ;;  %v16344_v43 = vld [vmem:[#allocation476_spill] sm:$0xff] }
 0x2f7   : > { %v4880_v28 = vpack.c.bf16 %v4420_v45, %v4418_v41 }
 0x2f8   : > { %1770 = vperm.xlu1 %8647, %v16333_v40   ;;  %1765 = vperm.xlu0 %8646, %v16334_v49   ;;  %v3299_v23 = vpop.f32.mrb[104].mxu0  ;;  %v4881_v50 = vpack.c.bf16 %v4421_v54, %v4419_v47  ;;  %v12815_v49 = vpop.permute.xlu1 %1360 }
 0x2f9   : > { %v3300_v12 = vadd.f32 %v3299_v23, %v12352_v19  ;;  %v3301_v36 = vpop.f32.mrb[105].mxu0  ;;  %16340 = vst [vmem:[#allocation702_spill] sm:$0xff] %v12815_v49  ;;  %v12819_v54 = vpop.permute.xlu0 %1355 }
 0x2fa   : > { %v3302_v29 = vadd.f32 %v3301_v36, %v12352_v19  ;;  %v3303_v40 = vpop.f32.mrb[106].mxu0  ;;  %5318 = vmatprep.mubr.bf16.mxu1 %v4881_v50  ;;  %16342 = vst [vmem:[#allocation663_spill] sm:$0xff] %v12819_v54 }
 0x2fb   : > { %v3304_v45 = vadd.f32 %v3303_v40, %v16341_v46  ;;  %v3305_v41 = vpop.f32.mrb[107].mxu0  ;;  %v4422_v23 = vmax.f32 %v3300_v12, 0.0  ;;  %v16346_v12 = vld [vmem:[#allocation479_spill] sm:$0xff] }
 0x2fc   : > { %1780 = vperm.xlu1 %8647, %v16336_v34   ;;  %1775 = vperm.xlu0 %8646, %v16339_v7   ;;  %v3306_v47 = vadd.f32 %v3305_v41, %v16341_v46  ;;  %v4423_v19 = vmax.f32 %v3302_v29, 0.0 }
 0x2fd   : > { %5319 = vmatmul.mubr.bf16.gmra.mrb[100].mxu1 %v4880_v28  ;;  %v4424_v34 = vmax.f32 %v3304_v45, 0.0  ;;  %7903 = vmatmul.mubr.msk.bf16.gmra.mrb[212].mxu0 %vm2613_vm1, %v7774_v2  ;;  %v12825_v28 = vpop.permute.xlu1 %1370  ;;  %v16347_v45 = vld [vmem:[#allocation111_spill] sm:$0xff]  ;;  %v16348_v2 = vld [vmem:[#allocation110_spill] sm:$0xff] }
 0x2fe   : > { %v4425_v36 = vmax.f32 %v3306_v47, 0.0  ;;  %3577 = vmatprep.mubr.bf16.mxu0 %v16136_v0  ;;  %16345 = vst [vmem:[#allocation703_spill] sm:$0xff] %v12825_v28  ;;  %v7775_v49 = vcombine.low %v16348_v2, %v16347_v45  ;;  %v16349_v47 = vld [vmem:[#allocation478_spill] sm:$0xff] }
 0x2ff   : > { %v4882_v50 = vpack.c.bf16 %v4424_v34, %v4422_v23  ;;  %v16351_v23 = vld [vmem:[#allocation664_spill] sm:$0xff] }
 0x300   : > { %1790 = vperm.xlu1 %8647, %v16343_v42   ;;  %1785 = vperm.xlu0 %8646, %v16344_v43   ;;  %v3309_v7 = vpop.f32.mrb[108].mxu0  ;;  %v4883_v40 = vpack.c.bf16 %v4425_v36, %v4423_v19  ;;  %v12833_v43 = vpop.permute.xlu0 %1365 }
 0x301   : > { %v3310_v46 = vadd.f32 %v3309_v7, %v12363_v51  ;;  %v3311_v41 = vpop.f32.mrb[109].mxu0  ;;  %16350 = vst [vmem:[#allocation704_spill] sm:$0xff] %v12833_v43 }
 0x302   : > { %v3312_v29 = vadd.f32 %v3311_v41, %v12363_v51  ;;  %v3313_v42 = vpop.f32.mrb[110].mxu0  ;;  %5326 = vmatprep.mubr.bf16.mxu1 %v4883_v40  ;;  %v16353_v41 = vld [vmem:[#allocation480_spill] sm:$0xff]  ;;  %v12843_v40 = vpop.permute.xlu1 %1380 }
 0x303   : > { %v3314_v34 = vadd.f32 %v3313_v42, %v16351_v23  ;;  %v3315_v19 = vpop.f32.mrb[111].mxu0  ;;  %v4426_v7 = vmax.f32 %v3310_v46, 0.0  ;;  %16354 = vst [vmem:[#allocation664_spill] sm:$0xff] %v12843_v40 }
 0x304   : > { %1800 = vperm.xlu1 %8647, %v16346_v12   ;;  %1795 = vperm.xlu0 %8646, %v16349_v47   ;;  %v3316_v36 = vadd.f32 %v3315_v19, %v16351_v23  ;;  %v16352_v12 = vld [vmem:[#allocation481_spill] sm:$0xff]  ;;  %v4427_v45 = vmax.f32 %v3312_v29, 0.0  ;;  %v16356_v29 = vld [vmem:[#allocation483_spill] sm:$0xff] }
 0x305   : > { %5327 = vmatmul.mubr.bf16.gmra.mrb[104].mxu1 %v4882_v50  ;;  %v4428_v28 = vmax.f32 %v3314_v34, 0.0  ;;  %7904 = vmatmul.mubr.msk.bf16.gmra.mrb[216].mxu0 %vm2613_vm1, %v7775_v49  ;;  %v12847_v34 = vpop.permute.xlu0 %1375  ;;  %v16357_v19 = vld [vmem:[#allocation113_spill] sm:$0xff] }
 0x306   : > { %v4429_v51 = vmax.f32 %v3316_v36, 0.0  ;;  %3587 = vmatprep.mubr.bf16.mxu0 %v16136_v0  ;;  %16355 = vst [vmem:[#allocation705_spill] sm:$0xff] %v12847_v34  ;;  %v16358_v36 = vld [vmem:[#allocation112_spill] sm:$0xff]  ;;  %v12858_v49 = vpop.permute.xlu1 %1390 }
 0x307   : > { %v4884_v50 = vpack.c.bf16 %v4428_v28, %v4426_v7 }
 0x308   : > { %1810 = vperm.xlu1 %8647, %v16352_v12   ;;  %1805 = vperm.xlu0 %8646, %v16353_v41   ;;  %v12840_v2 = vpop.f32.mrb[0].mxu1  ;;  %v3319_v42 = vpop.f32.mrb[112].mxu0  ;;  %v4885_v46 = vpack.c.bf16 %v4429_v51, %v4427_v45  ;;  %v7776_v12 = vcombine.low %v16358_v36, %v16357_v19  ;;  %v16360_v45 = vld [vmem:[#allocation665_spill] sm:$0xff]  ;;  %v16363_v36 = vld [vmem:[#allocation484_spill] sm:$0xff] }
 0x309   : > { %v5122_v47 = vpop.f32.mrb[1].mxu1  ;;  %v3320_v41 = vadd.f32 %v3319_v42, %v12372_v56  ;;  %v3321_v43 = vpop.f32.mrb[113].mxu0  ;;  %16361 = vst [vmem:[#allocation665_spill] sm:$0xff] %v12858_v49  ;;  %v16362_v19 = vld [vmem:[#allocation485_spill] sm:$0xff] }
 0x30a   : > { %v12845_v23 = vpop.f32.mrb[2].mxu1  ;;  %v16359_v47 = vld [vmem:[#allocation482_spill] sm:$0xff]  ;;  %5334 = vmatprep.mubr.bf16.mxu1 %v4885_v46  ;;  %v3322_v28 = vadd.f32 %v3321_v43, %v12372_v56  ;;  %v3323_v7 = vpop.f32.mrb[114].mxu0 }
 0x30b   : > { %v5125_v40 = vpop.f32.mrb[3].mxu1  ;;  %v3324_v51 = vadd.f32 %v3323_v7, %v16360_v45  ;;  %v3325_v34 = vpop.f32.mrb[115].mxu0  ;;  %v4430_v42 = vmax.f32 %v3320_v41, 0.0  ;;  %v16365_v41 = vld [vmem:[#allocation487_spill] sm:$0xff] }
 0x30c   : > { %1820 = vperm.xlu1 %8647, %v16356_v29   ;;  %1815 = vperm.xlu0 %8646, %v16359_v47   ;;  %v3326_v29 = vadd.f32 %v3325_v34, %v16360_v45  ;;  %v12867_v56 = vpop.permute.xlu0 %1385  ;;  %v4431_v43 = vmax.f32 %v3322_v28, 0.0  ;;  %v16368_v28 = vld [vmem:[#allocation486_spill] sm:$0xff] }
 0x30d   : > { %5335 = vmatmul.mubr.bf16.gmra.mrb[108].mxu1 %v4884_v50  ;;  %7905 = vmatmul.mubr.msk.bf16.gmra.mrb[220].mxu0 %vm2613_vm1, %v7776_v12  ;;  %v4432_v40 = vmax.f32 %v3324_v51, 0.0  ;;  %16364 = vst [vmem:[#allocation706_spill] sm:$0xff] %v12867_v56  ;;  %v16366_v51 = vld [vmem:[#allocation115_spill] sm:$0xff] }
 0x30e   : > { %3597 = vmatprep.mubr.bf16.mxu0 %v16136_v0  ;;  %v4433_v50 = vmax.f32 %v3326_v29, 0.0  ;;  %v12878_v29 = vpop.permute.xlu1 %1400 }
 0x30f   : > { %v4886_v34 = vpack.c.bf16 %v4432_v40, %v4430_v42  ;;  %16369 = vst [vmem:[#allocation707_spill] sm:$0xff] %v12878_v29  ;;  %v16370_v40 = vld [vmem:[#allocation666_spill] sm:$0xff] }
 0x310   : > { %1830 = vperm.xlu1 %8647, %v16362_v19   ;;  %1825 = vperm.xlu0 %8646, %v16363_v36   ;;  %v12864_v46 = vpop.f32.mrb[4].mxu1  ;;  %v3329_v7 = vpop.f32.mrb[116].mxu0  ;;  %v4887_v45 = vpack.c.bf16 %v4433_v50, %v4431_v43  ;;  %v16367_v19 = vld [vmem:[#allocation114_spill] sm:$0xff] }
 0x311   : > { %v5130_v47 = vpop.f32.mrb[5].mxu1  ;;  %v7777_v36 = vcombine.low %v16367_v19, %v16366_v51  ;;  %v3330_v54 = vadd.f32 %v3329_v7, %v12383_v62  ;;  %v3331_v13 = vpop.f32.mrb[117].mxu0  ;;  %v16372_v7 = vld [vmem:[#allocation489_spill] sm:$0xff]  ;;  %v16373_v51 = vld [vmem:[#allocation488_spill] sm:$0xff] }
 0x312   : > { %v12869_v49 = vpop.f32.mrb[6].mxu1  ;;  %v3332_v47 = vadd.f32 %v3331_v13, %v12383_v62  ;;  %v3333_v42 = vpop.f32.mrb[118].mxu0  ;;  %5342 = vmatprep.mubr.bf16.mxu1 %v4887_v45 }
 0x313   : > { %v5133_v56 = vpop.f32.mrb[7].mxu1  ;;  %v3334_v12 = vadd.f32 %v3333_v42, %v16370_v40  ;;  %v3335_v10 = vpop.f32.mrb[119].mxu0 }
 0x314   : > { %1840 = vperm.xlu1 %8647, %v16365_v41   ;;  %1835 = vperm.xlu0 %8646, %v16368_v28   ;;  %v12882_v43 = vpop.permute.xlu0 %1395  ;;  %v3336_v50 = vadd.f32 %v3335_v10, %v16370_v40  ;;  %v4434_v56 = vmax.f32 %v3330_v54, 0.0  ;;  %v4435_v62 = vmax.f32 %v3332_v47, 0.0  ;;  %v12893_v10 = vpop.permute.xlu1 %1410  ;;  %v16375_v54 = vld [vmem:[#allocation491_spill] sm:$0xff]  ;;  %v16376_v40 = vld [vmem:[#allocation117_spill] sm:$0xff] }
 0x315   : > { %5343 = vmatmul.mubr.bf16.gmra.mrb[112].mxu1 %v4886_v34  ;;  %16371 = vst [vmem:[#allocation666_spill] sm:$0xff] %v12882_v43  ;;  %7906 = vmatmul.mubr.msk.bf16.gmra.mrb[224].mxu0 %vm2613_vm1, %v7777_v36  ;;  %v4436_v41 = vmax.f32 %v3334_v12, 0.0  ;;  %16374 = vst [vmem:[#allocation708_spill] sm:$0xff] %v12893_v10  ;;  %v16380_v10 = vld [vmem:[#allocation667_spill] sm:$0xff] }
 0x316   : > { %3607 = vmatprep.mubr.bf16.mxu0 %v16136_v0  ;;  %v4437_v13 = vmax.f32 %v3336_v50, 0.0 }
 0x317   : > { %v4888_v42 = vpack.c.bf16 %v4436_v41, %v4434_v56 }
 0x318   : > { %1850 = vperm.xlu1 %8647, %v16372_v7   ;;  %1845 = vperm.xlu0 %8646, %v16373_v51   ;;  %v12888_v19 = vpop.f32.mrb[8].mxu1  ;;  %v3339_v34 = vpop.f32.mrb[120].mxu0  ;;  %v4889_v12 = vpack.c.bf16 %v4437_v13, %v4435_v62  ;;  %v16377_v7 = vld [vmem:[#allocation116_spill] sm:$0xff]  ;;  %v16381_v13 = vld [vmem:[#allocation493_spill] sm:$0xff] }
 0x319   : > { %v5138_v45 = vpop.f32.mrb[9].mxu1  ;;  %v7778_v51 = vcombine.low %v16377_v7, %v16376_v40  ;;  %v3340_v29 = vadd.f32 %v3339_v34, %v12392_v48  ;;  %v3341_v47 = vpop.f32.mrb[121].mxu0  ;;  %v16382_v40 = vld [vmem:[#allocation492_spill] sm:$0xff] }
 0x31a   : > { %v12891_v28 = vpop.f32.mrb[10].mxu1  ;;  %v16378_v45 = vld [vmem:[#allocation490_spill] sm:$0xff]  ;;  %v12902_v43 = vpop.permute.xlu0 %1405  ;;  %v3342_v56 = vadd.f32 %v3341_v47, %v12392_v48  ;;  %5350 = vmatprep.mubr.bf16.mxu1 %v4889_v12 }
 0x31b   : > { %v5141_v50 = vpop.f32.mrb[11].mxu1  ;;  %16379 = vst [vmem:[#allocation709_spill] sm:$0xff] %v12902_v43  ;;  %v3343_v41 = vpop.f32.mrb[122].mxu0  ;;  %v4438_v34 = vmax.f32 %v3340_v29, 0.0 }
 0x31c   : > { %1860 = vperm.xlu1 %8647, %v16375_v54   ;;  %1855 = vperm.xlu0 %8646, %v16378_v45   ;;  %v3344_v36 = vadd.f32 %v3343_v41, %v16380_v10  ;;  %v3345_v38 = vpop.f32.mrb[123].mxu0  ;;  %v12913_v48 = vpop.permute.xlu1 %1420  ;;  %v4439_v12 = vmax.f32 %v3342_v56, 0.0  ;;  %v16386_v41 = vld [vmem:[#allocation119_spill] sm:$0xff] }
 0x31d   : > { %5351 = vmatmul.mubr.bf16.gmra.mrb[116].mxu1 %v4888_v42  ;;  %v3346_v62 = vadd.f32 %v3345_v38, %v16380_v10  ;;  %7907 = vmatmul.mubr.msk.bf16.gmra.mrb[228].mxu0 %vm2613_vm1, %v7778_v51  ;;  %16383 = vst [vmem:[#allocation667_spill] sm:$0xff] %v12913_v48 }
 0x31e   : > { %v4440_v54 = vmax.f32 %v3344_v36, 0.0  ;;  %3617 = vmatprep.mubr.bf16.mxu0 %v16136_v0  ;;  %v12917_v10 = vpop.permute.xlu0 %1415  ;;  %v16385_v36 = vld [vmem:[#allocation495_spill] sm:$0xff] }
 0x31f   : > { %v4441_v47 = vmax.f32 %v3346_v62, 0.0  ;;  %16384 = vst [vmem:[#allocation710_spill] sm:$0xff] %v12917_v10 }
 0x320   : > { %1870 = vperm.xlu1 %8647, %v16381_v13   ;;  %1865 = vperm.xlu0 %8646, %v16382_v40   ;;  %v12910_v7 = vpop.f32.mrb[12].mxu1  ;;  %v3349_v42 = vpop.f32.mrb[124].mxu0  ;;  %v4890_v38 = vpack.c.bf16 %v4440_v54, %v4438_v34  ;;  %v16387_v13 = vld [vmem:[#allocation118_spill] sm:$0xff]  ;;  %v16389_v54 = vld [vmem:[#allocation668_spill] sm:$0xff] }
 0x321   : > { %v5146_v50 = vpop.f32.mrb[13].mxu1  ;;  %v4891_v51 = vpack.c.bf16 %v4441_v47, %v4439_v12  ;;  %v7779_v40 = vcombine.low %v16387_v13, %v16386_v41  ;;  %v3350_v48 = vadd.f32 %v3349_v42, %v12403_v22  ;;  %v3351_v56 = vpop.f32.mrb[125].mxu0  ;;  %v16391_v47 = vld [vmem:[#allocation497_spill] sm:$0xff]  ;;  %v16392_v41 = vld [vmem:[#allocation496_spill] sm:$0xff] }
 0x322   : > { %v12915_v45 = vpop.f32.mrb[14].mxu1  ;;  %v16388_v50 = vld [vmem:[#allocation494_spill] sm:$0xff]  ;;  %v3352_v43 = vadd.f32 %v3351_v56, %v12403_v22  ;;  %v3353_v34 = vpop.f32.mrb[126].mxu0 }
 0x323   : > { %v5149_v62 = vpop.f32.mrb[15].mxu1  ;;  %5358 = vmatprep.mubr.bf16.mxu1 %v4891_v51  ;;  %v3354_v10 = vadd.f32 %v3353_v34, %v16389_v54  ;;  %v3355_v37 = vpop.f32.mrb[127].mxu0  ;;  %v4442_v42 = vmax.f32 %v3350_v48, 0.0  ;;  %v16394_v48 = vld [vmem:[#allocation499_spill] sm:$0xff]  ;;  %v16395_v34 = vld [vmem:[#allocation121_spill] sm:$0xff] }
 0x324   : > { %1880 = vperm.xlu1 %8647, %v16385_v36   ;;  %1875 = vperm.xlu0 %8646, %v16388_v50   ;;  %v12928_v29 = vpop.permute.xlu1 %1430  ;;  %v3356_v12 = vadd.f32 %v3355_v37, %v16389_v54  ;;  %v12937_v22 = vpop.permute.xlu0 %1425  ;;  %v4443_v51 = vmax.f32 %v3352_v43, 0.0  ;;  %v16396_v54 = vld [vmem:[#allocation120_spill] sm:$0xff]  ;;  %v16397_v43 = vld [vmem:[#allocation498_spill] sm:$0xff] }
 0x325   : > { %5359 = vmatmul.mubr.bf16.gmra.mrb[120].mxu1 %v4890_v38  ;;  %16390 = vst [vmem:[#allocation668_spill] sm:$0xff] %v12928_v29  ;;  %7908 = vmatmul.mubr.msk.bf16.gmra.mrb[232].mxu0 %vm2613_vm1, %v7779_v40  ;;  %v4444_v36 = vmax.f32 %v3354_v10, 0.0  ;;  %16393 = vst [vmem:[#allocation711_spill] sm:$0xff] %v12937_v22 }
 0x326   : > { %3627 = vmatprep.mubr.bf16.mxu0 %v16136_v0  ;;  %v4445_v38 = vmax.f32 %v3356_v12, 0.0 }
 0x327   : > { %v4892_v37 = vpack.c.bf16 %v4444_v36, %v4442_v42  ;;  %v16399_v36 = vld [vmem:[#allocation669_spill] sm:$0xff] }
 0x328   : > { %1890 = vperm.xlu1 %8647, %v16391_v47   ;;  %1885 = vperm.xlu0 %8646, %v16392_v41   ;;  %v12934_v13 = vpop.f32.mrb[16].mxu1  ;;  %v3359_v62 = vpop.f32.mrb[128].mxu0  ;;  %v4893_v10 = vpack.c.bf16 %v4445_v38, %v4443_v51  ;;  %v7780_v47 = vcombine.low %v16396_v54, %v16395_v34  ;;  %v16402_v34 = vld [vmem:[#allocation500_spill] sm:$0xff] }
 0x329   : > { %v5154_v56 = vpop.f32.mrb[17].mxu1  ;;  %v3360_v41 = vadd.f32 %v3359_v62, %v12412_v58  ;;  %v3361_v29 = vpop.f32.mrb[129].mxu0  ;;  %v16401_v62 = vld [vmem:[#allocation501_spill] sm:$0xff] }
 0x32a   : > { %v12939_v50 = vpop.f32.mrb[18].mxu1  ;;  %v12948_v12 = vpop.permute.xlu1 %1440  ;;  %v3362_v56 = vadd.f32 %v3361_v29, %v12412_v58  ;;  %5366 = vmatprep.mubr.bf16.mxu1 %v4893_v10 }
 0x32b   : > { %v5157_v22 = vpop.f32.mrb[19].mxu1  ;;  %16398 = vst [vmem:[#allocation712_spill] sm:$0xff] %v12948_v12  ;;  %v3363_v42 = vpop.f32.mrb[130].mxu0 }
 0x32c   : > { %1900 = vperm.xlu1 %8647, %v16394_v48   ;;  %1895 = vperm.xlu0 %8646, %v16397_v43   ;;  %v3364_v40 = vadd.f32 %v3363_v42, %v16399_v36  ;;  %v3365_v31 = vpop.f32.mrb[131].mxu0  ;;  %v12952_v51 = vpop.permute.xlu0 %1435  ;;  %v4446_v22 = vmax.f32 %v3360_v41, 0.0  ;;  %v4447_v58 = vmax.f32 %v3362_v56, 0.0  ;;  %v16404_v41 = vld [vmem:[#allocation503_spill] sm:$0xff] }
 0x32d   : > { %5367 = vmatmul.mubr.bf16.gmra.mrb[124].mxu1 %v4892_v37  ;;  %16400 = vst [vmem:[#allocation669_spill] sm:$0xff] %v12952_v51  ;;  %v3366_v38 = vadd.f32 %v3365_v31, %v16399_v36  ;;  %7909 = vmatmul.mubr.msk.bf16.gmra.mrb[236].mxu0 %vm2613_vm1, %v7780_v47  ;;  %v16405_v36 = vld [vmem:[#allocation123_spill] sm:$0xff] }
 0x32e   : > { %v4448_v48 = vmax.f32 %v3364_v40, 0.0  ;;  %3637 = vmatprep.mubr.bf16.mxu0 %v16136_v0  ;;  %v12963_v31 = vpop.permute.xlu1 %1450 }
 0x32f   : > { %v4449_v29 = vmax.f32 %v3366_v38, 0.0  ;;  %16403 = vst [vmem:[#allocation713_spill] sm:$0xff] %v12963_v31  ;;  %v16409_v31 = vld [vmem:[#allocation670_spill] sm:$0xff] }
 0x330   : > { %1910 = vperm.xlu1 %8647, %v16401_v62   ;;  %1905 = vperm.xlu0 %8646, %v16402_v34   ;;  %v12958_v54 = vpop.f32.mrb[20].mxu1  ;;  %v3369_v37 = vpop.f32.mrb[132].mxu0  ;;  %v4894_v42 = vpack.c.bf16 %v4448_v48, %v4446_v22  ;;  %v16406_v62 = vld [vmem:[#allocation122_spill] sm:$0xff] }
 0x331   : > { %v5162_v10 = vpop.f32.mrb[21].mxu1  ;;  %v4895_v40 = vpack.c.bf16 %v4449_v29, %v4447_v58  ;;  %v7781_v34 = vcombine.low %v16406_v62, %v16405_v36  ;;  %v3370_v12 = vadd.f32 %v3369_v37, %v12423_v52  ;;  %v3371_v56 = vpop.f32.mrb[133].mxu0  ;;  %v16410_v29 = vld [vmem:[#allocation505_spill] sm:$0xff]  ;;  %v16411_v36 = vld [vmem:[#allocation504_spill] sm:$0xff] }
 0x332   : > { %v12961_v43 = vpop.f32.mrb[22].mxu1  ;;  %v16407_v10 = vld [vmem:[#allocation502_spill] sm:$0xff]  ;;  %v12972_v51 = vpop.permute.xlu0 %1445  ;;  %v3372_v22 = vadd.f32 %v3371_v56, %v12423_v52 }
 0x333   : > { %v5165_v38 = vpop.f32.mrb[23].mxu1  ;;  %16408 = vst [vmem:[#allocation714_spill] sm:$0xff] %v12972_v51  ;;  %v3373_v48 = vpop.f32.mrb[134].mxu0  ;;  %5374 = vmatprep.mubr.bf16.mxu1 %v4895_v40  ;;  %v4450_v37 = vmax.f32 %v3370_v12, 0.0 }
 0x334   : > { %1920 = vperm.xlu1 %8647, %v16404_v41   ;;  %1915 = vperm.xlu0 %8646, %v16407_v10   ;;  %v3374_v47 = vadd.f32 %v3373_v48, %v16409_v31  ;;  %v3375_v32 = vpop.f32.mrb[135].mxu0  ;;  %v12983_v52 = vpop.permute.xlu1 %1460  ;;  %v4451_v40 = vmax.f32 %v3372_v22, 0.0  ;;  %v16415_v48 = vld [vmem:[#allocation125_spill] sm:$0xff] }
 0x335   : > { %5375 = vmatmul.mubr.bf16.gmra.mrb[128].mxu1 %v4894_v42  ;;  %v3376_v58 = vadd.f32 %v3375_v32, %v16409_v31  ;;  %7910 = vmatmul.mubr.msk.bf16.gmra.mrb[240].mxu0 %vm2613_vm1, %v7781_v34  ;;  %16412 = vst [vmem:[#allocation670_spill] sm:$0xff] %v12983_v52 }
 0x336   : > { %v4452_v41 = vmax.f32 %v3374_v47, 0.0  ;;  %3647 = vmatprep.mubr.bf16.mxu0 %v16136_v0  ;;  %v12987_v31 = vpop.permute.xlu0 %1455  ;;  %v16414_v47 = vld [vmem:[#allocation507_spill] sm:$0xff] }
 0x337   : > { %v4453_v56 = vmax.f32 %v3376_v58, 0.0  ;;  %16413 = vst [vmem:[#allocation715_spill] sm:$0xff] %v12987_v31 }
 0x338   : > { %1930 = vperm.xlu1 %8647, %v16410_v29   ;;  %1925 = vperm.xlu0 %8646, %v16411_v36   ;;  %v12980_v62 = vpop.f32.mrb[24].mxu1  ;;  %v3379_v42 = vpop.f32.mrb[136].mxu0  ;;  %v4896_v32 = vpack.c.bf16 %v4452_v41, %v4450_v37  ;;  %v16416_v29 = vld [vmem:[#allocation124_spill] sm:$0xff]  ;;  %v16418_v41 = vld [vmem:[#allocation671_spill] sm:$0xff] }
 0x339   : > { %v5170_v38 = vpop.f32.mrb[25].mxu1  ;;  %v4897_v34 = vpack.c.bf16 %v4453_v56, %v4451_v40  ;;  %v7782_v36 = vcombine.low %v16416_v29, %v16415_v48  ;;  %v3380_v52 = vadd.f32 %v3379_v42, %v12432_v18  ;;  %v3381_v22 = vpop.f32.mrb[137].mxu0  ;;  %v16419_v40 = vld [vmem:[#allocation509_spill] sm:$0xff]  ;;  %v16421_v29 = vld [vmem:[#allocation508_spill] sm:$0xff] }
 0x33a   : > { %v12985_v10 = vpop.f32.mrb[26].mxu1  ;;  %v16417_v38 = vld [vmem:[#allocation506_spill] sm:$0xff]  ;;  %v3382_v51 = vadd.f32 %v3381_v22, %v12432_v18  ;;  %v3383_v37 = vpop.f32.mrb[138].mxu0 }
 0x33b   : > { %v5173_v58 = vpop.f32.mrb[27].mxu1  ;;  %5382 = vmatprep.mubr.bf16.mxu1 %v4897_v34  ;;  %v3384_v31 = vadd.f32 %v3383_v37, %v16418_v41  ;;  %v3385_v39 = vpop.f32.mrb[139].mxu0  ;;  %v4454_v42 = vmax.f32 %v3380_v52, 0.0  ;;  %v16423_v52 = vld [vmem:[#allocation511_spill] sm:$0xff] }
 0x33c   : > { %1940 = vperm.xlu1 %8647, %v16414_v47   ;;  %1935 = vperm.xlu0 %8646, %v16417_v38   ;;  %v3386_v47 = vadd.f32 %v3385_v39, %v16418_v41  ;;  %v13001_v56 = vpop.permute.xlu1 %1470  ;;  %v13007_v18 = vpop.permute.xlu0 %1465  ;;  %v4455_v34 = vmax.f32 %v3382_v51, 0.0  ;;  %v16424_v41 = vld [vmem:[#allocation127_spill] sm:$0xff]  ;;  %v16426_v51 = vld [vmem:[#allocation510_spill] sm:$0xff] }
 0x33d   : > { %5383 = vmatmul.mubr.bf16.gmra.mrb[132].mxu1 %v4896_v32  ;;  %7911 = vmatmul.mubr.msk.bf16.gmra.mrb[244].mxu0 %vm2613_vm1, %v7782_v36  ;;  %16420 = vst [vmem:[#allocation671_spill] sm:$0xff] %v13001_v56  ;;  %v4456_v48 = vmax.f32 %v3384_v31, 0.0  ;;  %16422 = vst [vmem:[#allocation716_spill] sm:$0xff] %v13007_v18 }
 0x33e   : > { %3657 = vmatprep.mubr.bf16.mxu0 %v16136_v0  ;;  %v4457_v32 = vmax.f32 %v3386_v47, 0.0 }
 0x33f   : > { %v4898_v36 = vpack.c.bf16 %v4456_v48, %v4454_v42  ;;  %v16427_v42 = vld [vmem:[#allocation672_spill] sm:$0xff] }
 0x340   : > { %1950 = vperm.xlu1 %8647, %v16419_v40   ;;  %1945 = vperm.xlu0 %8646, %v16421_v29   ;;  %v13004_v58 = vpop.f32.mrb[28].mxu1  ;;  %v3389_v39 = vpop.f32.mrb[140].mxu0  ;;  %v4899_v31 = vpack.c.bf16 %v4457_v32, %v4455_v34  ;;  %v16425_v40 = vld [vmem:[#allocation126_spill] sm:$0xff]  ;;  %v16429_v32 = vld [vmem:[#allocation513_spill] sm:$0xff] }
 0x341   : > { %v5178_v22 = vpop.f32.mrb[29].mxu1  ;;  %v7783_v29 = vcombine.low %v16425_v40, %v16424_v41  ;;  %v3390_v12 = vadd.f32 %v3389_v39, %v12443_v60  ;;  %v3391_v56 = vpop.f32.mrb[141].mxu0  ;;  %v16431_v41 = vld [vmem:[#allocation512_spill] sm:$0xff] }
 0x342   : > { %v13009_v38 = vpop.f32.mrb[30].mxu1  ;;  %v3392_v47 = vadd.f32 %v3391_v56, %v12443_v60  ;;  %v3393_v22 = vpop.f32.mrb[142].mxu0  ;;  %5390 = vmatprep.mubr.bf16.mxu1 %v4899_v31 }
 0x343   : > { %v5181_v18 = vpop.f32.mrb[31].mxu1  ;;  %v3394_v48 = vadd.f32 %v3393_v22, %v16427_v42  ;;  %v3395_v26 = vpop.f32.mrb[143].mxu0 }
 0x344   : > { %1960 = vperm.xlu1 %8647, %v16423_v52   ;;  %1955 = vperm.xlu0 %8646, %v16426_v51   ;;  %v13020_v37 = vpop.permute.xlu1 %1480  ;;  %v3396_v34 = vadd.f32 %v3395_v26, %v16427_v42  ;;  %v13025_v39 = vpop.permute.xlu0 %1475  ;;  %v4458_v18 = vmax.f32 %v3390_v12, 0.0  ;;  %v4459_v56 = vmax.f32 %v3392_v47, 0.0  ;;  %v16434_v47 = vld [vmem:[#allocation673_spill] sm:$0xff] }
 0x345   : > { %5391 = vmatmul.mubr.bf16.gmra.mrb[136].mxu1 %v4898_v36  ;;  %16428 = vst [vmem:[#allocation672_spill] sm:$0xff] %v13020_v37  ;;  %7912 = vmatmul.mubr.msk.bf16.gmra.mrb[248].mxu0 %vm2613_vm1, %v7783_v29  ;;  %16430 = vst [vmem:[#allocation717_spill] sm:$0xff] %v13025_v39  ;;  %v4460_v52 = vmax.f32 %v3394_v48, 0.0  ;;  %v16432_v29 = vld [vmem:[#allocation129_spill] sm:$0xff]  ;;  %v16433_v37 = vld [vmem:[#allocation128_spill] sm:$0xff] }
 0x346   : > { %3667 = vmatprep.mubr.bf16.mxu0 %v16136_v0  ;;  %v4461_v31 = vmax.f32 %v3396_v34, 0.0 }
 0x347   : > { %v4900_v22 = vpack.c.bf16 %v4460_v52, %v4458_v18  ;;  %v16435_v18 = vpack.c.bf16 %v12845_v23, %v12840_v2  ;;  %v16437_v2 = vld [vmem:[#allocation130_spill] sm:$0xff] }
 0x348   : > { %1970 = vperm.xlu1 %8647, %v16429_v32   ;;  %1965 = vperm.xlu0 %8646, %v16431_v41   ;;  %v5184_v60 = vpop.f32.mrb[32].mxu1  ;;  %v3399_v40 = vpop.f32.mrb[144].mxu0  ;;  %v4901_v42 = vpack.c.bf16 %v4461_v31, %v4459_v56  ;;  %v7784_v32 = vcombine.low %v16433_v37, %v16432_v29  ;;  %v16436_v29 = vld [vmem:[#allocation131_spill] sm:$0xff] }
 0x349   : > { %v5186_v36 = vpop.f32.mrb[33].mxu1  ;;  %v3400_v39 = vadd.f32 %v3399_v40, %v12452_v4  ;;  %v3401_v12 = vpop.f32.mrb[145].mxu0  ;;  %v7785_v23 = vcombine.low %v16437_v2, %v16436_v29 }
 0x34a   : > { %v5187_v51 = vpop.f32.mrb[34].mxu1  ;;  %v3402_v41 = vadd.f32 %v3401_v12, %v12452_v4  ;;  %v3403_v33 = vpop.f32.mrb[146].mxu0  ;;  %5398 = vmatprep.mubr.bf16.mxu1 %v4901_v42 }
 0x34b   : > { %v6151_v26 = vpack.c.bf16 %v5187_v51, %v5184_v60  ;;  %v5189_v48 = vpop.f32.mrb[35].mxu1  ;;  %v3404_v34 = vadd.f32 %v3403_v33, %v16434_v47  ;;  %v3405_v36 = vpop.f32.mrb[147].mxu0  ;;  %v4462_v37 = vmax.f32 %v3400_v39, 0.0 }
 0x34c   : > { %v3406_v52 = vadd.f32 %v3405_v36, %v16434_v47  ;;  %v4463_v4 = vmax.f32 %v3402_v41, 0.0  ;;  %v16438_v41 = vld [vmem:[#allocation674_spill] sm:$0xff] }
 0x34d   : > { %8108 = vmatprep.subr.bf16.mxu0 %v6151_v26  ;;  %5399 = vmatmul.mubr.bf16.gmra.mrb[140].mxu1 %v4900_v22  ;;  %v4464_v60 = vmax.f32 %v3404_v34, 0.0 }
 0x34e   : > { %8109 = vmatpush3.bf16.msra.mxu0 %v16435_v18  ;;  %v4465_v31 = vmax.f32 %v3406_v52, 0.0  ;;  %v16439_v18 = vpack.c.bf16 %v12869_v49, %v12864_v46  ;;  %v16441_v49 = vld [vmem:[#allocation132_spill] sm:$0xff] }
 0x34f   : > { %7913 = vmatmul.mubr.msk.bf16.gmra.mrb[252].mxu0 %vm2613_vm1, %v7784_v32  ;;  %v4902_v26 = vpack.c.bf16 %v4464_v60, %v4462_v37 }
 0x350   : > { %v5192_v56 = vpop.f32.mrb[36].mxu1  ;;  %3677 = vmatprep.mubr.bf16.mxu0 %v16136_v0  ;;  %v3409_v51 = vpop.f32.mrb[148].mxu0  ;;  %v4903_v42 = vpack.c.bf16 %v4465_v31, %v4463_v4 }
 0x351   : > { %v5194_v40 = vpop.f32.mrb[37].mxu1  ;;  %v3410_v12 = vadd.f32 %v3409_v51, %v12463_v44  ;;  %v3411_v48 = vpop.f32.mrb[149].mxu0 }
 0x352   : > { %v5195_v33 = vpop.f32.mrb[38].mxu1  ;;  %v3412_v39 = vadd.f32 %v3411_v48, %v12463_v44  ;;  %v3413_v47 = vpop.f32.mrb[150].mxu0  ;;  %5406 = vmatprep.mubr.bf16.mxu1 %v4903_v42  ;;  %v16440_v42 = vld [vmem:[#allocation133_spill] sm:$0xff] }
 0x353   : > { %v6152_v22 = vpack.c.bf16 %v5195_v33, %v5192_v56  ;;  %v5197_v32 = vpop.f32.mrb[39].mxu1  ;;  %v3414_v34 = vadd.f32 %v3413_v47, %v16438_v41  ;;  %v3415_v36 = vpop.f32.mrb[151].mxu0  ;;  %v4466_v37 = vmax.f32 %v3410_v12, 0.0  ;;  %v7786_v46 = vcombine.low %v16441_v49, %v16440_v42 }
 0x354   : > { %v3416_v52 = vadd.f32 %v3415_v36, %v16438_v41  ;;  %v4467_v44 = vmax.f32 %v3412_v39, 0.0  ;;  %v16442_v32 = vld [vmem:[#allocation675_spill] sm:$0xff]  ;;  %v16443_v41 = vpack.c.bf16 %v12891_v28, %v12888_v19  ;;  %v16445_v19 = vld [vmem:[#allocation134_spill] sm:$0xff] }
 0x355   : > { %8110 = vmatprep.subr.bf16.mxu0 %v6152_v22  ;;  %5407 = vmatmul.mubr.bf16.gmra.mrb[144].mxu1 %v4902_v26  ;;  %v4468_v60 = vmax.f32 %v3414_v34, 0.0 }
 0x356   : > { %8111 = vmatpush3.bf16.msra.mxu0 %v16439_v18  ;;  %v4469_v4 = vmax.f32 %v3416_v52, 0.0 }
 0x357   : > { %7914 = vmatmul.mubr.msk.bf16.gmra.mrb[0].mxu0 %vm2613_vm1, %v7785_v23  ;;  %v4904_v33 = vpack.c.bf16 %v4468_v60, %v4466_v37 }
 0x358   : > { %v5200_v56 = vpop.f32.mrb[40].mxu1  ;;  %3687 = vmatprep.mubr.bf16.mxu0 %v16136_v0  ;;  %v3419_v40 = vpop.f32.mrb[152].mxu0  ;;  %v4905_v22 = vpack.c.bf16 %v4469_v4, %v4467_v44 }
 0x359   : > { %v5202_v31 = vpop.f32.mrb[41].mxu1  ;;  %v3420_v29 = vadd.f32 %v3419_v40, %v12472_v57  ;;  %v3421_v2 = vpop.f32.mrb[153].mxu0 }
 0x35a   : > { %v5203_v51 = vpop.f32.mrb[42].mxu1  ;;  %v3422_v12 = vadd.f32 %v3421_v2, %v12472_v57  ;;  %v3423_v48 = vpop.f32.mrb[154].mxu0  ;;  %5414 = vmatprep.mubr.bf16.mxu1 %v4905_v22 }
 0x35b   : > { %v6153_v26 = vpack.c.bf16 %v5203_v51, %v5200_v56  ;;  %v5205_v23 = vpop.f32.mrb[43].mxu1  ;;  %v3424_v39 = vadd.f32 %v3423_v48, %v16442_v32  ;;  %v3425_v47 = vpop.f32.mrb[155].mxu0  ;;  %v4470_v36 = vmax.f32 %v3420_v29, 0.0  ;;  %v16444_v51 = vld [vmem:[#allocation135_spill] sm:$0xff] }
 0x35c   : > { %v3426_v34 = vadd.f32 %v3425_v47, %v16442_v32  ;;  %v4471_v57 = vmax.f32 %v3422_v12, 0.0  ;;  %v7787_v28 = vcombine.low %v16445_v19, %v16444_v51  ;;  %v16447_v23 = vpack.c.bf16 %v12915_v45, %v12910_v7  ;;  %v16449_v7 = vld [vmem:[#allocation136_spill] sm:$0xff] }
 0x35d   : > { %8112 = vmatprep.subr.bf16.mxu0 %v6153_v26  ;;  %5415 = vmatmul.mubr.bf16.gmra.mrb[148].mxu1 %v4904_v33  ;;  %v4472_v18 = vmax.f32 %v3424_v39, 0.0 }
 0x35e   : > { %8113 = vmatpush3.bf16.msra.mxu0 %v16443_v41  ;;  %v4473_v37 = vmax.f32 %v3426_v34, 0.0 }
 0x35f   : > { %7915 = vmatmul.mubr.msk.bf16.gmra.mrb[4].mxu0 %vm2613_vm1, %v7786_v46  ;;  %v4906_v4 = vpack.c.bf16 %v4472_v18, %v4470_v36  ;;  %v16446_v46 = vld [vmem:[#allocation676_spill] sm:$0xff] }
 0x360   : > { %v5208_v52 = vpop.f32.mrb[44].mxu1  ;;  %3697 = vmatprep.mubr.bf16.mxu0 %v16136_v0  ;;  %v3429_v56 = vpop.f32.mrb[156].mxu0  ;;  %v4907_v40 = vpack.c.bf16 %v4473_v37, %v4471_v57  ;;  %v16448_v37 = vld [vmem:[#allocation137_spill] sm:$0xff] }
 0x361   : > { %v5210_v60 = vpop.f32.mrb[45].mxu1  ;;  %v3430_v33 = vadd.f32 %v3429_v56, %v12483_v63  ;;  %v3431_v26 = vpop.f32.mrb[157].mxu0  ;;  %v7788_v45 = vcombine.low %v16449_v7, %v16448_v37 }
 0x362   : > { %v5211_v44 = vpop.f32.mrb[46].mxu1  ;;  %v3432_v42 = vadd.f32 %v3431_v26, %v12483_v63  ;;  %v3433_v49 = vpop.f32.mrb[158].mxu0  ;;  %5422 = vmatprep.mubr.bf16.mxu1 %v4907_v40  ;;  %v16450_v40 = vld [vmem:[#allocation677_spill] sm:$0xff] }
 0x363   : > { %v6154_v31 = vpack.c.bf16 %v5211_v44, %v5208_v52  ;;  %v5213_v22 = vpop.f32.mrb[47].mxu1  ;;  %v3434_v29 = vadd.f32 %v3433_v49, %v16446_v46  ;;  %v3435_v2 = vpop.f32.mrb[159].mxu0  ;;  %v4474_v48 = vmax.f32 %v3430_v33, 0.0 }
 0x364   : > { %v3436_v12 = vadd.f32 %v3435_v2, %v16446_v46  ;;  %v4475_v63 = vmax.f32 %v3432_v42, 0.0 }
 0x365   : > { %8114 = vmatprep.subr.bf16.mxu0 %v6154_v31  ;;  %5423 = vmatmul.mubr.bf16.gmra.mrb[152].mxu1 %v4906_v4  ;;  %v4476_v32 = vmax.f32 %v3434_v29, 0.0 }
 0x366   : > { %8115 = vmatpush3.bf16.msra.mxu0 %v16447_v23  ;;  %v4477_v47 = vmax.f32 %v3436_v12, 0.0 }
 0x367   : > { %7916 = vmatmul.mubr.msk.bf16.gmra.mrb[8].mxu0 %vm2613_vm1, %v7787_v28  ;;  %v4908_v18 = vpack.c.bf16 %v4476_v32, %v4474_v48  ;;  %v16451_v28 = vpack.c.bf16 %v12939_v50, %v12934_v13  ;;  %v16452_v32 = vld [vmem:[#allocation139_spill] sm:$0xff]  ;;  %v16453_v13 = vld [vmem:[#allocation138_spill] sm:$0xff] }
 0x368   : > { %v5216_v39 = vpop.f32.mrb[48].mxu1  ;;  %3707 = vmatprep.mubr.bf16.mxu0 %v16136_v0  ;;  %v3439_v34 = vpop.f32.mrb[160].mxu0  ;;  %v4909_v57 = vpack.c.bf16 %v4477_v47, %v4475_v63  ;;  %v7789_v50 = vcombine.low %v16453_v13, %v16452_v32 }
 0x369   : > { %v5218_v41 = vpop.f32.mrb[49].mxu1  ;;  %v3440_v60 = vadd.f32 %v3439_v34, %v12492_v20  ;;  %v3441_v56 = vpop.f32.mrb[161].mxu0 }
 0x36a   : > { %v5219_v36 = vpop.f32.mrb[50].mxu1  ;;  %v3442_v4 = vadd.f32 %v3441_v56, %v12492_v20  ;;  %v3443_v31 = vpop.f32.mrb[162].mxu0  ;;  %5430 = vmatprep.mubr.bf16.mxu1 %v4909_v57  ;;  %v16455_v57 = vpack.c.bf16 %v12961_v43, %v12958_v54  ;;  %v16457_v54 = vld [vmem:[#allocation140_spill] sm:$0xff] }
 0x36b   : > { %v6155_v52 = vpack.c.bf16 %v5219_v36, %v5216_v39  ;;  %v5221_v44 = vpop.f32.mrb[51].mxu1  ;;  %v3444_v51 = vadd.f32 %v3443_v31, %v16450_v40  ;;  %v3445_v19 = vpop.f32.mrb[163].mxu0  ;;  %v4478_v26 = vmax.f32 %v3440_v60, 0.0  ;;  %v16454_v36 = vld [vmem:[#allocation678_spill] sm:$0xff] }
 0x36c   : > { %v3446_v33 = vadd.f32 %v3445_v19, %v16450_v40  ;;  %v4479_v20 = vmax.f32 %v3442_v4, 0.0 }
 0x36d   : > { %8116 = vmatprep.subr.bf16.mxu0 %v6155_v52  ;;  %5431 = vmatmul.mubr.bf16.gmra.mrb[156].mxu1 %v4908_v18  ;;  %v4480_v22 = vmax.f32 %v3444_v51, 0.0 }
 0x36e   : > { %8117 = vmatpush3.bf16.msra.mxu0 %v16451_v28  ;;  %v4481_v49 = vmax.f32 %v3446_v33, 0.0  ;;  %v16456_v28 = vld [vmem:[#allocation141_spill] sm:$0xff] }
 0x36f   : > { %7917 = vmatmul.mubr.msk.bf16.gmra.mrb[12].mxu0 %vm2613_vm1, %v7788_v45  ;;  %v4910_v23 = vpack.c.bf16 %v4480_v22, %v4478_v26  ;;  %v7790_v43 = vcombine.low %v16457_v54, %v16456_v28 }
 0x370   : > { %v5224_v42 = vpop.f32.mrb[52].mxu1  ;;  %3717 = vmatprep.mubr.bf16.mxu0 %v16136_v0  ;;  %v3449_v29 = vpop.f32.mrb[164].mxu0  ;;  %v4911_v48 = vpack.c.bf16 %v4481_v49, %v4479_v20  ;;  %v16458_v49 = vld [vmem:[#allocation679_spill] sm:$0xff] }
 0x371   : > { %v5226_v46 = vpop.f32.mrb[53].mxu1  ;;  %v3450_v39 = vadd.f32 %v3449_v29, %v12503_v55  ;;  %v3451_v63 = vpop.f32.mrb[165].mxu0 }
 0x372   : > { %v5227_v2 = vpop.f32.mrb[54].mxu1  ;;  %v3452_v41 = vadd.f32 %v3451_v63, %v12503_v55  ;;  %v3453_v34 = vpop.f32.mrb[166].mxu0  ;;  %5438 = vmatprep.mubr.bf16.mxu1 %v4911_v48 }
 0x373   : > { %v6156_v12 = vpack.c.bf16 %v5227_v2, %v5224_v42  ;;  %v5229_v47 = vpop.f32.mrb[55].mxu1  ;;  %v3454_v18 = vadd.f32 %v3453_v34, %v16454_v36  ;;  %v3455_v52 = vpop.f32.mrb[167].mxu0  ;;  %v4482_v7 = vmax.f32 %v3450_v39, 0.0  ;;  %v16459_v2 = vpack.c.bf16 %v12985_v10, %v12980_v62  ;;  %v16461_v62 = vld [vmem:[#allocation142_spill] sm:$0xff] }
 0x374   : > { %v3456_v37 = vadd.f32 %v3455_v52, %v16454_v36  ;;  %v4483_v55 = vmax.f32 %v3452_v41, 0.0  ;;  %v16460_v36 = vld [vmem:[#allocation143_spill] sm:$0xff] }
 0x375   : > { %8118 = vmatprep.subr.bf16.mxu0 %v6156_v12  ;;  %5439 = vmatmul.mubr.bf16.gmra.mrb[160].mxu1 %v4910_v23  ;;  %v4484_v45 = vmax.f32 %v3454_v18, 0.0  ;;  %v7791_v10 = vcombine.low %v16461_v62, %v16460_v36  ;;  %v16467_v62 = vld [vmem:[#allocation147_spill] sm:$0xff] }
 0x376   : > { %8119 = vmatpush3.bf16.msra.mxu0 %v16455_v57  ;;  %v4485_v56 = vmax.f32 %v3456_v37, 0.0 }
 0x377   : > { %7918 = vmatmul.mubr.msk.bf16.gmra.mrb[16].mxu0 %vm2613_vm1, %v7789_v50  ;;  %v4912_v40 = vpack.c.bf16 %v4484_v45, %v4482_v7  ;;  %v16462_v45 = vld [vmem:[#allocation680_spill] sm:$0xff] }
 0x378   : > { %v5232_v60 = vpop.f32.mrb[56].mxu1  ;;  %3727 = vmatprep.mubr.bf16.mxu0 %v16136_v0  ;;  %v3459_v4 = vpop.f32.mrb[168].mxu0  ;;  %v4913_v19 = vpack.c.bf16 %v4485_v56, %v4483_v55  ;;  %v16463_v56 = vpack.c.bf16 %v13009_v38, %v13004_v58  ;;  %v16464_v58 = vld [vmem:[#allocation145_spill] sm:$0xff]  ;;  %v16465_v38 = vld [vmem:[#allocation144_spill] sm:$0xff] }
 0x379   : > { %v5234_v44 = vpop.f32.mrb[57].mxu1  ;;  %v3460_v33 = vadd.f32 %v3459_v4, %v12512_v61  ;;  %v3461_v26 = vpop.f32.mrb[169].mxu0 }
 0x37a   : > { %v5235_v31 = vpop.f32.mrb[58].mxu1  ;;  %v3462_v42 = vadd.f32 %v3461_v26, %v12512_v61  ;;  %v3463_v20 = vpop.f32.mrb[170].mxu0  ;;  %5446 = vmatprep.mubr.bf16.mxu1 %v4913_v19 }
 0x37b   : > { %v6157_v51 = vpack.c.bf16 %v5235_v31, %v5232_v60  ;;  %v5237_v22 = vpop.f32.mrb[59].mxu1  ;;  %v3464_v46 = vadd.f32 %v3463_v20, %v16458_v49  ;;  %v3465_v29 = vpop.f32.mrb[171].mxu0  ;;  %v4486_v12 = vmax.f32 %v3460_v33, 0.0 }
 0x37c   : > { %v3466_v23 = vadd.f32 %v3465_v29, %v16458_v49  ;;  %v4487_v61 = vmax.f32 %v3462_v42, 0.0  ;;  %v7792_v22 = vcombine.low %v16465_v38, %v16464_v58  ;;  %v16470_v58 = vld [vmem:[#allocation148_spill] sm:$0xff] }
 0x37d   : > { %8120 = vmatprep.subr.bf16.mxu0 %v6157_v51  ;;  %5447 = vmatmul.mubr.bf16.gmra.mrb[164].mxu1 %v4912_v40  ;;  %v4488_v48 = vmax.f32 %v3464_v46, 0.0 }
 0x37e   : > { %8121 = vmatpush3.bf16.msra.mxu0 %v16459_v2  ;;  %v4489_v13 = vmax.f32 %v3466_v23, 0.0  ;;  %v16466_v2 = vld [vmem:[#allocation681_spill] sm:$0xff] }
 0x37f   : > { %7919 = vmatmul.mubr.msk.bf16.gmra.mrb[20].mxu0 %vm2613_vm1, %v7790_v43  ;;  %v4914_v47 = vpack.c.bf16 %v4488_v48, %v4486_v12 }
 0x380   : > { %v5240_v32 = vpop.f32.mrb[60].mxu1  ;;  %3737 = vmatprep.mubr.bf16.mxu0 %v16136_v0  ;;  %v3469_v39 = vpop.f32.mrb[172].mxu0  ;;  %v4915_v34 = vpack.c.bf16 %v4489_v13, %v4487_v61 }
 0x381   : > { %v5242_v50 = vpop.f32.mrb[61].mxu1  ;;  %v3470_v18 = vadd.f32 %v3469_v39, %v12523_v53  ;;  %v3471_v52 = vpop.f32.mrb[173].mxu0 }
 0x382   : > { %v5243_v63 = vpop.f32.mrb[62].mxu1  ;;  %v3472_v37 = vadd.f32 %v3471_v52, %v12523_v53  ;;  %v3473_v7 = vpop.f32.mrb[174].mxu0  ;;  %5454 = vmatprep.mubr.bf16.mxu1 %v4915_v34 }
 0x383   : > { %v6158_v41 = vpack.c.bf16 %v5243_v63, %v5240_v32  ;;  %v5245_v57 = vpop.f32.mrb[63].mxu1  ;;  %v3474_v60 = vadd.f32 %v3473_v7, %v16462_v45  ;;  %v3475_v55 = vpop.f32.mrb[175].mxu0  ;;  %v4490_v4 = vmax.f32 %v3470_v18, 0.0 }
 0x384   : > { %v3476_v44 = vadd.f32 %v3475_v55, %v16462_v45  ;;  %v4491_v53 = vmax.f32 %v3472_v37, 0.0 }
 0x385   : > { %8122 = vmatprep.subr.bf16.mxu0 %v6158_v41  ;;  %5455 = vmatmul.mubr.bf16.gmra.mrb[168].mxu1 %v4914_v47  ;;  %v4492_v31 = vmax.f32 %v3474_v60, 0.0 }
 0x386   : > { %8123 = vmatpush3.bf16.msra.mxu0 %v16463_v56  ;;  %v4493_v51 = vmax.f32 %v3476_v44, 0.0 }
 0x387   : > { %7920 = vmatmul.mubr.msk.bf16.gmra.mrb[24].mxu0 %vm2613_vm1, %v7791_v10  ;;  %v4916_v43 = vpack.c.bf16 %v4492_v31, %v4490_v4  ;;  %v16468_v10 = vld [vmem:[#allocation146_spill] sm:$0xff] }
 0x388   : > { %v5248_v40 = vpop.f32.mrb[64].mxu1  ;;  %3747 = vmatprep.mubr.bf16.mxu0 %v16136_v0  ;;  %v3479_v28 = vpop.f32.mrb[176].mxu0  ;;  %v4917_v26 = vpack.c.bf16 %v4493_v51, %v4491_v53  ;;  %v7793_v18 = vcombine.low %v16468_v10, %v16467_v62 }
 0x389   : > { %v5250_v19 = vpop.f32.mrb[65].mxu1  ;;  %v3480_v42 = vadd.f32 %v3479_v28, %v12532_v3  ;;  %v3481_v20 = vpop.f32.mrb[177].mxu0 }
 0x38a   : > { %v5251_v54 = vpop.f32.mrb[66].mxu1  ;;  %v3482_v46 = vadd.f32 %v3481_v20, %v12532_v3  ;;  %v3483_v29 = vpop.f32.mrb[178].mxu0  ;;  %5462 = vmatprep.mubr.bf16.mxu1 %v4917_v26  ;;  %v16469_v26 = vld [vmem:[#allocation149_spill] sm:$0xff] }
 0x38b   : > { %v13117_v33 = vpack.c.bf16 %v5251_v54, %v5248_v40  ;;  %v5253_v49 = vpop.f32.mrb[67].mxu1  ;;  %v3484_v23 = vadd.f32 %v3483_v29, %v16466_v2  ;;  %v3485_v12 = vpop.f32.mrb[179].mxu0  ;;  %v4494_v32 = vmax.f32 %v3480_v42, 0.0  ;;  %v7794_v38 = vcombine.low %v16470_v58, %v16469_v26 }
 0x38c   : > { %v3486_v48 = vadd.f32 %v3485_v12, %v16466_v2  ;;  %v4495_v50 = vmax.f32 %v3482_v46, 0.0  ;;  %v16471_v46 = vld [vmem:[#allocation682_spill] sm:$0xff] }
 0x38d   : > { %5463 = vmatmul.mubr.bf16.gmra.mrb[172].mxu1 %v4916_v43  ;;  %v4496_v61 = vmax.f32 %v3484_v23, 0.0 }
 0x38e   : > { %v4497_v39 = vmax.f32 %v3486_v48, 0.0 }
 0x38f   : > { %7921 = vmatmul.mubr.msk.bf16.gmra.mrb[28].mxu0 %vm2613_vm1, %v7792_v22  ;;  %v4918_v41 = vpack.c.bf16 %v4496_v61, %v4494_v32 }
 0x390   : > { %v5256_v13 = vpop.f32.mrb[68].mxu1  ;;  %3757 = vmatprep.mubr.bf16.mxu0 %v16136_v0  ;;  %v3489_v47 = vpop.f32.mrb[180].mxu0  ;;  %v4919_v36 = vpack.c.bf16 %v4497_v39, %v4495_v50 }
 0x391   : > { %v5258_v63 = vpop.f32.mrb[69].mxu1  ;;  %v3490_v52 = vadd.f32 %v3489_v47, %v12547_v25  ;;  %v3491_v57 = vpop.f32.mrb[181].mxu0 }
 0x392   : > { %v5259_v3 = vpop.f32.mrb[70].mxu1  ;;  %v3492_v7 = vadd.f32 %v3491_v57, %v12547_v25  ;;  %v3493_v45 = vpop.f32.mrb[182].mxu0  ;;  %5470 = vmatprep.mubr.bf16.mxu1 %v4919_v36  ;;  %v16473_v36 = vld [vmem:[#allocation150_spill] sm:$0xff] }
 0x393   : > { %v13127_v34 = vpack.c.bf16 %v5259_v3, %v5256_v13  ;;  %v5261_v37 = vpop.f32.mrb[71].mxu1  ;;  %v3494_v60 = vadd.f32 %v3493_v45, %v12541_v17  ;;  %v3495_v55 = vpop.f32.mrb[183].mxu0  ;;  %v4498_v44 = vmax.f32 %v3490_v52, 0.0 }
 0x394   : > { %v3496_v56 = vadd.f32 %v3495_v55, %v12541_v17  ;;  %v4499_v40 = vmax.f32 %v3492_v7, 0.0 }
 0x395   : > { %5471 = vmatmul.mubr.bf16.gmra.mrb[176].mxu1 %v4918_v41  ;;  %v4500_v4 = vmax.f32 %v3494_v60, 0.0  ;;  %v16472_v41 = vld [vmem:[#allocation151_spill] sm:$0xff] }
 0x396   : > { %v4501_v53 = vmax.f32 %v3496_v56, 0.0  ;;  %v7795_v62 = vcombine.low %v16473_v36, %v16472_v41 }
 0x397   : > { %7922 = vmatmul.mubr.msk.bf16.gmra.mrb[32].mxu0 %vm2613_vm1, %v7793_v18  ;;  %v4920_v28 = vpack.c.bf16 %v4500_v4, %v4498_v44 }
 0x398   : > { %v5264_v31 = vpop.f32.mrb[72].mxu1  ;;  %3767 = vmatprep.mubr.bf16.mxu0 %v16136_v0  ;;  %v3499_v19 = vpop.f32.mrb[184].mxu0  ;;  %v4921_v43 = vpack.c.bf16 %v4501_v53, %v4499_v40 }
 0x399   : > { %v5266_v51 = vpop.f32.mrb[73].mxu1  ;;  %v3500_v17 = vadd.f32 %v3499_v19, %v12559_v8  ;;  %v3501_v22 = vpop.f32.mrb[185].mxu0 }
 0x39a   : > { %v5267_v25 = vpop.f32.mrb[74].mxu1  ;;  %v3502_v20 = vadd.f32 %v3501_v22, %v12559_v8  ;;  %v3503_v49 = vpop.f32.mrb[186].mxu0  ;;  %5478 = vmatprep.mubr.bf16.mxu1 %v4921_v43  ;;  %v16475_v43 = vld [vmem:[#allocation152_spill] sm:$0xff] }
 0x39b   : > { %v13137_v54 = vpack.c.bf16 %v5267_v25, %v5264_v31  ;;  %v5269_v42 = vpop.f32.mrb[75].mxu1  ;;  %v3504_v29 = vadd.f32 %v3503_v49, %v16471_v46  ;;  %v3505_v2 = vpop.f32.mrb[187].mxu0  ;;  %v4502_v12 = vmax.f32 %v3500_v17, 0.0 }
 0x39c   : > { %v3506_v23 = vadd.f32 %v3505_v2, %v16471_v46  ;;  %v4503_v61 = vmax.f32 %v3502_v20, 0.0  ;;  %v16476_v42 = vld [vmem:[#allocation683_spill] sm:$0xff] }
 0x39d   : > { %5479 = vmatmul.mubr.bf16.gmra.mrb[180].mxu1 %v4920_v28  ;;  %v4504_v48 = vmax.f32 %v3504_v29, 0.0  ;;  %v16474_v28 = vld [vmem:[#allocation153_spill] sm:$0xff] }
 0x39e   : > { %v4505_v13 = vmax.f32 %v3506_v23, 0.0  ;;  %v7796_v26 = vcombine.low %v16475_v43, %v16474_v28 }
 0x39f   : > { %7923 = vmatmul.mubr.msk.bf16.gmra.mrb[36].mxu0 %vm2613_vm1, %v7794_v38  ;;  %v4922_v63 = vpack.c.bf16 %v4504_v48, %v4502_v12 }
 0x3a0   : > { %v5272_v32 = vpop.f32.mrb[76].mxu1  ;;  %3777 = vmatprep.mubr.bf16.mxu0 %v16136_v0  ;;  %v3509_v39 = vpop.f32.mrb[188].mxu0  ;;  %v4923_v3 = vpack.c.bf16 %v4505_v13, %v4503_v61 }
 0x3a1   : > { %v5274_v50 = vpop.f32.mrb[77].mxu1  ;;  %v3510_v10 = vadd.f32 %v3509_v39, %v12573_v1  ;;  %v3511_v18 = vpop.f32.mrb[189].mxu0 }
 0x3a2   : > { %v5275_v8 = vpop.f32.mrb[78].mxu1  ;;  %v3512_v57 = vadd.f32 %v3511_v18, %v12573_v1  ;;  %v3513_v37 = vpop.f32.mrb[190].mxu0  ;;  %5486 = vmatprep.mubr.bf16.mxu1 %v4923_v3 }
 0x3a3   : > { %v13147_v47 = vpack.c.bf16 %v5275_v8, %v5272_v32  ;;  %v5277_v52 = vpop.f32.mrb[79].mxu1  ;;  %v3514_v7 = vadd.f32 %v3513_v37, %v12565_v9  ;;  %v3515_v45 = vpop.f32.mrb[191].mxu0  ;;  %v4506_v55 = vmax.f32 %v3510_v10, 0.0  ;;  %v16477_v8 = vld [vmem:[#allocation155_spill] sm:$0xff] }
 0x3a4   : > { %v3516_v60 = vadd.f32 %v3515_v45, %v12565_v9  ;;  %v4507_v4 = vmax.f32 %v3512_v57, 0.0 }
 0x3a5   : > { %5487 = vmatmul.mubr.bf16.gmra.mrb[184].mxu1 %v4922_v63  ;;  %v4508_v56 = vmax.f32 %v3514_v7, 0.0  ;;  %v16478_v63 = vld [vmem:[#allocation154_spill] sm:$0xff] }
 0x3a6   : > { %v4509_v31 = vmax.f32 %v3516_v60, 0.0  ;;  %v7797_v3 = vcombine.low %v16478_v63, %v16477_v8 }
 0x3a7   : > { %7924 = vmatmul.mubr.msk.bf16.gmra.mrb[40].mxu0 %vm2613_vm1, %v7795_v62  ;;  %v4924_v51 = vpack.c.bf16 %v4508_v56, %v4506_v55 }
 0x3a8   : > { %v5280_v44 = vpop.f32.mrb[80].mxu1  ;;  %3787 = vmatprep.mubr.bf16.mxu0 %v16136_v0  ;;  %v3519_v53 = vpop.f32.mrb[192].mxu0  ;;  %v4925_v25 = vpack.c.bf16 %v4509_v31, %v4507_v4 }
 0x3a9   : > { %v5282_v40 = vpop.f32.mrb[81].mxu1  ;;  %v3520_v9 = vadd.f32 %v3519_v53, %v12583_v21  ;;  %v3521_v58 = vpop.f32.mrb[193].mxu0 }
 0x3aa   : > { %v5283_v1 = vpop.f32.mrb[82].mxu1  ;;  %v3522_v17 = vadd.f32 %v3521_v58, %v12583_v21  ;;  %v3523_v22 = vpop.f32.mrb[194].mxu0  ;;  %5494 = vmatprep.mubr.bf16.mxu1 %v4925_v25  ;;  %v16481_v58 = vld [vmem:[#allocation684_spill] sm:$0xff] }
 0x3ab   : > { %v13157_v19 = vpack.c.bf16 %v5283_v1, %v5280_v44  ;;  %v5285_v38 = vpop.f32.mrb[83].mxu1  ;;  %v3524_v20 = vadd.f32 %v3523_v22, %v16476_v42  ;;  %v3525_v49 = vpop.f32.mrb[195].mxu0  ;;  %v4510_v29 = vmax.f32 %v3520_v9, 0.0  ;;  %v16479_v1 = vld [vmem:[#allocation157_spill] sm:$0xff] }
 0x3ac   : > { %v3526_v46 = vadd.f32 %v3525_v49, %v16476_v42  ;;  %v4511_v12 = vmax.f32 %v3522_v17, 0.0 }
 0x3ad   : > { %5495 = vmatmul.mubr.bf16.gmra.mrb[188].mxu1 %v4924_v51  ;;  %v4512_v2 = vmax.f32 %v3524_v20, 0.0  ;;  %v16480_v51 = vld [vmem:[#allocation156_spill] sm:$0xff] }
 0x3ae   : > { %v4513_v48 = vmax.f32 %v3526_v46, 0.0  ;;  %v7798_v25 = vcombine.low %v16480_v51, %v16479_v1 }
 0x3af   : > { %7925 = vmatmul.mubr.msk.bf16.gmra.mrb[44].mxu0 %vm2613_vm1, %v7796_v26  ;;  %v4926_v13 = vpack.c.bf16 %v4512_v2, %v4510_v29 }
 0x3b0   : > { %v5288_v23 = vpop.f32.mrb[84].mxu1  ;;  %3797 = vmatprep.mubr.bf16.mxu0 %v16136_v0  ;;  %v3529_v61 = vpop.f32.mrb[196].mxu0  ;;  %v4927_v39 = vpack.c.bf16 %v4513_v48, %v4511_v12 }
 0x3b1   : > { %v5290_v32 = vpop.f32.mrb[85].mxu1  ;;  %v3530_v41 = vadd.f32 %v3529_v61, %v12599_v16  ;;  %v3531_v36 = vpop.f32.mrb[197].mxu0  ;;  %v16482_v61 = vld [vmem:[#allocation159_spill] sm:$0xff] }
 0x3b2   : > { %v5291_v21 = vpop.f32.mrb[86].mxu1  ;;  %v3532_v10 = vadd.f32 %v3531_v36, %v12599_v16  ;;  %v3533_v18 = vpop.f32.mrb[198].mxu0  ;;  %5502 = vmatprep.mubr.bf16.mxu1 %v4927_v39 }
 0x3b3   : > { %v13167_v50 = vpack.c.bf16 %v5291_v21, %v5288_v23  ;;  %v5293_v62 = vpop.f32.mrb[87].mxu1  ;;  %v3534_v52 = vadd.f32 %v3533_v18, %v12593_v27  ;;  %v3535_v57 = vpop.f32.mrb[199].mxu0  ;;  %v4514_v7 = vmax.f32 %v3530_v41, 0.0  ;;  %v16483_v21 = vld [vmem:[#allocation158_spill] sm:$0xff] }
 0x3b4   : > { %v3536_v37 = vadd.f32 %v3535_v57, %v12593_v27  ;;  %v4515_v55 = vmax.f32 %v3532_v10, 0.0 }
 0x3b5   : > { %5503 = vmatmul.mubr.bf16.gmra.mrb[192].mxu1 %v4926_v13  ;;  %v4516_v45 = vmax.f32 %v3534_v52, 0.0  ;;  %v7799_v13 = vcombine.low %v16483_v21, %v16482_v61 }
 0x3b6   : > { %v4517_v56 = vmax.f32 %v3536_v37, 0.0 }
 0x3b7   : > { %7926 = vmatmul.mubr.msk.bf16.gmra.mrb[48].mxu0 %vm2613_vm1, %v7797_v3  ;;  %v4928_v31 = vpack.c.bf16 %v4516_v45, %v4514_v7 }
 0x3b8   : > { %v5296_v60 = vpop.f32.mrb[88].mxu1  ;;  %3807 = vmatprep.mubr.bf16.mxu0 %v16136_v0  ;;  %v3539_v4 = vpop.f32.mrb[200].mxu0  ;;  %v4929_v53 = vpack.c.bf16 %v4517_v56, %v4515_v55 }
 0x3b9   : > { %v5298_v44 = vpop.f32.mrb[89].mxu1  ;;  %v3540_v27 = vadd.f32 %v3539_v4, %v12611_v15  ;;  %v3541_v28 = vpop.f32.mrb[201].mxu0 }
 0x3ba   : > { %v5299_v16 = vpop.f32.mrb[90].mxu1  ;;  %v3542_v26 = vadd.f32 %v3541_v28, %v12611_v15  ;;  %v3543_v9 = vpop.f32.mrb[202].mxu0  ;;  %5510 = vmatprep.mubr.bf16.mxu1 %v4929_v53  ;;  %v16485_v53 = vld [vmem:[#allocation160_spill] sm:$0xff] }
 0x3bb   : > { %v13177_v40 = vpack.c.bf16 %v5299_v16, %v5296_v60  ;;  %v5301_v43 = vpop.f32.mrb[91].mxu1  ;;  %v3544_v38 = vadd.f32 %v3543_v9, %v16481_v58  ;;  %v3545_v17 = vpop.f32.mrb[203].mxu0  ;;  %v4518_v42 = vmax.f32 %v3540_v27, 0.0  ;;  %v16486_v27 = vld [vmem:[#allocation685_spill] sm:$0xff] }
 0x3bc   : > { %v3546_v22 = vadd.f32 %v3545_v17, %v16481_v58  ;;  %v4519_v46 = vmax.f32 %v3542_v26, 0.0 }
 0x3bd   : > { %5511 = vmatmul.mubr.bf16.gmra.mrb[196].mxu1 %v4928_v31  ;;  %v4520_v20 = vmax.f32 %v3544_v38, 0.0 }
 0x3be   : > { %v4521_v29 = vmax.f32 %v3546_v22, 0.0 }
 0x3bf   : > { %7927 = vmatmul.mubr.msk.bf16.gmra.mrb[52].mxu0 %vm2613_vm1, %v7798_v25  ;;  %v4930_v12 = vpack.c.bf16 %v4520_v20, %v4518_v42 }
 0x3c0   : > { %v5304_v49 = vpop.f32.mrb[92].mxu1  ;;  %3817 = vmatprep.mubr.bf16.mxu0 %v16136_v0  ;;  %v3549_v23 = vpop.f32.mrb[204].mxu0  ;;  %v4931_v32 = vpack.c.bf16 %v4521_v29, %v4519_v46 }
 0x3c1   : > { %v5306_v2 = vpop.f32.mrb[93].mxu1  ;;  %v3550_v39 = vadd.f32 %v3549_v23, %v12625_v14  ;;  %v3551_v8 = vpop.f32.mrb[205].mxu0 }
 0x3c2   : > { %v5307_v15 = vpop.f32.mrb[94].mxu1  ;;  %v3552_v3 = vadd.f32 %v3551_v8, %v12625_v14  ;;  %v3553_v41 = vpop.f32.mrb[206].mxu0  ;;  %5518 = vmatprep.mubr.bf16.mxu1 %v4931_v32  ;;  %v16488_v32 = vld [vmem:[#allocation162_spill] sm:$0xff] }
 0x3c3   : > { %v13187_v48 = vpack.c.bf16 %v5307_v15, %v5304_v49  ;;  %v5309_v63 = vpop.f32.mrb[95].mxu1  ;;  %v3554_v36 = vadd.f32 %v3553_v41, %v12617_v6  ;;  %v3555_v62 = vpop.f32.mrb[207].mxu0  ;;  %v4522_v18 = vmax.f32 %v3550_v39, 0.0 }
 0x3c4   : > { %v3556_v10 = vadd.f32 %v3555_v62, %v12617_v6  ;;  %v4523_v37 = vmax.f32 %v3552_v3, 0.0  ;;  %v16484_v6 = vld [vmem:[#allocation161_spill] sm:$0xff] }
 0x3c5   : > { %5519 = vmatmul.mubr.bf16.gmra.mrb[200].mxu1 %v4930_v12  ;;  %v4524_v52 = vmax.f32 %v3554_v36, 0.0  ;;  %v7800_v1 = vcombine.low %v16485_v53, %v16484_v6  ;;  %v16487_v12 = vld [vmem:[#allocation163_spill] sm:$0xff] }
 0x3c6   : > { %v4525_v7 = vmax.f32 %v3556_v10, 0.0  ;;  %v7801_v61 = vcombine.low %v16488_v32, %v16487_v12 }
 0x3c7   : > { %7928 = vmatmul.mubr.msk.bf16.gmra.mrb[56].mxu0 %vm2613_vm1, %v7799_v13  ;;  %v4932_v55 = vpack.c.bf16 %v4524_v52, %v4522_v18 }
 0x3c8   : > { %v5312_v57 = vpop.f32.mrb[96].mxu1  ;;  %3827 = vmatprep.mubr.bf16.mxu0 %v16136_v0  ;;  %v3559_v60 = vpop.f32.mrb[208].mxu0  ;;  %v4933_v31 = vpack.c.bf16 %v4525_v7, %v4523_v37 }
 0x3c9   : > { %v5314_v45 = vpop.f32.mrb[97].mxu1  ;;  %v3560_v56 = vadd.f32 %v3559_v60, %v12635_v5  ;;  %v3561_v4 = vpop.f32.mrb[209].mxu0 }
 0x3ca   : > { %v5315_v14 = vpop.f32.mrb[98].mxu1  ;;  %v3562_v51 = vadd.f32 %v3561_v4, %v12635_v5  ;;  %v3563_v25 = vpop.f32.mrb[210].mxu0  ;;  %5526 = vmatprep.mubr.bf16.mxu1 %v4933_v31 }
 0x3cb   : > { %v6167_v44 = vpack.c.bf16 %v5315_v14, %v5312_v57  ;;  %v5317_v16 = vpop.f32.mrb[99].mxu1  ;;  %v3564_v28 = vadd.f32 %v3563_v25, %v16486_v27  ;;  %v3565_v43 = vpop.f32.mrb[211].mxu0  ;;  %v4526_v9 = vmax.f32 %v3560_v56, 0.0  ;;  %v16489_v14 = vld [vmem:[#allocation165_spill] sm:$0xff] }
 0x3cc   : > { %v3566_v26 = vadd.f32 %v3565_v43, %v16486_v27  ;;  %v4527_v38 = vmax.f32 %v3562_v51, 0.0  ;;  %v16491_v16 = vld [vmem:[#allocation686_spill] sm:$0xff] }
 0x3cd   : > { %8172 = vmatprep.subr.bf16.mxu0 %v6167_v44  ;;  %5527 = vmatmul.mubr.bf16.gmra.mrb[204].mxu1 %v4932_v55  ;;  %v4528_v58 = vmax.f32 %v3564_v28, 0.0  ;;  %v16490_v55 = vld [vmem:[#allocation164_spill] sm:$0xff] }
 0x3ce   : > { %8620 = vmatprep.subr.bf16.mxu1 %v6167_v44  ;;  %v4529_v17 = vmax.f32 %v3566_v26, 0.0  ;;  %v7802_v56 = vcombine.low %v16490_v55, %v16489_v14 }
 0x3cf   : > { %8628 = vmatpush3.bf16.msra.mxu1 %v13117_v33  ;;  %7929 = vmatmul.mubr.msk.bf16.gmra.mrb[60].mxu0 %vm2613_vm1, %v7800_v1  ;;  %v4934_v42 = vpack.c.bf16 %v4528_v58, %v4526_v9 }
 0x3d0   : > { %v5320_v22 = vpop.f32.mrb[100].mxu1  ;;  %3837 = vmatprep.mubr.bf16.mxu0 %v16136_v0  ;;  %v3569_v20 = vpop.f32.mrb[212].mxu0  ;;  %v4935_v46 = vpack.c.bf16 %v4529_v17, %v4527_v38 }
 0x3d1   : > { %v5322_v5 = vpop.f32.mrb[101].mxu1  ;;  %v3570_v29 = vadd.f32 %v3569_v20, %v12651_v59  ;;  %v3571_v23 = vpop.f32.mrb[213].mxu0  ;;  %v16493_v20 = vld [vmem:[#allocation166_spill] sm:$0xff] }
 0x3d2   : > { %v5323_v49 = vpop.f32.mrb[102].mxu1  ;;  %v3572_v21 = vadd.f32 %v3571_v23, %v12651_v59  ;;  %v3573_v13 = vpop.f32.mrb[214].mxu0  ;;  %5534 = vmatprep.mubr.bf16.mxu1 %v4935_v46 }
 0x3d3   : > { %v13207_v2 = vpack.c.bf16 %v5323_v49, %v5320_v22  ;;  %v5325_v15 = vpop.f32.mrb[103].mxu1  ;;  %v3574_v39 = vadd.f32 %v3573_v13, %v12645_v24  ;;  %v3575_v8 = vpop.f32.mrb[215].mxu0  ;;  %v4530_v3 = vmax.f32 %v3570_v29, 0.0 }
 0x3d4   : > { %v3576_v63 = vadd.f32 %v3575_v8, %v12645_v24  ;;  %v4531_v36 = vmax.f32 %v3572_v21, 0.0 }
 0x3d5   : > { %8621 = vmatprep.subr.bf16.mxu1 %v13207_v2  ;;  %5535 = vmatmul.mubr.bf16.gmra.mrb[208].mxu1 %v4934_v42  ;;  %v4532_v41 = vmax.f32 %v3574_v39, 0.0  ;;  %v16492_v42 = vld [vmem:[#allocation167_spill] sm:$0xff] }
 0x3d6   : > { %8629 = vmatpush3.bf16.msra.mxu1 %v13127_v34  ;;  %v4533_v62 = vmax.f32 %v3576_v63, 0.0  ;;  %v7803_v49 = vcombine.low %v16493_v20, %v16492_v42  ;;  %v16501_v42 = vld [vmem:[#allocation689_spill] sm:$0xff] }
 0x3d7   : > { %7930 = vmatmul.mubr.msk.bf16.gmra.mrb[64].mxu0 %vm2613_vm1, %v7801_v61  ;;  %v4936_v18 = vpack.c.bf16 %v4532_v41, %v4530_v3  ;;  %v16494_v41 = vld [vmem:[#allocation688_spill] sm:$0xff] }
 0x3d8   : > { %v5328_v10 = vpop.f32.mrb[104].mxu1  ;;  %3847 = vmatprep.mubr.bf16.mxu0 %v16136_v0  ;;  %v3579_v52 = vpop.f32.mrb[216].mxu0  ;;  %v4937_v37 = vpack.c.bf16 %v4533_v62, %v4531_v36 }
 0x3d9   : > { %v5330_v59 = vpop.f32.mrb[105].mxu1  ;;  %v3580_v7 = vadd.f32 %v3579_v52, %v12663_v35  ;;  %v3581_v45 = vpop.f32.mrb[217].mxu0 }
 0x3da   : > { %v5331_v57 = vpop.f32.mrb[106].mxu1  ;;  %v3582_v44 = vadd.f32 %v3581_v45, %v12663_v35  ;;  %v3583_v4 = vpop.f32.mrb[218].mxu0  ;;  %5542 = vmatprep.mubr.bf16.mxu1 %v4937_v37  ;;  %v16496_v59 = vld [vmem:[#allocation168_spill] sm:$0xff]  ;;  %v16497_v45 = vld [vmem:[#allocation687_spill] sm:$0xff] }
 0x3db   : > { %v13219_v24 = vpack.c.bf16 %v5331_v57, %v5328_v10  ;;  %v5333_v60 = vpop.f32.mrb[107].mxu1  ;;  %v3584_v31 = vadd.f32 %v3583_v4, %v16491_v16  ;;  %v3585_v6 = vpop.f32.mrb[219].mxu0  ;;  %v4534_v1 = vmax.f32 %v3580_v7, 0.0  ;;  %v16495_v10 = vld [vmem:[#allocation169_spill] sm:$0xff] }
 0x3dc   : > { %v3586_v53 = vadd.f32 %v3585_v6, %v16491_v16  ;;  %v4535_v25 = vmax.f32 %v3582_v44, 0.0 }
 0x3dd   : > { %8622 = vmatprep.subr.bf16.mxu1 %v13219_v24  ;;  %5543 = vmatmul.mubr.bf16.gmra.mrb[212].mxu1 %v4936_v18  ;;  %v4536_v51 = vmax.f32 %v3584_v31, 0.0  ;;  %v7804_v18 = vcombine.low %v16496_v59, %v16495_v10 }
 0x3de   : > { %8630 = vmatpush3.bf16.msra.mxu1 %v13137_v54  ;;  %v4537_v27 = vmax.f32 %v3586_v53, 0.0 }
 0x3df   : > { %7931 = vmatmul.mubr.msk.bf16.gmra.mrb[68].mxu0 %vm2613_vm1, %v7802_v56  ;;  %v4938_v43 = vpack.c.bf16 %v4536_v51, %v4534_v1 }
 0x3e0   : > { %v5336_v28 = vpop.f32.mrb[108].mxu1  ;;  %3857 = vmatprep.mubr.bf16.mxu0 %v16136_v0  ;;  %v3589_v26 = vpop.f32.mrb[220].mxu0  ;;  %v4939_v58 = vpack.c.bf16 %v4537_v27, %v4535_v25  ;;  %v16498_v25 = vld [vmem:[#allocation690_spill] sm:$0xff] }
 0x3e1   : > { %v5338_v35 = vpop.f32.mrb[109].mxu1  ;;  %v3590_v38 = vadd.f32 %v3589_v26, %v12677_v11  ;;  %v3591_v22 = vpop.f32.mrb[221].mxu0  ;;  %v16500_v26 = vld [vmem:[#allocation170_spill] sm:$0xff] }
 0x3e2   : > { %v5339_v9 = vpop.f32.mrb[110].mxu1  ;;  %v3592_v46 = vadd.f32 %v3591_v22, %v12677_v11  ;;  %v3593_v29 = vpop.f32.mrb[222].mxu0  ;;  %5550 = vmatprep.mubr.bf16.mxu1 %v4939_v58 }
 0x3e3   : > { %v13231_v17 = vpack.c.bf16 %v5339_v9, %v5336_v28  ;;  %v5341_v5 = vpop.f32.mrb[111].mxu1  ;;  %v3594_v23 = vadd.f32 %v3593_v29, %v12669_v30  ;;  %v3595_v15 = vpop.f32.mrb[223].mxu0  ;;  %v4538_v32 = vmax.f32 %v3590_v38, 0.0 }
 0x3e4   : > { %v3596_v12 = vadd.f32 %v3595_v15, %v12669_v30  ;;  %v4539_v21 = vmax.f32 %v3592_v46, 0.0 }
 0x3e5   : > { %8623 = vmatprep.subr.bf16.mxu1 %v13231_v17  ;;  %5551 = vmatmul.mubr.bf16.gmra.mrb[216].mxu1 %v4938_v43  ;;  %v4540_v61 = vmax.f32 %v3594_v23, 0.0  ;;  %v16499_v43 = vld [vmem:[#allocation171_spill] sm:$0xff] }
 0x3e6   : > { %8631 = vmatpush3.bf16.msra.mxu1 %v13147_v47  ;;  %v4541_v13 = vmax.f32 %v3596_v12, 0.0  ;;  %v7805_v9 = vcombine.low %v16500_v26, %v16499_v43 }
 0x3e7   : > { %7932 = vmatmul.mubr.msk.bf16.gmra.mrb[72].mxu0 %vm2613_vm1, %v7803_v49  ;;  %v4940_v39 = vpack.c.bf16 %v4540_v61, %v4538_v32 }
 0x3e8   : > { %3867 = vmatprep.mubr.bf16.mxu0 %v16136_v0  ;;  %v5344_v11 = vpop.f32.mrb[112].mxu1  ;;  %v3599_v63 = vpop.f32.mrb[224].mxu0  ;;  %v4941_v3 = vpack.c.bf16 %v4541_v13, %v4539_v21 }
 0x3e9   : > { %v5346_v8 = vpop.f32.mrb[113].mxu1  ;;  %v3600_v36 = vadd.f32 %v3599_v63, %v16494_v41  ;;  %v3601_v30 = vpop.f32.mrb[225].mxu0 }
 0x3ea   : > { %v5347_v62 = vpop.f32.mrb[114].mxu1  ;;  %v3602_v57 = vadd.f32 %v3601_v30, %v16494_v41  ;;  %v3603_v7 = vpop.f32.mrb[226].mxu0  ;;  %5558 = vmatprep.mubr.bf16.mxu1 %v4941_v3  ;;  %v16503_v41 = vld [vmem:[#allocation173_spill] sm:$0xff] }
 0x3eb   : > { %v13245_v52 = vpack.c.bf16 %v5347_v62, %v5344_v11  ;;  %v5349_v37 = vpop.f32.mrb[115].mxu1  ;;  %v3604_v60 = vadd.f32 %v3603_v7, %v16497_v45  ;;  %v3605_v14 = vpop.f32.mrb[227].mxu0  ;;  %v4542_v56 = vmax.f32 %v3600_v36, 0.0  ;;  %v16504_v36 = vld [vmem:[#allocation172_spill] sm:$0xff] }
 0x3ec   : > { %v3606_v55 = vadd.f32 %v3605_v14, %v16497_v45  ;;  %v4543_v4 = vmax.f32 %v3602_v57, 0.0  ;;  %v7806_v62 = vcombine.low %v16504_v36, %v16503_v41  ;;  %v16505_v57 = vld [vmem:[#allocation691_spill] sm:$0xff] }
 0x3ed   : > { %5559 = vmatmul.mubr.bf16.gmra.mrb[220].mxu1 %v4940_v39  ;;  %8624 = vmatprep.subr.bf16.mxu1 %v13245_v52  ;;  %v4544_v44 = vmax.f32 %v3604_v60, 0.0  ;;  %v16502_v39 = vld [vmem:[#allocation692_spill] sm:$0xff] }
 0x3ee   : > { %8632 = vmatpush3.bf16.msra.mxu1 %v13157_v19  ;;  %v4545_v16 = vmax.f32 %v3606_v55, 0.0 }
 0x3ef   : > { %7933 = vmatmul.mubr.msk.bf16.gmra.mrb[76].mxu0 %vm2613_vm1, %v7804_v18  ;;  %v4942_v6 = vpack.c.bf16 %v4544_v44, %v4542_v56 }
 0x3f0   : > { %3877 = vmatprep.mubr.bf16.mxu0 %v16136_v0  ;;  %v5352_v31 = vpop.f32.mrb[116].mxu1  ;;  %v3609_v1 = vpop.f32.mrb[228].mxu0  ;;  %v4943_v51 = vpack.c.bf16 %v4545_v16, %v4543_v4 }
 0x3f1   : > { %v5354_v53 = vpop.f32.mrb[117].mxu1  ;;  %v3610_v27 = vadd.f32 %v3609_v1, %v16498_v25  ;;  %v3611_v35 = vpop.f32.mrb[229].mxu0 }
 0x3f2   : > { %v5355_v28 = vpop.f32.mrb[118].mxu1  ;;  %v3612_v38 = vadd.f32 %v3611_v35, %v16498_v25  ;;  %v3613_v5 = vpop.f32.mrb[230].mxu0  ;;  %5566 = vmatprep.mubr.bf16.mxu1 %v4943_v51  ;;  %v16506_v53 = vld [vmem:[#allocation694_spill] sm:$0xff] }
 0x3f3   : > { %v13257_v58 = vpack.c.bf16 %v5355_v28, %v5352_v31  ;;  %v5357_v22 = vpop.f32.mrb[119].mxu1  ;;  %v3614_v20 = vadd.f32 %v3613_v5, %v16501_v42  ;;  %v3615_v49 = vpop.f32.mrb[231].mxu0  ;;  %v4546_v29 = vmax.f32 %v3610_v27, 0.0  ;;  %v16507_v27 = vld [vmem:[#allocation175_spill] sm:$0xff]  ;;  %v16508_v28 = vld [vmem:[#allocation174_spill] sm:$0xff] }
 0x3f4   : > { %v3616_v46 = vadd.f32 %v3615_v49, %v16501_v42  ;;  %v4547_v15 = vmax.f32 %v3612_v38, 0.0  ;;  %v7807_v35 = vcombine.low %v16508_v28, %v16507_v27  ;;  %v16509_v22 = vld [vmem:[#allocation693_spill] sm:$0xff]  ;;  %v16516_v27 = vld [vmem:[#allocation178_spill] sm:$0xff] }
 0x3f5   : > { %5567 = vmatmul.mubr.bf16.gmra.mrb[224].mxu1 %v4942_v6  ;;  %8625 = vmatprep.subr.bf16.mxu1 %v13257_v58  ;;  %v4548_v23 = vmax.f32 %v3614_v20, 0.0 }
 0x3f6   : > { %8633 = vmatpush3.bf16.msra.mxu1 %v13167_v50  ;;  %v4549_v12 = vmax.f32 %v3616_v46, 0.0 }
 0x3f7   : > { %7934 = vmatmul.mubr.msk.bf16.gmra.mrb[80].mxu0 %vm2613_vm1, %v7805_v9  ;;  %v4944_v61 = vpack.c.bf16 %v4548_v23, %v4546_v29 }
 0x3f8   : > { %3887 = vmatprep.mubr.bf16.mxu0 %v16136_v0  ;;  %v5360_v32 = vpop.f32.mrb[120].mxu1  ;;  %v3619_v13 = vpop.f32.mrb[232].mxu0  ;;  %v4945_v11 = vpack.c.bf16 %v4549_v12, %v4547_v15 }
 0x3f9   : > { %v5362_v21 = vpop.f32.mrb[121].mxu1  ;;  %v3620_v8 = vadd.f32 %v3619_v13, %v16502_v39  ;;  %v3621_v3 = vpop.f32.mrb[233].mxu0  ;;  %v16510_v13 = vld [vmem:[#allocation696_spill] sm:$0xff] }
 0x3fa   : > { %v5363_v63 = vpop.f32.mrb[122].mxu1  ;;  %v3622_v10 = vadd.f32 %v3621_v3, %v16502_v39  ;;  %v3623_v18 = vpop.f32.mrb[234].mxu0  ;;  %5574 = vmatprep.mubr.bf16.mxu1 %v4945_v11  ;;  %v16512_v3 = vld [vmem:[#allocation176_spill] sm:$0xff] }
 0x3fb   : > { %v13269_v30 = vpack.c.bf16 %v5363_v63, %v5360_v32  ;;  %v5365_v59 = vpop.f32.mrb[123].mxu1  ;;  %v3624_v37 = vadd.f32 %v3623_v18, %v16505_v57  ;;  %v3625_v7 = vpop.f32.mrb[235].mxu0  ;;  %v4550_v60 = vmax.f32 %v3620_v8, 0.0  ;;  %v16511_v63 = vld [vmem:[#allocation177_spill] sm:$0xff]  ;;  %v16513_v18 = vld [vmem:[#allocation695_spill] sm:$0xff] }
 0x3fc   : > { %v3626_v45 = vadd.f32 %v3625_v7, %v16505_v57  ;;  %v4551_v55 = vmax.f32 %v3622_v10, 0.0  ;;  %v7808_v41 = vcombine.low %v16512_v3, %v16511_v63 }
 0x3fd   : > { %5575 = vmatmul.mubr.bf16.gmra.mrb[228].mxu1 %v4944_v61  ;;  %8626 = vmatprep.subr.bf16.mxu1 %v13269_v30  ;;  %v4552_v14 = vmax.f32 %v3624_v37, 0.0 }
 0x3fe   : > { %8634 = vmatpush3.bf16.msra.mxu1 %v13177_v40  ;;  %v4553_v56 = vmax.f32 %v3626_v45, 0.0 }
 0x3ff   : > { %7935 = vmatmul.mubr.msk.bf16.gmra.mrb[84].mxu0 %vm2613_vm1, %v7806_v62  ;;  %v4946_v4 = vpack.c.bf16 %v4552_v14, %v4550_v60 }
 0x400   : > { %3897 = vmatprep.mubr.bf16.mxu0 %v16136_v0  ;;  %v5368_v44 = vpop.f32.mrb[124].mxu1  ;;  %v3629_v31 = vpop.f32.mrb[236].mxu0  ;;  %v4947_v6 = vpack.c.bf16 %v4553_v56, %v4551_v55 }
 0x401   : > { %v5370_v16 = vpop.f32.mrb[125].mxu1  ;;  %v3630_v1 = vadd.f32 %v3629_v31, %v16506_v53  ;;  %v3631_v25 = vpop.f32.mrb[237].mxu0 }
 0x402   : > { %v5371_v51 = vpop.f32.mrb[126].mxu1  ;;  %v3632_v26 = vadd.f32 %v3631_v25, %v16506_v53  ;;  %v3633_v38 = vpop.f32.mrb[238].mxu0  ;;  %5582 = vmatprep.mubr.bf16.mxu1 %v4947_v6  ;;  %v16514_v6 = vld [vmem:[#allocation698_spill] sm:$0xff]  ;;  %v16515_v25 = vld [vmem:[#allocation179_spill] sm:$0xff] }
 0x403   : > { %v13281_v43 = vpack.c.bf16 %v5371_v51, %v5368_v44  ;;  %v5373_v9 = vpop.f32.mrb[127].mxu1  ;;  %v3634_v5 = vadd.f32 %v3633_v38, %v16509_v22  ;;  %v3635_v42 = vpop.f32.mrb[239].mxu0  ;;  %v4554_v49 = vmax.f32 %v3630_v1, 0.0  ;;  %v7809_v28 = vcombine.low %v16516_v27, %v16515_v25  ;;  %v16522_v27 = vld [vmem:[#allocation660_spill] sm:$0xff] }
 0x404   : > { %v3636_v20 = vadd.f32 %v3635_v42, %v16509_v22  ;;  %v4555_v29 = vmax.f32 %v3632_v26, 0.0  ;;  %v16517_v22 = vld [vmem:[#allocation697_spill] sm:$0xff] }
 0x405   : > { %5583 = vmatmul.mubr.bf16.gmra.mrb[232].mxu1 %v4946_v4  ;;  %8627 = vmatprep.subr.bf16.mxu1 %v13281_v43  ;;  %v4556_v46 = vmax.f32 %v3634_v5, 0.0 }
 0x406   : > { %8635 = vmatpush3.bf16.msra.mxu1 %v13187_v48  ;;  %v4557_v23 = vmax.f32 %v3636_v20, 0.0 }
 0x407   : > { %7936 = vmatmul.mubr.msk.bf16.gmra.mrb[88].mxu0 %vm2613_vm1, %v7807_v35  ;;  %v4948_v12 = vpack.c.bf16 %v4556_v46, %v4554_v49 }
 0x408   : > { %3907 = vmatprep.mubr.bf16.mxu0 %v16136_v0  ;;  %v13290_v15 = vpop.f32.mrb[128].mxu1  ;;  %v3639_v61 = vpop.f32.mrb[240].mxu0  ;;  %v4949_v21 = vpack.c.bf16 %v4557_v23, %v4555_v29 }
 0x409   : > { %v5378_v32 = vpop.f32.mrb[129].mxu1  ;;  %v3640_v11 = vadd.f32 %v3639_v61, %v16510_v13  ;;  %v3641_v8 = vpop.f32.mrb[241].mxu0 }
 0x40a   : > { %v13293_v39 = vpop.f32.mrb[130].mxu1  ;;  %v3642_v62 = vadd.f32 %v3641_v8, %v16510_v13  ;;  %v3643_v59 = vpop.f32.mrb[242].mxu0  ;;  %5590 = vmatprep.mubr.bf16.mxu1 %v4949_v21 }
 0x40b   : > { %v5381_v10 = vpop.f32.mrb[131].mxu1  ;;  %v3644_v57 = vadd.f32 %v3643_v59, %v16513_v18  ;;  %v3645_v37 = vpop.f32.mrb[243].mxu0  ;;  %v4558_v45 = vmax.f32 %v3640_v11, 0.0  ;;  %v16518_v11 = vld [vmem:[#allocation658_spill] sm:$0xff] }
 0x40c   : > { %v3646_v7 = vadd.f32 %v3645_v37, %v16513_v18  ;;  %v4559_v14 = vmax.f32 %v3642_v62, 0.0  ;;  %v16520_v62 = vld [vmem:[#allocation180_spill] sm:$0xff] }
 0x40d   : > { %5591 = vmatmul.mubr.bf16.gmra.mrb[236].mxu1 %v4948_v12  ;;  %v4560_v60 = vmax.f32 %v3644_v57, 0.0 }
 0x40e   : > { %v4561_v55 = vmax.f32 %v3646_v7, 0.0  ;;  %v16521_v7 = vld [vmem:[#allocation699_spill] sm:$0xff] }
 0x40f   : > { %7937 = vmatmul.mubr.msk.bf16.gmra.mrb[92].mxu0 %vm2613_vm1, %v7808_v41  ;;  %v4950_v44 = vpack.c.bf16 %v4560_v60, %v4558_v45  ;;  %v16519_v41 = vld [vmem:[#allocation181_spill] sm:$0xff] }
 0x410   : > { %3917 = vmatprep.mubr.bf16.mxu0 %v16136_v0  ;;  %v13304_v56 = vpop.f32.mrb[132].mxu1  ;;  %v3649_v16 = vpop.f32.mrb[244].mxu0  ;;  %v4951_v31 = vpack.c.bf16 %v4561_v55, %v4559_v14  ;;  %v7810_v10 = vcombine.low %v16520_v62, %v16519_v41 }
 0x411   : > { %v5386_v4 = vpop.f32.mrb[133].mxu1  ;;  %v3650_v53 = vadd.f32 %v3649_v16, %v16514_v6  ;;  %v3651_v51 = vpop.f32.mrb[245].mxu0 }
 0x412   : > { %v13307_v1 = vpop.f32.mrb[134].mxu1  ;;  %v3652_v26 = vadd.f32 %v3651_v51, %v16514_v6  ;;  %v3653_v38 = vpop.f32.mrb[246].mxu0  ;;  %5598 = vmatprep.mubr.bf16.mxu1 %v4951_v31 }
 0x413   : > { %v5389_v9 = vpop.f32.mrb[135].mxu1  ;;  %v3654_v5 = vadd.f32 %v3653_v38, %v16517_v22  ;;  %v3655_v42 = vpop.f32.mrb[247].mxu0  ;;  %v4562_v49 = vmax.f32 %v3650_v53, 0.0  ;;  %v16523_v38 = vld [vmem:[#allocation183_spill] sm:$0xff] }
 0x414   : > { %v3656_v20 = vadd.f32 %v3655_v42, %v16517_v22  ;;  %v4563_v29 = vmax.f32 %v3652_v26, 0.0  ;;  %v16524_v22 = vld [vmem:[#allocation182_spill] sm:$0xff] }
 0x415   : > { %5599 = vmatmul.mubr.bf16.gmra.mrb[240].mxu1 %v4950_v44  ;;  %v4564_v46 = vmax.f32 %v3654_v5, 0.0  ;;  %v7811_v5 = vcombine.low %v16524_v22, %v16523_v38 }
 0x416   : > { %v4565_v23 = vmax.f32 %v3656_v20, 0.0 }
 0x417   : > { %7938 = vmatmul.mubr.msk.bf16.gmra.mrb[96].mxu0 %vm2613_vm1, %v7809_v28  ;;  %v4952_v32 = vpack.c.bf16 %v4564_v46, %v4562_v49 }
 0x418   : > { %3927 = vmatprep.mubr.bf16.mxu0 %v16136_v0  ;;  %v13318_v12 = vpop.f32.mrb[136].mxu1  ;;  %v3659_v21 = vpop.f32.mrb[248].mxu0  ;;  %v4953_v13 = vpack.c.bf16 %v4565_v23, %v4563_v29  ;;  %v16525_v29 = vld [vmem:[#allocation700_spill] sm:$0xff] }
 0x419   : > { %v5394_v61 = vpop.f32.mrb[137].mxu1  ;;  %v3660_v8 = vadd.f32 %v3659_v21, %v16518_v11  ;;  %v3661_v3 = vpop.f32.mrb[249].mxu0 }
 0x41a   : > { %v13321_v63 = vpop.f32.mrb[138].mxu1  ;;  %v3662_v18 = vadd.f32 %v3661_v3, %v16518_v11  ;;  %v3663_v37 = vpop.f32.mrb[250].mxu0  ;;  %5606 = vmatprep.mubr.bf16.mxu1 %v4953_v13 }
 0x41b   : > { %v5397_v57 = vpop.f32.mrb[139].mxu1  ;;  %v3664_v45 = vadd.f32 %v3663_v37, %v16521_v7  ;;  %v3665_v60 = vpop.f32.mrb[251].mxu0  ;;  %v4566_v55 = vmax.f32 %v3660_v8, 0.0 }
 0x41c   : > { %v3666_v14 = vadd.f32 %v3665_v60, %v16521_v7  ;;  %v4567_v4 = vmax.f32 %v3662_v18, 0.0  ;;  %v16526_v57 = vld [vmem:[#allocation701_spill] sm:$0xff] }
 0x41d   : > { %5607 = vmatmul.mubr.bf16.gmra.mrb[244].mxu1 %v4952_v32  ;;  %v4568_v44 = vmax.f32 %v3664_v45, 0.0  ;;  %v16527_v60 = vld [vmem:[#allocation185_spill] sm:$0xff] }
 0x41e   : > { %v4569_v16 = vmax.f32 %v3666_v14, 0.0  ;;  %v16528_v14 = vld [vmem:[#allocation184_spill] sm:$0xff] }
 0x41f   : > { %7939 = vmatmul.mubr.msk.bf16.gmra.mrb[100].mxu0 %vm2613_vm1, %v7810_v10  ;;  %v4954_v6 = vpack.c.bf16 %v4568_v44, %v4566_v55  ;;  %v7812_v55 = vcombine.low %v16528_v14, %v16527_v60 }
 0x420   : > { %3937 = vmatprep.mubr.bf16.mxu0 %v16136_v0  ;;  %v13332_v31 = vpop.f32.mrb[140].mxu1  ;;  %v4955_v25 = vpack.c.bf16 %v4569_v16, %v4567_v4 }
 0x421   : > { %v5402_v53 = vpop.f32.mrb[141].mxu1 }
 0x422   : > { %v3669_v51 = vpop.f32.mrb[252].mxu0  ;;  %v13335_v26 = vpop.f32.mrb[142].mxu1  ;;  %5614 = vmatprep.mubr.bf16.mxu1 %v4955_v25  ;;  %v16529_v53 = vld [vmem:[#allocation659_spill] sm:$0xff] }
 0x423   : > { %v3670_v28 = vadd.f32 %v3669_v51, %v16522_v27  ;;  %v3671_v9 = vpop.f32.mrb[253].mxu0  ;;  %v5405_v49 = vpop.f32.mrb[143].mxu1 }
 0x424   : > { %v3672_v20 = vadd.f32 %v3671_v9, %v16522_v27  ;;  %v3673_v46 = vpop.f32.mrb[254].mxu0 }
 0x425   : > { %v3674_v23 = vadd.f32 %v3673_v46, %v16525_v29  ;;  %v3675_v32 = vpop.f32.mrb[255].mxu0  ;;  %5615 = vmatmul.mubr.bf16.gmra.mrb[248].mxu1 %v4954_v6  ;;  %v4570_v21 = vmax.f32 %v3670_v28, 0.0 }
 0x426   : > { %v3676_v61 = vadd.f32 %v3675_v32, %v16525_v29  ;;  %v4571_v11 = vmax.f32 %v3672_v20, 0.0 }
 0x427   : > { %v4572_v13 = vmax.f32 %v3674_v23, 0.0  ;;  %7940 = vmatmul.mubr.msk.bf16.gmra.mrb[104].mxu0 %vm2613_vm1, %v7811_v5  ;;  %v16530_v23 = vld [vmem:[#allocation661_spill] sm:$0xff] }
 0x428   : > { %v4573_v8 = vmax.f32 %v3676_v61, 0.0  ;;  %3947 = vmatprep.mubr.bf16.mxu0 %v16136_v0  ;;  %v13346_v3 = vpop.f32.mrb[144].mxu1 }
 0x429   : > { %v4956_v41 = vpack.c.bf16 %v4572_v13, %v4570_v21  ;;  %v5410_v62 = vpop.f32.mrb[145].mxu1  ;;  %v16531_v13 = vld [vmem:[#allocation187_spill] sm:$0xff] }
 0x42a   : > { %v3679_v10 = vpop.f32.mrb[0].mxu0  ;;  %v4957_v18 = vpack.c.bf16 %v4573_v8, %v4571_v11  ;;  %v13349_v7 = vpop.f32.mrb[146].mxu1  ;;  %v16532_v11 = vld [vmem:[#allocation186_spill] sm:$0xff] }
 0x42b   : > { %v3680_v37 = vadd.f32 %v3679_v10, %v16526_v57  ;;  %v3681_v45 = vpop.f32.mrb[1].mxu0  ;;  %v5413_v16 = vpop.f32.mrb[147].mxu1  ;;  %v7813_v8 = vcombine.low %v16532_v11, %v16531_v13  ;;  %v16539_v13 = vld [vmem:[#allocation702_spill] sm:$0xff] }
 0x42c   : > { %v3682_v4 = vadd.f32 %v3681_v45, %v16526_v57  ;;  %v3683_v6 = vpop.f32.mrb[2].mxu0  ;;  %5622 = vmatprep.mubr.bf16.mxu1 %v4957_v18  ;;  %v16533_v57 = vld [vmem:[#allocation662_spill] sm:$0xff] }
 0x42d   : > { %v3684_v51 = vadd.f32 %v3683_v6, %v16529_v53  ;;  %v3685_v25 = vpop.f32.mrb[3].mxu0  ;;  %5623 = vmatmul.mubr.bf16.gmra.mrb[252].mxu1 %v4956_v41  ;;  %v4574_v28 = vmax.f32 %v3680_v37, 0.0 }
 0x42e   : > { %v3686_v27 = vadd.f32 %v3685_v25, %v16529_v53  ;;  %v4575_v38 = vmax.f32 %v3682_v4, 0.0 }
 0x42f   : > { %v4576_v9 = vmax.f32 %v3684_v51, 0.0  ;;  %7941 = vmatmul.mubr.msk.bf16.gmra.mrb[108].mxu0 %vm2613_vm1, %v7812_v55 }
 0x430   : > { %v4577_v22 = vmax.f32 %v3686_v27, 0.0  ;;  %3957 = vmatprep.mubr.bf16.mxu0 %v16136_v0  ;;  %v13360_v20 = vpop.f32.mrb[148].mxu1 }
 0x431   : > { %v4958_v5 = vpack.c.bf16 %v4576_v9, %v4574_v28  ;;  %v5418_v49 = vpop.f32.mrb[149].mxu1  ;;  %v16535_v28 = vld [vmem:[#allocation663_spill] sm:$0xff] }
 0x432   : > { %v3689_v46 = vpop.f32.mrb[4].mxu0  ;;  %v4959_v29 = vpack.c.bf16 %v4577_v22, %v4575_v38  ;;  %v13363_v61 = vpop.f32.mrb[150].mxu1  ;;  %v16538_v49 = vld [vmem:[#allocation188_spill] sm:$0xff] }
 0x433   : > { %v3690_v32 = vadd.f32 %v3689_v46, %v16530_v23  ;;  %v3691_v21 = vpop.f32.mrb[5].mxu0  ;;  %v5421_v10 = vpop.f32.mrb[151].mxu1 }
 0x434   : > { %v3692_v62 = vadd.f32 %v3691_v21, %v16530_v23  ;;  %v3693_v18 = vpop.f32.mrb[6].mxu0  ;;  %5630 = vmatprep.mubr.bf16.mxu1 %v4959_v29 }
 0x435   : > { %v3694_v37 = vadd.f32 %v3693_v18, %v16533_v57  ;;  %v3695_v45 = vpop.f32.mrb[7].mxu0  ;;  %5631 = vmatmul.mubr.bf16.gmra.mrb[0].mxu1 %v4958_v5  ;;  %v4578_v14 = vmax.f32 %v3690_v32, 0.0  ;;  %v16537_v5 = vld [vmem:[#allocation189_spill] sm:$0xff] }
 0x436   : > { %v3696_v60 = vadd.f32 %v3695_v45, %v16533_v57  ;;  %v4579_v4 = vmax.f32 %v3692_v62, 0.0  ;;  %v7814_v46 = vcombine.low %v16538_v49, %v16537_v5 }
 0x437   : > { %v4580_v55 = vmax.f32 %v3694_v37, 0.0  ;;  %7942 = vmatmul.mubr.msk.bf16.gmra.mrb[112].mxu0 %vm2613_vm1, %v7813_v8 }
 0x438   : > { %v4581_v16 = vmax.f32 %v3696_v60, 0.0  ;;  %3967 = vmatprep.mubr.bf16.mxu0 %v16136_v0  ;;  %v13374_v53 = vpop.f32.mrb[152].mxu1 }
 0x439   : > { %v4960_v6 = vpack.c.bf16 %v4580_v55, %v4578_v14  ;;  %16534 = vst [vmem:[#allocation673_spill] sm:$0xff] %v13374_v53  ;;  %v5426_v51 = vpop.f32.mrb[153].mxu1 }
 0x43a   : > { %v3699_v25 = vpop.f32.mrb[8].mxu0  ;;  %v4961_v27 = vpack.c.bf16 %v4581_v16, %v4579_v4  ;;  %v13377_v38 = vpop.f32.mrb[154].mxu1  ;;  %v16541_v16 = vld [vmem:[#allocation704_spill] sm:$0xff] }
 0x43b   : > { %v3700_v9 = vadd.f32 %v3699_v25, %v16535_v28  ;;  %16536 = vst [vmem:[#allocation674_spill] sm:$0xff] %v13377_v38  ;;  %v3701_v22 = vpop.f32.mrb[9].mxu0  ;;  %v5429_v32 = vpop.f32.mrb[155].mxu1 }
 0x43c   : > { %v3702_v23 = vadd.f32 %v3701_v22, %v16535_v28  ;;  %v3703_v21 = vpop.f32.mrb[10].mxu0  ;;  %5638 = vmatprep.mubr.bf16.mxu1 %v4961_v27  ;;  %v16544_v28 = vld [vmem:[#allocation190_spill] sm:$0xff] }
 0x43d   : > { %v3704_v11 = vadd.f32 %v3703_v21, %v16539_v13  ;;  %v3705_v8 = vpop.f32.mrb[11].mxu0  ;;  %5639 = vmatmul.mubr.bf16.gmra.mrb[4].mxu1 %v4960_v6  ;;  %v4582_v10 = vmax.f32 %v3700_v9, 0.0  ;;  %v16543_v6 = vld [vmem:[#allocation191_spill] sm:$0xff] }
 0x43e   : > { %v3706_v62 = vadd.f32 %v3705_v8, %v16539_v13  ;;  %v4583_v57 = vmax.f32 %v3702_v23, 0.0  ;;  %v7815_v9 = vcombine.low %v16544_v28, %v16543_v6  ;;  %v16545_v23 = vld [vmem:[#allocation703_spill] sm:$0xff] }
 0x43f   : > { %v4584_v18 = vmax.f32 %v3704_v11, 0.0  ;;  %7943 = vmatmul.mubr.msk.bf16.gmra.mrb[116].mxu0 %vm2613_vm1, %v7814_v46 }
 0x440   : > { %v4585_v37 = vmax.f32 %v3706_v62, 0.0  ;;  %3977 = vmatprep.mubr.bf16.mxu0 %v16136_v0  ;;  %v13388_v60 = vpop.f32.mrb[156].mxu1 }
 0x441   : > { %v4962_v45 = vpack.c.bf16 %v4584_v18, %v4582_v10  ;;  %16540 = vst [vmem:[#allocation675_spill] sm:$0xff] %v13388_v60  ;;  %v5434_v14 = vpop.f32.mrb[157].mxu1 }
 0x442   : > { %v3709_v55 = vpop.f32.mrb[12].mxu0  ;;  %v4963_v4 = vpack.c.bf16 %v4585_v37, %v4583_v57  ;;  %v13391_v25 = vpop.f32.mrb[158].mxu1 }
 0x443   : > { %v3710_v51 = vadd.f32 %v3709_v55, %v16541_v16  ;;  %16542 = vst [vmem:[#allocation676_spill] sm:$0xff] %v13391_v25  ;;  %v3711_v27 = vpop.f32.mrb[13].mxu0  ;;  %v5437_v49 = vpop.f32.mrb[159].mxu1 }
 0x444   : > { %v3712_v5 = vadd.f32 %v3711_v27, %v16541_v16  ;;  %v3713_v46 = vpop.f32.mrb[14].mxu0  ;;  %5646 = vmatprep.mubr.bf16.mxu1 %v4963_v4  ;;  %v16546_v4 = vld [vmem:[#allocation705_spill] sm:$0xff] }
 0x445   : > { %v3714_v32 = vadd.f32 %v3713_v46, %v16545_v23  ;;  %v3715_v21 = vpop.f32.mrb[15].mxu0  ;;  %5647 = vmatmul.mubr.bf16.gmra.mrb[8].mxu1 %v4962_v45  ;;  %v4586_v11 = vmax.f32 %v3710_v51, 0.0  ;;  %v16547_v45 = vld [vmem:[#allocation193_spill] sm:$0xff]  ;;  %v16548_v51 = vld [vmem:[#allocation192_spill] sm:$0xff] }
 0x446   : > { %v3716_v13 = vadd.f32 %v3715_v21, %v16545_v23  ;;  %v4587_v62 = vmax.f32 %v3712_v5, 0.0  ;;  %v7816_v28 = vcombine.low %v16548_v51, %v16547_v45  ;;  %v16549_v23 = vld [vmem:[#allocation664_spill] sm:$0xff]  ;;  %v16550_v45 = vld [vmem:[#allocation706_spill] sm:$0xff] }
 0x447   : > { %v4588_v8 = vmax.f32 %v3714_v32, 0.0  ;;  %7944 = vmatmul.mubr.msk.bf16.gmra.mrb[120].mxu0 %vm2613_vm1, %v7815_v9 }
 0x448   : > { %v4589_v10 = vmax.f32 %v3716_v13, 0.0  ;;  %3987 = vmatprep.mubr.bf16.mxu0 %v16136_v0  ;;  %v13402_v57 = vpop.f32.mrb[160].mxu1 }
 0x449   : > { %v4964_v18 = vpack.c.bf16 %v4588_v8, %v4586_v11  ;;  %v5442_v37 = vpop.f32.mrb[161].mxu1 }
 0x44a   : > { %v3719_v14 = vpop.f32.mrb[16].mxu0  ;;  %v4965_v55 = vpack.c.bf16 %v4589_v10, %v4587_v62  ;;  %v13405_v27 = vpop.f32.mrb[162].mxu1 }
 0x44b   : > { %v3720_v16 = vadd.f32 %v3719_v14, %v16546_v4  ;;  %v3721_v6 = vpop.f32.mrb[17].mxu0  ;;  %v5445_v49 = vpop.f32.mrb[163].mxu1 }
 0x44c   : > { %v3722_v5 = vadd.f32 %v3721_v6, %v16546_v4  ;;  %v3723_v46 = vpop.f32.mrb[18].mxu0  ;;  %5654 = vmatprep.mubr.bf16.mxu1 %v4965_v55 }
 0x44d   : > { %v3724_v32 = vadd.f32 %v3723_v46, %v16549_v23  ;;  %v3725_v21 = vpop.f32.mrb[19].mxu0  ;;  %5655 = vmatmul.mubr.bf16.gmra.mrb[12].mxu1 %v4964_v18  ;;  %v4590_v11 = vmax.f32 %v3720_v16, 0.0  ;;  %v16551_v18 = vld [vmem:[#allocation195_spill] sm:$0xff]  ;;  %v16552_v16 = vld [vmem:[#allocation194_spill] sm:$0xff] }
 0x44e   : > { %v3726_v13 = vadd.f32 %v3725_v21, %v16549_v23  ;;  %v4591_v62 = vmax.f32 %v3722_v5, 0.0  ;;  %v7817_v23 = vcombine.low %v16552_v16, %v16551_v18 }
 0x44f   : > { %v4592_v8 = vmax.f32 %v3724_v32, 0.0  ;;  %7945 = vmatmul.mubr.msk.bf16.gmra.mrb[124].mxu0 %vm2613_vm1, %v7816_v28 }
 0x450   : > { %v4593_v10 = vmax.f32 %v3726_v13, 0.0  ;;  %3997 = vmatprep.mubr.bf16.mxu0 %v16136_v0  ;;  %v13416_v14 = vpop.f32.mrb[164].mxu1  ;;  %v16553_v13 = vld [vmem:[#allocation665_spill] sm:$0xff] }
 0x451   : > { %v4966_v37 = vpack.c.bf16 %v4592_v8, %v4590_v11  ;;  %v5450_v4 = vpop.f32.mrb[165].mxu1 }
 0x452   : > { %v3729_v6 = vpop.f32.mrb[20].mxu0  ;;  %v4967_v55 = vpack.c.bf16 %v4593_v10, %v4591_v62  ;;  %v13419_v49 = vpop.f32.mrb[166].mxu1 }
 0x453   : > { %v3730_v51 = vadd.f32 %v3729_v6, %v16550_v45  ;;  %v3731_v46 = vpop.f32.mrb[21].mxu0  ;;  %v5453_v32 = vpop.f32.mrb[167].mxu1 }
 0x454   : > { %v3732_v5 = vadd.f32 %v3731_v46, %v16550_v45  ;;  %v3733_v21 = vpop.f32.mrb[22].mxu0  ;;  %5662 = vmatprep.mubr.bf16.mxu1 %v4967_v55  ;;  %v16554_v32 = vld [vmem:[#allocation666_spill] sm:$0xff] }
 0x455   : > { %v3734_v11 = vadd.f32 %v3733_v21, %v16553_v13  ;;  %v3735_v8 = vpop.f32.mrb[23].mxu0  ;;  %5663 = vmatmul.mubr.bf16.gmra.mrb[16].mxu1 %v4966_v37  ;;  %v4594_v10 = vmax.f32 %v3730_v51, 0.0  ;;  %v16555_v37 = vld [vmem:[#allocation197_spill] sm:$0xff]  ;;  %v16556_v51 = vld [vmem:[#allocation196_spill] sm:$0xff] }
 0x456   : > { %v3736_v62 = vadd.f32 %v3735_v8, %v16553_v13  ;;  %v4595_v6 = vmax.f32 %v3732_v5, 0.0 }
 0x457   : > { %v4596_v4 = vmax.f32 %v3734_v11, 0.0  ;;  %7946 = vmatmul.mubr.msk.bf16.gmra.mrb[128].mxu0 %vm2613_vm1, %v7817_v23  ;;  %v7818_v11 = vcombine.low %v16556_v51, %v16555_v37 }
 0x458   : > { %v4597_v18 = vmax.f32 %v3736_v62, 0.0  ;;  %4007 = vmatprep.mubr.bf16.mxu0 %v16136_v0  ;;  %v13430_v22 = vpop.f32.mrb[168].mxu1 }
 0x459   : > { %v4968_v16 = vpack.c.bf16 %v4596_v4, %v4594_v10  ;;  %v5458_v45 = vpop.f32.mrb[169].mxu1  ;;  %v16557_v10 = vld [vmem:[#allocation707_spill] sm:$0xff] }
 0x45a   : > { %v3739_v46 = vpop.f32.mrb[24].mxu0  ;;  %v4969_v55 = vpack.c.bf16 %v4597_v18, %v4595_v6  ;;  %v13433_v29 = vpop.f32.mrb[170].mxu1 }
 0x45b   : > { %v3740_v21 = vadd.f32 %v3739_v46, %v16554_v32  ;;  %v3741_v13 = vpop.f32.mrb[25].mxu0  ;;  %v5461_v8 = vpop.f32.mrb[171].mxu1 }
 0x45c   : > { %v3742_v5 = vadd.f32 %v3741_v13, %v16554_v32  ;;  %v3743_v62 = vpop.f32.mrb[26].mxu0  ;;  %5670 = vmatprep.mubr.bf16.mxu1 %v4969_v55  ;;  %v16558_v8 = vld [vmem:[#allocation709_spill] sm:$0xff] }
 0x45d   : > { %v3744_v4 = vadd.f32 %v3743_v62, %v16557_v10  ;;  %v3745_v45 = vpop.f32.mrb[27].mxu0  ;;  %5671 = vmatmul.mubr.bf16.gmra.mrb[20].mxu1 %v4968_v16  ;;  %v4598_v18 = vmax.f32 %v3740_v21, 0.0  ;;  %v16559_v16 = vld [vmem:[#allocation199_spill] sm:$0xff]  ;;  %v16560_v21 = vld [vmem:[#allocation198_spill] sm:$0xff] }
 0x45e   : > { %v3746_v6 = vadd.f32 %v3745_v45, %v16557_v10  ;;  %v4599_v41 = vmax.f32 %v3742_v5, 0.0 }
 0x45f   : > { %v4600_v46 = vmax.f32 %v3744_v4, 0.0  ;;  %7947 = vmatmul.mubr.msk.bf16.gmra.mrb[132].mxu0 %vm2613_vm1, %v7818_v11  ;;  %v7819_v4 = vcombine.low %v16560_v21, %v16559_v16 }
 0x460   : > { %v4601_v37 = vmax.f32 %v3746_v6, 0.0  ;;  %4017 = vmatprep.mubr.bf16.mxu0 %v16136_v0  ;;  %v13444_v44 = vpop.f32.mrb[172].mxu1 }
 0x461   : > { %v4970_v51 = vpack.c.bf16 %v4600_v46, %v4598_v18  ;;  %v5466_v32 = vpop.f32.mrb[173].mxu1  ;;  %v16561_v18 = vld [vmem:[#allocation708_spill] sm:$0xff] }
 0x462   : > { %v3749_v13 = vpop.f32.mrb[28].mxu0  ;;  %v4971_v55 = vpack.c.bf16 %v4601_v37, %v4599_v41  ;;  %v13447_v42 = vpop.f32.mrb[174].mxu1 }
 0x463   : > { %v3750_v62 = vadd.f32 %v3749_v13, %v16558_v8  ;;  %v3751_v10 = vpop.f32.mrb[29].mxu0  ;;  %v5469_v45 = vpop.f32.mrb[175].mxu1 }
 0x464   : > { %v3752_v5 = vadd.f32 %v3751_v10, %v16558_v8  ;;  %v3753_v6 = vpop.f32.mrb[30].mxu0  ;;  %5678 = vmatprep.mubr.bf16.mxu1 %v4971_v55  ;;  %v16562_v45 = vld [vmem:[#allocation710_spill] sm:$0xff] }
 0x465   : > { %v3754_v46 = vadd.f32 %v3753_v6, %v16561_v18  ;;  %v3755_v32 = vpop.f32.mrb[31].mxu0  ;;  %5679 = vmatmul.mubr.bf16.gmra.mrb[24].mxu1 %v4970_v51  ;;  %v4602_v37 = vmax.f32 %v3750_v62, 0.0  ;;  %v16563_v51 = vld [vmem:[#allocation201_spill] sm:$0xff]  ;;  %v16564_v62 = vld [vmem:[#allocation200_spill] sm:$0xff] }
 0x466   : > { %v3756_v41 = vadd.f32 %v3755_v32, %v16561_v18  ;;  %v4603_v59 = vmax.f32 %v3752_v5, 0.0 }
 0x467   : > { %v4604_v13 = vmax.f32 %v3754_v46, 0.0  ;;  %7948 = vmatmul.mubr.msk.bf16.gmra.mrb[136].mxu0 %vm2613_vm1, %v7819_v4  ;;  %v7820_v46 = vcombine.low %v16564_v62, %v16563_v51 }
 0x468   : > { %v4605_v16 = vmax.f32 %v3756_v41, 0.0  ;;  %4027 = vmatprep.mubr.bf16.mxu0 %v16136_v0  ;;  %v13458_v11 = vpop.f32.mrb[176].mxu1 }
 0x469   : > { %v4972_v21 = vpack.c.bf16 %v4604_v13, %v4602_v37  ;;  %v5474_v8 = vpop.f32.mrb[177].mxu1  ;;  %v16565_v37 = vld [vmem:[#allocation667_spill] sm:$0xff] }
 0x46a   : > { %v3759_v10 = vpop.f32.mrb[32].mxu0  ;;  %v4973_v55 = vpack.c.bf16 %v4605_v16, %v4603_v59  ;;  %v13461_v23 = vpop.f32.mrb[178].mxu1 }
 0x46b   : > { %v3760_v6 = vadd.f32 %v3759_v10, %v16562_v45  ;;  %v3761_v18 = vpop.f32.mrb[33].mxu0  ;;  %v5477_v32 = vpop.f32.mrb[179].mxu1 }
 0x46c   : > { %v3762_v5 = vadd.f32 %v3761_v18, %v16562_v45  ;;  %v3763_v41 = vpop.f32.mrb[34].mxu0  ;;  %5686 = vmatprep.mubr.bf16.mxu1 %v4973_v55  ;;  %v16566_v32 = vld [vmem:[#allocation711_spill] sm:$0xff] }
 0x46d   : > { %v3764_v13 = vadd.f32 %v3763_v41, %v16565_v37  ;;  %v3765_v8 = vpop.f32.mrb[35].mxu0  ;;  %5687 = vmatmul.mubr.bf16.gmra.mrb[28].mxu1 %v4972_v21  ;;  %v4606_v16 = vmax.f32 %v3760_v6, 0.0  ;;  %v16567_v21 = vld [vmem:[#allocation203_spill] sm:$0xff]  ;;  %v16568_v6 = vld [vmem:[#allocation202_spill] sm:$0xff] }
 0x46e   : > { %v3766_v59 = vadd.f32 %v3765_v8, %v16565_v37  ;;  %v4607_v35 = vmax.f32 %v3762_v5, 0.0 }
 0x46f   : > { %v4608_v10 = vmax.f32 %v3764_v13, 0.0  ;;  %7949 = vmatmul.mubr.msk.bf16.gmra.mrb[140].mxu0 %vm2613_vm1, %v7820_v46  ;;  %v7821_v13 = vcombine.low %v16568_v6, %v16567_v21 }
 0x470   : > { %v4609_v51 = vmax.f32 %v3766_v59, 0.0  ;;  %4037 = vmatprep.mubr.bf16.mxu0 %v16136_v0  ;;  %v13472_v4 = vpop.f32.mrb[180].mxu1 }
 0x471   : > { %v4974_v62 = vpack.c.bf16 %v4608_v10, %v4606_v16  ;;  %v5482_v45 = vpop.f32.mrb[181].mxu1  ;;  %v16569_v16 = vld [vmem:[#allocation668_spill] sm:$0xff] }
 0x472   : > { %v3769_v18 = vpop.f32.mrb[36].mxu0  ;;  %v4975_v55 = vpack.c.bf16 %v4609_v51, %v4607_v35  ;;  %v13475_v28 = vpop.f32.mrb[182].mxu1 }
 0x473   : > { %v3770_v41 = vadd.f32 %v3769_v18, %v16566_v32  ;;  %v3771_v37 = vpop.f32.mrb[37].mxu0  ;;  %v5485_v8 = vpop.f32.mrb[183].mxu1 }
 0x474   : > { %v3772_v5 = vadd.f32 %v3771_v37, %v16566_v32  ;;  %v3773_v59 = vpop.f32.mrb[38].mxu0  ;;  %5694 = vmatprep.mubr.bf16.mxu1 %v4975_v55  ;;  %v16571_v8 = vld [vmem:[#allocation669_spill] sm:$0xff] }
 0x475   : > { %v3774_v10 = vadd.f32 %v3773_v59, %v16569_v16  ;;  %v3775_v45 = vpop.f32.mrb[39].mxu0  ;;  %5695 = vmatmul.mubr.bf16.gmra.mrb[32].mxu1 %v4974_v62  ;;  %v4610_v51 = vmax.f32 %v3770_v41, 0.0  ;;  %v16573_v62 = vld [vmem:[#allocation205_spill] sm:$0xff]  ;;  %v16574_v41 = vld [vmem:[#allocation204_spill] sm:$0xff] }
 0x476   : > { %v3776_v35 = vadd.f32 %v3775_v45, %v16569_v16  ;;  %v4611_v36 = vmax.f32 %v3772_v5, 0.0 }
 0x477   : > { %v4612_v18 = vmax.f32 %v3774_v10, 0.0  ;;  %7950 = vmatmul.mubr.msk.bf16.gmra.mrb[144].mxu0 %vm2613_vm1, %v7821_v13  ;;  %v7822_v10 = vcombine.low %v16574_v41, %v16573_v62 }
 0x478   : > { %v4613_v21 = vmax.f32 %v3776_v35, 0.0  ;;  %4047 = vmatprep.mubr.bf16.mxu0 %v16136_v0  ;;  %v13486_v46 = vpop.f32.mrb[184].mxu1 }
 0x479   : > { %v4976_v6 = vpack.c.bf16 %v4612_v18, %v4610_v51  ;;  %16570 = vst [vmem:[#allocation677_spill] sm:$0xff] %v13486_v46  ;;  %v5490_v32 = vpop.f32.mrb[185].mxu1  ;;  %v16575_v51 = vld [vmem:[#allocation712_spill] sm:$0xff] }
 0x47a   : > { %v3779_v37 = vpop.f32.mrb[40].mxu0  ;;  %v4977_v55 = vpack.c.bf16 %v4613_v21, %v4611_v36  ;;  %v13489_v9 = vpop.f32.mrb[186].mxu1 }
 0x47b   : > { %v3780_v59 = vadd.f32 %v3779_v37, %v16571_v8  ;;  %16572 = vst [vmem:[#allocation678_spill] sm:$0xff] %v13489_v9  ;;  %v3781_v16 = vpop.f32.mrb[41].mxu0  ;;  %v5493_v45 = vpop.f32.mrb[187].mxu1 }
 0x47c   : > { %v3782_v5 = vadd.f32 %v3781_v16, %v16571_v8  ;;  %v3783_v35 = vpop.f32.mrb[42].mxu0  ;;  %5702 = vmatprep.mubr.bf16.mxu1 %v4977_v55  ;;  %v16577_v45 = vld [vmem:[#allocation714_spill] sm:$0xff] }
 0x47d   : > { %v3784_v18 = vadd.f32 %v3783_v35, %v16575_v51  ;;  %v3785_v32 = vpop.f32.mrb[43].mxu0  ;;  %5703 = vmatmul.mubr.bf16.gmra.mrb[36].mxu1 %v4976_v6  ;;  %v4614_v21 = vmax.f32 %v3780_v59, 0.0  ;;  %v16579_v6 = vld [vmem:[#allocation207_spill] sm:$0xff]  ;;  %v16580_v59 = vld [vmem:[#allocation206_spill] sm:$0xff] }
 0x47e   : > { %v3786_v36 = vadd.f32 %v3785_v32, %v16575_v51  ;;  %v4615_v60 = vmax.f32 %v3782_v5, 0.0 }
 0x47f   : > { %v4616_v37 = vmax.f32 %v3784_v18, 0.0  ;;  %7951 = vmatmul.mubr.msk.bf16.gmra.mrb[148].mxu0 %vm2613_vm1, %v7822_v10  ;;  %v7823_v18 = vcombine.low %v16580_v59, %v16579_v6 }
 0x480   : > { %v4617_v62 = vmax.f32 %v3786_v36, 0.0  ;;  %4057 = vmatprep.mubr.bf16.mxu0 %v16136_v0  ;;  %v13500_v13 = vpop.f32.mrb[188].mxu1 }
 0x481   : > { %v4978_v41 = vpack.c.bf16 %v4616_v37, %v4614_v21  ;;  %16576 = vst [vmem:[#allocation679_spill] sm:$0xff] %v13500_v13  ;;  %v5498_v8 = vpop.f32.mrb[189].mxu1  ;;  %v16581_v21 = vld [vmem:[#allocation713_spill] sm:$0xff] }
 0x482   : > { %v3789_v16 = vpop.f32.mrb[44].mxu0  ;;  %v4979_v55 = vpack.c.bf16 %v4617_v62, %v4615_v60  ;;  %v13503_v25 = vpop.f32.mrb[190].mxu1 }
 0x483   : > { %v3790_v35 = vadd.f32 %v3789_v16, %v16577_v45  ;;  %16578 = vst [vmem:[#allocation680_spill] sm:$0xff] %v13503_v25  ;;  %v3791_v51 = vpop.f32.mrb[45].mxu0  ;;  %v5501_v32 = vpop.f32.mrb[191].mxu1 }
 0x484   : > { %v3792_v5 = vadd.f32 %v3791_v51, %v16577_v45  ;;  %v3793_v36 = vpop.f32.mrb[46].mxu0  ;;  %5710 = vmatprep.mubr.bf16.mxu1 %v4979_v55  ;;  %v16583_v32 = vld [vmem:[#allocation715_spill] sm:$0xff] }
 0x485   : > { %v3794_v37 = vadd.f32 %v3793_v36, %v16581_v21  ;;  %v3795_v8 = vpop.f32.mrb[47].mxu0  ;;  %5711 = vmatmul.mubr.bf16.gmra.mrb[40].mxu1 %v4978_v41  ;;  %v4618_v62 = vmax.f32 %v3790_v35, 0.0  ;;  %v16585_v41 = vld [vmem:[#allocation209_spill] sm:$0xff]  ;;  %v16586_v35 = vld [vmem:[#allocation208_spill] sm:$0xff] }
 0x486   : > { %v3796_v60 = vadd.f32 %v3795_v8, %v16581_v21  ;;  %v4619_v53 = vmax.f32 %v3792_v5, 0.0 }
 0x487   : > { %v4620_v16 = vmax.f32 %v3794_v37, 0.0  ;;  %7952 = vmatmul.mubr.msk.bf16.gmra.mrb[152].mxu0 %vm2613_vm1, %v7823_v18  ;;  %v7824_v37 = vcombine.low %v16586_v35, %v16585_v41 }
 0x488   : > { %v4621_v6 = vmax.f32 %v3796_v60, 0.0  ;;  %4067 = vmatprep.mubr.bf16.mxu0 %v16136_v0  ;;  %v13514_v10 = vpop.f32.mrb[192].mxu1 }
 0x489   : > { %v4980_v59 = vpack.c.bf16 %v4620_v16, %v4618_v62  ;;  %16582 = vst [vmem:[#allocation681_spill] sm:$0xff] %v13514_v10  ;;  %v5506_v45 = vpop.f32.mrb[193].mxu1  ;;  %v16587_v62 = vld [vmem:[#allocation670_spill] sm:$0xff] }
 0x48a   : > { %v3799_v51 = vpop.f32.mrb[48].mxu0  ;;  %v4981_v55 = vpack.c.bf16 %v4621_v6, %v4619_v53  ;;  %v13517_v13 = vpop.f32.mrb[194].mxu1 }
 0x48b   : > { %v3800_v36 = vadd.f32 %v3799_v51, %v16583_v32  ;;  %16584 = vst [vmem:[#allocation682_spill] sm:$0xff] %v13517_v13  ;;  %v3801_v21 = vpop.f32.mrb[49].mxu0  ;;  %v5509_v8 = vpop.f32.mrb[195].mxu1 }
 0x48c   : > { %v3802_v5 = vadd.f32 %v3801_v21, %v16583_v32  ;;  %v3803_v60 = vpop.f32.mrb[50].mxu0  ;;  %5718 = vmatprep.mubr.bf16.mxu1 %v4981_v55  ;;  %v16589_v8 = vld [vmem:[#allocation716_spill] sm:$0xff] }
 0x48d   : > { %v3804_v16 = vadd.f32 %v3803_v60, %v16587_v62  ;;  %v3805_v45 = vpop.f32.mrb[51].mxu0  ;;  %5719 = vmatmul.mubr.bf16.gmra.mrb[44].mxu1 %v4980_v59  ;;  %v4622_v6 = vmax.f32 %v3800_v36, 0.0  ;;  %v16591_v59 = vld [vmem:[#allocation211_spill] sm:$0xff]  ;;  %v16592_v36 = vld [vmem:[#allocation210_spill] sm:$0xff] }
 0x48e   : > { %v3806_v53 = vadd.f32 %v3805_v45, %v16587_v62  ;;  %v4623_v25 = vmax.f32 %v3802_v5, 0.0 }
 0x48f   : > { %v4624_v51 = vmax.f32 %v3804_v16, 0.0  ;;  %7953 = vmatmul.mubr.msk.bf16.gmra.mrb[156].mxu0 %vm2613_vm1, %v7824_v37  ;;  %v7825_v16 = vcombine.low %v16592_v36, %v16591_v59 }
 0x490   : > { %v4625_v41 = vmax.f32 %v3806_v53, 0.0  ;;  %4077 = vmatprep.mubr.bf16.mxu0 %v16136_v0  ;;  %v13528_v18 = vpop.f32.mrb[196].mxu1 }
 0x491   : > { %v4982_v35 = vpack.c.bf16 %v4624_v51, %v4622_v6  ;;  %16588 = vst [vmem:[#allocation683_spill] sm:$0xff] %v13528_v18  ;;  %v5514_v32 = vpop.f32.mrb[197].mxu1  ;;  %v16593_v6 = vld [vmem:[#allocation671_spill] sm:$0xff] }
 0x492   : > { %v3809_v21 = vpop.f32.mrb[52].mxu0  ;;  %v4983_v55 = vpack.c.bf16 %v4625_v41, %v4623_v25  ;;  %v13531_v10 = vpop.f32.mrb[198].mxu1 }
 0x493   : > { %v3810_v60 = vadd.f32 %v3809_v21, %v16589_v8  ;;  %16590 = vst [vmem:[#allocation684_spill] sm:$0xff] %v13531_v10  ;;  %v3811_v62 = vpop.f32.mrb[53].mxu0  ;;  %v5517_v45 = vpop.f32.mrb[199].mxu1 }
 0x494   : > { %v3812_v5 = vadd.f32 %v3811_v62, %v16589_v8  ;;  %v3813_v53 = vpop.f32.mrb[54].mxu0  ;;  %5726 = vmatprep.mubr.bf16.mxu1 %v4983_v55  ;;  %v16595_v45 = vld [vmem:[#allocation717_spill] sm:$0xff]  ;;  %v1491_v10 = vpop.permute.xlu1 %1490 }
 0x495   : > { %v3814_v51 = vadd.f32 %v3813_v53, %v16593_v6  ;;  %v3815_v32 = vpop.f32.mrb[55].mxu0  ;;  %5727 = vmatmul.mubr.bf16.gmra.mrb[48].mxu1 %v4982_v35  ;;  %v4626_v41 = vmax.f32 %v3810_v60, 0.0  ;;  %v16597_v35 = vld [vmem:[#allocation213_spill] sm:$0xff]  ;;  %v16598_v60 = vld [vmem:[#allocation212_spill] sm:$0xff] }
 0x496   : > { %v3816_v25 = vadd.f32 %v3815_v32, %v16593_v6  ;;  %v4627_v13 = vmax.f32 %v3812_v5, 0.0 }
 0x497   : > { %v4628_v21 = vmax.f32 %v3814_v51, 0.0  ;;  %7954 = vmatmul.mubr.msk.bf16.gmra.mrb[160].mxu0 %vm2613_vm1, %v7825_v16  ;;  %v7826_v51 = vcombine.low %v16598_v60, %v16597_v35  ;;  %v1486_v16 = vpop.permute.xlu0 %1485 }
 0x498   : > { %v4629_v59 = vmax.f32 %v3816_v25, 0.0  ;;  %4087 = vmatprep.mubr.bf16.mxu0 %v16136_v0  ;;  %v13542_v37 = vpop.f32.mrb[200].mxu1 }
 0x499   : > { %v4984_v36 = vpack.c.bf16 %v4628_v21, %v4626_v41  ;;  %16594 = vst [vmem:[#allocation685_spill] sm:$0xff] %v13542_v37  ;;  %v5522_v8 = vpop.f32.mrb[201].mxu1  ;;  %v16599_v41 = vld [vmem:[#allocation672_spill] sm:$0xff] }
 0x49a   : > { %v3819_v62 = vpop.f32.mrb[56].mxu0  ;;  %v4985_v55 = vpack.c.bf16 %v4629_v59, %v4627_v13  ;;  %v13545_v18 = vpop.f32.mrb[202].mxu1 }
 0x49b   : > { %v3820_v53 = vadd.f32 %v3819_v62, %v16595_v45  ;;  %16596 = vst [vmem:[#allocation686_spill] sm:$0xff] %v13545_v18  ;;  %v3821_v6 = vpop.f32.mrb[57].mxu0  ;;  %v5525_v32 = vpop.f32.mrb[203].mxu1 }
 0x49c   : > { %v3822_v5 = vadd.f32 %v3821_v6, %v16595_v45  ;;  %v3823_v25 = vpop.f32.mrb[58].mxu0  ;;  %5734 = vmatprep.mubr.bf16.mxu1 %v4985_v55 }
 0x49d   : > { %v3824_v21 = vadd.f32 %v3823_v25, %v16599_v41  ;;  %v3825_v8 = vpop.f32.mrb[59].mxu0  ;;  %5735 = vmatmul.mubr.bf16.gmra.mrb[52].mxu1 %v4984_v36  ;;  %v4630_v59 = vmax.f32 %v3820_v53, 0.0  ;;  %v16602_v53 = vld [vmem:[#allocation215_spill] sm:$0xff] }
 0x49e   : > { %v3826_v13 = vadd.f32 %v3825_v8, %v16599_v41  ;;  %v4631_v35 = vmax.f32 %v3822_v5, 0.0  ;;  %v16603_v41 = vld [vmem:[#allocation214_spill] sm:$0xff] }
 0x49f   : > { %v4632_v62 = vmax.f32 %v3824_v21, 0.0  ;;  %7955 = vmatmul.mubr.msk.bf16.gmra.mrb[164].mxu0 %vm2613_vm1, %v7826_v51  ;;  %v7827_v21 = vcombine.low %v16603_v41, %v16602_v53  ;;  %v1496_v53 = vpop.permute.xlu0 %1495 }
 0x4a0   : > { %v4633_v60 = vmax.f32 %v3826_v13, 0.0  ;;  %4097 = vmatprep.mubr.bf16.mxu0 %v16136_v0  ;;  %v13556_v6 = vpop.f32.mrb[204].mxu1 }
 0x4a1   : > { %v4986_v45 = vpack.c.bf16 %v4632_v62, %v4630_v59  ;;  %16600 = vst [vmem:[#allocation688_spill] sm:$0xff] %v13556_v6  ;;  %v5530_v55 = vpop.f32.mrb[205].mxu1 }
 0x4a2   : > { %v3829_v32 = vpop.f32.mrb[60].mxu0  ;;  %v4987_v25 = vpack.c.bf16 %v4633_v60, %v4631_v35  ;;  %v13558_v18 = vpop.f32.mrb[206].mxu1 }
 0x4a3   : > { %v3830_v37 = vadd.f32 %v3829_v32, %v1486_v16  ;;  %16601 = vst [vmem:[#allocation687_spill] sm:$0xff] %v13558_v18  ;;  %v3831_v36 = vpop.f32.mrb[61].mxu0  ;;  %v5533_v8 = vpop.f32.mrb[207].mxu1 }
 0x4a4   : > { %v3832_v5 = vadd.f32 %v3831_v36, %v1486_v16  ;;  %v3833_v13 = vpop.f32.mrb[62].mxu0  ;;  %5742 = vmatprep.mubr.bf16.mxu1 %v4987_v25  ;;  %v1501_v60 = vpop.permute.xlu1 %1500 }
 0x4a5   : > { %v3834_v59 = vadd.f32 %v3833_v13, %v1491_v10  ;;  %v3835_v62 = vpop.f32.mrb[63].mxu0  ;;  %5743 = vmatmul.mubr.bf16.gmra.mrb[56].mxu1 %v4986_v45  ;;  %v4634_v55 = vmax.f32 %v3830_v37, 0.0  ;;  %v16606_v37 = vld [vmem:[#allocation217_spill] sm:$0xff]  ;;  %v16607_v45 = vld [vmem:[#allocation216_spill] sm:$0xff] }
 0x4a6   : > { %v3836_v38 = vadd.f32 %v3835_v62, %v1491_v10  ;;  %v4635_v32 = vmax.f32 %v3832_v5, 0.0 }
 0x4a7   : > { %v4636_v35 = vmax.f32 %v3834_v59, 0.0  ;;  %7956 = vmatmul.mubr.msk.bf16.gmra.mrb[168].mxu0 %vm2613_vm1, %v7827_v21  ;;  %v7828_v59 = vcombine.low %v16607_v45, %v16606_v37  ;;  %v1506_v37 = vpop.permute.xlu0 %1505 }
 0x4a8   : > { %v4637_v46 = vmax.f32 %v3836_v38, 0.0  ;;  %4107 = vmatprep.mubr.bf16.mxu0 %v16136_v0  ;;  %v13566_v51 = vpop.f32.mrb[208].mxu1 }
 0x4a9   : > { %v4988_v41 = vpack.c.bf16 %v4636_v35, %v4634_v55  ;;  %16604 = vst [vmem:[#allocation690_spill] sm:$0xff] %v13566_v51  ;;  %v5538_v16 = vpop.f32.mrb[209].mxu1 }
 0x4aa   : > { %v3839_v36 = vpop.f32.mrb[64].mxu0  ;;  %v4989_v25 = vpack.c.bf16 %v4637_v46, %v4635_v32  ;;  %v13568_v13 = vpop.f32.mrb[210].mxu1 }
 0x4ab   : > { %v3840_v8 = vadd.f32 %v3839_v36, %v1496_v53  ;;  %16605 = vst [vmem:[#allocation689_spill] sm:$0xff] %v13568_v13  ;;  %v3841_v10 = vpop.f32.mrb[65].mxu0  ;;  %v5541_v5 = vpop.f32.mrb[211].mxu1 }
 0x4ac   : > { %v3842_v38 = vadd.f32 %v3841_v10, %v1496_v53  ;;  %v3843_v62 = vpop.f32.mrb[66].mxu0  ;;  %5750 = vmatprep.mubr.bf16.mxu1 %v4989_v25  ;;  %v1511_v32 = vpop.permute.xlu1 %1510 }
 0x4ad   : > { %v3844_v55 = vadd.f32 %v3843_v62, %v1501_v60  ;;  %v3845_v35 = vpop.f32.mrb[67].mxu0  ;;  %5751 = vmatmul.mubr.bf16.gmra.mrb[60].mxu1 %v4988_v41  ;;  %v4638_v16 = vmax.f32 %v3840_v8, 0.0  ;;  %v16610_v41 = vld [vmem:[#allocation219_spill] sm:$0xff]  ;;  %v16611_v8 = vld [vmem:[#allocation218_spill] sm:$0xff] }
 0x4ae   : > { %v3846_v6 = vadd.f32 %v3845_v35, %v1501_v60  ;;  %v4639_v36 = vmax.f32 %v3842_v38, 0.0 }
 0x4af   : > { %v4640_v46 = vmax.f32 %v3844_v55, 0.0  ;;  %7957 = vmatmul.mubr.msk.bf16.gmra.mrb[172].mxu0 %vm2613_vm1, %v7828_v59  ;;  %v7829_v55 = vcombine.low %v16611_v8, %v16610_v41  ;;  %v1516_v41 = vpop.permute.xlu0 %1515 }
 0x4b0   : > { %v4641_v18 = vmax.f32 %v3846_v6, 0.0  ;;  %4117 = vmatprep.mubr.bf16.mxu0 %v16136_v0  ;;  %v13576_v21 = vpop.f32.mrb[212].mxu1 }
 0x4b1   : > { %v4990_v45 = vpack.c.bf16 %v4640_v46, %v4638_v16  ;;  %16608 = vst [vmem:[#allocation692_spill] sm:$0xff] %v13576_v21  ;;  %v5546_v53 = vpop.f32.mrb[213].mxu1 }
 0x4b2   : > { %v3849_v10 = vpop.f32.mrb[68].mxu0  ;;  %v4991_v25 = vpack.c.bf16 %v4641_v18, %v4639_v36  ;;  %v13578_v62 = vpop.f32.mrb[214].mxu1 }
 0x4b3   : > { %v3850_v5 = vadd.f32 %v3849_v10, %v1506_v37  ;;  %16609 = vst [vmem:[#allocation691_spill] sm:$0xff] %v13578_v62  ;;  %v3851_v60 = vpop.f32.mrb[69].mxu0  ;;  %v5549_v38 = vpop.f32.mrb[215].mxu1 }
 0x4b4   : > { %v3852_v6 = vadd.f32 %v3851_v60, %v1506_v37  ;;  %v3853_v35 = vpop.f32.mrb[70].mxu0  ;;  %5758 = vmatprep.mubr.bf16.mxu1 %v4991_v25  ;;  %v1521_v36 = vpop.permute.xlu1 %1520 }
 0x4b5   : > { %v3854_v16 = vadd.f32 %v3853_v35, %v1511_v32  ;;  %v3855_v46 = vpop.f32.mrb[71].mxu0  ;;  %5759 = vmatmul.mubr.bf16.gmra.mrb[64].mxu1 %v4990_v45  ;;  %v4642_v53 = vmax.f32 %v3850_v5, 0.0  ;;  %v16614_v45 = vld [vmem:[#allocation221_spill] sm:$0xff]  ;;  %v16615_v5 = vld [vmem:[#allocation220_spill] sm:$0xff] }
 0x4b6   : > { %v3856_v51 = vadd.f32 %v3855_v46, %v1511_v32  ;;  %v4643_v10 = vmax.f32 %v3852_v6, 0.0 }
 0x4b7   : > { %v4644_v18 = vmax.f32 %v3854_v16, 0.0  ;;  %7958 = vmatmul.mubr.msk.bf16.gmra.mrb[176].mxu0 %vm2613_vm1, %v7829_v55  ;;  %v7830_v16 = vcombine.low %v16615_v5, %v16614_v45  ;;  %v1526_v45 = vpop.permute.xlu0 %1525 }
 0x4b8   : > { %v4645_v13 = vmax.f32 %v3856_v51, 0.0  ;;  %4127 = vmatprep.mubr.bf16.mxu0 %v16136_v0  ;;  %v13586_v59 = vpop.f32.mrb[216].mxu1 }
 0x4b9   : > { %v4992_v8 = vpack.c.bf16 %v4644_v18, %v4642_v53  ;;  %16612 = vst [vmem:[#allocation694_spill] sm:$0xff] %v13586_v59  ;;  %v5554_v37 = vpop.f32.mrb[217].mxu1 }
 0x4ba   : > { %v3859_v60 = vpop.f32.mrb[72].mxu0  ;;  %v4993_v25 = vpack.c.bf16 %v4645_v13, %v4643_v10  ;;  %v13588_v35 = vpop.f32.mrb[218].mxu1 }
 0x4bb   : > { %v3860_v38 = vadd.f32 %v3859_v60, %v1516_v41  ;;  %16613 = vst [vmem:[#allocation693_spill] sm:$0xff] %v13588_v35  ;;  %v3861_v32 = vpop.f32.mrb[73].mxu0  ;;  %v5557_v6 = vpop.f32.mrb[219].mxu1 }
 0x4bc   : > { %v3862_v51 = vadd.f32 %v3861_v32, %v1516_v41  ;;  %v3863_v46 = vpop.f32.mrb[74].mxu0  ;;  %5766 = vmatprep.mubr.bf16.mxu1 %v4993_v25  ;;  %v1531_v10 = vpop.permute.xlu1 %1530 }
 0x4bd   : > { %v3864_v53 = vadd.f32 %v3863_v46, %v1521_v36  ;;  %v3865_v18 = vpop.f32.mrb[75].mxu0  ;;  %5767 = vmatmul.mubr.bf16.gmra.mrb[68].mxu1 %v4992_v8  ;;  %v4646_v37 = vmax.f32 %v3860_v38, 0.0  ;;  %v16618_v8 = vld [vmem:[#allocation223_spill] sm:$0xff]  ;;  %v16619_v38 = vld [vmem:[#allocation222_spill] sm:$0xff] }
 0x4be   : > { %v3866_v21 = vadd.f32 %v3865_v18, %v1521_v36  ;;  %v4647_v60 = vmax.f32 %v3862_v51, 0.0 }
 0x4bf   : > { %v4648_v13 = vmax.f32 %v3864_v53, 0.0  ;;  %7959 = vmatmul.mubr.msk.bf16.gmra.mrb[180].mxu0 %vm2613_vm1, %v7830_v16  ;;  %v7831_v53 = vcombine.low %v16619_v38, %v16618_v8  ;;  %v1536_v8 = vpop.permute.xlu0 %1535 }
 0x4c0   : > { %v4649_v62 = vmax.f32 %v3866_v21, 0.0  ;;  %4137 = vmatprep.mubr.bf16.mxu0 %v16136_v0  ;;  %v13596_v55 = vpop.f32.mrb[220].mxu1 }
 0x4c1   : > { %v4994_v5 = vpack.c.bf16 %v4648_v13, %v4646_v37  ;;  %16616 = vst [vmem:[#allocation696_spill] sm:$0xff] %v13596_v55  ;;  %v5562_v41 = vpop.f32.mrb[221].mxu1 }
 0x4c2   : > { %v3869_v32 = vpop.f32.mrb[76].mxu0  ;;  %v4995_v25 = vpack.c.bf16 %v4649_v62, %v4647_v60  ;;  %v13598_v46 = vpop.f32.mrb[222].mxu1 }
 0x4c3   : > { %v3870_v6 = vadd.f32 %v3869_v32, %v1526_v45  ;;  %16617 = vst [vmem:[#allocation695_spill] sm:$0xff] %v13598_v46  ;;  %v3871_v36 = vpop.f32.mrb[77].mxu0  ;;  %v5565_v51 = vpop.f32.mrb[223].mxu1 }
 0x4c4   : > { %v3872_v21 = vadd.f32 %v3871_v36, %v1526_v45  ;;  %v3873_v18 = vpop.f32.mrb[78].mxu0  ;;  %5774 = vmatprep.mubr.bf16.mxu1 %v4995_v25  ;;  %v1541_v60 = vpop.permute.xlu1 %1540 }
 0x4c5   : > { %v3874_v37 = vadd.f32 %v3873_v18, %v1531_v10  ;;  %v3875_v13 = vpop.f32.mrb[79].mxu0  ;;  %5775 = vmatmul.mubr.bf16.gmra.mrb[72].mxu1 %v4994_v5  ;;  %v4650_v41 = vmax.f32 %v3870_v6, 0.0  ;;  %v16621_v5 = vld [vmem:[#allocation224_spill] sm:$0xff] }
 0x4c6   : > { %v3876_v59 = vadd.f32 %v3875_v13, %v1531_v10  ;;  %v4651_v32 = vmax.f32 %v3872_v21, 0.0  ;;  %v16620_v10 = vld [vmem:[#allocation225_spill] sm:$0xff] }
 0x4c7   : > { %v4652_v62 = vmax.f32 %v3874_v37, 0.0  ;;  %7960 = vmatmul.mubr.msk.bf16.gmra.mrb[184].mxu0 %vm2613_vm1, %v7831_v53  ;;  %v7832_v6 = vcombine.low %v16621_v5, %v16620_v10  ;;  %v16625_v10 = vld [vmem:[#allocation226_spill] sm:$0xff] }
 0x4c8   : > { %v4653_v35 = vmax.f32 %v3876_v59, 0.0  ;;  %4147 = vmatprep.mubr.bf16.mxu0 %v16136_v0  ;;  %v5568_v16 = vpop.f32.mrb[224].mxu1 }
 0x4c9   : > { %v4996_v38 = vpack.c.bf16 %v4652_v62, %v4650_v41  ;;  %v5570_v45 = vpop.f32.mrb[225].mxu1 }
 0x4ca   : > { %v3879_v36 = vpop.f32.mrb[80].mxu0  ;;  %v4997_v51 = vpack.c.bf16 %v4653_v35, %v4651_v32  ;;  %v5571_v18 = vpop.f32.mrb[226].mxu1 }
 0x4cb   : > { %v3880_v25 = vadd.f32 %v3879_v36, %v1536_v8  ;;  %v3881_v55 = vpop.f32.mrb[81].mxu0  ;;  %v6199_v37 = vpack.c.bf16 %v5571_v18, %v5568_v16  ;;  %v5573_v53 = vpop.f32.mrb[227].mxu1 }
 0x4cc   : > { %v3882_v13 = vadd.f32 %v3881_v55, %v1536_v8  ;;  %v3883_v46 = vpop.f32.mrb[82].mxu0  ;;  %5782 = vmatprep.mubr.bf16.mxu1 %v4997_v51  ;;  %v1551_v35 = vpop.permute.xlu1 %1550 }
 0x4cd   : > { %v3884_v59 = vadd.f32 %v3883_v46, %v1541_v60  ;;  %v3885_v21 = vpop.f32.mrb[83].mxu0  ;;  %5783 = vmatmul.mubr.bf16.gmra.mrb[76].mxu1 %v4996_v38  ;;  %8300 = vmatprep.subr.bf16.mxu1 %v6199_v37  ;;  %v4654_v41 = vmax.f32 %v3880_v25, 0.0  ;;  %v1546_v36 = vpop.permute.xlu0 %1545  ;;  %v16624_v25 = vld [vmem:[#allocation227_spill] sm:$0xff] }
 0x4ce   : > { %v3886_v9 = vadd.f32 %v3885_v21, %v1541_v60  ;;  %v4655_v32 = vmax.f32 %v3882_v13, 0.0  ;;  %v7833_v5 = vcombine.low %v16625_v10, %v16624_v25 }
 0x4cf   : > { %v4656_v62 = vmax.f32 %v3884_v59, 0.0  ;;  %7961 = vmatmul.mubr.msk.bf16.gmra.mrb[188].mxu0 %vm2613_vm1, %v7832_v6 }
 0x4d0   : > { %v4657_v45 = vmax.f32 %v3886_v9, 0.0  ;;  %4157 = vmatprep.mubr.bf16.mxu0 %v16136_v0  ;;  %v13610_v55 = vpop.f32.mrb[228].mxu1 }
 0x4d1   : > { %v4998_v16 = vpack.c.bf16 %v4656_v62, %v4654_v41  ;;  %16622 = vst [vmem:[#allocation698_spill] sm:$0xff] %v13610_v55  ;;  %v5578_v8 = vpop.f32.mrb[229].mxu1 }
 0x4d2   : > { %v3889_v51 = vpop.f32.mrb[84].mxu0  ;;  %v4999_v46 = vpack.c.bf16 %v4657_v45, %v4655_v32  ;;  %v13612_v60 = vpop.f32.mrb[230].mxu1 }
 0x4d3   : > { %v3890_v18 = vadd.f32 %v3889_v51, %v1546_v36  ;;  %16623 = vst [vmem:[#allocation697_spill] sm:$0xff] %v13612_v60  ;;  %v3891_v38 = vpop.f32.mrb[85].mxu0  ;;  %v5581_v37 = vpop.f32.mrb[231].mxu1 }
 0x4d4   : > { %v3892_v9 = vadd.f32 %v3891_v38, %v1546_v36  ;;  %v3893_v13 = vpop.f32.mrb[86].mxu0  ;;  %5790 = vmatprep.mubr.bf16.mxu1 %v4999_v46  ;;  %v1561_v32 = vpop.permute.xlu1 %1560 }
 0x4d5   : > { %v3894_v53 = vadd.f32 %v3893_v13, %v1551_v35  ;;  %v3895_v59 = vpop.f32.mrb[87].mxu0  ;;  %5791 = vmatmul.mubr.bf16.gmra.mrb[80].mxu1 %v4998_v16  ;;  %v4658_v41 = vmax.f32 %v3890_v18, 0.0  ;;  %v1556_v51 = vpop.permute.xlu0 %1555  ;;  %v16628_v16 = vld [vmem:[#allocation229_spill] sm:$0xff]  ;;  %v16629_v18 = vld [vmem:[#allocation228_spill] sm:$0xff] }
 0x4d6   : > { %v3896_v21 = vadd.f32 %v3895_v59, %v1551_v35  ;;  %v4659_v45 = vmax.f32 %v3892_v9, 0.0 }
 0x4d7   : > { %v4660_v62 = vmax.f32 %v3894_v53, 0.0  ;;  %7962 = vmatmul.mubr.msk.bf16.gmra.mrb[192].mxu0 %vm2613_vm1, %v7833_v5  ;;  %v7834_v53 = vcombine.low %v16629_v18, %v16628_v16 }
 0x4d8   : > { %v4661_v8 = vmax.f32 %v3896_v21, 0.0  ;;  %4167 = vmatprep.mubr.bf16.mxu0 %v16136_v0  ;;  %v13620_v10 = vpop.f32.mrb[232].mxu1 }
 0x4d9   : > { %v5000_v25 = vpack.c.bf16 %v4660_v62, %v4658_v41  ;;  %16626 = vst [vmem:[#allocation658_spill] sm:$0xff] %v13620_v10  ;;  %v5586_v36 = vpop.f32.mrb[233].mxu1  ;;  %v1566_v16 = vpop.permute.xlu0 %1565 }
 0x4da   : > { %v3899_v38 = vpop.f32.mrb[88].mxu0  ;;  %v5001_v46 = vpack.c.bf16 %v4661_v8, %v4659_v45  ;;  %v13622_v13 = vpop.f32.mrb[234].mxu1 }
 0x4db   : > { %v3900_v37 = vadd.f32 %v3899_v38, %v1556_v51  ;;  %16627 = vst [vmem:[#allocation699_spill] sm:$0xff] %v13622_v13  ;;  %v3901_v35 = vpop.f32.mrb[89].mxu0  ;;  %v5589_v59 = vpop.f32.mrb[235].mxu1 }
 0x4dc   : > { %v3902_v9 = vadd.f32 %v3901_v35, %v1556_v51  ;;  %v3903_v21 = vpop.f32.mrb[90].mxu0  ;;  %5798 = vmatprep.mubr.bf16.mxu1 %v5001_v46  ;;  %v1571_v8 = vpop.permute.xlu1 %1570 }
 0x4dd   : > { %v3904_v41 = vadd.f32 %v3903_v21, %v1561_v32  ;;  %v3905_v62 = vpop.f32.mrb[91].mxu0  ;;  %5799 = vmatmul.mubr.bf16.gmra.mrb[84].mxu1 %v5000_v25  ;;  %v4662_v36 = vmax.f32 %v3900_v37, 0.0  ;;  %v16632_v25 = vld [vmem:[#allocation231_spill] sm:$0xff]  ;;  %v16633_v37 = vld [vmem:[#allocation230_spill] sm:$0xff] }
 0x4de   : > { %v3906_v6 = vadd.f32 %v3905_v62, %v1561_v32  ;;  %v4663_v38 = vmax.f32 %v3902_v9, 0.0 }
 0x4df   : > { %v4664_v45 = vmax.f32 %v3904_v41, 0.0  ;;  %7963 = vmatmul.mubr.msk.bf16.gmra.mrb[196].mxu0 %vm2613_vm1, %v7834_v53  ;;  %v7835_v41 = vcombine.low %v16633_v37, %v16632_v25  ;;  %v1576_v25 = vpop.permute.xlu0 %1575 }
 0x4e0   : > { %v4665_v55 = vmax.f32 %v3906_v6, 0.0  ;;  %4177 = vmatprep.mubr.bf16.mxu0 %v16136_v0  ;;  %v13630_v5 = vpop.f32.mrb[236].mxu1 }
 0x4e1   : > { %v5002_v18 = vpack.c.bf16 %v4664_v45, %v4662_v36  ;;  %16630 = vst [vmem:[#allocation660_spill] sm:$0xff] %v13630_v5  ;;  %v5594_v51 = vpop.f32.mrb[237].mxu1 }
 0x4e2   : > { %v3909_v35 = vpop.f32.mrb[92].mxu0  ;;  %v5003_v46 = vpack.c.bf16 %v4665_v55, %v4663_v38  ;;  %v13632_v21 = vpop.f32.mrb[238].mxu1 }
 0x4e3   : > { %v3910_v59 = vadd.f32 %v3909_v35, %v1566_v16  ;;  %16631 = vst [vmem:[#allocation700_spill] sm:$0xff] %v13632_v21  ;;  %v3911_v32 = vpop.f32.mrb[93].mxu0  ;;  %v5597_v9 = vpop.f32.mrb[239].mxu1 }
 0x4e4   : > { %v3912_v6 = vadd.f32 %v3911_v32, %v1566_v16  ;;  %v3913_v62 = vpop.f32.mrb[94].mxu0  ;;  %5806 = vmatprep.mubr.bf16.mxu1 %v5003_v46  ;;  %v1581_v38 = vpop.permute.xlu1 %1580 }
 0x4e5   : > { %v3914_v36 = vadd.f32 %v3913_v62, %v1571_v8  ;;  %v3915_v45 = vpop.f32.mrb[95].mxu0  ;;  %5807 = vmatmul.mubr.bf16.gmra.mrb[88].mxu1 %v5002_v18  ;;  %v4666_v51 = vmax.f32 %v3910_v59, 0.0  ;;  %v16636_v18 = vld [vmem:[#allocation233_spill] sm:$0xff]  ;;  %v16637_v59 = vld [vmem:[#allocation232_spill] sm:$0xff] }
 0x4e6   : > { %v3916_v10 = vadd.f32 %v3915_v45, %v1571_v8  ;;  %v4667_v35 = vmax.f32 %v3912_v6, 0.0 }
 0x4e7   : > { %v4668_v55 = vmax.f32 %v3914_v36, 0.0  ;;  %7964 = vmatmul.mubr.msk.bf16.gmra.mrb[200].mxu0 %vm2613_vm1, %v7835_v41  ;;  %v7836_v36 = vcombine.low %v16637_v59, %v16636_v18  ;;  %v1586_v18 = vpop.permute.xlu0 %1585 }
 0x4e8   : > { %v4669_v13 = vmax.f32 %v3916_v10, 0.0  ;;  %4187 = vmatprep.mubr.bf16.mxu0 %v16136_v0  ;;  %v13640_v53 = vpop.f32.mrb[240].mxu1 }
 0x4e9   : > { %v5004_v37 = vpack.c.bf16 %v4668_v55, %v4666_v51  ;;  %16634 = vst [vmem:[#allocation701_spill] sm:$0xff] %v13640_v53  ;;  %v5602_v16 = vpop.f32.mrb[241].mxu1 }
 0x4ea   : > { %v3919_v32 = vpop.f32.mrb[96].mxu0  ;;  %v5005_v46 = vpack.c.bf16 %v4669_v13, %v4667_v35  ;;  %v13642_v62 = vpop.f32.mrb[242].mxu1 }
 0x4eb   : > { %v3920_v9 = vadd.f32 %v3919_v32, %v1576_v25  ;;  %16635 = vst [vmem:[#allocation659_spill] sm:$0xff] %v13642_v62  ;;  %v3921_v8 = vpop.f32.mrb[97].mxu0  ;;  %v5605_v6 = vpop.f32.mrb[243].mxu1 }
 0x4ec   : > { %v3922_v10 = vadd.f32 %v3921_v8, %v1576_v25  ;;  %v3923_v45 = vpop.f32.mrb[98].mxu0  ;;  %5814 = vmatprep.mubr.bf16.mxu1 %v5005_v46  ;;  %v1591_v35 = vpop.permute.xlu1 %1590 }
 0x4ed   : > { %v3924_v51 = vadd.f32 %v3923_v45, %v1581_v38  ;;  %v3925_v55 = vpop.f32.mrb[99].mxu0  ;;  %5815 = vmatmul.mubr.bf16.gmra.mrb[92].mxu1 %v5004_v37  ;;  %v4670_v16 = vmax.f32 %v3920_v9, 0.0  ;;  %v16640_v37 = vld [vmem:[#allocation235_spill] sm:$0xff]  ;;  %v16641_v9 = vld [vmem:[#allocation234_spill] sm:$0xff] }
 0x4ee   : > { %v3926_v5 = vadd.f32 %v3925_v55, %v1581_v38  ;;  %v4671_v32 = vmax.f32 %v3922_v10, 0.0 }
 0x4ef   : > { %v4672_v13 = vmax.f32 %v3924_v51, 0.0  ;;  %7965 = vmatmul.mubr.msk.bf16.gmra.mrb[204].mxu0 %vm2613_vm1, %v7836_v36  ;;  %v7837_v51 = vcombine.low %v16641_v9, %v16640_v37  ;;  %v1596_v37 = vpop.permute.xlu0 %1595 }
 0x4f0   : > { %v4673_v21 = vmax.f32 %v3926_v5, 0.0  ;;  %4197 = vmatprep.mubr.bf16.mxu0 %v16136_v0  ;;  %v13650_v41 = vpop.f32.mrb[244].mxu1 }
 0x4f1   : > { %v5006_v59 = vpack.c.bf16 %v4672_v13, %v4670_v16  ;;  %16638 = vst [vmem:[#allocation661_spill] sm:$0xff] %v13650_v41  ;;  %v5610_v25 = vpop.f32.mrb[245].mxu1 }
 0x4f2   : > { %v3929_v8 = vpop.f32.mrb[100].mxu0  ;;  %v5007_v46 = vpack.c.bf16 %v4673_v21, %v4671_v32  ;;  %v13652_v45 = vpop.f32.mrb[246].mxu1 }
 0x4f3   : > { %v3930_v6 = vadd.f32 %v3929_v8, %v1586_v18  ;;  %16639 = vst [vmem:[#allocation662_spill] sm:$0xff] %v13652_v45  ;;  %v3931_v38 = vpop.f32.mrb[101].mxu0  ;;  %v5613_v10 = vpop.f32.mrb[247].mxu1 }
 0x4f4   : > { %v3932_v5 = vadd.f32 %v3931_v38, %v1586_v18  ;;  %v3933_v55 = vpop.f32.mrb[102].mxu0  ;;  %5822 = vmatprep.mubr.bf16.mxu1 %v5007_v46  ;;  %v1601_v32 = vpop.permute.xlu1 %1600 }
 0x4f5   : > { %v3934_v16 = vadd.f32 %v3933_v55, %v1591_v35  ;;  %v3935_v13 = vpop.f32.mrb[103].mxu0  ;;  %5823 = vmatmul.mubr.bf16.gmra.mrb[96].mxu1 %v5006_v59  ;;  %v4674_v25 = vmax.f32 %v3930_v6, 0.0  ;;  %v16644_v59 = vld [vmem:[#allocation237_spill] sm:$0xff]  ;;  %v16645_v6 = vld [vmem:[#allocation236_spill] sm:$0xff] }
 0x4f6   : > { %v3936_v53 = vadd.f32 %v3935_v13, %v1591_v35  ;;  %v4675_v8 = vmax.f32 %v3932_v5, 0.0 }
 0x4f7   : > { %v4676_v21 = vmax.f32 %v3934_v16, 0.0  ;;  %7966 = vmatmul.mubr.msk.bf16.gmra.mrb[208].mxu0 %vm2613_vm1, %v7837_v51  ;;  %v7838_v16 = vcombine.low %v16645_v6, %v16644_v59  ;;  %v1606_v59 = vpop.permute.xlu0 %1605 }
 0x4f8   : > { %v4677_v62 = vmax.f32 %v3936_v53, 0.0  ;;  %4207 = vmatprep.mubr.bf16.mxu0 %v16136_v0  ;;  %v13660_v36 = vpop.f32.mrb[248].mxu1 }
 0x4f9   : > { %v5008_v9 = vpack.c.bf16 %v4676_v21, %v4674_v25  ;;  %16642 = vst [vmem:[#allocation663_spill] sm:$0xff] %v13660_v36  ;;  %v5618_v18 = vpop.f32.mrb[249].mxu1 }
 0x4fa   : > { %v3939_v38 = vpop.f32.mrb[104].mxu0  ;;  %v5009_v46 = vpack.c.bf16 %v4677_v62, %v4675_v8  ;;  %v13662_v55 = vpop.f32.mrb[250].mxu1 }
 0x4fb   : > { %v3940_v10 = vadd.f32 %v3939_v38, %v1596_v37  ;;  %16643 = vst [vmem:[#allocation702_spill] sm:$0xff] %v13662_v55  ;;  %v3941_v35 = vpop.f32.mrb[105].mxu0  ;;  %v5621_v5 = vpop.f32.mrb[251].mxu1 }
 0x4fc   : > { %v3942_v53 = vadd.f32 %v3941_v35, %v1596_v37  ;;  %v3943_v13 = vpop.f32.mrb[106].mxu0  ;;  %5830 = vmatprep.mubr.bf16.mxu1 %v5009_v46  ;;  %v1611_v8 = vpop.permute.xlu1 %1610 }
 0x4fd   : > { %v3944_v25 = vadd.f32 %v3943_v13, %v1601_v32  ;;  %v3945_v21 = vpop.f32.mrb[107].mxu0  ;;  %5831 = vmatmul.mubr.bf16.gmra.mrb[100].mxu1 %v5008_v9  ;;  %v4678_v18 = vmax.f32 %v3940_v10, 0.0  ;;  %v16648_v9 = vld [vmem:[#allocation239_spill] sm:$0xff]  ;;  %v16649_v10 = vld [vmem:[#allocation238_spill] sm:$0xff] }
 0x4fe   : > { %v3946_v41 = vadd.f32 %v3945_v21, %v1601_v32  ;;  %v4679_v38 = vmax.f32 %v3942_v53, 0.0 }
 0x4ff   : > { %v4680_v62 = vmax.f32 %v3944_v25, 0.0  ;;  %7967 = vmatmul.mubr.msk.bf16.gmra.mrb[212].mxu0 %vm2613_vm1, %v7838_v16  ;;  %v7839_v25 = vcombine.low %v16649_v10, %v16648_v9  ;;  %v1616_v9 = vpop.permute.xlu0 %1615 }
 0x500   : > { %v4681_v45 = vmax.f32 %v3946_v41, 0.0  ;;  %4217 = vmatprep.mubr.bf16.mxu0 %v16136_v0  ;;  %v13670_v51 = vpop.f32.mrb[252].mxu1 }
 0x501   : > { %v5010_v6 = vpack.c.bf16 %v4680_v62, %v4678_v18  ;;  %16646 = vst [vmem:[#allocation704_spill] sm:$0xff] %v13670_v51  ;;  %v5626_v37 = vpop.f32.mrb[253].mxu1 }
 0x502   : > { %v3949_v35 = vpop.f32.mrb[108].mxu0  ;;  %v5011_v46 = vpack.c.bf16 %v4681_v45, %v4679_v38  ;;  %v13672_v13 = vpop.f32.mrb[254].mxu1 }
 0x503   : > { %v3950_v5 = vadd.f32 %v3949_v35, %v1606_v59  ;;  %16647 = vst [vmem:[#allocation703_spill] sm:$0xff] %v13672_v13  ;;  %v3951_v32 = vpop.f32.mrb[109].mxu0  ;;  %v5629_v53 = vpop.f32.mrb[255].mxu1 }
 0x504   : > { %v3952_v41 = vadd.f32 %v3951_v32, %v1606_v59  ;;  %v3953_v21 = vpop.f32.mrb[110].mxu0  ;;  %5838 = vmatprep.mubr.bf16.mxu1 %v5011_v46  ;;  %v1621_v38 = vpop.permute.xlu1 %1620 }
 0x505   : > { %v3954_v18 = vadd.f32 %v3953_v21, %v1611_v8  ;;  %v3955_v62 = vpop.f32.mrb[111].mxu0  ;;  %5839 = vmatmul.mubr.bf16.gmra.mrb[104].mxu1 %v5010_v6  ;;  %v4682_v37 = vmax.f32 %v3950_v5, 0.0  ;;  %v16652_v6 = vld [vmem:[#allocation241_spill] sm:$0xff]  ;;  %v16653_v5 = vld [vmem:[#allocation240_spill] sm:$0xff] }
 0x506   : > { %v3956_v36 = vadd.f32 %v3955_v62, %v1611_v8  ;;  %v4683_v35 = vmax.f32 %v3952_v41, 0.0 }
 0x507   : > { %v4684_v45 = vmax.f32 %v3954_v18, 0.0  ;;  %7968 = vmatmul.mubr.msk.bf16.gmra.mrb[216].mxu0 %vm2613_vm1, %v7839_v25  ;;  %v7840_v18 = vcombine.low %v16653_v5, %v16652_v6  ;;  %v1626_v6 = vpop.permute.xlu0 %1625 }
 0x508   : > { %v4685_v55 = vmax.f32 %v3956_v36, 0.0  ;;  %4227 = vmatprep.mubr.bf16.mxu0 %v16136_v0  ;;  %v13680_v16 = vpop.f32.mrb[0].mxu1 }
 0x509   : > { %v5012_v10 = vpack.c.bf16 %v4684_v45, %v4682_v37  ;;  %16650 = vst [vmem:[#allocation705_spill] sm:$0xff] %v13680_v16  ;;  %v5634_v59 = vpop.f32.mrb[1].mxu1 }
 0x50a   : > { %v3959_v32 = vpop.f32.mrb[112].mxu0  ;;  %v5013_v46 = vpack.c.bf16 %v4685_v55, %v4683_v35  ;;  %v13682_v21 = vpop.f32.mrb[2].mxu1 }
 0x50b   : > { %v3960_v53 = vadd.f32 %v3959_v32, %v1616_v9  ;;  %16651 = vst [vmem:[#allocation664_spill] sm:$0xff] %v13682_v21  ;;  %v3961_v8 = vpop.f32.mrb[113].mxu0  ;;  %v5637_v41 = vpop.f32.mrb[3].mxu1 }
 0x50c   : > { %v3962_v36 = vadd.f32 %v3961_v8, %v1616_v9  ;;  %v3963_v62 = vpop.f32.mrb[114].mxu0  ;;  %5846 = vmatprep.mubr.bf16.mxu1 %v5013_v46  ;;  %v1631_v35 = vpop.permute.xlu1 %1630 }
 0x50d   : > { %v3964_v37 = vadd.f32 %v3963_v62, %v1621_v38  ;;  %v3965_v45 = vpop.f32.mrb[115].mxu0  ;;  %5847 = vmatmul.mubr.bf16.gmra.mrb[108].mxu1 %v5012_v10  ;;  %v4686_v59 = vmax.f32 %v3960_v53, 0.0  ;;  %v16656_v10 = vld [vmem:[#allocation243_spill] sm:$0xff]  ;;  %v16657_v53 = vld [vmem:[#allocation242_spill] sm:$0xff] }
 0x50e   : > { %v3966_v51 = vadd.f32 %v3965_v45, %v1621_v38  ;;  %v4687_v32 = vmax.f32 %v3962_v36, 0.0 }
 0x50f   : > { %v4688_v55 = vmax.f32 %v3964_v37, 0.0  ;;  %7969 = vmatmul.mubr.msk.bf16.gmra.mrb[220].mxu0 %vm2613_vm1, %v7840_v18  ;;  %v7841_v37 = vcombine.low %v16657_v53, %v16656_v10  ;;  %v1636_v10 = vpop.permute.xlu0 %1635 }
 0x510   : > { %v4689_v13 = vmax.f32 %v3966_v51, 0.0  ;;  %4237 = vmatprep.mubr.bf16.mxu0 %v16136_v0  ;;  %v13690_v25 = vpop.f32.mrb[4].mxu1 }
 0x511   : > { %v5014_v5 = vpack.c.bf16 %v4688_v55, %v4686_v59  ;;  %16654 = vst [vmem:[#allocation706_spill] sm:$0xff] %v13690_v25  ;;  %v5642_v9 = vpop.f32.mrb[5].mxu1 }
 0x512   : > { %v3969_v8 = vpop.f32.mrb[116].mxu0  ;;  %v5015_v46 = vpack.c.bf16 %v4689_v13, %v4687_v32  ;;  %v13692_v62 = vpop.f32.mrb[6].mxu1 }
 0x513   : > { %v3970_v41 = vadd.f32 %v3969_v8, %v1626_v6  ;;  %16655 = vst [vmem:[#allocation665_spill] sm:$0xff] %v13692_v62  ;;  %v3971_v38 = vpop.f32.mrb[117].mxu0  ;;  %v5645_v36 = vpop.f32.mrb[7].mxu1 }
 0x514   : > { %v3972_v51 = vadd.f32 %v3971_v38, %v1626_v6  ;;  %v3973_v45 = vpop.f32.mrb[118].mxu0  ;;  %5854 = vmatprep.mubr.bf16.mxu1 %v5015_v46  ;;  %v1641_v32 = vpop.permute.xlu1 %1640 }
 0x515   : > { %v3974_v59 = vadd.f32 %v3973_v45, %v1631_v35  ;;  %v3975_v55 = vpop.f32.mrb[119].mxu0  ;;  %5855 = vmatmul.mubr.bf16.gmra.mrb[112].mxu1 %v5014_v5  ;;  %v4690_v9 = vmax.f32 %v3970_v41, 0.0  ;;  %v16660_v5 = vld [vmem:[#allocation245_spill] sm:$0xff]  ;;  %v16661_v41 = vld [vmem:[#allocation244_spill] sm:$0xff] }
 0x516   : > { %v3976_v60 = vadd.f32 %v3975_v55, %v1631_v35  ;;  %v4691_v8 = vmax.f32 %v3972_v51, 0.0 }
 0x517   : > { %v4692_v13 = vmax.f32 %v3974_v59, 0.0  ;;  %7970 = vmatmul.mubr.msk.bf16.gmra.mrb[224].mxu0 %vm2613_vm1, %v7841_v37  ;;  %v7842_v59 = vcombine.low %v16661_v41, %v16660_v5  ;;  %v1646_v5 = vpop.permute.xlu0 %1645 }
 0x518   : > { %v4693_v16 = vmax.f32 %v3976_v60, 0.0  ;;  %4247 = vmatprep.mubr.bf16.mxu0 %v16136_v0  ;;  %v13700_v18 = vpop.f32.mrb[8].mxu1 }
 0x519   : > { %v5016_v53 = vpack.c.bf16 %v4692_v13, %v4690_v9  ;;  %16658 = vst [vmem:[#allocation666_spill] sm:$0xff] %v13700_v18  ;;  %v5650_v6 = vpop.f32.mrb[9].mxu1 }
 0x51a   : > { %v3979_v38 = vpop.f32.mrb[120].mxu0  ;;  %v5017_v46 = vpack.c.bf16 %v4693_v16, %v4691_v8  ;;  %v13702_v45 = vpop.f32.mrb[10].mxu1 }
 0x51b   : > { %v3980_v36 = vadd.f32 %v3979_v38, %v1636_v10  ;;  %16659 = vst [vmem:[#allocation707_spill] sm:$0xff] %v13702_v45  ;;  %v3981_v35 = vpop.f32.mrb[121].mxu0  ;;  %v5653_v51 = vpop.f32.mrb[11].mxu1 }
 0x51c   : > { %v3982_v60 = vadd.f32 %v3981_v35, %v1636_v10  ;;  %v3983_v55 = vpop.f32.mrb[122].mxu0  ;;  %5862 = vmatprep.mubr.bf16.mxu1 %v5017_v46  ;;  %v1651_v8 = vpop.permute.xlu1 %1650 }
 0x51d   : > { %v3984_v9 = vadd.f32 %v3983_v55, %v1641_v32  ;;  %v3985_v13 = vpop.f32.mrb[123].mxu0  ;;  %5863 = vmatmul.mubr.bf16.gmra.mrb[116].mxu1 %v5016_v53  ;;  %v4694_v6 = vmax.f32 %v3980_v36, 0.0  ;;  %v16664_v53 = vld [vmem:[#allocation247_spill] sm:$0xff]  ;;  %v16665_v36 = vld [vmem:[#allocation246_spill] sm:$0xff] }
 0x51e   : > { %v3986_v25 = vadd.f32 %v3985_v13, %v1641_v32  ;;  %v4695_v38 = vmax.f32 %v3982_v60, 0.0 }
 0x51f   : > { %v4696_v16 = vmax.f32 %v3984_v9, 0.0  ;;  %7971 = vmatmul.mubr.msk.bf16.gmra.mrb[228].mxu0 %vm2613_vm1, %v7842_v59  ;;  %v7843_v9 = vcombine.low %v16665_v36, %v16664_v53  ;;  %v1656_v53 = vpop.permute.xlu0 %1655 }
 0x520   : > { %v4697_v62 = vmax.f32 %v3986_v25, 0.0  ;;  %4257 = vmatprep.mubr.bf16.mxu0 %v16136_v0  ;;  %v13710_v37 = vpop.f32.mrb[12].mxu1 }
 0x521   : > { %v5018_v41 = vpack.c.bf16 %v4696_v16, %v4694_v6  ;;  %16662 = vst [vmem:[#allocation709_spill] sm:$0xff] %v13710_v37  ;;  %v5658_v10 = vpop.f32.mrb[13].mxu1 }
 0x522   : > { %v3989_v35 = vpop.f32.mrb[124].mxu0  ;;  %v5019_v46 = vpack.c.bf16 %v4697_v62, %v4695_v38  ;;  %v13712_v55 = vpop.f32.mrb[14].mxu1 }
 0x523   : > { %v3990_v51 = vadd.f32 %v3989_v35, %v1646_v5  ;;  %16663 = vst [vmem:[#allocation708_spill] sm:$0xff] %v13712_v55  ;;  %v3991_v32 = vpop.f32.mrb[125].mxu0  ;;  %v5661_v60 = vpop.f32.mrb[15].mxu1 }
 0x524   : > { %v3992_v25 = vadd.f32 %v3991_v32, %v1646_v5  ;;  %v3993_v13 = vpop.f32.mrb[126].mxu0  ;;  %5870 = vmatprep.mubr.bf16.mxu1 %v5019_v46  ;;  %v1661_v38 = vpop.permute.xlu1 %1660 }
 0x525   : > { %v3994_v6 = vadd.f32 %v3993_v13, %v1651_v8  ;;  %v3995_v16 = vpop.f32.mrb[127].mxu0  ;;  %5871 = vmatmul.mubr.bf16.gmra.mrb[120].mxu1 %v5018_v41  ;;  %v4698_v10 = vmax.f32 %v3990_v51, 0.0  ;;  %v16668_v41 = vld [vmem:[#allocation249_spill] sm:$0xff]  ;;  %v16669_v51 = vld [vmem:[#allocation248_spill] sm:$0xff] }
 0x526   : > { %v3996_v18 = vadd.f32 %v3995_v16, %v1651_v8  ;;  %v4699_v35 = vmax.f32 %v3992_v25, 0.0 }
 0x527   : > { %v4700_v62 = vmax.f32 %v3994_v6, 0.0  ;;  %7972 = vmatmul.mubr.msk.bf16.gmra.mrb[232].mxu0 %vm2613_vm1, %v7843_v9  ;;  %v7844_v6 = vcombine.low %v16669_v51, %v16668_v41  ;;  %v1666_v41 = vpop.permute.xlu0 %1665 }
 0x528   : > { %v4701_v45 = vmax.f32 %v3996_v18, 0.0  ;;  %4267 = vmatprep.mubr.bf16.mxu0 %v16136_v0  ;;  %v13720_v59 = vpop.f32.mrb[16].mxu1 }
 0x529   : > { %v5020_v36 = vpack.c.bf16 %v4700_v62, %v4698_v10  ;;  %16666 = vst [vmem:[#allocation710_spill] sm:$0xff] %v13720_v59  ;;  %v5666_v5 = vpop.f32.mrb[17].mxu1 }
 0x52a   : > { %v3999_v32 = vpop.f32.mrb[128].mxu0  ;;  %v5021_v46 = vpack.c.bf16 %v4701_v45, %v4699_v35  ;;  %v13722_v13 = vpop.f32.mrb[18].mxu1 }
 0x52b   : > { %v4000_v60 = vadd.f32 %v3999_v32, %v1656_v53  ;;  %16667 = vst [vmem:[#allocation667_spill] sm:$0xff] %v13722_v13  ;;  %v4001_v8 = vpop.f32.mrb[129].mxu0  ;;  %v5669_v25 = vpop.f32.mrb[19].mxu1 }
 0x52c   : > { %v4002_v18 = vadd.f32 %v4001_v8, %v1656_v53  ;;  %v4003_v16 = vpop.f32.mrb[130].mxu0  ;;  %5878 = vmatprep.mubr.bf16.mxu1 %v5021_v46  ;;  %v1671_v35 = vpop.permute.xlu1 %1670 }
 0x52d   : > { %v4004_v10 = vadd.f32 %v4003_v16, %v1661_v38  ;;  %v4005_v62 = vpop.f32.mrb[131].mxu0  ;;  %5879 = vmatmul.mubr.bf16.gmra.mrb[124].mxu1 %v5020_v36  ;;  %v4702_v5 = vmax.f32 %v4000_v60, 0.0  ;;  %v16672_v36 = vld [vmem:[#allocation251_spill] sm:$0xff]  ;;  %v16673_v60 = vld [vmem:[#allocation250_spill] sm:$0xff] }
 0x52e   : > { %v4006_v37 = vadd.f32 %v4005_v62, %v1661_v38  ;;  %v4703_v32 = vmax.f32 %v4002_v18, 0.0 }
 0x52f   : > { %v4704_v45 = vmax.f32 %v4004_v10, 0.0  ;;  %7973 = vmatmul.mubr.msk.bf16.gmra.mrb[236].mxu0 %vm2613_vm1, %v7844_v6  ;;  %v7845_v10 = vcombine.low %v16673_v60, %v16672_v36  ;;  %v1676_v36 = vpop.permute.xlu0 %1675 }
 0x530   : > { %v4705_v55 = vmax.f32 %v4006_v37, 0.0  ;;  %4277 = vmatprep.mubr.bf16.mxu0 %v16136_v0  ;;  %v13730_v9 = vpop.f32.mrb[20].mxu1 }
 0x531   : > { %v5022_v51 = vpack.c.bf16 %v4704_v45, %v4702_v5  ;;  %16670 = vst [vmem:[#allocation711_spill] sm:$0xff] %v13730_v9  ;;  %v5674_v53 = vpop.f32.mrb[21].mxu1 }
 0x532   : > { %v4009_v8 = vpop.f32.mrb[132].mxu0  ;;  %v5023_v46 = vpack.c.bf16 %v4705_v55, %v4703_v32  ;;  %v13732_v16 = vpop.f32.mrb[22].mxu1 }
 0x533   : > { %v4010_v25 = vadd.f32 %v4009_v8, %v1666_v41  ;;  %16671 = vst [vmem:[#allocation668_spill] sm:$0xff] %v13732_v16  ;;  %v4011_v38 = vpop.f32.mrb[133].mxu0  ;;  %v5677_v18 = vpop.f32.mrb[23].mxu1 }
 0x534   : > { %v4012_v37 = vadd.f32 %v4011_v38, %v1666_v41  ;;  %v4013_v62 = vpop.f32.mrb[134].mxu0  ;;  %5886 = vmatprep.mubr.bf16.mxu1 %v5023_v46  ;;  %v1681_v32 = vpop.permute.xlu1 %1680 }
 0x535   : > { %v4014_v5 = vadd.f32 %v4013_v62, %v1671_v35  ;;  %v4015_v45 = vpop.f32.mrb[135].mxu0  ;;  %5887 = vmatmul.mubr.bf16.gmra.mrb[128].mxu1 %v5022_v51  ;;  %v4706_v53 = vmax.f32 %v4010_v25, 0.0  ;;  %v16676_v51 = vld [vmem:[#allocation253_spill] sm:$0xff]  ;;  %v16677_v25 = vld [vmem:[#allocation252_spill] sm:$0xff] }
 0x536   : > { %v4016_v59 = vadd.f32 %v4015_v45, %v1671_v35  ;;  %v4707_v8 = vmax.f32 %v4012_v37, 0.0 }
 0x537   : > { %v4708_v55 = vmax.f32 %v4014_v5, 0.0  ;;  %7974 = vmatmul.mubr.msk.bf16.gmra.mrb[240].mxu0 %vm2613_vm1, %v7845_v10  ;;  %v7846_v5 = vcombine.low %v16677_v25, %v16676_v51  ;;  %v1686_v51 = vpop.permute.xlu0 %1685 }
 0x538   : > { %v4709_v13 = vmax.f32 %v4016_v59, 0.0  ;;  %4287 = vmatprep.mubr.bf16.mxu0 %v16136_v0  ;;  %v13740_v6 = vpop.f32.mrb[24].mxu1 }
 0x539   : > { %v5024_v60 = vpack.c.bf16 %v4708_v55, %v4706_v53  ;;  %16674 = vst [vmem:[#allocation669_spill] sm:$0xff] %v13740_v6  ;;  %v5682_v41 = vpop.f32.mrb[25].mxu1 }
 0x53a   : > { %v4019_v38 = vpop.f32.mrb[136].mxu0  ;;  %v5025_v46 = vpack.c.bf16 %v4709_v13, %v4707_v8  ;;  %v13742_v62 = vpop.f32.mrb[26].mxu1 }
 0x53b   : > { %v4020_v18 = vadd.f32 %v4019_v38, %v1676_v36  ;;  %16675 = vst [vmem:[#allocation712_spill] sm:$0xff] %v13742_v62  ;;  %v4021_v35 = vpop.f32.mrb[137].mxu0  ;;  %v5685_v37 = vpop.f32.mrb[27].mxu1 }
 0x53c   : > { %v4022_v59 = vadd.f32 %v4021_v35, %v1676_v36  ;;  %v4023_v45 = vpop.f32.mrb[138].mxu0  ;;  %5894 = vmatprep.mubr.bf16.mxu1 %v5025_v46  ;;  %v1691_v8 = vpop.permute.xlu1 %1690 }
 0x53d   : > { %v4024_v53 = vadd.f32 %v4023_v45, %v1681_v32  ;;  %v4025_v55 = vpop.f32.mrb[139].mxu0  ;;  %5895 = vmatmul.mubr.bf16.gmra.mrb[132].mxu1 %v5024_v60  ;;  %v4710_v41 = vmax.f32 %v4020_v18, 0.0  ;;  %v16680_v60 = vld [vmem:[#allocation255_spill] sm:$0xff]  ;;  %v16681_v18 = vld [vmem:[#allocation254_spill] sm:$0xff] }
 0x53e   : > { %v4026_v9 = vadd.f32 %v4025_v55, %v1681_v32  ;;  %v4711_v38 = vmax.f32 %v4022_v59, 0.0 }
 0x53f   : > { %v4712_v13 = vmax.f32 %v4024_v53, 0.0  ;;  %7975 = vmatmul.mubr.msk.bf16.gmra.mrb[244].mxu0 %vm2613_vm1, %v7846_v5  ;;  %v7847_v53 = vcombine.low %v16681_v18, %v16680_v60  ;;  %v1696_v60 = vpop.permute.xlu0 %1695 }
 0x540   : > { %v4713_v16 = vmax.f32 %v4026_v9, 0.0  ;;  %4297 = vmatprep.mubr.bf16.mxu0 %v16136_v0  ;;  %v13750_v10 = vpop.f32.mrb[28].mxu1 }
 0x541   : > { %v5026_v25 = vpack.c.bf16 %v4712_v13, %v4710_v41  ;;  %16678 = vst [vmem:[#allocation714_spill] sm:$0xff] %v13750_v10  ;;  %v5690_v36 = vpop.f32.mrb[29].mxu1 }
 0x542   : > { %v4029_v35 = vpop.f32.mrb[140].mxu0  ;;  %v5027_v46 = vpack.c.bf16 %v4713_v16, %v4711_v38  ;;  %v13752_v45 = vpop.f32.mrb[30].mxu1 }
 0x543   : > { %v4030_v37 = vadd.f32 %v4029_v35, %v1686_v51  ;;  %16679 = vst [vmem:[#allocation713_spill] sm:$0xff] %v13752_v45  ;;  %v4031_v32 = vpop.f32.mrb[141].mxu0  ;;  %v5693_v59 = vpop.f32.mrb[31].mxu1 }
 0x544   : > { %v4032_v9 = vadd.f32 %v4031_v32, %v1686_v51  ;;  %v4033_v55 = vpop.f32.mrb[142].mxu0  ;;  %5902 = vmatprep.mubr.bf16.mxu1 %v5027_v46  ;;  %v1701_v38 = vpop.permute.xlu1 %1700 }
 0x545   : > { %v4034_v41 = vadd.f32 %v4033_v55, %v1691_v8  ;;  %v4035_v13 = vpop.f32.mrb[143].mxu0  ;;  %5903 = vmatmul.mubr.bf16.gmra.mrb[136].mxu1 %v5026_v25  ;;  %v4714_v36 = vmax.f32 %v4030_v37, 0.0  ;;  %v16684_v25 = vld [vmem:[#allocation257_spill] sm:$0xff]  ;;  %v16685_v37 = vld [vmem:[#allocation256_spill] sm:$0xff] }
 0x546   : > { %v4036_v6 = vadd.f32 %v4035_v13, %v1691_v8  ;;  %v4715_v35 = vmax.f32 %v4032_v9, 0.0  ;;  %v16686_v13 = vld [vmem:[#allocation522_spill] sm:$0xff] }
 0x547   : > { %v4716_v16 = vmax.f32 %v4034_v41, 0.0  ;;  %7976 = vmatmul.mubr.msk.bf16.gmra.mrb[248].mxu0 %vm2613_vm1, %v7847_v53  ;;  %v7848_v41 = vcombine.low %v16685_v37, %v16684_v25  ;;  %v1706_v53 = vpop.permute.xlu0 %1705 }
 0x548   : > { %v4717_v62 = vmax.f32 %v4036_v6, 0.0  ;;  %4307 = vmatprep.mubr.bf16.mxu0 %v16136_v0  ;;  %v13760_v5 = vpop.f32.mrb[32].mxu1  ;;  %v1711_v45 = vpop.permute.xlu1 %1710 }
 0x549   : > { %v5028_v18 = vpack.c.bf16 %v4716_v16, %v4714_v36  ;;  %16682 = vst [vmem:[#allocation715_spill] sm:$0xff] %v13760_v5  ;;  %v5698_v51 = vpop.f32.mrb[33].mxu1  ;;  %v16687_v36 = vld [vmem:[#allocation514_spill] sm:$0xff] }
 0x54a   : > { %v4039_v32 = vpop.f32.mrb[144].mxu0  ;;  %v5029_v46 = vpack.c.bf16 %v4717_v62, %v4715_v35  ;;  %v13762_v55 = vpop.f32.mrb[34].mxu1  ;;  %v7979_v16 = vcombine.high %v16687_v36, %v16686_v13 }
 0x54b   : > { %v4040_v59 = vadd.f32 %v4039_v32, %v1696_v60  ;;  %16683 = vst [vmem:[#allocation670_spill] sm:$0xff] %v13762_v55  ;;  %v4041_v8 = vpop.f32.mrb[145].mxu0  ;;  %v5701_v9 = vpop.f32.mrb[35].mxu1 }
 0x54c   : > { %v4042_v6 = vadd.f32 %v4041_v8, %v1696_v60  ;;  %v4043_v0 = vpop.f32.mrb[146].mxu0  ;;  %5910 = vmatprep.mubr.bf16.mxu1 %v5029_v46 }
 0x54d   : > { %v4044_v51 = vadd.f32 %v4043_v0, %v1701_v38  ;;  %v4045_v10 = vpop.f32.mrb[147].mxu0  ;;  %5911 = vmatmul.mubr.bf16.gmra.mrb[140].mxu1 %v5028_v18  ;;  %v4718_v35 = vmax.f32 %v4040_v59, 0.0 }
 0x54e   : > { %v4046_v62 = vadd.f32 %v4045_v10, %v1701_v38  ;;  %v4719_v25 = vmax.f32 %v4042_v6, 0.0  ;;  %v7978_v38 = vcombine.low %v16687_v36, %v16686_v13 }
 0x54f   : > { %v4720_v32 = vmax.f32 %v4044_v51, 0.0  ;;  %7977 = vmatmul.mubr.msk.bf16.gmra.mrb[252].mxu0 %vm2613_vm1, %v7848_v41  ;;  %v16689_v51 = vld [vmem:[#allocation530_spill] sm:$0xff] }
 0x550   : > { %v4721_v37 = vmax.f32 %v4046_v62, 0.0  ;;  %6943 = vmatprep.mubr.bf16.mxu0 %v7979_v16  ;;  %v13771_v8 = vpop.f32.mrb[36].mxu1  ;;  %v16688_v16 = vld [vmem:[#allocation538_spill] sm:$0xff] }
 0x551   : > { %v5030_v60 = vpack.c.bf16 %v4720_v32, %v4718_v35  ;;  %v5706_v9 = vpop.f32.mrb[37].mxu1  ;;  %v7995_v62 = vcombine.high %v16689_v51, %v16688_v16 }
 0x552   : > { %v5031_v46 = vpack.c.bf16 %v4721_v37, %v4719_v25  ;;  %v4049_v21 = vpop.f32.mrb[148].mxu0  ;;  %v13773_v0 = vpop.f32.mrb[38].mxu1 }
 0x553   : > { %v4050_v5 = vadd.f32 %v4049_v21, %v1706_v53  ;;  %v4051_v10 = vpop.f32.mrb[149].mxu0  ;;  %v5709_v41 = vpop.f32.mrb[39].mxu1 }
 0x554   : > { %v4052_v59 = vadd.f32 %v4051_v10, %v1706_v53  ;;  %v4053_v6 = vpop.f32.mrb[150].mxu0  ;;  %5918 = vmatprep.mubr.bf16.mxu1 %v5031_v46  ;;  %v1721_v9 = vpop.permute.xlu1 %1720 }
 0x555   : > { %v4054_v35 = vadd.f32 %v4053_v6, %v1711_v45  ;;  %v4055_v32 = vpop.f32.mrb[151].mxu0  ;;  %5919 = vmatmul.mubr.bf16.gmra.mrb[144].mxu1 %v5030_v60  ;;  %v4722_v21 = vmax.f32 %v4050_v5, 0.0  ;;  %v1716_v53 = vpop.permute.xlu0 %1715 }
 0x556   : > { %v4056_v25 = vadd.f32 %v4055_v32, %v1711_v45  ;;  %v4723_v55 = vmax.f32 %v4052_v59, 0.0 }
 0x557   : > { %v4724_v37 = vmax.f32 %v4054_v35, 0.0  ;;  %6944 = vmatmul.mubr.bf16.vlgmr.msra.gmra.mrb[0].mxu0 %v7978_v38  ;;  %v7994_v38 = vcombine.low %v16689_v51, %v16688_v16 }
 0x558   : > { %v4725_v13 = vmax.f32 %v4056_v25, 0.0  ;;  %8173 = vmatpush3.bf16.msra.mxu0 %v13117_v33  ;;  %6951 = vmatprep.mubr.bf16.mxu0 %v7995_v62  ;;  %v13782_v41 = vpop.f32.mrb[40].mxu1 }
 0x559   : > { %v5032_v10 = vpack.c.bf16 %v4724_v37, %v4722_v21  ;;  %8174 = vmatprep.subr.bf16.mxu0 %v13207_v2  ;;  %v5714_v6 = vpop.f32.mrb[41].mxu1  ;;  %v16690_v2 = vld [vmem:[#allocation554_spill] sm:$0xff] }
 0x55a   : > { %v5033_v46 = vpack.c.bf16 %v4725_v13, %v4723_v55  ;;  %v4059_v18 = vpop.f32.mrb[152].mxu0  ;;  %v13785_v60 = vpop.f32.mrb[42].mxu1  ;;  %v16691_v55 = vld [vmem:[#allocation546_spill] sm:$0xff] }
 0x55b   : > { %v4060_v45 = vadd.f32 %v4059_v18, %v1716_v53  ;;  %v4061_v5 = vpop.f32.mrb[153].mxu0  ;;  %v5717_v62 = vpop.f32.mrb[43].mxu1  ;;  %v8011_v13 = vcombine.high %v16691_v55, %v16690_v2 }
 0x55c   : > { %v4062_v59 = vadd.f32 %v4061_v5, %v1716_v53  ;;  %8175 = vmatpush3.bf16.msra.mxu0 %v13127_v34  ;;  %v4063_v35 = vpop.f32.mrb[154].mxu0  ;;  %5926 = vmatprep.mubr.bf16.mxu1 %v5033_v46  ;;  %v1731_v6 = vpop.permute.xlu1 %1730 }
 0x55d   : > { %v4064_v32 = vadd.f32 %v4063_v35, %v1721_v9  ;;  %8176 = vmatprep.subr.bf16.mxu0 %v13219_v24  ;;  %v4065_v18 = vpop.f32.mrb[155].mxu0  ;;  %5927 = vmatmul.mubr.bf16.gmra.mrb[148].mxu1 %v5032_v10  ;;  %v4726_v21 = vmax.f32 %v4060_v45, 0.0  ;;  %v1726_v34 = vpop.permute.xlu0 %1725 }
 0x55e   : > { %v4066_v25 = vadd.f32 %v4065_v18, %v1721_v9  ;;  %v4727_v33 = vmax.f32 %v4062_v59, 0.0 }
 0x55f   : > { %v4728_v37 = vmax.f32 %v4064_v32, 0.0  ;;  %6952 = vmatmul.mubr.bf16.gmra.mrb[4].mxu0 %v7994_v38  ;;  %v8010_v38 = vcombine.low %v16691_v55, %v16690_v2 }
 0x560   : > { %v4729_v53 = vmax.f32 %v4066_v25, 0.0  ;;  %8177 = vmatpush3.bf16.msra.mxu0 %v13137_v54  ;;  %6959 = vmatprep.mubr.bf16.mxu0 %v8011_v13  ;;  %v13796_v5 = vpop.f32.mrb[44].mxu1 }
 0x561   : > { %v5034_v46 = vpack.c.bf16 %v4728_v37, %v4726_v21  ;;  %8178 = vmatprep.subr.bf16.mxu0 %v13231_v17  ;;  %v5722_v24 = vpop.f32.mrb[45].mxu1  ;;  %v16692_v17 = vld [vmem:[#allocation570_spill] sm:$0xff] }
 0x562   : > { %v5035_v62 = vpack.c.bf16 %v4729_v53, %v4727_v33  ;;  %v4069_v35 = vpop.f32.mrb[156].mxu0  ;;  %v13799_v10 = vpop.f32.mrb[46].mxu1  ;;  %v16693_v33 = vld [vmem:[#allocation562_spill] sm:$0xff] }
 0x563   : > { %v4070_v9 = vadd.f32 %v4069_v35, %v1726_v34  ;;  %v4071_v45 = vpop.f32.mrb[157].mxu0  ;;  %v5725_v13 = vpop.f32.mrb[47].mxu1  ;;  %v8027_v18 = vcombine.high %v16693_v33, %v16692_v17 }
 0x564   : > { %v4072_v59 = vadd.f32 %v4071_v45, %v1726_v34  ;;  %8179 = vmatpush3.bf16.msra.mxu0 %v13147_v47  ;;  %v4073_v32 = vpop.f32.mrb[158].mxu0  ;;  %5934 = vmatprep.mubr.bf16.mxu1 %v5035_v62  ;;  %v1741_v35 = vpop.permute.xlu1 %1740 }
 0x565   : > { %v4074_v25 = vadd.f32 %v4073_v32, %v1731_v6  ;;  %8180 = vmatprep.subr.bf16.mxu0 %v13245_v52  ;;  %v4075_v21 = vpop.f32.mrb[159].mxu0  ;;  %5935 = vmatmul.mubr.bf16.gmra.mrb[152].mxu1 %v5034_v46  ;;  %v4730_v53 = vmax.f32 %v4070_v9, 0.0  ;;  %v1736_v47 = vpop.permute.xlu0 %1735 }
 0x566   : > { %v4076_v37 = vadd.f32 %v4075_v21, %v1731_v6  ;;  %v4731_v54 = vmax.f32 %v4072_v59, 0.0 }
 0x567   : > { %v4732_v24 = vmax.f32 %v4074_v25, 0.0  ;;  %6960 = vmatmul.mubr.bf16.gmra.mrb[8].mxu0 %v8010_v38  ;;  %v8026_v38 = vcombine.low %v16693_v33, %v16692_v17 }
 0x568   : > { %v4733_v34 = vmax.f32 %v4076_v37, 0.0  ;;  %8181 = vmatpush3.bf16.msra.mxu0 %v13157_v19  ;;  %6967 = vmatprep.mubr.bf16.mxu0 %v8027_v18  ;;  %v13810_v45 = vpop.f32.mrb[48].mxu1 }
 0x569   : > { %v5036_v62 = vpack.c.bf16 %v4732_v24, %v4730_v53  ;;  %8182 = vmatprep.subr.bf16.mxu0 %v13257_v58  ;;  %v5730_v52 = vpop.f32.mrb[49].mxu1  ;;  %v16694_v58 = vld [vmem:[#allocation586_spill] sm:$0xff] }
 0x56a   : > { %v5037_v13 = vpack.c.bf16 %v4733_v34, %v4731_v54  ;;  %v4079_v32 = vpop.f32.mrb[160].mxu0  ;;  %v13813_v46 = vpop.f32.mrb[50].mxu1  ;;  %v16695_v54 = vld [vmem:[#allocation578_spill] sm:$0xff] }
 0x56b   : > { %v4080_v6 = vadd.f32 %v4079_v32, %v1736_v47  ;;  %v4081_v9 = vpop.f32.mrb[161].mxu0  ;;  %v5733_v18 = vpop.f32.mrb[51].mxu1  ;;  %v8043_v21 = vcombine.high %v16695_v54, %v16694_v58 }
 0x56c   : > { %v4082_v59 = vadd.f32 %v4081_v9, %v1736_v47  ;;  %8183 = vmatpush3.bf16.msra.mxu0 %v13167_v50  ;;  %v4083_v25 = vpop.f32.mrb[162].mxu0  ;;  %5942 = vmatprep.mubr.bf16.mxu1 %v5037_v13  ;;  %v1751_v32 = vpop.permute.xlu1 %1750 }
 0x56d   : > { %v4084_v37 = vadd.f32 %v4083_v25, %v1741_v35  ;;  %8184 = vmatprep.subr.bf16.mxu0 %v13269_v30  ;;  %v4085_v53 = vpop.f32.mrb[163].mxu0  ;;  %5943 = vmatmul.mubr.bf16.gmra.mrb[156].mxu1 %v5036_v62  ;;  %v4734_v34 = vmax.f32 %v4080_v6, 0.0  ;;  %v1746_v50 = vpop.permute.xlu0 %1745 }
 0x56e   : > { %v4086_v24 = vadd.f32 %v4085_v53, %v1741_v35  ;;  %v4735_v19 = vmax.f32 %v4082_v59, 0.0 }
 0x56f   : > { %v4736_v52 = vmax.f32 %v4084_v37, 0.0  ;;  %6968 = vmatmul.mubr.bf16.gmra.mrb[12].mxu0 %v8026_v38  ;;  %v8042_v38 = vcombine.low %v16695_v54, %v16694_v58 }
 0x570   : > { %v4737_v47 = vmax.f32 %v4086_v24, 0.0  ;;  %8185 = vmatpush3.bf16.msra.mxu0 %v13177_v40  ;;  %6975 = vmatprep.mubr.bf16.mxu0 %v8043_v21  ;;  %v13824_v9 = vpop.f32.mrb[52].mxu1 }
 0x571   : > { %v5038_v13 = vpack.c.bf16 %v4736_v52, %v4734_v34  ;;  %8186 = vmatprep.subr.bf16.mxu0 %v13281_v43  ;;  %v5738_v30 = vpop.f32.mrb[53].mxu1  ;;  %v16696_v43 = vld [vmem:[#allocation602_spill] sm:$0xff]  ;;  %v16698_v34 = vpack.c.bf16 %v13405_v27, %v13402_v57 }
 0x572   : > { %v5039_v18 = vpack.c.bf16 %v4737_v47, %v4735_v19  ;;  %v4089_v25 = vpop.f32.mrb[164].mxu0  ;;  %v13827_v62 = vpop.f32.mrb[54].mxu1  ;;  %v16697_v19 = vld [vmem:[#allocation594_spill] sm:$0xff] }
 0x573   : > { %v4090_v35 = vadd.f32 %v4089_v25, %v1746_v50  ;;  %v4091_v6 = vpop.f32.mrb[165].mxu0  ;;  %v5741_v21 = vpop.f32.mrb[55].mxu1  ;;  %v8059_v53 = vcombine.high %v16697_v19, %v16696_v43 }
 0x574   : > { %v4092_v59 = vadd.f32 %v4091_v6, %v1746_v50  ;;  %8187 = vmatpush3.bf16.msra.mxu0 %v13187_v48  ;;  %v4093_v37 = vpop.f32.mrb[166].mxu0  ;;  %5950 = vmatprep.mubr.bf16.mxu1 %v5039_v18  ;;  %v1761_v50 = vpop.permute.xlu1 %1760 }
 0x575   : > { %v4094_v24 = vadd.f32 %v4093_v37, %v1751_v32  ;;  %8236 = vmatprep.subr.bf16.mxu0 %v16698_v34  ;;  %v4095_v52 = vpop.f32.mrb[167].mxu0  ;;  %5951 = vmatmul.mubr.bf16.gmra.mrb[160].mxu1 %v5038_v13  ;;  %v4738_v30 = vmax.f32 %v4090_v35, 0.0  ;;  %v1756_v48 = vpop.permute.xlu0 %1755 }
 0x576   : > { %v4096_v47 = vadd.f32 %v4095_v52, %v1751_v32  ;;  %v4739_v6 = vmax.f32 %v4092_v59, 0.0  ;;  %v8058_v32 = vcombine.low %v16697_v19, %v16696_v43 }
 0x577   : > { %v4740_v25 = vmax.f32 %v4094_v24, 0.0  ;;  %6976 = vmatmul.mubr.bf16.gmra.mrb[16].mxu0 %v8042_v38  ;;  %v16700_v24 = vld [vmem:[#allocation610_spill] sm:$0xff] }
 0x578   : > { %v4741_v21 = vmax.f32 %v4096_v47, 0.0  ;;  %6983 = vmatprep.mubr.bf16.mxu0 %v8059_v53  ;;  %v13839_v40 = vpop.f32.mrb[56].mxu1  ;;  %v16699_v53 = vld [vmem:[#allocation618_spill] sm:$0xff] }
 0x579   : > { %v5040_v18 = vpack.c.bf16 %v4740_v25, %v4738_v30  ;;  %v5746_v37 = vpop.f32.mrb[57].mxu1  ;;  %v8075_v34 = vcombine.high %v16700_v24, %v16699_v53  ;;  %v1766_v19 = vpop.permute.xlu0 %1765 }
 0x57a   : > { %v5041_v2 = vpack.c.bf16 %v4741_v21, %v4739_v6  ;;  %v4099_v16 = vpop.f32.mrb[168].mxu0  ;;  %v13841_v57 = vpop.f32.mrb[58].mxu1 }
 0x57b   : > { %v4100_v17 = vadd.f32 %v4099_v16, %v1756_v48  ;;  %v4101_v27 = vpop.f32.mrb[169].mxu0  ;;  %v5749_v38 = vpop.f32.mrb[59].mxu1 }
 0x57c   : > { %v4102_v35 = vadd.f32 %v4101_v27, %v1756_v48  ;;  %v4103_v59 = vpop.f32.mrb[170].mxu0  ;;  %5958 = vmatprep.mubr.bf16.mxu1 %v5041_v2  ;;  %v1771_v6 = vpop.permute.xlu1 %1770 }
 0x57d   : > { %v4104_v52 = vadd.f32 %v4103_v59, %v1761_v50  ;;  %v4105_v47 = vpop.f32.mrb[171].mxu0  ;;  %5959 = vmatmul.mubr.bf16.gmra.mrb[164].mxu1 %v5040_v18  ;;  %v4742_v16 = vmax.f32 %v4100_v17, 0.0  ;;  %v8074_v17 = vcombine.low %v16700_v24, %v16699_v53  ;;  %v1776_v43 = vpop.permute.xlu0 %1775 }
 0x57e   : > { %v4106_v30 = vadd.f32 %v4105_v47, %v1761_v50  ;;  %v4743_v21 = vmax.f32 %v4102_v35, 0.0 }
 0x57f   : > { %v4744_v25 = vmax.f32 %v4104_v52, 0.0  ;;  %6984 = vmatmul.mubr.bf16.gmra.mrb[20].mxu0 %v8058_v32  ;;  %v16702_v52 = vld [vmem:[#allocation626_spill] sm:$0xff] }
 0x580   : > { %v4745_v37 = vmax.f32 %v4106_v30, 0.0  ;;  %6991 = vmatprep.mubr.bf16.mxu0 %v8075_v34  ;;  %v13849_v48 = vpop.f32.mrb[60].mxu1  ;;  %v16701_v34 = vld [vmem:[#allocation634_spill] sm:$0xff] }
 0x581   : > { %v5042_v13 = vpack.c.bf16 %v4744_v25, %v4742_v16  ;;  %v5754_v2 = vpop.f32.mrb[61].mxu1  ;;  %v8091_v47 = vcombine.high %v16702_v52, %v16701_v34 }
 0x582   : > { %v5043_v27 = vpack.c.bf16 %v4745_v37, %v4743_v21  ;;  %v4109_v38 = vpop.f32.mrb[172].mxu0  ;;  %v13851_v36 = vpop.f32.mrb[62].mxu1 }
 0x583   : > { %v4110_v33 = vadd.f32 %v4109_v38, %v1766_v19  ;;  %v4111_v59 = vpop.f32.mrb[173].mxu0  ;;  %v5757_v32 = vpop.f32.mrb[63].mxu1 }
 0x584   : > { %v4112_v18 = vadd.f32 %v4111_v59, %v1766_v19  ;;  %v4113_v35 = vpop.f32.mrb[174].mxu0  ;;  %5966 = vmatprep.mubr.bf16.mxu1 %v5043_v27  ;;  %v1781_v2 = vpop.permute.xlu1 %1780 }
 0x585   : > { %v4114_v30 = vadd.f32 %v4113_v35, %v1771_v6  ;;  %v4115_v16 = vpop.f32.mrb[175].mxu0  ;;  %5967 = vmatmul.mubr.bf16.gmra.mrb[168].mxu1 %v5042_v13  ;;  %v4746_v21 = vmax.f32 %v4110_v33, 0.0  ;;  %v8090_v33 = vcombine.low %v16702_v52, %v16701_v34  ;;  %v1786_v52 = vpop.permute.xlu0 %1785 }
 0x586   : > { %v4116_v25 = vadd.f32 %v4115_v16, %v1771_v6  ;;  %v4747_v38 = vmax.f32 %v4112_v18, 0.0 }
 0x587   : > { %v4748_v37 = vmax.f32 %v4114_v30, 0.0  ;;  %6992 = vmatmul.mubr.bf16.gmra.mrb[24].mxu0 %v8074_v17  ;;  %v16704_v30 = vld [vmem:[#allocation515_spill] sm:$0xff] }
 0x588   : > { %v4749_v24 = vmax.f32 %v4116_v25, 0.0  ;;  %6999 = vmatprep.mubr.bf16.mxu0 %v8091_v47  ;;  %v13859_v19 = vpop.f32.mrb[64].mxu1  ;;  %v16703_v47 = vld [vmem:[#allocation523_spill] sm:$0xff] }
 0x589   : > { %v5044_v50 = vpack.c.bf16 %v4748_v37, %v4746_v21  ;;  %v5762_v27 = vpop.f32.mrb[65].mxu1  ;;  %v7981_v16 = vcombine.high %v16704_v30, %v16703_v47 }
 0x58a   : > { %v5045_v59 = vpack.c.bf16 %v4749_v24, %v4747_v38  ;;  %v4119_v32 = vpop.f32.mrb[176].mxu0  ;;  %v13861_v53 = vpop.f32.mrb[66].mxu1 }
 0x58b   : > { %v4120_v51 = vadd.f32 %v4119_v32, %v1776_v43  ;;  %v4121_v35 = vpop.f32.mrb[177].mxu0  ;;  %v5765_v17 = vpop.f32.mrb[67].mxu1 }
 0x58c   : > { %v4122_v6 = vadd.f32 %v4121_v35, %v1776_v43  ;;  %v4123_v18 = vpop.f32.mrb[178].mxu0  ;;  %5974 = vmatprep.mubr.bf16.mxu1 %v5045_v59  ;;  %v1791_v27 = vpop.permute.xlu1 %1790 }
 0x58d   : > { %v4124_v24 = vadd.f32 %v4123_v18, %v1781_v2  ;;  %v4125_v25 = vpop.f32.mrb[179].mxu0  ;;  %5975 = vmatmul.mubr.bf16.gmra.mrb[172].mxu1 %v5044_v50  ;;  %v4750_v37 = vmax.f32 %v4120_v51, 0.0  ;;  %v7980_v51 = vcombine.low %v16704_v30, %v16703_v47  ;;  %v16707_v50 = vpack.c.bf16 %v13293_v39, %v13290_v15 }
 0x58e   : > { %v4126_v21 = vadd.f32 %v4125_v25, %v1781_v2  ;;  %v4751_v32 = vmax.f32 %v4122_v6, 0.0 }
 0x58f   : > { %v4752_v38 = vmax.f32 %v4124_v24, 0.0  ;;  %7000 = vmatmul.mubr.bf16.gmra.mrb[28].mxu0 %v8090_v33  ;;  %v16706_v24 = vld [vmem:[#allocation531_spill] sm:$0xff] }
 0x590   : > { %v4753_v34 = vmax.f32 %v4126_v21, 0.0  ;;  %7040 = vmatprep.mubr.bf16.mxu0 %v7981_v16  ;;  %v13869_v43 = vpop.f32.mrb[68].mxu1  ;;  %v16705_v16 = vld [vmem:[#allocation539_spill] sm:$0xff] }
 0x591   : > { %v5046_v13 = vpack.c.bf16 %v4752_v38, %v4750_v37  ;;  %v5770_v59 = vpop.f32.mrb[69].mxu1  ;;  %v7997_v25 = vcombine.high %v16706_v24, %v16705_v16  ;;  %v7996_v15 = vcombine.low %v16706_v24, %v16705_v16 }
 0x592   : > { %v5047_v35 = vpack.c.bf16 %v4753_v34, %v4751_v32  ;;  %v4129_v17 = vpop.f32.mrb[180].mxu0  ;;  %v13871_v55 = vpop.f32.mrb[70].mxu1 }
 0x593   : > { %v4130_v54 = vadd.f32 %v4129_v17, %v1786_v52  ;;  %v4131_v18 = vpop.f32.mrb[181].mxu0  ;;  %v5773_v33 = vpop.f32.mrb[71].mxu1 }
 0x594   : > { %v4132_v2 = vadd.f32 %v4131_v18, %v1786_v52  ;;  %v4133_v6 = vpop.f32.mrb[182].mxu0  ;;  %5982 = vmatprep.mubr.bf16.mxu1 %v5047_v35  ;;  %v1801_v59 = vpop.permute.xlu1 %1800  ;;  %v16708_v33 = vpack.c.bf16 %v13419_v49, %v13416_v14  ;;  %v16710_v49 = vld [vmem:[#allocation555_spill] sm:$0xff] }
 0x595   : > { %v4134_v34 = vadd.f32 %v4133_v6, %v1791_v27  ;;  %v4135_v21 = vpop.f32.mrb[183].mxu0  ;;  %5983 = vmatmul.mubr.bf16.gmra.mrb[176].mxu1 %v5046_v13  ;;  %v4754_v38 = vmax.f32 %v4130_v54, 0.0  ;;  %v1796_v52 = vpop.permute.xlu0 %1795 }
 0x596   : > { %v4136_v37 = vadd.f32 %v4135_v21, %v1791_v27  ;;  %v4755_v17 = vmax.f32 %v4132_v2, 0.0 }
 0x597   : > { %v4756_v32 = vmax.f32 %v4134_v34, 0.0  ;;  %7041 = vmatmul.mubr.bf16.vlgmr.msra.gmra.mrb[32].mxu0 %v7980_v51  ;;  %v16709_v34 = vpack.c.bf16 %v13307_v1, %v13304_v56  ;;  %v16713_v1 = vpack.c.bf16 %v13321_v63, %v13318_v12 }
 0x598   : > { %v4757_v30 = vmax.f32 %v4136_v37, 0.0  ;;  %8237 = vmatpush3.bf16.msra.mxu0 %v16707_v50  ;;  %7048 = vmatprep.mubr.bf16.mxu0 %v7997_v25  ;;  %v13882_v18 = vpop.f32.mrb[72].mxu1 }
 0x599   : > { %v5048_v35 = vpack.c.bf16 %v4756_v32, %v4754_v38  ;;  %8238 = vmatprep.subr.bf16.mxu0 %v16708_v33  ;;  %v5778_v54 = vpop.f32.mrb[73].mxu1  ;;  %v16712_v38 = vpack.c.bf16 %v13433_v29, %v13430_v22  ;;  %v16714_v29 = vpack.c.bf16 %v13447_v42, %v13444_v44  ;;  %v16716_v44 = vld [vmem:[#allocation571_spill] sm:$0xff] }
 0x59a   : > { %v5049_v13 = vpack.c.bf16 %v4757_v30, %v4755_v17  ;;  %v4139_v27 = vpop.f32.mrb[184].mxu0  ;;  %v13887_v6 = vpop.f32.mrb[74].mxu1  ;;  %v16711_v30 = vld [vmem:[#allocation547_spill] sm:$0xff] }
 0x59b   : > { %v4140_v51 = vadd.f32 %v4139_v27, %v1796_v52  ;;  %v4141_v2 = vpop.f32.mrb[185].mxu0  ;;  %v5781_v25 = vpop.f32.mrb[75].mxu1  ;;  %v8013_v21 = vcombine.high %v16711_v30, %v16710_v49  ;;  %v8012_v12 = vcombine.low %v16711_v30, %v16710_v49 }
 0x59c   : > { %v4142_v50 = vadd.f32 %v4141_v2, %v1796_v52  ;;  %8239 = vmatpush3.bf16.msra.mxu0 %v16709_v34  ;;  %v4143_v14 = vpop.f32.mrb[186].mxu0  ;;  %5990 = vmatprep.mubr.bf16.mxu1 %v5049_v13  ;;  %v1811_v54 = vpop.permute.xlu1 %1810 }
 0x59d   : > { %v4144_v37 = vadd.f32 %v4143_v14, %v1801_v59  ;;  %8240 = vmatprep.subr.bf16.mxu0 %v16712_v38  ;;  %v4145_v32 = vpop.f32.mrb[187].mxu0  ;;  %5991 = vmatmul.mubr.bf16.gmra.mrb[180].mxu1 %v5048_v35  ;;  %v4758_v33 = vmax.f32 %v4140_v51, 0.0  ;;  %v1806_v13 = vpop.permute.xlu0 %1805 }
 0x59e   : > { %v4146_v17 = vadd.f32 %v4145_v32, %v1801_v59  ;;  %v4759_v27 = vmax.f32 %v4142_v50, 0.0 }
 0x59f   : > { %v4760_v52 = vmax.f32 %v4144_v37, 0.0  ;;  %7049 = vmatmul.mubr.bf16.gmra.mrb[36].mxu0 %v7996_v15  ;;  %v16717_v37 = vld [vmem:[#allocation563_spill] sm:$0xff] }
 0x5a0   : > { %v4761_v56 = vmax.f32 %v4146_v17, 0.0  ;;  %8241 = vmatpush3.bf16.msra.mxu0 %v16713_v1  ;;  %7056 = vmatprep.mubr.bf16.mxu0 %v8013_v21  ;;  %v13904_v25 = vpop.f32.mrb[76].mxu1  ;;  %v16715_v21 = vpack.c.bf16 %v13335_v26, %v13332_v31  ;;  %v8029_v38 = vcombine.high %v16717_v37, %v16716_v44  ;;  %v16718_v17 = vpack.c.bf16 %v13461_v23, %v13458_v11  ;;  %v1821_v1 = vpop.permute.xlu1 %1820 }
 0x5a1   : > { %v5050_v2 = vpack.c.bf16 %v4760_v52, %v4758_v33  ;;  %8242 = vmatprep.subr.bf16.mxu0 %v16714_v29  ;;  %v5786_v59 = vpop.f32.mrb[77].mxu1  ;;  %v16719_v26 = vpack.c.bf16 %v13349_v7, %v13346_v3  ;;  %v1816_v29 = vpop.permute.xlu0 %1815  ;;  %v16720_v23 = vpack.c.bf16 %v13475_v28, %v13472_v4  ;;  %v8028_v3 = vcombine.low %v16717_v37, %v16716_v44  ;;  %v16722_v4 = vld [vmem:[#allocation524_spill] sm:$0xff] }
 0x5a2   : > { %v5051_v22 = vpack.c.bf16 %v4761_v56, %v4759_v27  ;;  %v4149_v35 = vpop.f32.mrb[188].mxu0  ;;  %v13909_v15 = vpop.f32.mrb[78].mxu1 }
 0x5a3   : > { %v4150_v51 = vadd.f32 %v4149_v35, %v1806_v13  ;;  %v4151_v50 = vpop.f32.mrb[189].mxu0  ;;  %v5789_v14 = vpop.f32.mrb[79].mxu1 }
 0x5a4   : > { %v4152_v34 = vadd.f32 %v4151_v50, %v1806_v13  ;;  %8243 = vmatpush3.bf16.msra.mxu0 %v16715_v21  ;;  %v4153_v42 = vpop.f32.mrb[190].mxu0  ;;  %5998 = vmatprep.mubr.bf16.mxu1 %v5051_v22  ;;  %v16721_v14 = vpack.c.bf16 %v13363_v61, %v13360_v20  ;;  %v16723_v21 = vld [vmem:[#allocation516_spill] sm:$0xff]  ;;  %v16727_v61 = vld [vmem:[#allocation674_spill] sm:$0xff] }
 0x5a5   : > { %v4154_v32 = vadd.f32 %v4153_v42, %v1811_v54  ;;  %8244 = vmatprep.subr.bf16.mxu0 %v16718_v17  ;;  %v4155_v33 = vpop.f32.mrb[191].mxu0  ;;  %5999 = vmatmul.mubr.bf16.gmra.mrb[184].mxu1 %v5050_v2  ;;  %v4762_v27 = vmax.f32 %v4150_v51, 0.0  ;;  %v7983_v42 = vcombine.high %v16723_v21, %v16722_v4  ;;  %v16725_v17 = vld [vmem:[#allocation677_spill] sm:$0xff] }
 0x5a6   : > { %v4156_v52 = vadd.f32 %v4155_v33, %v1811_v54  ;;  %v4763_v13 = vmax.f32 %v4152_v34, 0.0 }
 0x5a7   : > { %v4764_v56 = vmax.f32 %v4154_v32, 0.0  ;;  %7057 = vmatmul.mubr.bf16.gmra.mrb[40].mxu0 %v8012_v12  ;;  %v16724_v32 = vld [vmem:[#allocation678_spill] sm:$0xff] }
 0x5a8   : > { %v4765_v31 = vmax.f32 %v4156_v52, 0.0  ;;  %8245 = vmatpush3.bf16.msra.mxu0 %v16719_v26  ;;  %7064 = vmatprep.mubr.bf16.mxu0 %v8029_v38  ;;  %v13926_v59 = vpop.f32.mrb[80].mxu1  ;;  %v16726_v33 = vpack.c.bf16 %v16724_v32, %v16725_v17 }
 0x5a9   : > { %v5052_v22 = vpack.c.bf16 %v4764_v56, %v4762_v27  ;;  %8246 = vmatprep.subr.bf16.mxu0 %v16720_v23  ;;  %v5794_v54 = vpop.f32.mrb[81].mxu1 }
 0x5aa   : > { %v5053_v11 = vpack.c.bf16 %v4765_v31, %v4763_v13  ;;  %v4159_v2 = vpop.f32.mrb[192].mxu0  ;;  %v13931_v51 = vpop.f32.mrb[82].mxu1 }
 0x5ab   : > { %v4160_v35 = vadd.f32 %v4159_v2, %v1816_v29  ;;  %v4161_v50 = vpop.f32.mrb[193].mxu0  ;;  %v5797_v34 = vpop.f32.mrb[83].mxu1 }
 0x5ac   : > { %v4162_v12 = vadd.f32 %v4161_v50, %v1816_v29  ;;  %8247 = vmatpush3.bf16.msra.mxu0 %v16721_v14  ;;  %v4163_v28 = vpop.f32.mrb[194].mxu0  ;;  %6006 = vmatprep.mubr.bf16.mxu1 %v5053_v11  ;;  %v1831_v31 = vpop.permute.xlu1 %1830  ;;  %v16728_v29 = vld [vmem:[#allocation673_spill] sm:$0xff]  ;;  %v16730_v50 = vld [vmem:[#allocation680_spill] sm:$0xff]  ;;  %v16731_v34 = vld [vmem:[#allocation679_spill] sm:$0xff] }
 0x5ad   : > { %v4164_v38 = vadd.f32 %v4163_v28, %v1821_v1  ;;  %8248 = vmatprep.subr.bf16.mxu0 %v16726_v33  ;;  %v4165_v52 = vpop.f32.mrb[195].mxu0  ;;  %6007 = vmatmul.mubr.bf16.gmra.mrb[188].mxu1 %v5052_v22  ;;  %v4766_v56 = vmax.f32 %v4160_v35, 0.0  ;;  %v16729_v23 = vpack.c.bf16 %v16727_v61, %v16728_v29  ;;  %v1826_v11 = vpop.permute.xlu0 %1825  ;;  %v16732_v14 = vpack.c.bf16 %v16730_v50, %v16731_v34  ;;  %v16733_v33 = vld [vmem:[#allocation676_spill] sm:$0xff]  ;;  %v16738_v29 = vld [vmem:[#allocation670_spill] sm:$0xff] }
 0x5ae   : > { %v4166_v27 = vadd.f32 %v4165_v52, %v1821_v1  ;;  %v4767_v26 = vmax.f32 %v4162_v12, 0.0  ;;  %v16734_v52 = vld [vmem:[#allocation675_spill] sm:$0xff] }
 0x5af   : > { %v4768_v13 = vmax.f32 %v4164_v38, 0.0  ;;  %7065 = vmatmul.mubr.bf16.gmra.mrb[44].mxu0 %v8028_v3  ;;  %v7982_v38 = vcombine.low %v16723_v21, %v16722_v4 }
 0x5b0   : > { %v4769_v20 = vmax.f32 %v4166_v27, 0.0  ;;  %8249 = vmatpush3.bf16.msra.mxu0 %v16729_v23  ;;  %7137 = vmatprep.mubr.bf16.mxu0 %v7983_v42  ;;  %v13948_v2 = vpop.f32.mrb[84].mxu1  ;;  %v16735_v27 = vpack.c.bf16 %v16733_v33, %v16734_v52  ;;  %v16739_v23 = vld [vmem:[#allocation715_spill] sm:$0xff]  ;;  %v16741_v33 = vld [vmem:[#allocation664_spill] sm:$0xff]  ;;  %v16742_v52 = vld [vmem:[#allocation705_spill] sm:$0xff] }
 0x5b1   : > { %v5054_v54 = vpack.c.bf16 %v4768_v13, %v4766_v56  ;;  %8250 = vmatprep.subr.bf16.mxu0 %v16732_v14  ;;  %v5802_v22 = vpop.f32.mrb[85].mxu1  ;;  %v16736_v13 = vld [vmem:[#allocation540_spill] sm:$0xff]  ;;  %v16740_v50 = vpack.c.bf16 %v16738_v29, %v16739_v23  ;;  %v16744_v29 = vpack.c.bf16 %v13773_v0, %v13771_v8 }
 0x5b2   : > { %v5055_v1 = vpack.c.bf16 %v4769_v20, %v4767_v26  ;;  %v4169_v35 = vpop.f32.mrb[196].mxu0  ;;  %v13953_v28 = vpop.f32.mrb[86].mxu1  ;;  %v16737_v26 = vld [vmem:[#allocation532_spill] sm:$0xff] }
 0x5b3   : > { %v4170_v3 = vadd.f32 %v4169_v35, %v1826_v11  ;;  %v4171_v12 = vpop.f32.mrb[197].mxu0  ;;  %v5805_v17 = vpop.f32.mrb[87].mxu1  ;;  %v7999_v20 = vcombine.high %v16737_v26, %v16736_v13  ;;  %v7998_v23 = vcombine.low %v16737_v26, %v16736_v13  ;;  %v16748_v0 = vld [vmem:[#allocation556_spill] sm:$0xff] }
 0x5b4   : > { %v4172_v32 = vadd.f32 %v4171_v12, %v1826_v11  ;;  %8251 = vmatpush3.bf16.msra.mxu0 %v16735_v27  ;;  %v4173_v56 = vpop.f32.mrb[198].mxu0  ;;  %6014 = vmatprep.mubr.bf16.mxu1 %v5055_v1  ;;  %v1841_v35 = vpop.permute.xlu1 %1840  ;;  %v16743_v1 = vpack.c.bf16 %v16741_v33, %v16742_v52  ;;  %v16750_v52 = vpack.c.bf16 %v13785_v60, %v13782_v41 }
 0x5b5   : > { %v4174_v61 = vadd.f32 %v4173_v56, %v1831_v31  ;;  %8364 = vmatprep.subr.bf16.mxu0 %v16740_v50  ;;  %v4175_v34 = vpop.f32.mrb[199].mxu0  ;;  %6015 = vmatmul.mubr.bf16.gmra.mrb[192].mxu1 %v5054_v54  ;;  %v4770_v22 = vmax.f32 %v4170_v3, 0.0  ;;  %v1836_v27 = vpop.permute.xlu0 %1835  ;;  %v16754_v41 = vpack.c.bf16 %v13799_v10, %v13796_v5  ;;  %v16758_v10 = vld [vmem:[#allocation572_spill] sm:$0xff] }
 0x5b6   : > { %v4176_v14 = vadd.f32 %v4175_v34, %v1831_v31  ;;  %v4771_v12 = vmax.f32 %v4172_v32, 0.0 }
 0x5b7   : > { %v4772_v11 = vmax.f32 %v4174_v61, 0.0  ;;  %7138 = vmatmul.mubr.bf16.vlgmr.msra.gmra.mrb[48].mxu0 %v7982_v38 }
 0x5b8   : > { %v4773_v17 = vmax.f32 %v4176_v14, 0.0  ;;  %8365 = vmatpush3.bf16.msra.mxu0 %v16743_v1  ;;  %7145 = vmatprep.mubr.bf16.mxu0 %v7999_v20  ;;  %v13970_v42 = vpop.f32.mrb[88].mxu1  ;;  %v16745_v14 = vld [vmem:[#allocation665_spill] sm:$0xff] }
 0x5b9   : > { %v5056_v56 = vpack.c.bf16 %v4772_v11, %v4770_v22  ;;  %8366 = vmatprep.subr.bf16.mxu0 %v16744_v29  ;;  %v5810_v54 = vpop.f32.mrb[89].mxu1  ;;  %v16746_v22 = vld [vmem:[#allocation706_spill] sm:$0xff] }
 0x5ba   : > { %v5057_v31 = vpack.c.bf16 %v4773_v17, %v4771_v12  ;;  %v4179_v3 = vpop.f32.mrb[200].mxu0  ;;  %v13975_v61 = vpop.f32.mrb[90].mxu1  ;;  %v16747_v11 = vpack.c.bf16 %v16745_v14, %v16746_v22  ;;  %v16749_v12 = vld [vmem:[#allocation548_spill] sm:$0xff]  ;;  %v16751_v14 = vld [vmem:[#allocation707_spill] sm:$0xff]  ;;  %v16752_v22 = vld [vmem:[#allocation666_spill] sm:$0xff] }
 0x5bb   : > { %v4180_v38 = vadd.f32 %v4179_v3, %v1836_v27  ;;  %v4181_v32 = vpop.f32.mrb[201].mxu0  ;;  %v5813_v34 = vpop.f32.mrb[91].mxu1  ;;  %v8015_v17 = vcombine.high %v16749_v12, %v16748_v0 }
 0x5bc   : > { %v4182_v50 = vadd.f32 %v4181_v32, %v1836_v27  ;;  %8367 = vmatpush3.bf16.msra.mxu0 %v16747_v11  ;;  %v4183_v8 = vpop.f32.mrb[202].mxu0  ;;  %6022 = vmatprep.mubr.bf16.mxu1 %v5057_v31  ;;  %v1851_v3 = vpop.permute.xlu1 %1850  ;;  %v16753_v31 = vpack.c.bf16 %v16751_v14, %v16752_v22  ;;  %v16760_v22 = vpack.c.bf16 %v13813_v46, %v13810_v45 }
 0x5bd   : > { %v4184_v33 = vadd.f32 %v4183_v8, %v1841_v35  ;;  %8368 = vmatprep.subr.bf16.mxu0 %v16750_v52  ;;  %v4185_v1 = vpop.f32.mrb[203].mxu0  ;;  %6023 = vmatmul.mubr.bf16.gmra.mrb[196].mxu1 %v5056_v56  ;;  %v4774_v54 = vmax.f32 %v4180_v38, 0.0  ;;  %v1846_v11 = vpop.permute.xlu0 %1845  ;;  %v16764_v45 = vpack.c.bf16 %v13827_v62, %v13824_v9  ;;  %v16768_v62 = vld [vmem:[#allocation588_spill] sm:$0xff] }
 0x5be   : > { %v4186_v29 = vadd.f32 %v4185_v1, %v1841_v35  ;;  %v4775_v32 = vmax.f32 %v4182_v50, 0.0 }
 0x5bf   : > { %v4776_v27 = vmax.f32 %v4184_v33, 0.0  ;;  %7146 = vmatmul.mubr.bf16.gmra.mrb[52].mxu0 %v7998_v23  ;;  %v8014_v33 = vcombine.low %v16749_v12, %v16748_v0 }
 0x5c0   : > { %v4777_v34 = vmax.f32 %v4186_v29, 0.0  ;;  %8369 = vmatpush3.bf16.msra.mxu0 %v16753_v31  ;;  %7153 = vmatprep.mubr.bf16.mxu0 %v8015_v17  ;;  %v13992_v20 = vpop.f32.mrb[92].mxu1  ;;  %v16755_v29 = vld [vmem:[#allocation708_spill] sm:$0xff] }
 0x5c1   : > { %v5058_v8 = vpack.c.bf16 %v4776_v27, %v4774_v54  ;;  %8370 = vmatprep.subr.bf16.mxu0 %v16754_v41  ;;  %v5818_v35 = vpop.f32.mrb[93].mxu1  ;;  %v16756_v54 = vld [vmem:[#allocation709_spill] sm:$0xff] }
 0x5c2   : > { %v5059_v60 = vpack.c.bf16 %v4777_v34, %v4775_v32  ;;  %v4189_v56 = vpop.f32.mrb[204].mxu0  ;;  %v13997_v23 = vpop.f32.mrb[94].mxu1  ;;  %v16757_v27 = vpack.c.bf16 %v16755_v29, %v16756_v54  ;;  %v16759_v32 = vld [vmem:[#allocation564_spill] sm:$0xff]  ;;  %v16761_v29 = vld [vmem:[#allocation667_spill] sm:$0xff]  ;;  %v16762_v54 = vld [vmem:[#allocation710_spill] sm:$0xff] }
 0x5c3   : > { %v4190_v38 = vadd.f32 %v4189_v56, %v1846_v11  ;;  %v4191_v50 = vpop.f32.mrb[205].mxu0  ;;  %v5821_v1 = vpop.f32.mrb[95].mxu1  ;;  %v8031_v34 = vcombine.high %v16759_v32, %v16758_v10 }
 0x5c4   : > { %v4192_v52 = vadd.f32 %v4191_v50, %v1846_v11  ;;  %8371 = vmatpush3.bf16.msra.mxu0 %v16757_v27  ;;  %v4193_v5 = vpop.f32.mrb[206].mxu0  ;;  %6030 = vmatprep.mubr.bf16.mxu1 %v5059_v60  ;;  %v1861_v56 = vpop.permute.xlu1 %1860  ;;  %v16763_v60 = vpack.c.bf16 %v16761_v29, %v16762_v54  ;;  %v16770_v54 = vpack.c.bf16 %v13841_v57, %v13839_v40 }
 0x5c5   : > { %v4194_v14 = vadd.f32 %v4193_v5, %v1851_v3  ;;  %8372 = vmatprep.subr.bf16.mxu0 %v16760_v22  ;;  %v4195_v31 = vpop.f32.mrb[207].mxu0  ;;  %6031 = vmatmul.mubr.bf16.gmra.mrb[200].mxu1 %v5058_v8  ;;  %v4778_v35 = vmax.f32 %v4190_v38, 0.0  ;;  %v1856_v27 = vpop.permute.xlu0 %1855  ;;  %v16774_v40 = vpack.c.bf16 %v13851_v36, %v13849_v48  ;;  %v16778_v48 = vld [vmem:[#allocation604_spill] sm:$0xff] }
 0x5c6   : > { %v4196_v41 = vadd.f32 %v4195_v31, %v1851_v3  ;;  %v4779_v50 = vmax.f32 %v4192_v52, 0.0 }
 0x5c7   : > { %v4780_v11 = vmax.f32 %v4194_v14, 0.0  ;;  %7154 = vmatmul.mubr.bf16.gmra.mrb[56].mxu0 %v8014_v33  ;;  %v8030_v14 = vcombine.low %v16759_v32, %v16758_v10 }
 0x5c8   : > { %v4781_v1 = vmax.f32 %v4196_v41, 0.0  ;;  %8373 = vmatpush3.bf16.msra.mxu0 %v16763_v60  ;;  %7161 = vmatprep.mubr.bf16.mxu0 %v8031_v34  ;;  %v14014_v17 = vpop.f32.mrb[96].mxu1  ;;  %v16765_v41 = vld [vmem:[#allocation668_spill] sm:$0xff] }
 0x5c9   : > { %v5060_v5 = vpack.c.bf16 %v4780_v11, %v4778_v35  ;;  %8374 = vmatprep.subr.bf16.mxu0 %v16764_v45  ;;  %v5826_v3 = vpop.f32.mrb[97].mxu1  ;;  %v16766_v35 = vld [vmem:[#allocation711_spill] sm:$0xff] }
 0x5ca   : > { %v5061_v46 = vpack.c.bf16 %v4781_v1, %v4779_v50  ;;  %v4199_v8 = vpop.f32.mrb[208].mxu0  ;;  %v14019_v33 = vpop.f32.mrb[98].mxu1  ;;  %v16767_v11 = vpack.c.bf16 %v16765_v41, %v16766_v35  ;;  %v16769_v50 = vld [vmem:[#allocation580_spill] sm:$0xff]  ;;  %v16772_v35 = vld [vmem:[#allocation669_spill] sm:$0xff] }
 0x5cb   : > { %v4200_v38 = vadd.f32 %v4199_v8, %v1856_v27  ;;  %v4201_v52 = vpop.f32.mrb[209].mxu0  ;;  %v5829_v31 = vpop.f32.mrb[99].mxu1  ;;  %v8047_v1 = vcombine.high %v16769_v50, %v16768_v62  ;;  %v16771_v41 = vld [vmem:[#allocation712_spill] sm:$0xff] }
 0x5cc   : > { %v4202_v22 = vadd.f32 %v4201_v52, %v1856_v27  ;;  %8375 = vmatpush3.bf16.msra.mxu0 %v16767_v11  ;;  %v4203_v9 = vpop.f32.mrb[210].mxu0  ;;  %6038 = vmatprep.mubr.bf16.mxu1 %v5061_v46  ;;  %v1871_v8 = vpop.permute.xlu1 %1870  ;;  %v16773_v46 = vpack.c.bf16 %v16771_v41, %v16772_v35 }
 0x5cd   : > { %v4204_v29 = vadd.f32 %v4203_v9, %v1861_v56  ;;  %8376 = vmatprep.subr.bf16.mxu0 %v16770_v54  ;;  %v4205_v60 = vpop.f32.mrb[211].mxu0  ;;  %6039 = vmatmul.mubr.bf16.gmra.mrb[204].mxu1 %v5060_v5  ;;  %v4782_v3 = vmax.f32 %v4200_v38, 0.0  ;;  %v1866_v11 = vpop.permute.xlu0 %1865 }
 0x5ce   : > { %v4206_v45 = vadd.f32 %v4205_v60, %v1861_v56  ;;  %v4783_v52 = vmax.f32 %v4202_v22, 0.0 }
 0x5cf   : > { %v4784_v27 = vmax.f32 %v4204_v29, 0.0  ;;  %7162 = vmatmul.mubr.bf16.gmra.mrb[60].mxu0 %v8030_v14  ;;  %v8046_v29 = vcombine.low %v16769_v50, %v16768_v62 }
 0x5d0   : > { %v4785_v31 = vmax.f32 %v4206_v45, 0.0  ;;  %8377 = vmatpush3.bf16.msra.mxu0 %v16773_v46  ;;  %7169 = vmatprep.mubr.bf16.mxu0 %v8047_v1  ;;  %v14036_v7 = vpop.f32.mrb[100].mxu1  ;;  %v16775_v45 = vld [vmem:[#allocation713_spill] sm:$0xff] }
 0x5d1   : > { %v5062_v9 = vpack.c.bf16 %v4784_v27, %v4782_v3  ;;  %8378 = vmatprep.subr.bf16.mxu0 %v16774_v40  ;;  %v5834_v56 = vpop.f32.mrb[101].mxu1  ;;  %v16776_v3 = vld [vmem:[#allocation714_spill] sm:$0xff] }
 0x5d2   : > { %v5063_v57 = vpack.c.bf16 %v4785_v31, %v4783_v52  ;;  %v4209_v5 = vpop.f32.mrb[212].mxu0  ;;  %v14041_v14 = vpop.f32.mrb[102].mxu1  ;;  %v16777_v27 = vpack.c.bf16 %v16775_v45, %v16776_v3  ;;  %v16779_v52 = vld [vmem:[#allocation596_spill] sm:$0xff] }
 0x5d3   : > { %v4210_v38 = vadd.f32 %v4209_v5, %v1866_v11  ;;  %v4211_v22 = vpop.f32.mrb[213].mxu0  ;;  %v5837_v60 = vpop.f32.mrb[103].mxu1  ;;  %v8063_v31 = vcombine.high %v16779_v52, %v16778_v48 }
 0x5d4   : > { %v4212_v54 = vadd.f32 %v4211_v22, %v1866_v11  ;;  %8379 = vmatpush3.bf16.msra.mxu0 %v16777_v27  ;;  %v4213_v36 = vpop.f32.mrb[214].mxu0  ;;  %6046 = vmatprep.mubr.bf16.mxu1 %v5063_v57  ;;  %v1881_v5 = vpop.permute.xlu1 %1880 }
 0x5d5   : > { %v4214_v41 = vadd.f32 %v4213_v36, %v1871_v8  ;;  %v4215_v35 = vpop.f32.mrb[215].mxu0  ;;  %6047 = vmatmul.mubr.bf16.gmra.mrb[208].mxu1 %v5062_v9  ;;  %v4786_v40 = vmax.f32 %v4210_v38, 0.0  ;;  %v1876_v22 = vpop.permute.xlu0 %1875 }
 0x5d6   : > { %v4216_v46 = vadd.f32 %v4215_v35, %v1871_v8  ;;  %v4787_v63 = vmax.f32 %v4212_v54, 0.0  ;;  %v8062_v8 = vcombine.low %v16779_v52, %v16778_v48 }
 0x5d7   : > { %v4788_v56 = vmax.f32 %v4214_v41, 0.0  ;;  %7170 = vmatmul.mubr.bf16.gmra.mrb[64].mxu0 %v8046_v29  ;;  %v16781_v41 = vld [vmem:[#allocation612_spill] sm:$0xff] }
 0x5d8   : > { %v4789_v11 = vmax.f32 %v4216_v46, 0.0  ;;  %7177 = vmatprep.mubr.bf16.mxu0 %v8063_v31  ;;  %v14052_v45 = vpop.f32.mrb[104].mxu1  ;;  %v16780_v31 = vld [vmem:[#allocation620_spill] sm:$0xff] }
 0x5d9   : > { %v5064_v60 = vpack.c.bf16 %v4788_v56, %v4786_v40  ;;  %v5842_v57 = vpop.f32.mrb[105].mxu1  ;;  %v8079_v35 = vcombine.high %v16781_v41, %v16780_v31  ;;  %v1886_v0 = vpop.permute.xlu0 %1885 }
 0x5da   : > { %v5065_v3 = vpack.c.bf16 %v4789_v11, %v4787_v63  ;;  %v4219_v27 = vpop.f32.mrb[216].mxu0  ;;  %v14054_v1 = vpop.f32.mrb[106].mxu1 }
 0x5db   : > { %v4220_v39 = vadd.f32 %v4219_v27, %v1876_v22  ;;  %v4221_v36 = vpop.f32.mrb[217].mxu0  ;;  %v5845_v29 = vpop.f32.mrb[107].mxu1 }
 0x5dc   : > { %v4222_v38 = vadd.f32 %v4221_v36, %v1876_v22  ;;  %v4223_v54 = vpop.f32.mrb[218].mxu0  ;;  %6054 = vmatprep.mubr.bf16.mxu1 %v5065_v3  ;;  %v1891_v57 = vpop.permute.xlu1 %1890 }
 0x5dd   : > { %v4224_v63 = vadd.f32 %v4223_v54, %v1881_v5  ;;  %v4225_v46 = vpop.f32.mrb[219].mxu0  ;;  %6055 = vmatmul.mubr.bf16.gmra.mrb[212].mxu1 %v5064_v60  ;;  %v4790_v56 = vmax.f32 %v4220_v39, 0.0  ;;  %v8078_v39 = vcombine.low %v16781_v41, %v16780_v31  ;;  %v1896_v13 = vpop.permute.xlu0 %1895 }
 0x5de   : > { %v4226_v40 = vadd.f32 %v4225_v46, %v1881_v5  ;;  %v4791_v27 = vmax.f32 %v4222_v38, 0.0 }
 0x5df   : > { %v4792_v11 = vmax.f32 %v4224_v63, 0.0  ;;  %7178 = vmatmul.mubr.bf16.gmra.mrb[68].mxu0 %v8062_v8  ;;  %v16783_v63 = vld [vmem:[#allocation628_spill] sm:$0xff] }
 0x5e0   : > { %v4793_v34 = vmax.f32 %v4226_v40, 0.0  ;;  %7185 = vmatprep.mubr.bf16.mxu0 %v8079_v35  ;;  %v14062_v22 = vpop.f32.mrb[108].mxu1  ;;  %v16782_v35 = vld [vmem:[#allocation636_spill] sm:$0xff] }
 0x5e1   : > { %v5066_v9 = vpack.c.bf16 %v4792_v11, %v4790_v56  ;;  %v5850_v3 = vpop.f32.mrb[109].mxu1  ;;  %v8095_v46 = vcombine.high %v16783_v63, %v16782_v35  ;;  %v1906_v26 = vpop.permute.xlu0 %1905 }
 0x5e2   : > { %v5067_v36 = vpack.c.bf16 %v4793_v34, %v4791_v27  ;;  %v4229_v29 = vpop.f32.mrb[220].mxu0  ;;  %v14064_v10 = vpop.f32.mrb[110].mxu1 }
 0x5e3   : > { %v4230_v4 = vadd.f32 %v4229_v29, %v1886_v0  ;;  %v4231_v54 = vpop.f32.mrb[221].mxu0  ;;  %v5853_v8 = vpop.f32.mrb[111].mxu1 }
 0x5e4   : > { %v4232_v60 = vadd.f32 %v4231_v54, %v1886_v0  ;;  %v4233_v38 = vpop.f32.mrb[222].mxu0  ;;  %6062 = vmatprep.mubr.bf16.mxu1 %v5067_v36  ;;  %v1901_v3 = vpop.permute.xlu1 %1900 }
 0x5e5   : > { %v4234_v34 = vadd.f32 %v4233_v38, %v1891_v57  ;;  %v4235_v40 = vpop.f32.mrb[223].mxu0  ;;  %6063 = vmatmul.mubr.bf16.gmra.mrb[216].mxu1 %v5066_v9  ;;  %v4794_v11 = vmax.f32 %v4230_v4, 0.0  ;;  %v8094_v4 = vcombine.low %v16783_v63, %v16782_v35 }
 0x5e6   : > { %v4236_v56 = vadd.f32 %v4235_v40, %v1891_v57  ;;  %v4795_v29 = vmax.f32 %v4232_v60, 0.0 }
 0x5e7   : > { %v4796_v27 = vmax.f32 %v4234_v34, 0.0  ;;  %7186 = vmatmul.mubr.bf16.gmra.mrb[72].mxu0 %v8078_v39  ;;  %v16785_v34 = vld [vmem:[#allocation518_spill] sm:$0xff] }
 0x5e8   : > { %v4797_v12 = vmax.f32 %v4236_v56, 0.0  ;;  %7193 = vmatprep.mubr.bf16.mxu0 %v8095_v46  ;;  %v14072_v0 = vpop.f32.mrb[112].mxu1  ;;  %v16784_v46 = vld [vmem:[#allocation526_spill] sm:$0xff] }
 0x5e9   : > { %v5068_v5 = vpack.c.bf16 %v4796_v27, %v4794_v11  ;;  %v5858_v36 = vpop.f32.mrb[113].mxu1  ;;  %v7987_v40 = vcombine.high %v16785_v34, %v16784_v46 }
 0x5ea   : > { %v5069_v54 = vpack.c.bf16 %v4797_v12, %v4795_v29  ;;  %v4239_v8 = vpop.f32.mrb[224].mxu0  ;;  %v14074_v21 = vpop.f32.mrb[114].mxu1 }
 0x5eb   : > { %v4240_v16 = vadd.f32 %v4239_v8, %v1896_v13  ;;  %v4241_v38 = vpop.f32.mrb[225].mxu0  ;;  %v5861_v39 = vpop.f32.mrb[115].mxu1 }
 0x5ec   : > { %v4242_v57 = vadd.f32 %v4241_v38, %v1896_v13  ;;  %v4243_v60 = vpop.f32.mrb[226].mxu0  ;;  %6070 = vmatprep.mubr.bf16.mxu1 %v5069_v54  ;;  %v1911_v36 = vpop.permute.xlu1 %1910 }
 0x5ed   : > { %v4244_v12 = vadd.f32 %v4243_v60, %v1901_v3  ;;  %v4245_v56 = vpop.f32.mrb[227].mxu0  ;;  %6071 = vmatmul.mubr.bf16.gmra.mrb[220].mxu1 %v5068_v5  ;;  %v4798_v27 = vmax.f32 %v4240_v16, 0.0  ;;  %v7986_v16 = vcombine.low %v16785_v34, %v16784_v46  ;;  %v1916_v34 = vpop.permute.xlu0 %1915 }
 0x5ee   : > { %v4246_v11 = vadd.f32 %v4245_v56, %v1901_v3  ;;  %v4799_v8 = vmax.f32 %v4242_v57, 0.0 }
 0x5ef   : > { %v4800_v29 = vmax.f32 %v4244_v12, 0.0  ;;  %7194 = vmatmul.mubr.bf16.gmra.mrb[76].mxu0 %v8094_v4  ;;  %v16787_v12 = vld [vmem:[#allocation534_spill] sm:$0xff] }
 0x5f0   : > { %v4801_v24 = vmax.f32 %v4246_v11, 0.0  ;;  %7331 = vmatprep.mubr.bf16.mxu0 %v7987_v40  ;;  %v14082_v13 = vpop.f32.mrb[116].mxu1  ;;  %v16786_v40 = vld [vmem:[#allocation542_spill] sm:$0xff] }
 0x5f1   : > { %v5070_v9 = vpack.c.bf16 %v4800_v29, %v4798_v27  ;;  %v5866_v54 = vpop.f32.mrb[117].mxu1  ;;  %v8003_v56 = vcombine.high %v16787_v12, %v16786_v40 }
 0x5f2   : > { %v5071_v38 = vpack.c.bf16 %v4801_v24, %v4799_v8  ;;  %v4249_v39 = vpop.f32.mrb[228].mxu0  ;;  %v14084_v31 = vpop.f32.mrb[118].mxu1 }
 0x5f3   : > { %v4250_v30 = vadd.f32 %v4249_v39, %v1906_v26  ;;  %v4251_v60 = vpop.f32.mrb[229].mxu0  ;;  %v5869_v4 = vpop.f32.mrb[119].mxu1 }
 0x5f4   : > { %v4252_v3 = vadd.f32 %v4251_v60, %v1906_v26  ;;  %v4253_v57 = vpop.f32.mrb[230].mxu0  ;;  %6078 = vmatprep.mubr.bf16.mxu1 %v5071_v38  ;;  %v1921_v54 = vpop.permute.xlu1 %1920 }
 0x5f5   : > { %v4254_v24 = vadd.f32 %v4253_v57, %v1911_v36  ;;  %v4255_v11 = vpop.f32.mrb[231].mxu0  ;;  %6079 = vmatmul.mubr.bf16.gmra.mrb[224].mxu1 %v5070_v9  ;;  %v4802_v29 = vmax.f32 %v4250_v30, 0.0  ;;  %v8002_v30 = vcombine.low %v16787_v12, %v16786_v40  ;;  %v1926_v40 = vpop.permute.xlu0 %1925 }
 0x5f6   : > { %v4256_v27 = vadd.f32 %v4255_v11, %v1911_v36  ;;  %v4803_v39 = vmax.f32 %v4252_v3, 0.0 }
 0x5f7   : > { %v4804_v8 = vmax.f32 %v4254_v24, 0.0  ;;  %7332 = vmatmul.mubr.bf16.vlgmr.msra.gmra.mrb[80].mxu0 %v7986_v16  ;;  %v16789_v24 = vld [vmem:[#allocation550_spill] sm:$0xff] }
 0x5f8   : > { %v4805_v32 = vmax.f32 %v4256_v27, 0.0  ;;  %7339 = vmatprep.mubr.bf16.mxu0 %v8003_v56  ;;  %v14092_v26 = vpop.f32.mrb[120].mxu1  ;;  %v16788_v56 = vld [vmem:[#allocation558_spill] sm:$0xff] }
 0x5f9   : > { %v5072_v5 = vpack.c.bf16 %v4804_v8, %v4802_v29  ;;  %v5874_v38 = vpop.f32.mrb[121].mxu1  ;;  %v8019_v11 = vcombine.high %v16789_v24, %v16788_v56  ;;  %v1936_v46 = vpop.permute.xlu0 %1935 }
 0x5fa   : > { %v5073_v60 = vpack.c.bf16 %v4805_v32, %v4803_v39  ;;  %v4259_v4 = vpop.f32.mrb[232].mxu0  ;;  %v14094_v37 = vpop.f32.mrb[122].mxu1 }
 0x5fb   : > { %v4260_v35 = vadd.f32 %v4259_v4, %v1916_v34  ;;  %v4261_v57 = vpop.f32.mrb[233].mxu0  ;;  %v5877_v16 = vpop.f32.mrb[123].mxu1 }
 0x5fc   : > { %v4262_v36 = vadd.f32 %v4261_v57, %v1916_v34  ;;  %v4263_v3 = vpop.f32.mrb[234].mxu0  ;;  %6086 = vmatprep.mubr.bf16.mxu1 %v5073_v60  ;;  %v1931_v38 = vpop.permute.xlu1 %1930 }
 0x5fd   : > { %v4264_v32 = vadd.f32 %v4263_v3, %v1921_v54  ;;  %v4265_v27 = vpop.f32.mrb[235].mxu0  ;;  %6087 = vmatmul.mubr.bf16.gmra.mrb[228].mxu1 %v5072_v5  ;;  %v4806_v8 = vmax.f32 %v4260_v35, 0.0  ;;  %v8018_v35 = vcombine.low %v16789_v24, %v16788_v56 }
 0x5fe   : > { %v4266_v29 = vadd.f32 %v4265_v27, %v1921_v54  ;;  %v4807_v4 = vmax.f32 %v4262_v36, 0.0 }
 0x5ff   : > { %v4808_v39 = vmax.f32 %v4264_v32, 0.0  ;;  %7340 = vmatmul.mubr.bf16.gmra.mrb[84].mxu0 %v8002_v30  ;;  %v16791_v32 = vld [vmem:[#allocation566_spill] sm:$0xff] }
 0x600   : > { %v4809_v12 = vmax.f32 %v4266_v29, 0.0  ;;  %7347 = vmatprep.mubr.bf16.mxu0 %v8019_v11  ;;  %v14102_v34 = vpop.f32.mrb[124].mxu1  ;;  %v16790_v11 = vld [vmem:[#allocation574_spill] sm:$0xff] }
 0x601   : > { %v5074_v9 = vpack.c.bf16 %v4808_v39, %v4806_v8  ;;  %v5882_v60 = vpop.f32.mrb[125].mxu1  ;;  %v8035_v27 = vcombine.high %v16791_v32, %v16790_v11 }
 0x602   : > { %v5075_v57 = vpack.c.bf16 %v4809_v12, %v4807_v4  ;;  %v4269_v16 = vpop.f32.mrb[236].mxu0  ;;  %v14104_v44 = vpop.f32.mrb[126].mxu1 }
 0x603   : > { %v4270_v41 = vadd.f32 %v4269_v16, %v1926_v40  ;;  %v4271_v3 = vpop.f32.mrb[237].mxu0  ;;  %v5885_v30 = vpop.f32.mrb[127].mxu1 }
 0x604   : > { %v4272_v54 = vadd.f32 %v4271_v3, %v1926_v40  ;;  %v4273_v36 = vpop.f32.mrb[238].mxu0  ;;  %6094 = vmatprep.mubr.bf16.mxu1 %v5075_v57  ;;  %v1941_v60 = vpop.permute.xlu1 %1940 }
 0x605   : > { %v4274_v12 = vadd.f32 %v4273_v36, %v1931_v38  ;;  %v4275_v29 = vpop.f32.mrb[239].mxu0  ;;  %6095 = vmatmul.mubr.bf16.gmra.mrb[232].mxu1 %v5074_v9  ;;  %v4810_v39 = vmax.f32 %v4270_v41, 0.0  ;;  %v8034_v41 = vcombine.low %v16791_v32, %v16790_v11  ;;  %v1946_v32 = vpop.permute.xlu0 %1945 }
 0x606   : > { %v4276_v8 = vadd.f32 %v4275_v29, %v1931_v38  ;;  %v4811_v16 = vmax.f32 %v4272_v54, 0.0 }
 0x607   : > { %v4812_v4 = vmax.f32 %v4274_v12, 0.0  ;;  %7348 = vmatmul.mubr.bf16.gmra.mrb[88].mxu0 %v8018_v35  ;;  %v16793_v12 = vld [vmem:[#allocation582_spill] sm:$0xff] }
 0x608   : > { %v4813_v24 = vmax.f32 %v4276_v8, 0.0  ;;  %7355 = vmatprep.mubr.bf16.mxu0 %v8035_v27  ;;  %v14112_v40 = vpop.f32.mrb[128].mxu1  ;;  %v16792_v27 = vld [vmem:[#allocation590_spill] sm:$0xff] }
 0x609   : > { %v5076_v5 = vpack.c.bf16 %v4812_v4, %v4810_v39  ;;  %v5890_v57 = vpop.f32.mrb[129].mxu1  ;;  %v8051_v29 = vcombine.high %v16793_v12, %v16792_v27 }
 0x60a   : > { %v5077_v3 = vpack.c.bf16 %v4813_v24, %v4811_v16  ;;  %v4279_v30 = vpop.f32.mrb[240].mxu0  ;;  %v14114_v48 = vpop.f32.mrb[130].mxu1 }
 0x60b   : > { %v4280_v47 = vadd.f32 %v4279_v30, %v1936_v46  ;;  %v4281_v36 = vpop.f32.mrb[241].mxu0  ;;  %v5893_v35 = vpop.f32.mrb[131].mxu1 }
 0x60c   : > { %v4282_v38 = vadd.f32 %v4281_v36, %v1936_v46  ;;  %v4283_v54 = vpop.f32.mrb[242].mxu0  ;;  %6102 = vmatprep.mubr.bf16.mxu1 %v5077_v3  ;;  %v1951_v57 = vpop.permute.xlu1 %1950 }
 0x60d   : > { %v4284_v24 = vadd.f32 %v4283_v54, %v1941_v60  ;;  %v4285_v8 = vpop.f32.mrb[243].mxu0  ;;  %6103 = vmatmul.mubr.bf16.gmra.mrb[236].mxu1 %v5076_v5  ;;  %v4814_v4 = vmax.f32 %v4280_v47, 0.0  ;;  %v8050_v47 = vcombine.low %v16793_v12, %v16792_v27  ;;  %v1956_v27 = vpop.permute.xlu0 %1955 }
 0x60e   : > { %v4286_v39 = vadd.f32 %v4285_v8, %v1941_v60  ;;  %v4815_v30 = vmax.f32 %v4282_v38, 0.0 }
 0x60f   : > { %v4816_v16 = vmax.f32 %v4284_v24, 0.0  ;;  %7356 = vmatmul.mubr.bf16.gmra.mrb[92].mxu0 %v8034_v41  ;;  %v16795_v24 = vld [vmem:[#allocation598_spill] sm:$0xff] }
 0x610   : > { %v4817_v11 = vmax.f32 %v4286_v39, 0.0  ;;  %7363 = vmatprep.mubr.bf16.mxu0 %v8051_v29  ;;  %v14122_v46 = vpop.f32.mrb[132].mxu1  ;;  %v16794_v29 = vld [vmem:[#allocation606_spill] sm:$0xff] }
 0x611   : > { %v5078_v9 = vpack.c.bf16 %v4816_v16, %v4814_v4  ;;  %v5898_v3 = vpop.f32.mrb[133].mxu1  ;;  %v8067_v8 = vcombine.high %v16795_v24, %v16794_v29 }
 0x612   : > { %v5079_v36 = vpack.c.bf16 %v4817_v11, %v4815_v30  ;;  %v4289_v35 = vpop.f32.mrb[244].mxu0  ;;  %v14124_v50 = vpop.f32.mrb[134].mxu1 }
 0x613   : > { %v4290_v49 = vadd.f32 %v4289_v35, %v1946_v32  ;;  %v4291_v54 = vpop.f32.mrb[245].mxu0  ;;  %v5901_v41 = vpop.f32.mrb[135].mxu1 }
 0x614   : > { %v4292_v60 = vadd.f32 %v4291_v54, %v1946_v32  ;;  %v4293_v38 = vpop.f32.mrb[246].mxu0  ;;  %6110 = vmatprep.mubr.bf16.mxu1 %v5079_v36  ;;  %v1961_v3 = vpop.permute.xlu1 %1960 }
 0x615   : > { %v4294_v11 = vadd.f32 %v4293_v38, %v1951_v57  ;;  %v4295_v39 = vpop.f32.mrb[247].mxu0  ;;  %6111 = vmatmul.mubr.bf16.gmra.mrb[240].mxu1 %v5078_v9  ;;  %v4818_v16 = vmax.f32 %v4290_v49, 0.0  ;;  %v8066_v49 = vcombine.low %v16795_v24, %v16794_v29  ;;  %v1966_v29 = vpop.permute.xlu0 %1965 }
 0x616   : > { %v4296_v4 = vadd.f32 %v4295_v39, %v1951_v57  ;;  %v4819_v35 = vmax.f32 %v4292_v60, 0.0 }
 0x617   : > { %v4820_v30 = vmax.f32 %v4294_v11, 0.0  ;;  %7364 = vmatmul.mubr.bf16.gmra.mrb[96].mxu0 %v8050_v47  ;;  %v16797_v11 = vld [vmem:[#allocation614_spill] sm:$0xff] }
 0x618   : > { %v4821_v12 = vmax.f32 %v4296_v4, 0.0  ;;  %7371 = vmatprep.mubr.bf16.mxu0 %v8067_v8  ;;  %v14132_v32 = vpop.f32.mrb[136].mxu1  ;;  %v16796_v8 = vld [vmem:[#allocation622_spill] sm:$0xff] }
 0x619   : > { %v5080_v5 = vpack.c.bf16 %v4820_v30, %v4818_v16  ;;  %v5906_v36 = vpop.f32.mrb[137].mxu1  ;;  %v8083_v39 = vcombine.high %v16797_v11, %v16796_v8 }
 0x61a   : > { %v5081_v54 = vpack.c.bf16 %v4821_v12, %v4819_v35  ;;  %v4299_v41 = vpop.f32.mrb[248].mxu0  ;;  %v14134_v56 = vpop.f32.mrb[138].mxu1 }
 0x61b   : > { %v4300_v52 = vadd.f32 %v4299_v41, %v1956_v27  ;;  %v4301_v38 = vpop.f32.mrb[249].mxu0  ;;  %v5909_v47 = vpop.f32.mrb[139].mxu1 }
 0x61c   : > { %v4302_v57 = vadd.f32 %v4301_v38, %v1956_v27  ;;  %v4303_v60 = vpop.f32.mrb[250].mxu0  ;;  %6118 = vmatprep.mubr.bf16.mxu1 %v5081_v54  ;;  %v1971_v36 = vpop.permute.xlu1 %1970 }
 0x61d   : > { %v4304_v12 = vadd.f32 %v4303_v60, %v1961_v3  ;;  %v4305_v4 = vpop.f32.mrb[251].mxu0  ;;  %6119 = vmatmul.mubr.bf16.gmra.mrb[244].mxu1 %v5080_v5  ;;  %v4822_v30 = vmax.f32 %v4300_v52, 0.0  ;;  %v8082_v52 = vcombine.low %v16797_v11, %v16796_v8  ;;  %v16801_v5 = vld [vmem:[#allocation579_spill] sm:$0xff] }
 0x61e   : > { %v4306_v16 = vadd.f32 %v4305_v4, %v1961_v3  ;;  %v4823_v41 = vmax.f32 %v4302_v57, 0.0 }
 0x61f   : > { %v4824_v35 = vmax.f32 %v4304_v12, 0.0  ;;  %7372 = vmatmul.mubr.bf16.gmra.mrb[100].mxu0 %v8066_v49  ;;  %v16799_v12 = vld [vmem:[#allocation630_spill] sm:$0xff] }
 0x620   : > { %v4825_v24 = vmax.f32 %v4306_v16, 0.0  ;;  %7379 = vmatprep.mubr.bf16.mxu0 %v8083_v39  ;;  %v14142_v27 = vpop.f32.mrb[140].mxu1  ;;  %v16798_v39 = vld [vmem:[#allocation638_spill] sm:$0xff] }
 0x621   : > { %v5082_v9 = vpack.c.bf16 %v4824_v35, %v4822_v30  ;;  %v5914_v54 = vpop.f32.mrb[141].mxu1  ;;  %v8099_v4 = vcombine.high %v16799_v12, %v16798_v39 }
 0x622   : > { %v5083_v38 = vpack.c.bf16 %v4825_v24, %v4823_v41  ;;  %v4309_v47 = vpop.f32.mrb[252].mxu0  ;;  %v14144_v62 = vpop.f32.mrb[142].mxu1 }
 0x623   : > { %v4310_v58 = vadd.f32 %v4309_v47, %v1966_v29  ;;  %v4311_v60 = vpop.f32.mrb[253].mxu0  ;;  %v5917_v49 = vpop.f32.mrb[143].mxu1 }
 0x624   : > { %v4312_v3 = vadd.f32 %v4311_v60, %v1966_v29  ;;  %v4313_v57 = vpop.f32.mrb[254].mxu0  ;;  %6126 = vmatprep.mubr.bf16.mxu1 %v5083_v38  ;;  %v16800_v38 = vld [vmem:[#allocation587_spill] sm:$0xff] }
 0x625   : > { %v4314_v24 = vadd.f32 %v4313_v57, %v1971_v36  ;;  %v4315_v16 = vpop.f32.mrb[255].mxu0  ;;  %6127 = vmatmul.mubr.bf16.gmra.mrb[248].mxu1 %v5082_v9  ;;  %v4826_v35 = vmax.f32 %v4310_v58, 0.0  ;;  %v8045_v63 = vcombine.high %v16801_v5, %v16800_v38 }
 0x626   : > { %v4316_v30 = vadd.f32 %v4315_v16, %v1971_v36  ;;  %v4827_v54 = vmax.f32 %v4312_v3, 0.0  ;;  %v8098_v36 = vcombine.low %v16799_v12, %v16798_v39  ;;  %v16803_v3 = vld [vmem:[#allocation520_spill] sm:$0xff]  ;;  %v8044_v16 = vcombine.low %v16801_v5, %v16800_v38  ;;  %v16814_v38 = vld [vmem:[#allocation683_spill] sm:$0xff] }
 0x627   : > { %v4828_v41 = vmax.f32 %v4314_v24, 0.0  ;;  %7380 = vmatmul.mubr.bf16.gmra.mrb[104].mxu0 %v8082_v52  ;;  %v16802_v52 = vld [vmem:[#allocation528_spill] sm:$0xff] }
 0x628   : > { %v4829_v47 = vmax.f32 %v4316_v30, 0.0  ;;  %7387 = vmatprep.mubr.bf16.mxu0 %v8099_v4  ;;  %v14152_v11 = vpop.f32.mrb[144].mxu1  ;;  %v7991_v57 = vcombine.high %v16803_v3, %v16802_v52  ;;  %v16813_v12 = vld [vmem:[#allocation684_spill] sm:$0xff]  ;;  %v16828_v52 = vld [vmem:[#allocation687_spill] sm:$0xff] }
 0x629   : > { %v5084_v8 = vpack.c.bf16 %v4828_v41, %v4826_v35  ;;  %v5922_v60 = vpop.f32.mrb[145].mxu1  ;;  %v16804_v35 = vld [vmem:[#allocation603_spill] sm:$0xff] }
 0x62a   : > { %v5085_v29 = vpack.c.bf16 %v4829_v47, %v4827_v54  ;;  %v14154_v49 = vpop.f32.mrb[146].mxu1  ;;  %v16805_v41 = vld [vmem:[#allocation595_spill] sm:$0xff]  ;;  %v16815_v47 = vpack.c.bf16 %v16813_v12, %v16814_v38  ;;  %v16824_v12 = vld [vmem:[#allocation700_spill] sm:$0xff] }
 0x62b   : > { %v5925_v9 = vpop.f32.mrb[147].mxu1  ;;  %v8061_v54 = vcombine.high %v16805_v41, %v16804_v35  ;;  %v8060_v5 = vcombine.low %v16805_v41, %v16804_v35  ;;  %v16822_v35 = vld [vmem:[#allocation685_spill] sm:$0xff]  ;;  %v16825_v38 = vld [vmem:[#allocation660_spill] sm:$0xff] }
 0x62c   : > { %6134 = vmatprep.mubr.bf16.mxu1 %v5085_v29  ;;  %v16810_v9 = vld [vmem:[#allocation698_spill] sm:$0xff] }
 0x62d   : > { %6135 = vmatmul.mubr.bf16.gmra.mrb[252].mxu1 %v5084_v8  ;;  %v16806_v8 = vld [vmem:[#allocation682_spill] sm:$0xff] }
 0x62e   : > { %7072 = vmatprep.mubr.bf16.mxu1 %v8045_v63  ;;  %v16807_v63 = vld [vmem:[#allocation681_spill] sm:$0xff] }
 0x62f   : > { %7388 = vmatmul.mubr.bf16.gmra.mrb[108].mxu0 %v8098_v36  ;;  %v16808_v60 = vpack.c.bf16 %v16806_v8, %v16807_v63  ;;  %v16809_v36 = vld [vmem:[#allocation697_spill] sm:$0xff]  ;;  %v16817_v8 = vld [vmem:[#allocation611_spill] sm:$0xff] }
 0x630   : > { %7525 = vmatprep.mubr.bf16.mxu0 %v7991_v57  ;;  %v14164_v4 = vpop.f32.mrb[148].mxu1  ;;  %v16811_v57 = vpack.c.bf16 %v16809_v36, %v16810_v9  ;;  %v16819_v36 = vld [vmem:[#allocation658_spill] sm:$0xff] }
 0x631   : > { %v5930_v24 = vpop.f32.mrb[149].mxu1 }
 0x632   : > { %v14168_v30 = vpop.f32.mrb[150].mxu1 }
 0x633   : > { %v5933_v29 = vpop.f32.mrb[151].mxu1 }
 0x634   : > { %v16816_v29 = vld [vmem:[#allocation619_spill] sm:$0xff] }
 0x635   : > { %7073 = vmatmul.mubr.bf16.vlgmr.msra.gmra.mrb[0].mxu1 %v8044_v16  ;;  %v8077_v63 = vcombine.high %v16817_v8, %v16816_v29 }
 0x636   : > { %8301 = vmatpush3.bf16.msra.mxu1 %v16808_v60  ;;  %7080 = vmatprep.mubr.bf16.mxu1 %v8061_v54  ;;  %v16818_v60 = vld [vmem:[#allocation699_spill] sm:$0xff]  ;;  %v8076_v54 = vcombine.low %v16817_v8, %v16816_v29 }
 0x637   : > { %8302 = vmatprep.subr.bf16.mxu1 %v16811_v57  ;;  %v16820_v9 = vpack.c.bf16 %v16818_v60, %v16819_v36  ;;  %v16821_v57 = vld [vmem:[#allocation686_spill] sm:$0xff]  ;;  %v16829_v60 = vld [vmem:[#allocation688_spill] sm:$0xff] }
 0x638   : > { %v14180_v24 = vpop.f32.mrb[152].mxu1  ;;  %v16823_v39 = vpack.c.bf16 %v16821_v57, %v16822_v35  ;;  %v16830_v36 = vpack.c.bf16 %v16828_v52, %v16829_v60  ;;  %v16833_v35 = vld [vmem:[#allocation627_spill] sm:$0xff]  ;;  %v16835_v57 = vld [vmem:[#allocation701_spill] sm:$0xff]  ;;  %v16840_v52 = vld [vmem:[#allocation662_spill] sm:$0xff] }
 0x639   : > { %16812 = vst [vmem:[#allocation716_spill] sm:$0xff] %v14180_v24  ;;  %v5938_v58 = vpop.f32.mrb[153].mxu1  ;;  %v16841_v60 = vld [vmem:[#allocation661_spill] sm:$0xff] }
 0x63a   : > { %8303 = vmatpush3.bf16.msra.mxu1 %v16815_v47  ;;  %v14187_v16 = vpop.f32.mrb[154].mxu1  ;;  %v16826_v47 = vpack.c.bf16 %v16824_v12, %v16825_v38  ;;  %v16837_v38 = vld [vmem:[#allocation689_spill] sm:$0xff] }
 0x63b   : > { %8304 = vmatprep.subr.bf16.mxu1 %v16820_v9  ;;  %v5941_v58 = vpop.f32.mrb[155].mxu1  ;;  %v16832_v9 = vld [vmem:[#allocation635_spill] sm:$0xff] }
 0x63c   : > { %v16834_v58 = vld [vmem:[#allocation659_spill] sm:$0xff] }
 0x63d   : > { %7081 = vmatmul.mubr.bf16.gmra.mrb[4].mxu1 %v8060_v5  ;;  %v16836_v12 = vpack.c.bf16 %v16834_v58, %v16835_v57 }
 0x63e   : > { %8305 = vmatpush3.bf16.msra.mxu1 %v16823_v39  ;;  %7088 = vmatprep.mubr.bf16.mxu1 %v8077_v63  ;;  %v8093_v39 = vcombine.high %v16833_v35, %v16832_v9  ;;  %v8092_v63 = vcombine.low %v16833_v35, %v16832_v9  ;;  %v16852_v9 = vld [vmem:[#allocation694_spill] sm:$0xff] }
 0x63f   : > { %8306 = vmatprep.subr.bf16.mxu1 %v16826_v47  ;;  %v16838_v47 = vld [vmem:[#allocation690_spill] sm:$0xff] }
 0x640   : > { %v14202_v41 = vpop.f32.mrb[156].mxu1  ;;  %v16839_v8 = vpack.c.bf16 %v16837_v38, %v16838_v47  ;;  %v16850_v47 = vld [vmem:[#allocation517_spill] sm:$0xff] }
 0x641   : > { %16827 = vst [vmem:[#allocation671_spill] sm:$0xff] %v14202_v41  ;;  %v5946_v3 = vpop.f32.mrb[157].mxu1  ;;  %v16843_v41 = vld [vmem:[#allocation691_spill] sm:$0xff] }
 0x642   : > { %8307 = vmatpush3.bf16.msra.mxu1 %v16830_v36  ;;  %v14209_v5 = vpop.f32.mrb[158].mxu1  ;;  %v16842_v36 = vpack.c.bf16 %v16840_v52, %v16841_v60  ;;  %v14234_v60 = vpop.f32.mrb[0].mxu0 }
 0x643   : > { %16831 = vst [vmem:[#allocation717_spill] sm:$0xff] %v14209_v5  ;;  %8308 = vmatprep.subr.bf16.mxu1 %v16836_v12  ;;  %v5949_v3 = vpop.f32.mrb[159].mxu1  ;;  %v16844_v5 = vld [vmem:[#allocation692_spill] sm:$0xff]  ;;  %v16846_v12 = vld [vmem:[#allocation702_spill] sm:$0xff] }
 0x644   : > { %v16845_v58 = vpack.c.bf16 %v16843_v41, %v16844_v5  ;;  %v16847_v3 = vld [vmem:[#allocation663_spill] sm:$0xff] }
 0x645   : > { %7089 = vmatmul.mubr.bf16.gmra.mrb[8].mxu1 %v8076_v54  ;;  %v16848_v38 = vpack.c.bf16 %v16846_v12, %v16847_v3 }
 0x646   : > { %8309 = vmatpush3.bf16.msra.mxu1 %v16839_v8  ;;  %7096 = vmatprep.mubr.bf16.mxu1 %v8093_v39  ;;  %v16849_v39 = vld [vmem:[#allocation525_spill] sm:$0xff] }
 0x647   : > { %8310 = vmatprep.subr.bf16.mxu1 %v16842_v36  ;;  %v7985_v52 = vcombine.high %v16850_v47, %v16849_v39  ;;  %v16851_v36 = vld [vmem:[#allocation693_spill] sm:$0xff] }
 0x648   : > { %v5952_v29 = vpop.f32.mrb[160].mxu1  ;;  %v16853_v41 = vpack.c.bf16 %v16851_v36, %v16852_v9  ;;  %v7984_v9 = vcombine.low %v16850_v47, %v16849_v39 }
 0x649   : > { %v5954_v24 = vpop.f32.mrb[161].mxu1 }
 0x64a   : > { %8311 = vmatpush3.bf16.msra.mxu1 %v16845_v58  ;;  %v5955_v57 = vpop.f32.mrb[162].mxu1  ;;  %v14236_v24 = vpop.f32.mrb[1].mxu0  ;;  %v16855_v58 = vld [vmem:[#allocation703_spill] sm:$0xff] }
 0x64b   : > { %v6247_v54 = vpack.c.bf16 %v5955_v57, %v5952_v29  ;;  %8312 = vmatprep.subr.bf16.mxu1 %v16848_v38  ;;  %v5957_v8 = vpop.f32.mrb[163].mxu1  ;;  %v16854_v29 = vpack.c.bf16 %v14114_v48, %v14112_v40  ;;  %v14244_v5 = vpop.f32.mrb[2].mxu0  ;;  %v16856_v57 = vld [vmem:[#allocation704_spill] sm:$0xff]  ;;  %v16859_v48 = vld [vmem:[#allocation695_spill] sm:$0xff] }
 0x64c   : > { %v16857_v12 = vpack.c.bf16 %v16855_v58, %v16856_v57  ;;  %v14249_v3 = vpop.f32.mrb[3].mxu0  ;;  %v16860_v40 = vld [vmem:[#allocation696_spill] sm:$0xff] }
 0x64d   : > { %7097 = vmatmul.mubr.bf16.gmra.mrb[12].mxu1 %v8092_v63  ;;  %8492 = vmatprep.subr.bf16.mxu0 %v6247_v54  ;;  %v14251_v54 = vpop.f32.mrb[4].mxu0  ;;  %v16861_v36 = vpack.c.bf16 %v16859_v48, %v16860_v40  ;;  %v16865_v40 = vpack.c.bf16 %v13861_v53, %v13859_v19 }
 0x64e   : > { %8313 = vmatpush3.bf16.msra.mxu1 %v16853_v41  ;;  %8493 = vmatpush3.bf16.msra.mxu0 %v16854_v29  ;;  %16858 = vst [vmem:[#allocation672_spill] sm:$0xff] %v14251_v54  ;;  %v14255_v8 = vpop.f32.mrb[5].mxu0 }
 0x64f   : > { %8314 = vmatprep.subr.bf16.mxu1 %v16857_v12  ;;  %7234 = vmatprep.mubr.bf16.mxu1 %v7985_v52  ;;  %v14260_v29 = vpop.f32.mrb[6].mxu0  ;;  %v16862_v52 = vpack.c.bf16 %v14019_v33, %v14014_v17  ;;  %v16863_v12 = vld [vmem:[#allocation541_spill] sm:$0xff]  ;;  %v16866_v17 = vpack.c.bf16 %v14124_v50, %v14122_v46  ;;  %v16868_v50 = vpack.c.bf16 %v13871_v55, %v13869_v43 }
 0x650   : > { %v5960_v63 = vpop.f32.mrb[164].mxu1  ;;  %v14267_v54 = vpop.f32.mrb[7].mxu0  ;;  %v16872_v43 = vpack.c.bf16 %v13887_v6, %v13882_v18 }
 0x651   : > { %v5962_v38 = vpop.f32.mrb[165].mxu1  ;;  %v14269_v39 = vpop.f32.mrb[8].mxu0 }
 0x652   : > { %8315 = vmatpush3.bf16.msra.mxu1 %v16861_v36  ;;  %v5963_v41 = vpop.f32.mrb[166].mxu1  ;;  %v16864_v38 = vld [vmem:[#allocation533_spill] sm:$0xff]  ;;  %v14271_v48 = vpop.f32.mrb[9].mxu0 }
 0x653   : > { %v6248_v58 = vpack.c.bf16 %v5963_v41, %v5960_v63  ;;  %8428 = vmatprep.subr.bf16.mxu1 %v16862_v52  ;;  %v5965_v57 = vpop.f32.mrb[167].mxu1  ;;  %v8001_v35 = vcombine.high %v16864_v38, %v16863_v12  ;;  %v14279_v33 = vpop.f32.mrb[10].mxu0  ;;  %v16867_v63 = vpack.c.bf16 %v14041_v14, %v14036_v7  ;;  %v8000_v53 = vcombine.low %v16864_v38, %v16863_v12 }
 0x654   : > { %v14284_v36 = vpop.f32.mrb[11].mxu0  ;;  %v16869_v14 = vpack.c.bf16 %v14054_v1, %v14052_v45  ;;  %v16870_v57 = vld [vmem:[#allocation557_spill] sm:$0xff]  ;;  %v16873_v1 = vpack.c.bf16 %v14134_v56, %v14132_v32  ;;  %v16875_v56 = vpack.c.bf16 %v13909_v15, %v13904_v25  ;;  %v16879_v15 = vpack.c.bf16 %v13931_v51, %v13926_v59 }
 0x655   : > { %7235 = vmatmul.mubr.bf16.vlgmr.msra.gmra.mrb[16].mxu1 %v7984_v9  ;;  %8494 = vmatprep.subr.bf16.mxu0 %v6248_v58  ;;  %v14286_v41 = vpop.f32.mrb[12].mxu0 }
 0x656   : > { %8429 = vmatpush3.bf16.msra.mxu1 %v16865_v40  ;;  %8495 = vmatpush3.bf16.msra.mxu0 %v16866_v17  ;;  %v14290_v19 = vpop.f32.mrb[13].mxu0  ;;  %v16871_v40 = vld [vmem:[#allocation549_spill] sm:$0xff] }
 0x657   : > { %8430 = vmatprep.subr.bf16.mxu1 %v16867_v63  ;;  %7242 = vmatprep.mubr.bf16.mxu1 %v8001_v35  ;;  %v14295_v52 = vpop.f32.mrb[14].mxu0  ;;  %v8017_v17 = vcombine.high %v16871_v40, %v16870_v57  ;;  %v8016_v18 = vcombine.low %v16871_v40, %v16870_v57 }
 0x658   : > { %v5968_v9 = vpop.f32.mrb[168].mxu1  ;;  %v14302_v63 = vpop.f32.mrb[15].mxu0 }
 0x659   : > { %v5970_v58 = vpop.f32.mrb[169].mxu1 }
 0x65a   : > { %8431 = vmatpush3.bf16.msra.mxu1 %v16868_v50  ;;  %v5971_v46 = vpop.f32.mrb[170].mxu1  ;;  %v14304_v58 = vpop.f32.mrb[16].mxu0 }
 0x65b   : > { %v6249_v7 = vpack.c.bf16 %v5971_v46, %v5968_v9  ;;  %8432 = vmatprep.subr.bf16.mxu1 %v16869_v14  ;;  %v5973_v35 = vpop.f32.mrb[171].mxu1  ;;  %v14306_v55 = vpop.f32.mrb[17].mxu0  ;;  %v16874_v9 = vpack.c.bf16 %v14064_v10, %v14062_v22  ;;  %v16876_v22 = vpack.c.bf16 %v14074_v21, %v14072_v0  ;;  %v16880_v21 = vpack.c.bf16 %v14144_v62, %v14142_v27 }
 0x65c   : > { %v14314_v45 = vpop.f32.mrb[18].mxu0  ;;  %v16882_v62 = vpack.c.bf16 %v13953_v28, %v13948_v2  ;;  %v16886_v2 = vpack.c.bf16 %v13975_v61, %v13970_v42  ;;  %v16887_v28 = vpack.c.bf16 %v14154_v49, %v14152_v11  ;;  %v16889_v42 = vpack.c.bf16 %v13997_v23, %v13992_v20  ;;  %v16890_v11 = vld [vmem:[#allocation605_spill] sm:$0xff] }
 0x65d   : > { %8496 = vmatprep.subr.bf16.mxu0 %v6249_v7  ;;  %7243 = vmatmul.mubr.bf16.gmra.mrb[20].mxu1 %v8000_v53  ;;  %v14319_v50 = vpop.f32.mrb[19].mxu0  ;;  %v16891_v49 = vld [vmem:[#allocation597_spill] sm:$0xff] }
 0x65e   : > { %8433 = vmatpush3.bf16.msra.mxu1 %v16872_v43  ;;  %8497 = vmatpush3.bf16.msra.mxu0 %v16873_v1  ;;  %v14321_v46 = vpop.f32.mrb[20].mxu0  ;;  %v16878_v43 = vld [vmem:[#allocation565_spill] sm:$0xff]  ;;  %v8064_v20 = vcombine.low %v16891_v49, %v16890_v11 }
 0x65f   : > { %8434 = vmatprep.subr.bf16.mxu1 %v16874_v9  ;;  %7250 = vmatprep.mubr.bf16.mxu1 %v8017_v17  ;;  %v14325_v6 = vpop.f32.mrb[21].mxu0  ;;  %v16877_v17 = vld [vmem:[#allocation573_spill] sm:$0xff] }
 0x660   : > { %v5976_v53 = vpop.f32.mrb[172].mxu1  ;;  %v14330_v14 = vpop.f32.mrb[22].mxu0  ;;  %v8033_v1 = vcombine.high %v16878_v43, %v16877_v17  ;;  %v8032_v59 = vcombine.low %v16878_v43, %v16877_v17 }
 0x661   : > { %v5978_v7 = vpop.f32.mrb[173].mxu1  ;;  %v14337_v9 = vpop.f32.mrb[23].mxu0 }
 0x662   : > { %8435 = vmatpush3.bf16.msra.mxu1 %v16875_v56  ;;  %v5979_v32 = vpop.f32.mrb[174].mxu1  ;;  %v14339_v7 = vpop.f32.mrb[24].mxu0 }
 0x663   : > { %v6250_v10 = vpack.c.bf16 %v5979_v32, %v5976_v53  ;;  %8436 = vmatprep.subr.bf16.mxu1 %v16876_v22  ;;  %v5981_v35 = vpop.f32.mrb[175].mxu1  ;;  %v14341_v25 = vpop.f32.mrb[25].mxu0  ;;  %v16881_v53 = vpack.c.bf16 %v14084_v31, %v14082_v13  ;;  %v16883_v13 = vpack.c.bf16 %v14094_v37, %v14092_v26  ;;  %v16888_v26 = vpack.c.bf16 %v14104_v44, %v14102_v34 }
 0x664   : > { %v14349_v0 = vpop.f32.mrb[26].mxu0 }
 0x665   : > { %8498 = vmatprep.subr.bf16.mxu0 %v6250_v10  ;;  %7251 = vmatmul.mubr.bf16.gmra.mrb[24].mxu1 %v8016_v18  ;;  %v14354_v56 = vpop.f32.mrb[27].mxu0 }
 0x666   : > { %8437 = vmatpush3.bf16.msra.mxu1 %v16879_v15  ;;  %8499 = vmatpush3.bf16.msra.mxu0 %v16880_v21  ;;  %v14356_v32 = vpop.f32.mrb[28].mxu0  ;;  %v16885_v15 = vld [vmem:[#allocation581_spill] sm:$0xff] }
 0x667   : > { %8438 = vmatprep.subr.bf16.mxu1 %v16881_v53  ;;  %7258 = vmatprep.mubr.bf16.mxu1 %v8033_v1  ;;  %v14360_v51 = vpop.f32.mrb[29].mxu0  ;;  %v16884_v1 = vld [vmem:[#allocation589_spill] sm:$0xff] }
 0x668   : > { %v5984_v18 = vpop.f32.mrb[176].mxu1  ;;  %v14365_v22 = vpop.f32.mrb[30].mxu0  ;;  %v8049_v21 = vcombine.high %v16885_v15, %v16884_v1 }
 0x669   : > { %v5986_v10 = vpop.f32.mrb[177].mxu1  ;;  %v14372_v53 = vpop.f32.mrb[31].mxu0 }
 0x66a   : > { %8439 = vmatpush3.bf16.msra.mxu1 %v16882_v62  ;;  %v5987_v27 = vpop.f32.mrb[178].mxu1  ;;  %v8188_v10 = vpop.f32.mrb[32].mxu0 }
 0x66b   : > { %v6251_v31 = vpack.c.bf16 %v5987_v27, %v5984_v18  ;;  %8440 = vmatprep.subr.bf16.mxu1 %v16883_v13  ;;  %v5989_v35 = vpop.f32.mrb[179].mxu1  ;;  %v8189_v12 = vpop.f32.mrb[33].mxu0  ;;  %v8065_v13 = vcombine.high %v16891_v49, %v16890_v11  ;;  %v16897_v11 = vld [vmem:[#allocation642_spill] sm:$0xff] }
 0x66c   : > { %v8191_v37 = vpop.f32.mrb[34].mxu0 }
 0x66d   : > { %8500 = vmatprep.subr.bf16.mxu0 %v6251_v31  ;;  %7259 = vmatmul.mubr.bf16.gmra.mrb[28].mxu1 %v8032_v59  ;;  %v8192_v18 = vpop.f32.mrb[35].mxu0  ;;  %v8048_v59 = vcombine.low %v16885_v15, %v16884_v1  ;;  %v16893_v1 = vld [vmem:[#allocation621_spill] sm:$0xff] }
 0x66e   : > { %8441 = vmatpush3.bf16.msra.mxu1 %v16886_v2  ;;  %8501 = vmatpush3.bf16.msra.mxu0 %v16887_v28  ;;  %v16892_v28 = vpack.c.bf16 %v14168_v30, %v14164_v4  ;;  %v8126_v4 = vadd.f32 %v14236_v24, %v14234_v60  ;;  %v8129_v30 = vadd.f32 %v14249_v3, %v14244_v5 }
 0x66f   : > { %8442 = vmatprep.subr.bf16.mxu1 %v16888_v26  ;;  %7266 = vmatprep.mubr.bf16.mxu1 %v8049_v21  ;;  %v8193_v38 = vadd.f32 %v8192_v18, %v8191_v37  ;;  %v16903_v18 = vld [vmem:[#allocation520_spill] sm:$0xff] }
 0x670   : > { %v5992_v62 = vpop.f32.mrb[180].mxu1  ;;  %v6946_v17 = vadd.f32 %v8126_v4, %v16897_v11 }
 0x671   : > { %v5994_v27 = vpop.f32.mrb[181].mxu1 }
 0x672   : > { %v8194_v31 = vpop.f32.mrb[36].mxu0  ;;  %8443 = vmatpush3.bf16.msra.mxu1 %v16889_v42  ;;  %v5995_v61 = vpop.f32.mrb[182].mxu1 }
 0x673   : > { %v8195_v35 = vpop.f32.mrb[37].mxu0  ;;  %v6252_v2 = vpack.c.bf16 %v5995_v61, %v5992_v62  ;;  %v5997_v44 = vpop.f32.mrb[183].mxu1  ;;  %v16894_v62 = vld [vmem:[#allocation613_spill] sm:$0xff] }
 0x674   : > { %v8197_v34 = vpop.f32.mrb[38].mxu0  ;;  %v8081_v61 = vcombine.high %v16894_v62, %v16893_v1  ;;  %v8080_v24 = vcombine.low %v16894_v62, %v16893_v1 }
 0x675   : > { %v8198_v21 = vpop.f32.mrb[39].mxu0  ;;  %8502 = vmatprep.subr.bf16.mxu0 %v6252_v2  ;;  %7267 = vmatmul.mubr.bf16.gmra.mrb[32].mxu1 %v8048_v59 }
 0x676   : > { %8503 = vmatpush3.bf16.msra.mxu0 %v16892_v28  ;;  %7274 = vmatprep.mubr.bf16.mxu1 %v8065_v13  ;;  %v16895_v28 = vld [vmem:[#allocation716_spill] sm:$0xff] }
 0x678   : > { %v6000_v26 = vpop.f32.mrb[184].mxu1 }
 0x679   : > { %v6002_v27 = vpop.f32.mrb[185].mxu1 }
 0x67a   : > { %v14395_v23 = vpop.f32.mrb[40].mxu0  ;;  %v6003_v42 = vpop.f32.mrb[186].mxu1  ;;  %v16896_v27 = vpack.c.bf16 %v14187_v16, %v16895_v28  ;;  %v16900_v16 = vld [vmem:[#allocation629_spill] sm:$0xff] }
 0x67b   : > { %v14399_v44 = vpop.f32.mrb[41].mxu0  ;;  %v6253_v2 = vpack.c.bf16 %v6003_v42, %v6000_v26  ;;  %v6005_v59 = vpop.f32.mrb[187].mxu1  ;;  %v16898_v26 = vld [vmem:[#allocation643_spill] sm:$0xff] }
 0x67c   : > { %v14401_v15 = vpop.f32.mrb[42].mxu0  ;;  %v6949_v42 = vadd.f32 %v8129_v30, %v16898_v26  ;;  %v8190_v59 = vadd.f32 %v8189_v12, %v8188_v10  ;;  %v16901_v12 = vld [vmem:[#allocation672_spill] sm:$0xff]  ;;  %v8135_v10 = vadd.f32 %v14267_v54, %v14260_v29  ;;  %v16904_v26 = vld [vmem:[#allocation717_spill] sm:$0xff]  ;;  %v8196_v54 = vadd.f32 %v8195_v35, %v8194_v31 }
 0x67d   : > { %v8204_v13 = vpop.f32.mrb[43].mxu0  ;;  %8504 = vmatprep.subr.bf16.mxu0 %v6253_v2  ;;  %7275 = vmatmul.mubr.bf16.gmra.mrb[36].mxu1 %v8064_v20  ;;  %v16899_v2 = vld [vmem:[#allocation637_spill] sm:$0xff]  ;;  %v8199_v29 = vadd.f32 %v8198_v21, %v8197_v34 }
 0x67e   : > { %8505 = vmatpush3.bf16.msra.mxu0 %v16896_v27  ;;  %7282 = vmatprep.mubr.bf16.mxu1 %v8081_v61  ;;  %v7043_v43 = vadd.f32 %v8190_v59, %v6946_v17  ;;  %v7046_v5 = vadd.f32 %v8193_v38, %v6949_v42  ;;  %v8097_v28 = vcombine.high %v16900_v16, %v16899_v2  ;;  %v16902_v38 = vld [vmem:[#allocation528_spill] sm:$0xff]  ;;  %v16905_v42 = vld [vmem:[#allocation671_spill] sm:$0xff] }
 0x67f   : > { %v8132_v17 = vadd.f32 %v14255_v8, %v16901_v12  ;;  %v7990_v27 = vcombine.low %v16903_v18, %v16902_v38  ;;  %v16906_v59 = vpack.c.bf16 %v16904_v26, %v16905_v42  ;;  %v16910_v12 = vld [vmem:[#allocation645_spill] sm:$0xff]  ;;  %v16911_v42 = vld [vmem:[#allocation527_spill] sm:$0xff] }
 0x680   : > { %v6008_v40 = vpop.f32.mrb[188].mxu1  ;;  %v6957_v1 = vadd.f32 %v8135_v10, %v16910_v12  ;;  %v8138_v10 = vadd.f32 %v14271_v48, %v14269_v39  ;;  %v8202_v39 = vadd.f32 %v14399_v44, %v14395_v23  ;;  %v8205_v48 = vadd.f32 %v8204_v13, %v14401_v15  ;;  %v16931_v15 = vld [vmem:[#allocation591_spill] sm:$0xff] }
 0x681   : > { %v6010_v60 = vpop.f32.mrb[189].mxu1 }
 0x682   : > { %v14414_v3 = vpop.f32.mrb[44].mxu0  ;;  %v6011_v20 = vpop.f32.mrb[190].mxu1  ;;  %v16908_v60 = vld [vmem:[#allocation536_spill] sm:$0xff]  ;;  %v7054_v18 = vadd.f32 %v8199_v29, %v6957_v1  ;;  %v8141_v1 = vadd.f32 %v14284_v36, %v14279_v33 }
 0x683   : > { %v14418_v61 = vpop.f32.mrb[45].mxu0  ;;  %v6254_v11 = vpack.c.bf16 %v6011_v20, %v6008_v40  ;;  %v6013_v4 = vpop.f32.mrb[191].mxu1  ;;  %v16907_v40 = vld [vmem:[#allocation544_spill] sm:$0xff] }
 0x684   : > { %v14420_v30 = vpop.f32.mrb[46].mxu0  ;;  %v8007_v20 = vcombine.high %v16908_v60, %v16907_v40  ;;  %v16909_v4 = vld [vmem:[#allocation644_spill] sm:$0xff] }
 0x685   : > { %v14426_v37 = vpop.f32.mrb[47].mxu0  ;;  %8506 = vmatprep.subr.bf16.mxu0 %v6254_v11  ;;  %7283 = vmatmul.mubr.bf16.gmra.mrb[40].mxu1 %v8080_v24  ;;  %v6954_v8 = vadd.f32 %v8132_v17, %v16909_v4  ;;  %v8096_v11 = vcombine.low %v16900_v16, %v16899_v2  ;;  %v8006_v4 = vcombine.low %v16908_v60, %v16907_v40 }
 0x686   : > { %8507 = vmatpush3.bf16.msra.mxu0 %v16906_v59  ;;  %7290 = vmatprep.mubr.bf16.mxu1 %v8097_v28  ;;  %v16912_v59 = vld [vmem:[#allocation519_spill] sm:$0xff] }
 0x687   : > { %v7051_v38 = vadd.f32 %v8196_v54, %v6954_v8  ;;  %v7989_v49 = vcombine.high %v16912_v59, %v16911_v42  ;;  %v16913_v8 = vld [vmem:[#allocation560_spill] sm:$0xff] }
 0x688   : > { %v14437_v47 = vpop.f32.mrb[192].mxu1 }
 0x689   : > { %v6018_v24 = vpop.f32.mrb[193].mxu1  ;;  %7526 = vmatmul.mubr.bf16.vlgmr.msra.gmra.mrb[112].mxu0 %v7990_v27 }
 0x68a   : > { %v8252_v26 = vpop.f32.mrb[48].mxu0  ;;  %v14441_v28 = vpop.f32.mrb[194].mxu1  ;;  %7533 = vmatprep.mubr.bf16.mxu0 %v8007_v20  ;;  %v16914_v20 = vld [vmem:[#allocation552_spill] sm:$0xff]  ;;  %v16915_v24 = vld [vmem:[#allocation646_spill] sm:$0xff] }
 0x68b   : > { %v8253_v17 = vpop.f32.mrb[49].mxu0  ;;  %v6021_v35 = vpop.f32.mrb[195].mxu1  ;;  %v8023_v12 = vcombine.high %v16914_v20, %v16913_v8 }
 0x68c   : > { %v8254_v34 = vadd.f32 %v8253_v17, %v8252_v26  ;;  %v8255_v21 = vpop.f32.mrb[50].mxu0  ;;  %v6962_v26 = vadd.f32 %v8138_v10, %v16915_v24  ;;  %v16916_v17 = vld [vmem:[#allocation647_spill] sm:$0xff]  ;;  %v16919_v24 = vld [vmem:[#allocation576_spill] sm:$0xff] }
 0x68d   : > { %v8256_v27 = vpop.f32.mrb[51].mxu0  ;;  %7291 = vmatmul.mubr.bf16.gmra.mrb[44].mxu1 %v8096_v11  ;;  %v6965_v35 = vadd.f32 %v8141_v1, %v16916_v17  ;;  %v16918_v10 = vld [vmem:[#allocation535_spill] sm:$0xff] }
 0x68e   : > { %v14455_v54 = vadd.f32 %v8254_v34, %v7043_v43  ;;  %v8257_v29 = vadd.f32 %v8256_v27, %v8255_v21  ;;  %7428 = vmatprep.mubr.bf16.mxu1 %v7989_v49  ;;  %v7059_v11 = vadd.f32 %v8202_v39, %v6962_v26  ;;  %v7988_v43 = vcombine.low %v16912_v59, %v16911_v42  ;;  %v16917_v21 = vld [vmem:[#allocation543_spill] sm:$0xff]  ;;  %v16921_v39 = vld [vmem:[#allocation648_spill] sm:$0xff] }
 0x68f   : > { %v7062_v31 = vadd.f32 %v8205_v48, %v6965_v35  ;;  %v8005_v1 = vcombine.high %v16918_v10, %v16917_v21  ;;  %v8147_v27 = vadd.f32 %v14302_v63, %v14295_v52 }
 0x690   : > { %v14462_v33 = vadd.f32 %v8257_v29, %v7046_v5  ;;  %v14464_v36 = vpop.f32.mrb[196].mxu1  ;;  %v8022_v29 = vcombine.low %v16914_v20, %v16913_v8 }
 0x691   : > { %v6026_v2 = vpop.f32.mrb[197].mxu1  ;;  %7534 = vmatmul.mubr.bf16.gmra.mrb[116].mxu0 %v8006_v4 }
 0x692   : > { %v8258_v49 = vpop.f32.mrb[52].mxu0  ;;  %v14468_v34 = vpop.f32.mrb[198].mxu1  ;;  %7541 = vmatprep.mubr.bf16.mxu0 %v8023_v12  ;;  %v8144_v2 = vadd.f32 %v14290_v19, %v14286_v41  ;;  %v16920_v12 = vld [vmem:[#allocation568_spill] sm:$0xff]  ;;  %v8208_v41 = vadd.f32 %v14418_v61, %v14414_v3  ;;  %v8211_v19 = vadd.f32 %v14426_v37, %v14420_v30 }
 0x693   : > { %v8259_v23 = vpop.f32.mrb[53].mxu0  ;;  %v6029_v44 = vpop.f32.mrb[199].mxu1  ;;  %v8039_v26 = vcombine.high %v16920_v12, %v16919_v24 }
 0x694   : > { %v8260_v13 = vadd.f32 %v8259_v23, %v8258_v49  ;;  %v8261_v5 = vpop.f32.mrb[54].mxu0  ;;  %v6970_v48 = vadd.f32 %v8144_v2, %v16921_v39  ;;  %v16922_v49 = vld [vmem:[#allocation649_spill] sm:$0xff]  ;;  %v16923_v2 = vld [vmem:[#allocation559_spill] sm:$0xff] }
 0x695   : > { %v8262_v4 = vpop.f32.mrb[55].mxu0  ;;  %7429 = vmatmul.mubr.bf16.vlgmr.msra.gmra.mrb[48].mxu1 %v7988_v43  ;;  %v6973_v23 = vadd.f32 %v8147_v27, %v16922_v49  ;;  %v16924_v27 = vld [vmem:[#allocation551_spill] sm:$0xff] }
 0x696   : > { %v14482_v17 = vadd.f32 %v8260_v13, %v7051_v38  ;;  %v8263_v35 = vadd.f32 %v8262_v4, %v8261_v5  ;;  %7436 = vmatprep.mubr.bf16.mxu1 %v8005_v1  ;;  %v7067_v43 = vadd.f32 %v8208_v41, %v6970_v48  ;;  %v8004_v1 = vcombine.low %v16918_v10, %v16917_v21  ;;  %v16926_v41 = vld [vmem:[#allocation584_spill] sm:$0xff] }
 0x697   : > { %v7070_v44 = vadd.f32 %v8211_v19, %v6973_v23  ;;  %v8021_v3 = vcombine.high %v16924_v27, %v16923_v2  ;;  %v16925_v23 = vld [vmem:[#allocation592_spill] sm:$0xff] }
 0x698   : > { %v14490_v52 = vadd.f32 %v8263_v35, %v7054_v18  ;;  %v14492_v63 = vpop.f32.mrb[200].mxu1  ;;  %v14504_v35 = vadd.f32 %v14306_v55, %v14304_v58  ;;  %v8055_v19 = vcombine.high %v16926_v41, %v16925_v23 }
 0x699   : > { %v6034_v38 = vpop.f32.mrb[201].mxu1  ;;  %7542 = vmatmul.mubr.bf16.gmra.mrb[120].mxu0 %v8022_v29  ;;  %v14508_v29 = vadd.f32 %v14319_v50, %v14314_v45  ;;  %v8020_v45 = vcombine.low %v16924_v27, %v16923_v2 }
 0x69a   : > { %v8264_v13 = vpop.f32.mrb[56].mxu0  ;;  %v14496_v5 = vpop.f32.mrb[202].mxu1  ;;  %7549 = vmatprep.mubr.bf16.mxu0 %v8039_v26  ;;  %v8038_v26 = vcombine.low %v16920_v12, %v16919_v24 }
 0x69b   : > { %v8265_v61 = vpop.f32.mrb[57].mxu0  ;;  %v6037_v37 = vpop.f32.mrb[203].mxu1 }
 0x69c   : > { %v8266_v18 = vadd.f32 %v8265_v61, %v8264_v13  ;;  %v8267_v4 = vpop.f32.mrb[58].mxu0  ;;  %v16927_v13 = vld [vmem:[#allocation575_spill] sm:$0xff] }
 0x69d   : > { %v8268_v39 = vpop.f32.mrb[59].mxu0  ;;  %7437 = vmatmul.mubr.bf16.gmra.mrb[52].mxu1 %v8004_v1 }
 0x69e   : > { %v14512_v48 = vadd.f32 %v8266_v18, %v7059_v11  ;;  %v8269_v49 = vadd.f32 %v8268_v39, %v8267_v4  ;;  %7444 = vmatprep.mubr.bf16.mxu1 %v8021_v3  ;;  %v16928_v11 = vld [vmem:[#allocation567_spill] sm:$0xff]  ;;  %v14530_v39 = vadd.f32 %v14325_v6, %v14321_v46 }
 0x69f   : > { %v8037_v61 = vcombine.high %v16928_v11, %v16927_v13 }
 0x6a0   : > { %v14516_v38 = vadd.f32 %v8269_v49, %v7062_v31  ;;  %v14518_v58 = vpop.f32.mrb[204].mxu1 }
 0x6a1   : > { %v6042_v55 = vpop.f32.mrb[205].mxu1  ;;  %7550 = vmatmul.mubr.bf16.gmra.mrb[124].mxu0 %v8038_v26  ;;  %v14534_v26 = vadd.f32 %v14337_v9, %v14330_v14  ;;  %v8036_v14 = vcombine.low %v16928_v11, %v16927_v13 }
 0x6a2   : > { %v8270_v50 = vpop.f32.mrb[60].mxu0  ;;  %v14522_v1 = vpop.f32.mrb[206].mxu1  ;;  %7557 = vmatprep.mubr.bf16.mxu0 %v8055_v19  ;;  %v8054_v19 = vcombine.low %v16926_v41, %v16925_v23 }
 0x6a3   : > { %v8271_v3 = vpop.f32.mrb[61].mxu0  ;;  %v6045_v31 = vpop.f32.mrb[207].mxu1 }
 0x6a4   : > { %v8272_v18 = vadd.f32 %v8271_v3, %v8270_v50  ;;  %v8273_v4 = vpop.f32.mrb[62].mxu0  ;;  %v16929_v31 = vld [vmem:[#allocation608_spill] sm:$0xff] }
 0x6a5   : > { %v8274_v49 = vpop.f32.mrb[63].mxu0  ;;  %7445 = vmatmul.mubr.bf16.gmra.mrb[56].mxu1 %v8020_v45  ;;  %v16930_v50 = vld [vmem:[#allocation600_spill] sm:$0xff] }
 0x6a6   : > { %v14538_v55 = vadd.f32 %v8272_v18, %v7067_v43  ;;  %v8275_v30 = vadd.f32 %v8274_v49, %v8273_v4  ;;  %7452 = vmatprep.mubr.bf16.mxu1 %v8037_v61  ;;  %v8071_v3 = vcombine.high %v16930_v50, %v16929_v31  ;;  %v16932_v43 = vld [vmem:[#allocation583_spill] sm:$0xff] }
 0x6a7   : > { %v8053_v18 = vcombine.high %v16932_v43, %v16931_v15 }
 0x6a8   : > { %v14542_v37 = vadd.f32 %v8275_v30, %v7070_v44  ;;  %v14544_v46 = vpop.f32.mrb[208].mxu1 }
 0x6a9   : > { %v6050_v6 = vpop.f32.mrb[209].mxu1  ;;  %7558 = vmatmul.mubr.bf16.gmra.mrb[128].mxu0 %v8054_v19  ;;  %v14562_v19 = vadd.f32 %v14354_v56, %v14349_v0  ;;  %v16935_v56 = vld [vmem:[#allocation607_spill] sm:$0xff] }
 0x6aa   : > { %v8276_v9 = vpop.f32.mrb[64].mxu0  ;;  %v14548_v45 = vpop.f32.mrb[210].mxu1  ;;  %7565 = vmatprep.mubr.bf16.mxu0 %v8071_v3  ;;  %v14558_v6 = vadd.f32 %v14341_v25, %v14339_v7  ;;  %v8070_v3 = vcombine.low %v16930_v50, %v16929_v31  ;;  %v8052_v7 = vcombine.low %v16932_v43, %v16931_v15 }
 0x6ab   : > { %v8277_v61 = vpop.f32.mrb[65].mxu0  ;;  %v6053_v44 = vpop.f32.mrb[211].mxu1 }
 0x6ac   : > { %v14554_v30 = vadd.f32 %v8277_v61, %v8276_v9  ;;  %v8279_v49 = vpop.f32.mrb[66].mxu0  ;;  %v16933_v44 = vld [vmem:[#allocation624_spill] sm:$0xff] }
 0x6ad   : > { %v8280_v2 = vpop.f32.mrb[67].mxu0  ;;  %7453 = vmatmul.mubr.bf16.gmra.mrb[60].mxu1 %v8036_v14  ;;  %v16934_v9 = vld [vmem:[#allocation616_spill] sm:$0xff]  ;;  %v16936_v14 = vld [vmem:[#allocation599_spill] sm:$0xff] }
 0x6ae   : > { %v14566_v8 = vadd.f32 %v8280_v2, %v8279_v49  ;;  %7460 = vmatprep.mubr.bf16.mxu1 %v8053_v18  ;;  %v8087_v61 = vcombine.high %v16934_v9, %v16933_v44  ;;  %v8069_v11 = vcombine.high %v16936_v14, %v16935_v56 }
 0x6b0   : > { %v14570_v4 = vpop.f32.mrb[212].mxu1 }
 0x6b1   : > { %v6058_v10 = vpop.f32.mrb[213].mxu1  ;;  %7566 = vmatmul.mubr.bf16.gmra.mrb[132].mxu0 %v8070_v3  ;;  %v14588_v3 = vadd.f32 %v14372_v53, %v14365_v22  ;;  %v16939_v53 = vld [vmem:[#allocation623_spill] sm:$0xff] }
 0x6b2   : > { %v8282_v25 = vpop.f32.mrb[68].mxu0  ;;  %v14574_v0 = vpop.f32.mrb[214].mxu1  ;;  %7573 = vmatprep.mubr.bf16.mxu0 %v8087_v61  ;;  %v14584_v10 = vadd.f32 %v14360_v51, %v14356_v32  ;;  %v8086_v61 = vcombine.low %v16934_v9, %v16933_v44  ;;  %v8068_v32 = vcombine.low %v16936_v14, %v16935_v56  ;;  %v16943_v44 = vld [vmem:[#allocation529_spill] sm:$0xff] }
 0x6b3   : > { %v8283_v2 = vpop.f32.mrb[69].mxu0  ;;  %v6061_v49 = vpop.f32.mrb[215].mxu1 }
 0x6b4   : > { %v14580_v12 = vadd.f32 %v8283_v2, %v8282_v25  ;;  %v8285_v13 = vpop.f32.mrb[70].mxu0  ;;  %v16937_v49 = vld [vmem:[#allocation640_spill] sm:$0xff] }
 0x6b5   : > { %v8286_v15 = vpop.f32.mrb[71].mxu0  ;;  %7461 = vmatmul.mubr.bf16.gmra.mrb[64].mxu1 %v8052_v7  ;;  %v16938_v25 = vld [vmem:[#allocation632_spill] sm:$0xff]  ;;  %v16940_v7 = vld [vmem:[#allocation615_spill] sm:$0xff] }
 0x6b6   : > { %v14592_v16 = vadd.f32 %v8286_v15, %v8285_v13  ;;  %7468 = vmatprep.mubr.bf16.mxu1 %v8069_v11  ;;  %v8103_v2 = vcombine.high %v16938_v25, %v16937_v49  ;;  %v8085_v21 = vcombine.high %v16940_v7, %v16939_v53 }
 0x6b8   : > { %v14596_v18 = vpop.f32.mrb[216].mxu1 }
 0x6b9   : > { %v6066_v20 = vpop.f32.mrb[217].mxu1  ;;  %7574 = vmatmul.mubr.bf16.gmra.mrb[136].mxu0 %v8086_v61  ;;  %v8102_v61 = vcombine.low %v16938_v25, %v16937_v49  ;;  %v16944_v49 = vld [vmem:[#allocation521_spill] sm:$0xff] }
 0x6ba   : > { %v8288_v51 = vpop.f32.mrb[72].mxu0  ;;  %v14600_v22 = vpop.f32.mrb[218].mxu1  ;;  %7581 = vmatprep.mubr.bf16.mxu0 %v8103_v2  ;;  %v8084_v2 = vcombine.low %v16940_v7, %v16939_v53  ;;  %v7993_v50 = vcombine.high %v16944_v49, %v16943_v44 }
 0x6bb   : > { %v8289_v15 = vpop.f32.mrb[73].mxu0  ;;  %v6069_v11 = vpop.f32.mrb[219].mxu1 }
 0x6bc   : > { %v14606_v9 = vadd.f32 %v8289_v15, %v8288_v51  ;;  %v8291_v23 = vpop.f32.mrb[74].mxu0  ;;  %v16941_v51 = vld [vmem:[#allocation639_spill] sm:$0xff] }
 0x6bd   : > { %v8292_v20 = vpop.f32.mrb[75].mxu0  ;;  %7469 = vmatmul.mubr.bf16.gmra.mrb[68].mxu1 %v8068_v32  ;;  %v16942_v15 = vld [vmem:[#allocation631_spill] sm:$0xff] }
 0x6be   : > { %v14610_v14 = vadd.f32 %v8292_v20, %v8291_v23  ;;  %7476 = vmatprep.mubr.bf16.mxu1 %v8085_v21  ;;  %v8101_v31 = vcombine.high %v16942_v15, %v16941_v51  ;;  %v8100_v41 = vcombine.low %v16942_v15, %v16941_v51 }
 0x6c0   : > { %v14612_v24 = vpop.f32.mrb[220].mxu1 }
 0x6c1   : > { %v6074_v27 = vpop.f32.mrb[221].mxu1  ;;  %7582 = vmatmul.mubr.bf16.gmra.mrb[140].mxu0 %v8102_v61 }
 0x6c2   : > { %v8294_v13 = vpop.f32.mrb[76].mxu0  ;;  %v14616_v11 = vpop.f32.mrb[222].mxu1 }
 0x6c3   : > { %v8295_v32 = vpop.f32.mrb[77].mxu0  ;;  %v6077_v23 = vpop.f32.mrb[223].mxu1 }
 0x6c4   : > { %v14622_v20 = vadd.f32 %v8295_v32, %v8294_v13  ;;  %v8297_v21 = vpop.f32.mrb[78].mxu0 }
 0x6c5   : > { %v8298_v40 = vpop.f32.mrb[79].mxu0  ;;  %7477 = vmatmul.mubr.bf16.gmra.mrb[72].mxu1 %v8084_v2 }
 0x6c6   : > { %v14624_v27 = vadd.f32 %v8298_v40, %v8297_v21  ;;  %7484 = vmatprep.mubr.bf16.mxu1 %v8101_v31  ;;  %v16945_v31 = vpack.c.bf16 %v14441_v28, %v14437_v47 }
 0x6c8   : > { %v6080_v61 = vpop.f32.mrb[224].mxu1 }
 0x6c9   : > { %v6082_v7 = vpop.f32.mrb[225].mxu1 }
 0x6ca   : > { %v8380_v42 = vpop.f32.mrb[80].mxu0  ;;  %v6083_v43 = vpop.f32.mrb[226].mxu1 }
 0x6cb   : > { %v8381_v25 = vpop.f32.mrb[81].mxu0  ;;  %v6263_v23 = vpack.c.bf16 %v6083_v43, %v6080_v61  ;;  %v6085_v13 = vpop.f32.mrb[227].mxu1 }
 0x6cc   : > { %v14630_v32 = vadd.f32 %v8381_v25, %v8380_v42  ;;  %v8383_v53 = vpop.f32.mrb[82].mxu0 }
 0x6cd   : > { %v8384_v2 = vpop.f32.mrb[83].mxu0  ;;  %8556 = vmatprep.subr.bf16.mxu1 %v6263_v23  ;;  %7485 = vmatmul.mubr.bf16.gmra.mrb[76].mxu1 %v8100_v41 }
 0x6ce   : > { %v14632_v40 = vadd.f32 %v8384_v2, %v8383_v53  ;;  %8557 = vmatpush3.bf16.msra.mxu1 %v16945_v31  ;;  %7622 = vmatprep.mubr.bf16.mxu1 %v7993_v50  ;;  %v16946_v53 = vpack.c.bf16 %v14468_v34, %v14464_v36 }
 0x6d0   : > { %v6088_v7 = vpop.f32.mrb[228].mxu1 }
 0x6d1   : > { %v6090_v21 = vpop.f32.mrb[229].mxu1 }
 0x6d2   : > { %v8386_v15 = vpop.f32.mrb[84].mxu0  ;;  %v6091_v51 = vpop.f32.mrb[230].mxu1 }
 0x6d3   : > { %v8387_v56 = vpop.f32.mrb[85].mxu0  ;;  %v6264_v43 = vpack.c.bf16 %v6091_v51, %v6088_v7  ;;  %v6093_v61 = vpop.f32.mrb[231].mxu1 }
 0x6d4   : > { %v14637_v42 = vadd.f32 %v8387_v56, %v8386_v15  ;;  %v8389_v25 = vpop.f32.mrb[86].mxu0 }
 0x6d5   : > { %v8390_v13 = vpop.f32.mrb[87].mxu0  ;;  %8558 = vmatprep.subr.bf16.mxu1 %v6264_v43  ;;  %v16947_v43 = vpack.c.bf16 %v14496_v5, %v14492_v63 }
 0x6d6   : > { %v14639_v41 = vadd.f32 %v8390_v13, %v8389_v25  ;;  %8559 = vmatpush3.bf16.msra.mxu1 %v16946_v53 }
 0x6d8   : > { %v6096_v47 = vpop.f32.mrb[232].mxu1 }
 0x6d9   : > { %v6098_v28 = vpop.f32.mrb[233].mxu1 }
 0x6da   : > { %v8392_v50 = vpop.f32.mrb[88].mxu0  ;;  %v6099_v23 = vpop.f32.mrb[234].mxu1 }
 0x6db   : > { %v8393_v2 = vpop.f32.mrb[89].mxu0  ;;  %v6265_v31 = vpack.c.bf16 %v6099_v23, %v6096_v47  ;;  %v6101_v21 = vpop.f32.mrb[235].mxu1 }
 0x6dc   : > { %v14644_v51 = vadd.f32 %v8393_v2, %v8392_v50  ;;  %v8395_v56 = vpop.f32.mrb[90].mxu0 }
 0x6dd   : > { %v8396_v15 = vpop.f32.mrb[91].mxu0  ;;  %8560 = vmatprep.subr.bf16.mxu1 %v6265_v31  ;;  %v16948_v31 = vpack.c.bf16 %v14522_v1, %v14518_v58 }
 0x6de   : > { %v14646_v7 = vadd.f32 %v8396_v15, %v8395_v56  ;;  %8561 = vmatpush3.bf16.msra.mxu1 %v16947_v43 }
 0x6e0   : > { %v6104_v36 = vpop.f32.mrb[236].mxu1 }
 0x6e1   : > { %v6106_v34 = vpop.f32.mrb[237].mxu1 }
 0x6e2   : > { %v8398_v61 = vpop.f32.mrb[92].mxu0  ;;  %v6107_v25 = vpop.f32.mrb[238].mxu1 }
 0x6e3   : > { %v8399_v13 = vpop.f32.mrb[93].mxu0  ;;  %v6266_v53 = vpack.c.bf16 %v6107_v25, %v6104_v36  ;;  %v6109_v28 = vpop.f32.mrb[239].mxu1 }
 0x6e4   : > { %v14651_v47 = vadd.f32 %v8399_v13, %v8398_v61  ;;  %v8401_v50 = vpop.f32.mrb[94].mxu0 }
 0x6e5   : > { %v8402_v23 = vpop.f32.mrb[95].mxu0  ;;  %8562 = vmatprep.subr.bf16.mxu1 %v6266_v53  ;;  %v16949_v53 = vpack.c.bf16 %v14548_v45, %v14544_v46 }
 0x6e6   : > { %v14653_v2 = vadd.f32 %v8402_v23, %v8401_v50  ;;  %8563 = vmatpush3.bf16.msra.mxu1 %v16948_v31 }
 0x6e8   : > { %v6112_v63 = vpop.f32.mrb[240].mxu1 }
 0x6e9   : > { %v6114_v5 = vpop.f32.mrb[241].mxu1 }
 0x6ea   : > { %v8404_v21 = vpop.f32.mrb[96].mxu0  ;;  %v6115_v56 = vpop.f32.mrb[242].mxu1 }
 0x6eb   : > { %v8405_v15 = vpop.f32.mrb[97].mxu0  ;;  %v6267_v43 = vpack.c.bf16 %v6115_v56, %v6112_v63  ;;  %v6117_v34 = vpop.f32.mrb[243].mxu1 }
 0x6ec   : > { %v14658_v36 = vadd.f32 %v8405_v15, %v8404_v21  ;;  %v8407_v61 = vpop.f32.mrb[98].mxu0 }
 0x6ed   : > { %v8408_v25 = vpop.f32.mrb[99].mxu0  ;;  %8564 = vmatprep.subr.bf16.mxu1 %v6267_v43  ;;  %v16950_v43 = vpack.c.bf16 %v14574_v0, %v14570_v4 }
 0x6ee   : > { %v14660_v13 = vadd.f32 %v8408_v25, %v8407_v61  ;;  %8565 = vmatpush3.bf16.msra.mxu1 %v16949_v53 }
 0x6f0   : > { %v6120_v58 = vpop.f32.mrb[244].mxu1 }
 0x6f1   : > { %v6122_v1 = vpop.f32.mrb[245].mxu1 }
 0x6f2   : > { %v8410_v28 = vpop.f32.mrb[100].mxu0  ;;  %v6123_v50 = vpop.f32.mrb[246].mxu1 }
 0x6f3   : > { %v8411_v23 = vpop.f32.mrb[101].mxu0  ;;  %v6268_v31 = vpack.c.bf16 %v6123_v50, %v6120_v58  ;;  %v6125_v5 = vpop.f32.mrb[247].mxu1 }
 0x6f4   : > { %v14665_v63 = vadd.f32 %v8411_v23, %v8410_v28  ;;  %v8413_v21 = vpop.f32.mrb[102].mxu0 }
 0x6f5   : > { %v8414_v56 = vpop.f32.mrb[103].mxu0  ;;  %8566 = vmatprep.subr.bf16.mxu1 %v6268_v31  ;;  %v16951_v31 = vpack.c.bf16 %v14600_v22, %v14596_v18  ;;  %v16952_v18 = vpack.c.bf16 %v14616_v11, %v14612_v24  ;;  %v16953_v22 = vld [vmem:[#allocation545_spill] sm:$0xff] }
 0x6f6   : > { %v14667_v15 = vadd.f32 %v8414_v56, %v8413_v21  ;;  %8567 = vmatpush3.bf16.msra.mxu1 %v16950_v43  ;;  %v16957_v11 = vld [vmem:[#allocation561_spill] sm:$0xff] }
 0x6f8   : > { %v6128_v46 = vpop.f32.mrb[248].mxu1 }
 0x6f9   : > { %v6130_v45 = vpop.f32.mrb[249].mxu1 }
 0x6fa   : > { %v8416_v34 = vpop.f32.mrb[104].mxu0  ;;  %v6131_v61 = vpop.f32.mrb[250].mxu1 }
 0x6fb   : > { %v8417_v25 = vpop.f32.mrb[105].mxu0  ;;  %v6269_v53 = vpack.c.bf16 %v6131_v61, %v6128_v46  ;;  %v6133_v1 = vpop.f32.mrb[251].mxu1 }
 0x6fc   : > { %v14672_v58 = vadd.f32 %v8417_v25, %v8416_v34  ;;  %v8419_v28 = vpop.f32.mrb[106].mxu0  ;;  %v7992_v25 = vcombine.low %v16944_v49, %v16943_v44  ;;  %v16954_v1 = vld [vmem:[#allocation537_spill] sm:$0xff] }
 0x6fd   : > { %v8420_v50 = vpop.f32.mrb[107].mxu0  ;;  %8568 = vmatprep.subr.bf16.mxu1 %v6269_v53  ;;  %v8008_v24 = vcombine.low %v16954_v1, %v16953_v22 }
 0x6fe   : > { %v14674_v23 = vadd.f32 %v8420_v50, %v8419_v28  ;;  %8569 = vmatpush3.bf16.msra.mxu1 %v16951_v31  ;;  %v8009_v28 = vcombine.high %v16954_v1, %v16953_v22  ;;  %v16955_v50 = vld [vmem:[#allocation650_spill] sm:$0xff] }
 0x6ff   : > { %v6978_v31 = vadd.f32 %v14504_v35, %v16955_v50 }
 0x700   : > { %v6136_v4 = vpop.f32.mrb[252].mxu1 }
 0x701   : > { %v6138_v0 = vpop.f32.mrb[253].mxu1 }
 0x702   : > { %v8422_v5 = vpop.f32.mrb[108].mxu0  ;;  %v6139_v21 = vpop.f32.mrb[254].mxu1 }
 0x703   : > { %v8423_v56 = vpop.f32.mrb[109].mxu0  ;;  %v6270_v43 = vpack.c.bf16 %v6139_v21, %v6136_v4  ;;  %v6141_v45 = vpop.f32.mrb[255].mxu1 }
 0x704   : > { %v14679_v46 = vadd.f32 %v8423_v56, %v8422_v5  ;;  %v8425_v34 = vpop.f32.mrb[110].mxu0  ;;  %v16956_v5 = vld [vmem:[#allocation651_spill] sm:$0xff] }
 0x705   : > { %v8426_v61 = vpop.f32.mrb[111].mxu0  ;;  %8570 = vmatprep.subr.bf16.mxu1 %v6270_v43  ;;  %v6981_v21 = vadd.f32 %v14508_v29, %v16956_v5 }
 0x706   : > { %v14683_v53 = vadd.f32 %v8426_v61, %v8425_v34  ;;  %8571 = vmatpush3.bf16.msra.mxu1 %v16952_v18  ;;  %v16958_v18 = vld [vmem:[#allocation553_spill] sm:$0xff] }
 0x707   : > { %v8025_v44 = vcombine.high %v16958_v18, %v16957_v11 }
 0x708   : > { %v8212_v4 = vpop.f32.mrb[0].mxu1 }
 0x709   : > { %7623 = vmatmul.mubr.bf16.vlgmr.msra.gmra.mrb[80].mxu1 %v7992_v25  ;;  %v8213_v0 = vpop.f32.mrb[1].mxu1  ;;  %v16959_v25 = vld [vmem:[#allocation652_spill] sm:$0xff] }
 0x70a   : > { %7630 = vmatprep.mubr.bf16.mxu1 %v8009_v28  ;;  %v8214_v56 = vadd.f32 %v8213_v0, %v8212_v4  ;;  %v8215_v43 = vpop.f32.mrb[2].mxu1  ;;  %v6986_v28 = vadd.f32 %v14530_v39, %v16959_v25  ;;  %v16960_v4 = vld [vmem:[#allocation653_spill] sm:$0xff] }
 0x70b   : > { %v8216_v45 = vpop.f32.mrb[3].mxu1  ;;  %v6989_v0 = vadd.f32 %v14534_v26, %v16960_v4  ;;  %v16962_v39 = vld [vmem:[#allocation569_spill] sm:$0xff] }
 0x70c   : > { %v7075_v34 = vadd.f32 %v8214_v56, %v6978_v31  ;;  %v8217_v61 = vadd.f32 %v8216_v45, %v8215_v43 }
 0x70e   : > { %v7078_v49 = vadd.f32 %v8217_v61, %v6981_v21  ;;  %v14699_v35 = vadd.f32 %v14554_v30, %v7075_v34  ;;  %v8024_v30 = vcombine.low %v16958_v18, %v16957_v11  ;;  %v16961_v34 = vld [vmem:[#allocation577_spill] sm:$0xff] }
 0x70f   : > { %v8041_v61 = vcombine.high %v16962_v39, %v16961_v34 }
 0x710   : > { %v8218_v50 = vpop.f32.mrb[4].mxu1  ;;  %v14704_v29 = vadd.f32 %v14566_v8, %v7078_v49  ;;  %v16963_v49 = vld [vmem:[#allocation654_spill] sm:$0xff] }
 0x711   : > { %7631 = vmatmul.mubr.bf16.gmra.mrb[84].mxu1 %v8008_v24  ;;  %v8219_v31 = vpop.f32.mrb[5].mxu1 }
 0x712   : > { %7638 = vmatprep.mubr.bf16.mxu1 %v8025_v44  ;;  %v8220_v5 = vadd.f32 %v8219_v31, %v8218_v50  ;;  %v8221_v56 = vpop.f32.mrb[6].mxu1  ;;  %v6994_v44 = vadd.f32 %v14558_v6, %v16963_v49  ;;  %v16964_v50 = vld [vmem:[#allocation655_spill] sm:$0xff]  ;;  %v16966_v6 = vld [vmem:[#allocation585_spill] sm:$0xff] }
 0x713   : > { %v8222_v43 = vpop.f32.mrb[7].mxu1  ;;  %v6997_v31 = vadd.f32 %v14562_v19, %v16964_v50 }
 0x714   : > { %v7083_v21 = vadd.f32 %v8220_v5, %v6986_v28  ;;  %v8223_v45 = vadd.f32 %v8222_v43, %v8221_v56 }
 0x716   : > { %v7086_v25 = vadd.f32 %v8223_v45, %v6989_v0  ;;  %v14713_v8 = vadd.f32 %v14580_v12, %v7083_v21  ;;  %v8040_v12 = vcombine.low %v16962_v39, %v16961_v34  ;;  %v16965_v21 = vld [vmem:[#allocation593_spill] sm:$0xff] }
 0x717   : > { %v8057_v45 = vcombine.high %v16966_v6, %v16965_v21 }
 0x718   : > { %v8224_v24 = vpop.f32.mrb[8].mxu1  ;;  %v14718_v26 = vadd.f32 %v14592_v16, %v7086_v25 }
 0x719   : > { %7639 = vmatmul.mubr.bf16.gmra.mrb[88].mxu1 %v8024_v30  ;;  %v8225_v28 = vpop.f32.mrb[9].mxu1  ;;  %v16967_v30 = vld [vmem:[#allocation656_spill] sm:$0xff] }
 0x71a   : > { %7646 = vmatprep.mubr.bf16.mxu1 %v8041_v61  ;;  %v8226_v4 = vadd.f32 %v8225_v28, %v8224_v24  ;;  %v8227_v5 = vpop.f32.mrb[10].mxu1  ;;  %v7002_v61 = vadd.f32 %v14584_v10, %v16967_v30  ;;  %v16968_v24 = vld [vmem:[#allocation657_spill] sm:$0xff] }
 0x71b   : > { %v8228_v56 = vpop.f32.mrb[11].mxu1  ;;  %v7005_v28 = vadd.f32 %v14588_v3, %v16968_v24  ;;  %v16970_v10 = vld [vmem:[#allocation601_spill] sm:$0xff] }
 0x71c   : > { %v7091_v0 = vadd.f32 %v8226_v4, %v6994_v44  ;;  %v8229_v43 = vadd.f32 %v8228_v56, %v8227_v5 }
 0x71e   : > { %v7094_v49 = vadd.f32 %v8229_v43, %v6997_v31  ;;  %v14727_v16 = vadd.f32 %v14606_v9, %v7091_v0  ;;  %v8056_v9 = vcombine.low %v16966_v6, %v16965_v21  ;;  %v16969_v0 = vld [vmem:[#allocation609_spill] sm:$0xff] }
 0x71f   : > { %v8073_v43 = vcombine.high %v16970_v10, %v16969_v0 }
 0x720   : > { %v8230_v25 = vpop.f32.mrb[12].mxu1  ;;  %v14732_v19 = vadd.f32 %v14610_v14, %v7094_v49 }
 0x721   : > { %7647 = vmatmul.mubr.bf16.gmra.mrb[92].mxu1 %v8040_v12  ;;  %v8231_v44 = vpop.f32.mrb[13].mxu1 }
 0x722   : > { %7654 = vmatprep.mubr.bf16.mxu1 %v8057_v45  ;;  %v8232_v50 = vadd.f32 %v8231_v44, %v8230_v25  ;;  %v8233_v4 = vpop.f32.mrb[14].mxu1 }
 0x723   : > { %v8234_v5 = vpop.f32.mrb[15].mxu1 }
 0x724   : > { %v7099_v31 = vadd.f32 %v8232_v50, %v7002_v61  ;;  %v8235_v56 = vadd.f32 %v8234_v5, %v8233_v4  ;;  %v8072_v50 = vcombine.low %v16970_v10, %v16969_v0  ;;  %v16972_v4 = vld [vmem:[#allocation617_spill] sm:$0xff] }
 0x726   : > { %v7102_v30 = vadd.f32 %v8235_v56, %v7005_v28  ;;  %v14741_v14 = vadd.f32 %v14622_v20, %v7099_v31  ;;  %v16971_v28 = vld [vmem:[#allocation625_spill] sm:$0xff] }
 0x727   : > { %v8089_v20 = vcombine.high %v16972_v4, %v16971_v28 }
 0x728   : > { %v8316_v12 = vpop.f32.mrb[16].mxu1  ;;  %v14744_v45 = vadd.f32 %v14624_v27, %v7102_v30 }
 0x729   : > { %7655 = vmatmul.mubr.bf16.gmra.mrb[96].mxu1 %v8056_v9  ;;  %v8317_v3 = vpop.f32.mrb[17].mxu1 }
 0x72a   : > { %7662 = vmatprep.mubr.bf16.mxu1 %v8073_v43  ;;  %v8318_v49 = vadd.f32 %v8317_v3, %v8316_v12  ;;  %v8319_v61 = vpop.f32.mrb[18].mxu1 }
 0x72b   : > { %v8320_v25 = vpop.f32.mrb[19].mxu1 }
 0x72c   : > { %v7237_v44 = vadd.f32 %v8318_v49, %v14455_v54  ;;  %v8321_v24 = vadd.f32 %v8320_v25, %v8319_v61  ;;  %v8088_v49 = vcombine.low %v16972_v4, %v16971_v28  ;;  %v16974_v61 = vld [vmem:[#allocation633_spill] sm:$0xff] }
 0x72e   : > { %v7240_v5 = vadd.f32 %v8321_v24, %v14462_v33  ;;  %v14753_v27 = vadd.f32 %v14630_v32, %v7237_v44  ;;  %v16973_v33 = vld [vmem:[#allocation641_spill] sm:$0xff] }
 0x72f   : > { %v8105_v32 = vcombine.high %v16974_v61, %v16973_v33 }
 0x730   : > { %v8322_v31 = vpop.f32.mrb[20].mxu1  ;;  %v14756_v56 = vadd.f32 %v14632_v40, %v7240_v5 }
 0x731   : > { %7663 = vmatmul.mubr.bf16.gmra.mrb[100].mxu1 %v8072_v50  ;;  %v8323_v9 = vpop.f32.mrb[21].mxu1 }
 0x732   : > { %7670 = vmatprep.mubr.bf16.mxu1 %v8089_v20  ;;  %v8324_v54 = vadd.f32 %v8323_v9, %v8322_v31  ;;  %v8325_v43 = vpop.f32.mrb[22].mxu1 }
 0x733   : > { %v8326_v30 = vpop.f32.mrb[23].mxu1 }
 0x734   : > { %v7245_v12 = vadd.f32 %v8324_v54, %v14482_v17  ;;  %v8327_v3 = vadd.f32 %v8326_v30, %v8325_v43  ;;  %v8104_v54 = vcombine.low %v16974_v61, %v16973_v33 }
 0x736   : > { %v7248_v25 = vadd.f32 %v8327_v3, %v14490_v52  ;;  %v14765_v40 = vadd.f32 %v14637_v42, %v7245_v12 }
 0x738   : > { %v8328_v44 = vpop.f32.mrb[24].mxu1  ;;  %v14768_v24 = vadd.f32 %v14639_v41, %v7248_v25 }
 0x739   : > { %7671 = vmatmul.mubr.bf16.gmra.mrb[104].mxu1 %v8088_v49  ;;  %v8329_v50 = vpop.f32.mrb[25].mxu1 }
 0x73a   : > { %7678 = vmatprep.mubr.bf16.mxu1 %v8105_v32  ;;  %v8330_v17 = vadd.f32 %v8329_v50, %v8328_v44  ;;  %v8331_v20 = vpop.f32.mrb[26].mxu1 }
 0x73b   : > { %v8332_v5 = vpop.f32.mrb[27].mxu1 }
 0x73c   : > { %v7253_v31 = vadd.f32 %v8330_v17, %v14512_v48  ;;  %v8333_v9 = vadd.f32 %v8332_v5, %v8331_v20 }
 0x73e   : > { %v7256_v52 = vadd.f32 %v8333_v9, %v14516_v38  ;;  %v14775_v42 = vadd.f32 %v14644_v51, %v7253_v31 }
 0x740   : > { %v8334_v43 = vpop.f32.mrb[28].mxu1  ;;  %v14778_v41 = vadd.f32 %v14646_v7, %v7256_v52 }
 0x741   : > { %7679 = vmatmul.mubr.bf16.gmra.mrb[108].mxu1 %v8104_v54  ;;  %v8335_v30 = vpop.f32.mrb[29].mxu1 }
 0x742   : > { %v8336_v12 = vadd.f32 %v8335_v30, %v8334_v43  ;;  %v8337_v3 = vpop.f32.mrb[30].mxu1 }
 0x743   : > { %v8338_v49 = vpop.f32.mrb[31].mxu1 }
 0x744   : > { %v7261_v48 = vadd.f32 %v8336_v12, %v14538_v55  ;;  %v8339_v32 = vadd.f32 %v8338_v49, %v8337_v3 }
 0x746   : > { %v7264_v25 = vadd.f32 %v8339_v32, %v14542_v37  ;;  %v14783_v44 = vadd.f32 %v14651_v47, %v7261_v48 }
 0x748   : > { %v8340_v38 = vpop.f32.mrb[32].mxu1  ;;  %v14786_v51 = vadd.f32 %v14653_v2, %v7264_v25 }
 0x749   : > { %v8341_v50 = vpop.f32.mrb[33].mxu1 }
 0x74a   : > { %v8342_v7 = vadd.f32 %v8341_v50, %v8340_v38  ;;  %v8343_v17 = vpop.f32.mrb[34].mxu1 }
 0x74b   : > { %v8344_v20 = vpop.f32.mrb[35].mxu1 }
 0x74c   : > { %v7269_v5 = vadd.f32 %v8342_v7, %v14699_v35  ;;  %v8345_v31 = vadd.f32 %v8344_v20, %v8343_v17 }
 0x74e   : > { %v7272_v9 = vadd.f32 %v8345_v31, %v14704_v29  ;;  %v14791_v55 = vadd.f32 %v14658_v36, %v7269_v5 }
 0x750   : > { %v8346_v37 = vpop.f32.mrb[36].mxu1  ;;  %v14794_v47 = vadd.f32 %v14660_v13, %v7272_v9 }
 0x751   : > { %v8347_v54 = vpop.f32.mrb[37].mxu1 }
 0x752   : > { %v8348_v52 = vadd.f32 %v8347_v54, %v8346_v37  ;;  %v8349_v2 = vpop.f32.mrb[38].mxu1 }
 0x753   : > { %v8350_v43 = vpop.f32.mrb[39].mxu1 }
 0x754   : > { %v7277_v30 = vadd.f32 %v8348_v52, %v14713_v8  ;;  %v8351_v12 = vadd.f32 %v8350_v43, %v8349_v2 }
 0x756   : > { %v7280_v3 = vadd.f32 %v8351_v12, %v14718_v26  ;;  %v14799_v35 = vadd.f32 %v14665_v63, %v7277_v30 }
 0x758   : > { %v8352_v29 = vpop.f32.mrb[40].mxu1  ;;  %v14802_v36 = vadd.f32 %v14667_v15, %v7280_v3 }
 0x759   : > { %v8353_v49 = vpop.f32.mrb[41].mxu1 }
 0x75a   : > { %v8354_v48 = vadd.f32 %v8353_v49, %v8352_v29  ;;  %v8355_v13 = vpop.f32.mrb[42].mxu1 }
 0x75b   : > { %v8356_v32 = vpop.f32.mrb[43].mxu1 }
 0x75c   : > { %v7285_v25 = vadd.f32 %v8354_v48, %v14727_v16  ;;  %v8357_v38 = vadd.f32 %v8356_v32, %v8355_v13  ;;  %v8508_v50 = vpop.f32.mrb[112].mxu0 }
 0x75d   : > { %v8509_v7 = vpop.f32.mrb[113].mxu0 }
 0x75e   : > { %v7288_v8 = vadd.f32 %v8357_v38, %v14732_v19  ;;  %v14807_v26 = vadd.f32 %v14672_v58, %v7285_v25  ;;  %v8510_v63 = vadd.f32 %v8509_v7, %v8508_v50  ;;  %v8511_v17 = vpop.f32.mrb[114].mxu0 }
 0x75f   : > { %v8512_v20 = vpop.f32.mrb[115].mxu0 }
 0x760   : > { %v8358_v5 = vpop.f32.mrb[44].mxu1  ;;  %v14810_v15 = vadd.f32 %v14674_v23, %v7288_v8  ;;  %v8513_v31 = vadd.f32 %v8512_v20, %v8511_v17 }
 0x761   : > { %v8359_v9 = vpop.f32.mrb[45].mxu1 }
 0x762   : > { %v8360_v37 = vadd.f32 %v8359_v9, %v8358_v5  ;;  %v8361_v54 = vpop.f32.mrb[46].mxu1 }
 0x763   : > { %v8362_v16 = vpop.f32.mrb[47].mxu1 }
 0x764   : > { %v7293_v52 = vadd.f32 %v8360_v37, %v14741_v14  ;;  %v8363_v2 = vadd.f32 %v8362_v16, %v8361_v54  ;;  %v8514_v43 = vpop.f32.mrb[116].mxu0 }
 0x765   : > { %v8515_v19 = vpop.f32.mrb[117].mxu0 }
 0x766   : > { %v7296_v58 = vadd.f32 %v8363_v2, %v14744_v45  ;;  %v14815_v30 = vadd.f32 %v14679_v46, %v7293_v52  ;;  %v8516_v12 = vadd.f32 %v8515_v19, %v8514_v43  ;;  %v8517_v3 = vpop.f32.mrb[118].mxu0 }
 0x767   : > { %v8518_v29 = vpop.f32.mrb[119].mxu0 }
 0x768   : > { %v8444_v23 = vpop.f32.mrb[48].mxu1  ;;  %v14818_v49 = vadd.f32 %v14683_v53, %v7296_v58  ;;  %v8519_v48 = vadd.f32 %v8518_v29, %v8517_v3 }
 0x769   : > { %v8445_v13 = vpop.f32.mrb[49].mxu1 }
 0x76a   : > { %v8446_v32 = vadd.f32 %v8445_v13, %v8444_v23  ;;  %v8447_v25 = vpop.f32.mrb[50].mxu1 }
 0x76b   : > { %v8448_v14 = vpop.f32.mrb[51].mxu1 }
 0x76c   : > { %v7431_v38 = vadd.f32 %v8446_v32, %v14753_v27  ;;  %v8449_v50 = vadd.f32 %v8448_v14, %v8447_v25  ;;  %v8520_v7 = vpop.f32.mrb[120].mxu0 }
 0x76d   : > { %v8521_v45 = vpop.f32.mrb[121].mxu0 }
 0x76e   : > { %v7434_v46 = vadd.f32 %v8449_v50, %v14756_v56  ;;  %v14822_v8 = vadd.f32 %v8510_v63, %v7431_v38  ;;  %v8522_v17 = vadd.f32 %v8521_v45, %v8520_v7  ;;  %v8523_v20 = vpop.f32.mrb[122].mxu0 }
 0x76f   : > { %v8524_v5 = vpop.f32.mrb[123].mxu0 }
 0x770   : > { %v8450_v9 = vpop.f32.mrb[52].mxu1  ;;  %v14824_v53 = vadd.f32 %v8513_v31, %v7434_v46  ;;  %v8525_v37 = vadd.f32 %v8524_v5, %v8523_v20 }
 0x771   : > { %v8451_v54 = vpop.f32.mrb[53].mxu1 }
 0x772   : > { %v8452_v16 = vadd.f32 %v8451_v54, %v8450_v9  ;;  %v8453_v52 = vpop.f32.mrb[54].mxu1 }
 0x773   : > { %v8454_v2 = vpop.f32.mrb[55].mxu1 }
 0x774   : > { %v7439_v27 = vadd.f32 %v8452_v16, %v14765_v40  ;;  %v8455_v43 = vadd.f32 %v8454_v2, %v8453_v52  ;;  %v8526_v19 = vpop.f32.mrb[124].mxu0 }
 0x775   : > { %v8527_v58 = vpop.f32.mrb[125].mxu0 }
 0x776   : > { %v7442_v56 = vadd.f32 %v8455_v43, %v14768_v24  ;;  %v14828_v63 = vadd.f32 %v8516_v12, %v7439_v27  ;;  %v8528_v3 = vadd.f32 %v8527_v58, %v8526_v19  ;;  %v8529_v29 = vpop.f32.mrb[126].mxu0 }
 0x777   : > { %v8530_v23 = vpop.f32.mrb[127].mxu0 }
 0x778   : > { %v8456_v13 = vpop.f32.mrb[56].mxu1  ;;  %v14830_v31 = vadd.f32 %v8519_v48, %v7442_v56  ;;  %v8531_v32 = vadd.f32 %v8530_v23, %v8529_v29 }
 0x779   : > { %v8457_v25 = vpop.f32.mrb[57].mxu1 }
 0x77a   : > { %v8458_v14 = vadd.f32 %v8457_v25, %v8456_v13  ;;  %v8459_v38 = vpop.f32.mrb[58].mxu1 }
 0x77b   : > { %v8460_v50 = vpop.f32.mrb[59].mxu1 }
 0x77c   : > { %v7447_v40 = vadd.f32 %v8458_v14, %v14775_v42  ;;  %v8461_v7 = vadd.f32 %v8460_v50, %v8459_v38  ;;  %v8532_v45 = vpop.f32.mrb[128].mxu0 }
 0x77d   : > { %v8533_v46 = vpop.f32.mrb[129].mxu0 }
 0x77e   : > { %v7450_v24 = vadd.f32 %v8461_v7, %v14778_v41  ;;  %v14834_v12 = vadd.f32 %v8522_v17, %v7447_v40  ;;  %v8534_v20 = vadd.f32 %v8533_v46, %v8532_v45  ;;  %v8535_v5 = vpop.f32.mrb[130].mxu0 }
 0x77f   : > { %v8536_v9 = vpop.f32.mrb[131].mxu0 }
 0x780   : > { %v8462_v54 = vpop.f32.mrb[60].mxu1  ;;  %v14836_v48 = vadd.f32 %v8525_v37, %v7450_v24  ;;  %v8537_v16 = vadd.f32 %v8536_v9, %v8535_v5 }
 0x781   : > { %v8463_v52 = vpop.f32.mrb[61].mxu1 }
 0x782   : > { %v8464_v2 = vadd.f32 %v8463_v52, %v8462_v54  ;;  %v8465_v27 = vpop.f32.mrb[62].mxu1 }
 0x783   : > { %v8466_v43 = vpop.f32.mrb[63].mxu1 }
 0x784   : > { %v7455_v42 = vadd.f32 %v8464_v2, %v14783_v44  ;;  %v8467_v19 = vadd.f32 %v8466_v43, %v8465_v27  ;;  %v8538_v58 = vpop.f32.mrb[132].mxu0 }
 0x785   : > { %v8539_v56 = vpop.f32.mrb[133].mxu0 }
 0x786   : > { %v7458_v41 = vadd.f32 %v8467_v19, %v14786_v51  ;;  %v14840_v17 = vadd.f32 %v8528_v3, %v7455_v42  ;;  %v8540_v29 = vadd.f32 %v8539_v56, %v8538_v58  ;;  %v8541_v23 = vpop.f32.mrb[134].mxu0 }
 0x787   : > { %v8542_v13 = vpop.f32.mrb[135].mxu0 }
 0x788   : > { %v8468_v25 = vpop.f32.mrb[64].mxu1  ;;  %v14842_v37 = vadd.f32 %v8531_v32, %v7458_v41  ;;  %v8543_v14 = vadd.f32 %v8542_v13, %v8541_v23 }
 0x789   : > { %v8469_v38 = vpop.f32.mrb[65].mxu1 }
 0x78a   : > { %v8470_v50 = vadd.f32 %v8469_v38, %v8468_v25  ;;  %v8471_v40 = vpop.f32.mrb[66].mxu1 }
 0x78b   : > { %v8472_v7 = vpop.f32.mrb[67].mxu1 }
 0x78c   : > { %v7463_v44 = vadd.f32 %v8470_v50, %v14791_v55  ;;  %v8473_v45 = vadd.f32 %v8472_v7, %v8471_v40  ;;  %v8544_v46 = vpop.f32.mrb[136].mxu0 }
 0x78d   : > { %v8545_v24 = vpop.f32.mrb[137].mxu0 }
 0x78e   : > { %v7466_v51 = vadd.f32 %v8473_v45, %v14794_v47  ;;  %v14846_v3 = vadd.f32 %v8534_v20, %v7463_v44  ;;  %v8546_v5 = vadd.f32 %v8545_v24, %v8544_v46  ;;  %v8547_v9 = vpop.f32.mrb[138].mxu0 }
 0x78f   : > { %v8548_v54 = vpop.f32.mrb[139].mxu0 }
 0x790   : > { %v8474_v52 = vpop.f32.mrb[68].mxu1  ;;  %v14848_v32 = vadd.f32 %v8537_v16, %v7466_v51  ;;  %v8549_v2 = vadd.f32 %v8548_v54, %v8547_v9 }
 0x791   : > { %v8475_v27 = vpop.f32.mrb[69].mxu1 }
 0x792   : > { %v8476_v43 = vadd.f32 %v8475_v27, %v8474_v52  ;;  %v8477_v42 = vpop.f32.mrb[70].mxu1 }
 0x793   : > { %v8478_v19 = vpop.f32.mrb[71].mxu1 }
 0x794   : > { %v7471_v55 = vadd.f32 %v8476_v43, %v14799_v35  ;;  %v8479_v58 = vadd.f32 %v8478_v19, %v8477_v42  ;;  %v8550_v56 = vpop.f32.mrb[140].mxu0 }
 0x795   : > { %v8551_v41 = vpop.f32.mrb[141].mxu0 }
 0x796   : > { %v7474_v47 = vadd.f32 %v8479_v58, %v14802_v36  ;;  %v14852_v20 = vadd.f32 %v8540_v29, %v7471_v55  ;;  %v8552_v23 = vadd.f32 %v8551_v41, %v8550_v56  ;;  %v8553_v13 = vpop.f32.mrb[142].mxu0 }
 0x797   : > { %v8554_v25 = vpop.f32.mrb[143].mxu0 }
 0x798   : > { %v8480_v38 = vpop.f32.mrb[72].mxu1  ;;  %v14854_v16 = vadd.f32 %v8543_v14, %v7474_v47  ;;  %v8555_v50 = vadd.f32 %v8554_v25, %v8553_v13 }
 0x799   : > { %v8481_v40 = vpop.f32.mrb[73].mxu1 }
 0x79a   : > { %v8482_v7 = vadd.f32 %v8481_v40, %v8480_v38  ;;  %v8483_v44 = vpop.f32.mrb[74].mxu1 }
 0x79b   : > { %v8484_v45 = vpop.f32.mrb[75].mxu1 }
 0x79c   : > { %v7479_v35 = vadd.f32 %v8482_v7, %v14807_v26  ;;  %v8485_v46 = vadd.f32 %v8484_v45, %v8483_v44 }
 0x79e   : > { %v7482_v24 = vadd.f32 %v8485_v46, %v14810_v15  ;;  %v14858_v36 = vadd.f32 %v8546_v5, %v7479_v35 }
 0x7a0   : > { %v8486_v29 = vpop.f32.mrb[76].mxu1  ;;  %v14860_v51 = vadd.f32 %v8549_v2, %v7482_v24 }
 0x7a1   : > { %v8487_v9 = vpop.f32.mrb[77].mxu1 }
 0x7a2   : > { %v8488_v54 = vadd.f32 %v8487_v9, %v8486_v29  ;;  %v8489_v14 = vpop.f32.mrb[78].mxu1 }
 0x7a3   : > { %v8490_v52 = vpop.f32.mrb[79].mxu1 }
 0x7a4   : > { %v7487_v27 = vadd.f32 %v8488_v54, %v14815_v30  ;;  %v8491_v43 = vadd.f32 %v8490_v52, %v8489_v14 }
 0x7a6   : > { %v7490_v42 = vadd.f32 %v8491_v43, %v14818_v49  ;;  %v14864_v19 = vadd.f32 %v8552_v23, %v7487_v27 }
 0x7a8   : > { %v14866_v26 = vadd.f32 %v8555_v50, %v7490_v42 }
 0x7dc   : > { %v8572_v15 = vpop.f32.mrb[80].mxu1 }
 0x7dd   : > { %v8573_v5 = vpop.f32.mrb[81].mxu1 }
 0x7de   : > { %v8574_v55 = vadd.f32 %v8573_v5, %v8572_v15  ;;  %v8575_v58 = vpop.f32.mrb[82].mxu1 }
 0x7df   : > { %v8576_v30 = vpop.f32.mrb[83].mxu1 }
 0x7e0   : > { %v7625_v49 = vadd.f32 %v8574_v55, %v14822_v8  ;;  %v8577_v2 = vadd.f32 %v8576_v30, %v8575_v58 }
 0x7e2   : > { %7690 = vst.msk [vmem:[%s14872_s18] sm:$0xff] %vm7689_vm2, %v7625_v49  ;;  %v7628_v56 = vadd.f32 %v8577_v2, %v14824_v53 }
 0x7e4   : > { %7691 = vst.msk [vmem:[%s14872_s18 + $0x8] sm:$0xff] %vm7689_vm2, %v7628_v56  ;;  %v8578_v41 = vpop.f32.mrb[84].mxu1 }
 0x7e5   : > { %v8579_v47 = vpop.f32.mrb[85].mxu1 }
 0x7e6   : > { %v8580_v23 = vadd.f32 %v8579_v47, %v8578_v41  ;;  %v8581_v13 = vpop.f32.mrb[86].mxu1 }
 0x7e7   : > { %v8582_v25 = vpop.f32.mrb[87].mxu1 }
 0x7e8   : > { %v7633_v38 = vadd.f32 %v8580_v23, %v14828_v63  ;;  %v8583_v50 = vadd.f32 %v8582_v25, %v8581_v13 }
 0x7ea   : > { %7692 = vst.msk [vmem:[%s14872_s18 + $0x10] sm:$0xff] %vm7689_vm2, %v7633_v38  ;;  %v7636_v8 = vadd.f32 %v8583_v50, %v14830_v31 }
 0x7ec   : > { %7693 = vst.msk [vmem:[%s14872_s18 + $0x18] sm:$0xff] %vm7689_vm2, %v7636_v8  ;;  %v8584_v40 = vpop.f32.mrb[88].mxu1 }
 0x7ed   : > { %v8585_v53 = vpop.f32.mrb[89].mxu1 }
 0x7ee   : > { %v8586_v7 = vadd.f32 %v8585_v53, %v8584_v40  ;;  %v8587_v44 = vpop.f32.mrb[90].mxu1 }
 0x7ef   : > { %v8588_v45 = vpop.f32.mrb[91].mxu1 }
 0x7f0   : > { %v7641_v35 = vadd.f32 %v8586_v7, %v14834_v12  ;;  %v8589_v46 = vadd.f32 %v8588_v45, %v8587_v44 }
 0x7f2   : > { %7694 = vst.msk [vmem:[%s14872_s18 + $0x20] sm:$0xff] %vm7689_vm2, %v7641_v35  ;;  %v7644_v63 = vadd.f32 %v8589_v46, %v14836_v48 }
 0x7f4   : > { %7695 = vst.msk [vmem:[%s14872_s18 + $0x28] sm:$0xff] %vm7689_vm2, %v7644_v63  ;;  %v8590_v24 = vpop.f32.mrb[92].mxu1 }
 0x7f5   : > { %v8591_v31 = vpop.f32.mrb[93].mxu1 }
 0x7f6   : > { %v8592_v29 = vadd.f32 %v8591_v31, %v8590_v24  ;;  %v8593_v9 = vpop.f32.mrb[94].mxu1 }
 0x7f7   : > { %v8594_v54 = vpop.f32.mrb[95].mxu1 }
 0x7f8   : > { %v7649_v14 = vadd.f32 %v8592_v29, %v14840_v17  ;;  %v8595_v52 = vadd.f32 %v8594_v54, %v8593_v9 }
 0x7fa   : > { %7696 = vst.msk [vmem:[%s14872_s18 + $0x30] sm:$0xff] %vm7689_vm2, %v7649_v14  ;;  %v7652_v12 = vadd.f32 %v8595_v52, %v14842_v37 }
 0x7fc   : > { %7697 = vst.msk [vmem:[%s14872_s18 + $0x38] sm:$0xff] %vm7689_vm2, %v7652_v12  ;;  %v8596_v27 = vpop.f32.mrb[96].mxu1 }
 0x7fd   : > { %v8597_v48 = vpop.f32.mrb[97].mxu1 }
 0x7fe   : > { %v8598_v43 = vadd.f32 %v8597_v48, %v8596_v27  ;;  %v8599_v42 = vpop.f32.mrb[98].mxu1 }
 0x7ff   : > { %v8600_v15 = vpop.f32.mrb[99].mxu1 }
 0x800   : > { %v7657_v5 = vadd.f32 %v8598_v43, %v14846_v3  ;;  %v8601_v55 = vadd.f32 %v8600_v15, %v8599_v42 }
 0x802   : > { %7698 = vst.msk [vmem:[%s14872_s18 + $0x40] sm:$0xff] %vm7689_vm2, %v7657_v5  ;;  %v7660_v17 = vadd.f32 %v8601_v55, %v14848_v32 }
 0x804   : > { %7699 = vst.msk [vmem:[%s14872_s18 + $0x48] sm:$0xff] %vm7689_vm2, %v7660_v17  ;;  %v8602_v58 = vpop.f32.mrb[100].mxu1 }
 0x805   : > { %v8603_v37 = vpop.f32.mrb[101].mxu1 }
 0x806   : > { %v8604_v30 = vadd.f32 %v8603_v37, %v8602_v58  ;;  %v8605_v49 = vpop.f32.mrb[102].mxu1 }
 0x807   : > { %v8606_v2 = vpop.f32.mrb[103].mxu1 }
 0x808   : > { %v7665_v56 = vadd.f32 %v8604_v30, %v14852_v20  ;;  %v8607_v41 = vadd.f32 %v8606_v2, %v8605_v49 }
 0x80a   : > { %7700 = vst.msk [vmem:[%s14872_s18 + $0x50] sm:$0xff] %vm7689_vm2, %v7665_v56  ;;  %v7668_v3 = vadd.f32 %v8607_v41, %v14854_v16 }
 0x80c   : > { %7701 = vst.msk [vmem:[%s14872_s18 + $0x58] sm:$0xff] %vm7689_vm2, %v7668_v3  ;;  %v8608_v47 = vpop.f32.mrb[104].mxu1 }
 0x80d   : > { %v8609_v32 = vpop.f32.mrb[105].mxu1 }
 0x80e   : > { %v8610_v23 = vadd.f32 %v8609_v32, %v8608_v47  ;;  %v8611_v13 = vpop.f32.mrb[106].mxu1 }
 0x80f   : > { %v8612_v25 = vpop.f32.mrb[107].mxu1 }
 0x810   : > { %v7673_v38 = vadd.f32 %v8610_v23, %v14858_v36  ;;  %v8613_v50 = vadd.f32 %v8612_v25, %v8611_v13 }
 0x812   : > { %7702 = vst.msk [vmem:[%s14872_s18 + $0x60] sm:$0xff] %vm7689_vm2, %v7673_v38  ;;  %v7676_v20 = vadd.f32 %v8613_v50, %v14860_v51 }
 0x814   : > { %7703 = vst.msk [vmem:[%s14872_s18 + $0x68] sm:$0xff] %vm7689_vm2, %v7676_v20  ;;  %v8614_v8 = vpop.f32.mrb[108].mxu1 }
 0x815   : > { %v8615_v16 = vpop.f32.mrb[109].mxu1 }
 0x816   : > { %v8616_v40 = vadd.f32 %v8615_v16, %v8614_v8  ;;  %v8617_v53 = vpop.f32.mrb[110].mxu1  ;;  %682 = sbr.rel (!%p680_p0) target bundleno = 330 (0x14a), region = 49 }
 0x817   : > { %v8618_v7 = vpop.f32.mrb[111].mxu1 }
 0x818   : > { %v7681_v44 = vadd.f32 %v8616_v40, %v14864_v19  ;;  %v8619_v45 = vadd.f32 %v8618_v7, %v8617_v53 }
 0x81a   : > { %7704 = vst.msk [vmem:[%s14872_s18 + $0x70] sm:$0xff] %vm7689_vm2, %v7681_v44  ;;  %v7684_v35 = vadd.f32 %v8619_v45, %v14866_v26 }
 0x81c   : > { %7705 = vst.msk [vmem:[%s14872_s18 + $0x78] sm:$0xff] %vm7689_vm2, %v7684_v35 }

</bundles_post_ra>
